<compile_context>
chip_gen: v7x
topology: tpu7x:2x2x1
jax: 0.10.0
libtpu: 0.0.40
codegen_flags: <defaults>
</compile_context>

<pallas_src>
import jax
import jax.numpy as jnp
import numpy as np
from jax import lax
from jax.experimental import pallas as pl
from jax.experimental.pallas import tpu as pltpu

# ----------------------------- static geometry ------------------------------
H0, W0 = 115, 80            # (time frames, mel bands); flat stride = W0 in stage 1
H1, H2 = 113, 111           # rows after conv1 / conv2 (VALID)
P1H, P1W = 37, 25           # after first MaxPool2d(3); flat stride = P1W afterwards
H3, H4 = 35, 33             # rows after conv3 / conv4
P2H, P2W = 11, 7            # after second MaxPool2d(3)
C1, C2, C3, C4 = 64, 32, 128, 64
FEAT = P2H * P2W * C4       # 4928 = 64 * 11 * 7

XROWS = H0 * W0 + 8         # 9208 flat input rows (zero tail absorbs tap over-read)
A1_ROWS = H1 * W0 + 8       # 9048
A2_ROWS = H2 * W0           # 8880
P1_ROWS = P1H * P1W + 3     # 928
A3_ROWS = H3 * P1W + 5      # 880
A4_ROWS = H4 * P1W + 7      # 832

KCHUNK = 256                # FC contraction chunk
KPAD = 5120                 # FC contraction padded to 20 * 256

# TODO(synk): STFTLayer / LogMelBankLayer (input_type='audio'/'stft') and the CRNN/GRU
# branch are not exercised for model_type='CNN' + input_type='mel_spects' and are not
# implemented here; Dropout is identity (inference) and is_zeromean=False is assumed.


# ------------------------- fused conv-stack kernel ---------------------------
def _conv_stack_kernel(xf_ref, w1_ref, b1_ref, w2_ref, b2_ref, w3_ref, b3_ref,
                       w4_ref, b4_ref, out_ref, a1_ref, a2_ref, p1_ref,
                       a3_ref, a4_ref):
    f32 = jnp.float32

    def leaky(v):
        return jnp.where(v > 0, v, 0.01 * v)

    # Zero the small over-read tails so (discarded) garbage lanes stay finite.
    a1_ref[pl.ds(H1 * W0, 8), :] = jnp.zeros((8, C1), f32)
    p1_ref[pl.ds(P1H * P1W, 3), :] = jnp.zeros((3, C2), f32)
    a3_ref[pl.ds(H3 * P1W, 5), :] = jnp.zeros((5, C3), f32)

    # ---- conv1 (Cin=1 -> 64): each tap is a rank-1 VALU update (~2% of the FLOPs) ----
    m1, ch1 = H1 * W0, 128
    @pl.loop(0, pl.cdiv(m1, ch1))
    def _(c):
        o0 = jnp.minimum(c * ch1, m1 - ch1)          # last chunk overlaps (idempotent)
        acc = jnp.zeros((ch1, C1), f32) + b1_ref[...]
        for ky in range(3):
            for kx in range(3):
                col = xf_ref[0, pl.ds(o0 + ky * W0 + kx, ch1), :]      # (ch1, 1)
                acc = acc + col * w1_ref[3 * ky + kx]                  # (1, C1)
        a1_ref[pl.ds(o0, ch1), :] = leaky(acc)

    # ---- generic 3x3 VALID conv: 9 chunked MXU matmuls, bias+LeakyReLU epilogue ----
    def conv3x3(src, w9, b, dst, stride, m_out, chunk):
        cout = w9.shape[-1]

        @pl.loop(0, pl.cdiv(m_out, chunk))
        def _(c):
            o0 = jnp.minimum(c * chunk, m_out - chunk)
            acc = jnp.zeros((chunk, cout), f32) + b[...]
            for ky in range(3):
                for kx in range(3):
                    lhs = src[pl.ds(o0 + ky * stride + kx, chunk), :]  # (chunk, Cin)
                    acc = acc + jnp.dot(lhs, w9[3 * ky + kx],
                                        preferred_element_type=f32)
            dst[pl.ds(o0, chunk), :] = leaky(acc)

    # ---- MaxPool2d(3) via strided ref reads ----
    def maxpool3(src, src_stride, out_h, out_w, write_row):
        @pl.loop(0, out_h)
        def _(i):
            base = 3 * src_stride * i
            m = src[pl.ds(base, out_w, stride=3), :]
            for dy in range(3):
                for dx in range(3):
                    if dy == 0 and dx == 0:
                        continue
                    m = jnp.maximum(
                        m,
                        src[pl.ds(base + dy * src_stride + dx, out_w, stride=3), :])
            write_row(i, m)

    conv3x3(a1_ref, w2_ref, b2_ref, a2_ref, W0, H2 * W0, 256)

    def _p1_write(i, m):
        p1_ref[pl.ds(P1W * i, P1W), :] = m
    maxpool3(a2_ref, W0, P1H, P1W, _p1_write)

    conv3x3(p1_ref, w3_ref, b3_ref, a3_ref, P1W, H3 * P1W, 128)
    conv3x3(a3_ref, w4_ref, b4_ref, a4_ref, P1W, H4 * P1W, 128)

    def _out_write(i, m):
        out_ref[0, pl.ds(P2W * i, P2W), :] = m
    maxpool3(a4_ref, P1W, P2H, P2W, _out_write)


def conv_stack(xf, p):
    """xf: normalized, flattened input (B, XROWS, 1) -> pooled features (B, 77, 64)."""
    B = xf.shape[0]
    w1k = p["w1"].reshape(9, 1, C1)
    w2k = p["w2"].reshape(9, C1, C2)
    w3k = p["w3"].reshape(9, C2, C3)
    w4k = p["w4"].reshape(9, C3, C4)
    return pl.pallas_call(
        _conv_stack_kernel,
        out_shape=jax.ShapeDtypeStruct((B, P2H * P2W, C4), jnp.float32),
        grid=(B,),
        in_specs=[
            pl.BlockSpec((1, XROWS, 1), lambda b: (b, 0, 0)),
            pl.BlockSpec((9, 1, C1), lambda b: (0, 0, 0)),
            pl.BlockSpec((1, C1), lambda b: (0, 0)),
            pl.BlockSpec((9, C1, C2), lambda b: (0, 0, 0)),
            pl.BlockSpec((1, C2), lambda b: (0, 0)),
            pl.BlockSpec((9, C2, C3), lambda b: (0, 0, 0)),
            pl.BlockSpec((1, C3), lambda b: (0, 0)),
            pl.BlockSpec((9, C3, C4), lambda b: (0, 0, 0)),
            pl.BlockSpec((1, C4), lambda b: (0, 0)),
        ],
        out_specs=pl.BlockSpec((1, P2H * P2W, C4), lambda b: (b, 0, 0)),
        scratch_shapes=[
            pltpu.VMEM((A1_ROWS, C1), jnp.float32),
            pltpu.VMEM((A2_ROWS, C2), jnp.float32),
            pltpu.VMEM((P1_ROWS, C2), jnp.float32),
            pltpu.VMEM((A3_ROWS, C3), jnp.float32),
            pltpu.VMEM((A4_ROWS, C4), jnp.float32),
        ],
        compiler_params=pltpu.CompilerParams(
            dimension_semantics=("parallel",),
            vmem_limit_bytes=40 * 1024 * 1024),
    )(xf, w1k, p["b1"].reshape(1, -1), w2k, p["b2"].reshape(1, -1),
      w3k, p["b3"].reshape(1, -1), w4k, p["b4"].reshape(1, -1))


# ------------------------------- FC head kernel ------------------------------
def _fc_head_kernel(x_ref, w1_ref, b1_ref, w2_ref, b2_ref, w3_ref, b3_ref,
                    o_ref, acc_ref):
    k = pl.program_id(0)

    @pl.when(k == 0)
    def _():
        acc_ref[...] = jnp.zeros_like(acc_ref)

    acc_ref[...] += jnp.dot(x_ref[...], w1_ref[...],
                            preferred_element_type=jnp.float32)

    @pl.when(k == pl.num_programs(0) - 1)
    def _():
        h = acc_ref[...] + b1_ref[...]
        h = jnp.where(h > 0, h, 0.01 * h)
        h = jnp.dot(h, w2_ref[...], preferred_element_type=jnp.float32) + b2_ref[...]
        h = jnp.where(h > 0, h, 0.01 * h)
        z = jnp.sum(h * w3_ref[...], axis=-1, keepdims=True) + b3_ref[...]
        o_ref[...] = (1.0 / (1.0 + jnp.exp(-z))).astype(o_ref.dtype)


def fc_head(feat, p):
    """feat: (B, 4928) -> sigmoid logits (B, 1)."""
    B, F = feat.shape
    featp = jnp.pad(feat, ((0, 0), (0, KPAD - F)))
    w1p = jnp.pad(p["fc1_w"], ((0, KPAD - F), (0, 0)))
    return pl.pallas_call(
        _fc_head_kernel,
        out_shape=jax.ShapeDtypeStruct((B, 1), jnp.float32),
        grid=(KPAD // KCHUNK,),
        in_specs=[
            pl.BlockSpec((B, KCHUNK), lambda k: (0, k)),
            pl.BlockSpec((KCHUNK, 256), lambda k: (k, 0)),
            pl.BlockSpec((1, 256), lambda k: (0, 0)),
            pl.BlockSpec((256, 64), lambda k: (0, 0)),
            pl.BlockSpec((1, 64), lambda k: (0, 0)),
            pl.BlockSpec((1, 64), lambda k: (0, 0)),
            pl.BlockSpec((1, 1), lambda k: (0, 0)),
        ],
        out_specs=pl.BlockSpec((B, 1), lambda k: (0, 0)),
        scratch_shapes=[pltpu.VMEM((B, 256), jnp.float32)],
        compiler_params=pltpu.CompilerParams(
            dimension_semantics=("arbitrary",)),
    )(featp, w1p, p["fc1_b"].reshape(1, -1), p["fc2_w"],
      p["fc2_b"].reshape(1, -1), p["fc3_w"].reshape(1, -1),
      p["fc3_b"].reshape(1, 1))


# --------------------------------- wrapper -----------------------------------
def cnn_forward_pallas(x_nchw, params, mean, istd):
    B = x_nchw.shape[0]
    x2 = x_nchw[:, 0, :, :]                                     # (B, 115, 80)
    # Tiny (73 KB) fused XLA elementwise prepass; feeds the single fused conv kernel.
    xn = (x2 - mean[None, None, :]) * istd[None, None, :]
    xf = xn.reshape(B, H0 * W0, 1)
    xf = jnp.pad(xf, ((0, 0), (0, XROWS - H0 * W0), (0, 0)))
    feat3 = conv_stack(xf, params)                              # (B, 77, 64)
    feat = feat3.reshape(B, FEAT)                               # NHWC flatten
    return fc_head(feat, params)                                # (B, 1)


# ------------------------------ pure-JAX reference ---------------------------
def ref_forward(x_nchw, p, mean, istd):
    x = jnp.transpose(x_nchw, (0, 2, 3, 1))                     # NHWC (B,115,80,1)
    x = (x - mean.reshape(1, 1, -1, 1)) * istd.reshape(1, 1, -1, 1)

    def conv(t, w, b):
        y = lax.conv_general_dilated(t, w, (1, 1), "VALID",
                                     dimension_numbers=("NHWC", "HWIO", "NHWC"))
        return y + b.reshape(1, 1, 1, -1)

    def leaky(t):
        return jnp.where(t > 0, t, 0.01 * t)

    def pool3(t):
        return lax.reduce_window(t, -jnp.inf, lax.max,
                                 (1, 3, 3, 1), (1, 3, 3, 1), "VALID")

    x = leaky(conv(x, p["w1"], p["b1"]))
    x = leaky(conv(x, p["w2"], p["b2"]))
    x = pool3(x)
    x = leaky(conv(x, p["w3"], p["b3"]))
    x = leaky(conv(x, p["w4"], p["b4"]))
    x = pool3(x)
    feat = x.reshape(x.shape[0], -1)                            # NHWC flatten
    h = leaky(feat @ p["fc1_w"] + p["fc1_b"])
    h = leaky(h @ p["fc2_w"] + p["fc2_b"])
    z = h @ p["fc3_w"].reshape(-1, 1) + p["fc3_b"].reshape(1, 1)
    return 1.0 / (1.0 + jnp.exp(-z))


# ----------------------------------- main -------------------------------------
if __name__ == "__main__":
    B = 2
    key = jax.random.PRNGKey(0)
    ks = jax.random.split(key, 16)

    x = jax.random.normal(ks[0], (B, 1, H0, W0), jnp.float32)
    mean = 0.3 * jax.random.normal(ks[1], (W0,), jnp.float32)
    istd = 1.0 / (0.5 + jnp.abs(jax.random.normal(ks[2], (W0,), jnp.float32)))

    def winit(k, shape, fan_in):
        return jax.random.normal(k, shape, jnp.float32) / np.sqrt(fan_in)

    params = {
        "w1": winit(ks[3], (3, 3, 1, C1), 9 * 1),
        "b1": 0.1 * jax.random.normal(ks[4], (C1,), jnp.float32),
        "w2": winit(ks[5], (3, 3, C1, C2), 9 * C1),
        "b2": 0.1 * jax.random.normal(ks[6], (C2,), jnp.float32),
        "w3": winit(ks[7], (3, 3, C2, C3), 9 * C2),
        "b3": 0.1 * jax.random.normal(ks[8], (C3,), jnp.float32),
        "w4": winit(ks[9], (3, 3, C3, C4), 9 * C3),
        "b4": 0.1 * jax.random.normal(ks[10], (C4,), jnp.float32),
        "fc1_w": winit(ks[11], (FEAT, 256), FEAT),
        "fc1_b": jnp.zeros((256,), jnp.float32),
        "fc2_w": winit(ks[12], (256, 64), 256),
        "fc2_b": jnp.zeros((64,), jnp.float32),
        "fc3_w": winit(ks[13], (64,), 64),
        "fc3_b": jnp.zeros((1,), jnp.float32),
    }

    out = jax.jit(cnn_forward_pallas)(x, params, mean, istd)
    out = jax.block_until_ready(out)

    ref = jax.block_until_ready(jax.jit(ref_forward)(x, params, mean, istd))
    np.testing.assert_allclose(np.asarray(out), np.asarray(ref),
                               rtol=2e-3, atol=2e-3)
    print("KERNEL_OK")
</pallas_src>

<mosaic_0001>
module attributes {stable_mosaic.version = 11 : i64} {
  func.func @_conv_stack_kernel(%arg0: i32, %arg1: memref<1x9208x1xf32, #tpu.memory_space<vmem>>, %arg2: memref<9x1x64xf32, #tpu.memory_space<vmem>>, %arg3: memref<1x64xf32, #tpu.memory_space<vmem>>, %arg4: memref<9x64x32xf32, #tpu.memory_space<vmem>>, %arg5: memref<1x32xf32, #tpu.memory_space<vmem>>, %arg6: memref<9x32x128xf32, #tpu.memory_space<vmem>>, %arg7: memref<1x128xf32, #tpu.memory_space<vmem>>, %arg8: memref<9x128x64xf32, #tpu.memory_space<vmem>>, %arg9: memref<1x64xf32, #tpu.memory_space<vmem>>, %arg10: memref<1x77x64xf32, #tpu.memory_space<vmem>>, %arg11: memref<9048x64xf32, #tpu.memory_space<vmem>>, %arg12: memref<8880x32xf32, #tpu.memory_space<vmem>>, %arg13: memref<928x32xf32, #tpu.memory_space<vmem>>, %arg14: memref<880x128xf32, #tpu.memory_space<vmem>>, %arg15: memref<832x64xf32, #tpu.memory_space<vmem>>) attributes {dimension_semantics = [#tpu.dimension_semantics<parallel>], iteration_bounds = array<i64: 2>, scalar_prefetch = 0 : i64, scratch_operands = 5 : i64, tpu.core_type = #tpu.core_type<tc>, window_params = [{transform_indices = @transform_0, window_bounds = array<i64: 1, 9208, 1>}, {pipeline_mode = #tpu.pipeline_mode<synchronous>, transform_indices = @transform_1, window_bounds = array<i64: 9, 1, 64>}, {pipeline_mode = #tpu.pipeline_mode<synchronous>, transform_indices = @transform_2, window_bounds = array<i64: 1, 64>}, {pipeline_mode = #tpu.pipeline_mode<synchronous>, transform_indices = @transform_3, window_bounds = array<i64: 9, 64, 32>}, {pipeline_mode = #tpu.pipeline_mode<synchronous>, transform_indices = @transform_4, window_bounds = array<i64: 1, 32>}, {pipeline_mode = #tpu.pipeline_mode<synchronous>, transform_indices = @transform_5, window_bounds = array<i64: 9, 32, 128>}, {pipeline_mode = #tpu.pipeline_mode<synchronous>, transform_indices = @transform_6, window_bounds = array<i64: 1, 128>}, {pipeline_mode = #tpu.pipeline_mode<synchronous>, transform_indices = @transform_7, window_bounds = array<i64: 9, 128, 64>}, {pipeline_mode = #tpu.pipeline_mode<synchronous>, transform_indices = @transform_8, window_bounds = array<i64: 1, 64>}, {transform_indices = @transform_9, window_bounds = array<i64: 1, 77, 64>}]} {
    %cst = arith.constant 0.000000e+00 : f32
    %0 = vector.broadcast %cst : f32 to vector<8x64xf32>
    %c9040 = arith.constant 9040 : index
    %c0 = arith.constant 0 : index
    %1 = vector.load %arg11[%c9040, %c0] : memref<9048x64xf32, #tpu.memory_space<vmem>>, vector<8x64xf32>
    tpu.vector_store %arg11[%c9040, %c0], %0 {strides = array<i32>} : memref<9048x64xf32, #tpu.memory_space<vmem>>, vector<8x64xf32>,
    %cst_0 = arith.constant 0.000000e+00 : f32
    %2 = vector.broadcast %cst_0 : f32 to vector<3x32xf32>
    %c925 = arith.constant 925 : index
    %c0_1 = arith.constant 0 : index
    %3 = vector.load %arg13[%c925, %c0_1] : memref<928x32xf32, #tpu.memory_space<vmem>>, vector<3x32xf32>
    tpu.vector_store %arg13[%c925, %c0_1], %2 {strides = array<i32>} : memref<928x32xf32, #tpu.memory_space<vmem>>, vector<3x32xf32>,
    %cst_2 = arith.constant 0.000000e+00 : f32
    %4 = vector.broadcast %cst_2 : f32 to vector<5x128xf32>
    %c875 = arith.constant 875 : index
    %c0_3 = arith.constant 0 : index
    %5 = vector.load %arg14[%c875, %c0_3] : memref<880x128xf32, #tpu.memory_space<vmem>>, vector<5x128xf32>
    tpu.vector_store %arg14[%c875, %c0_3], %4 {strides = array<i32>} : memref<880x128xf32, #tpu.memory_space<vmem>>, vector<5x128xf32>,
    %c0_i32 = arith.constant 0 : i32
    %c71_i32 = arith.constant 71 : i32
    %6 = arith.addi %c0_i32, %c71_i32 : i32
    %c1_i32 = arith.constant 1 : i32
    scf.for %arg16 = %c0_i32 to %6 step %c1_i32  : i32 {
      %c1_i32_21 = arith.constant 1 : i32
      %12 = arith.muli %arg16, %c1_i32_21 : i32
      %c0_i32_22 = arith.constant 0 : i32
      %13 = arith.addi %c0_i32_22, %12 : i32
      %c128_i32 = arith.constant 128 : i32
      %14 = arith.muli %13, %c128_i32 : i32
      %c8912_i32 = arith.constant 8912 : i32
      %15 = arith.minsi %14, %c8912_i32 : i32
      %cst_23 = arith.constant 0.000000e+00 : f32
      %16 = vector.broadcast %cst_23 : f32 to vector<128x64xf32>
      %c0_24 = arith.constant 0 : index
      %c0_25 = arith.constant 0 : index
      %17 = vector.load %arg3[%c0_24, %c0_25] : memref<1x64xf32, #tpu.memory_space<vmem>>, vector<1x64xf32>
      %18 = vector.broadcast %17 : vector<1x64xf32> to vector<128x64xf32>
      %19 = arith.addf %16, %18 : vector<128x64xf32>
      %c0_i32_26 = arith.constant 0 : i32
      %20 = arith.addi %15, %c0_i32_26 : i32
      %c0_i32_27 = arith.constant 0 : i32
      %21 = arith.addi %20, %c0_i32_27 : i32
      %c0_28 = arith.constant 0 : index
      %22 = arith.index_cast %21 : i32 to index
      %c0_29 = arith.constant 0 : index
      %23 = vector.load %arg1[%c0_28, %22, %c0_29] : memref<1x9208x1xf32, #tpu.memory_space<vmem>>, vector<1x128x1xf32>
      %24 = vector.shape_cast %23 : vector<1x128x1xf32> to vector<128x1xf32>
      %c0_30 = arith.constant 0 : index
      %c0_31 = arith.constant 0 : index
      %c0_32 = arith.constant 0 : index
      %25 = vector.load %arg2[%c0_30, %c0_31, %c0_32] : memref<9x1x64xf32, #tpu.memory_space<vmem>>, vector<1x1x64xf32>
      %26 = vector.shape_cast %25 : vector<1x1x64xf32> to vector<1x64xf32>
      %27 = vector.broadcast %24 : vector<128x1xf32> to vector<128x64xf32>
      %28 = vector.broadcast %26 : vector<1x64xf32> to vector<128x64xf32>
      %29 = arith.mulf %27, %28 : vector<128x64xf32>
      %30 = arith.addf %19, %29 : vector<128x64xf32>
      %c0_i32_33 = arith.constant 0 : i32
      %31 = arith.addi %15, %c0_i32_33 : i32
      %c1_i32_34 = arith.constant 1 : i32
      %32 = arith.addi %31, %c1_i32_34 : i32
      %c0_35 = arith.constant 0 : index
      %33 = arith.index_cast %32 : i32 to index
      %c0_36 = arith.constant 0 : index
      %34 = vector.load %arg1[%c0_35, %33, %c0_36] : memref<1x9208x1xf32, #tpu.memory_space<vmem>>, vector<1x128x1xf32>
      %35 = vector.shape_cast %34 : vector<1x128x1xf32> to vector<128x1xf32>
      %c1 = arith.constant 1 : index
      %c0_37 = arith.constant 0 : index
      %c0_38 = arith.constant 0 : index
      %36 = vector.load %arg2[%c1, %c0_37, %c0_38] : memref<9x1x64xf32, #tpu.memory_space<vmem>>, vector<1x1x64xf32>
      %37 = vector.shape_cast %36 : vector<1x1x64xf32> to vector<1x64xf32>
      %38 = vector.broadcast %35 : vector<128x1xf32> to vector<128x64xf32>
      %39 = vector.broadcast %37 : vector<1x64xf32> to vector<128x64xf32>
      %40 = arith.mulf %38, %39 : vector<128x64xf32>
      %41 = arith.addf %30, %40 : vector<128x64xf32>
      %c0_i32_39 = arith.constant 0 : i32
      %42 = arith.addi %15, %c0_i32_39 : i32
      %c2_i32 = arith.constant 2 : i32
      %43 = arith.addi %42, %c2_i32 : i32
      %c0_40 = arith.constant 0 : index
      %44 = arith.index_cast %43 : i32 to index
      %c0_41 = arith.constant 0 : index
      %45 = vector.load %arg1[%c0_40, %44, %c0_41] : memref<1x9208x1xf32, #tpu.memory_space<vmem>>, vector<1x128x1xf32>
      %46 = vector.shape_cast %45 : vector<1x128x1xf32> to vector<128x1xf32>
      %c2 = arith.constant 2 : index
      %c0_42 = arith.constant 0 : index
      %c0_43 = arith.constant 0 : index
      %47 = vector.load %arg2[%c2, %c0_42, %c0_43] : memref<9x1x64xf32, #tpu.memory_space<vmem>>, vector<1x1x64xf32>
      %48 = vector.shape_cast %47 : vector<1x1x64xf32> to vector<1x64xf32>
      %49 = vector.broadcast %46 : vector<128x1xf32> to vector<128x64xf32>
      %50 = vector.broadcast %48 : vector<1x64xf32> to vector<128x64xf32>
      %51 = arith.mulf %49, %50 : vector<128x64xf32>
      %52 = arith.addf %41, %51 : vector<128x64xf32>
      %c80_i32 = arith.constant 80 : i32
      %53 = arith.addi %15, %c80_i32 : i32
      %c0_i32_44 = arith.constant 0 : i32
      %54 = arith.addi %53, %c0_i32_44 : i32
      %c0_45 = arith.constant 0 : index
      %55 = arith.index_cast %54 : i32 to index
      %c0_46 = arith.constant 0 : index
      %56 = vector.load %arg1[%c0_45, %55, %c0_46] : memref<1x9208x1xf32, #tpu.memory_space<vmem>>, vector<1x128x1xf32>
      %57 = vector.shape_cast %56 : vector<1x128x1xf32> to vector<128x1xf32>
      %c3 = arith.constant 3 : index
      %c0_47 = arith.constant 0 : index
      %c0_48 = arith.constant 0 : index
      %58 = vector.load %arg2[%c3, %c0_47, %c0_48] : memref<9x1x64xf32, #tpu.memory_space<vmem>>, vector<1x1x64xf32>
      %59 = vector.shape_cast %58 : vector<1x1x64xf32> to vector<1x64xf32>
      %60 = vector.broadcast %57 : vector<128x1xf32> to vector<128x64xf32>
      %61 = vector.broadcast %59 : vector<1x64xf32> to vector<128x64xf32>
      %62 = arith.mulf %60, %61 : vector<128x64xf32>
      %63 = arith.addf %52, %62 : vector<128x64xf32>
      %c80_i32_49 = arith.constant 80 : i32
      %64 = arith.addi %15, %c80_i32_49 : i32
      %c1_i32_50 = arith.constant 1 : i32
      %65 = arith.addi %64, %c1_i32_50 : i32
      %c0_51 = arith.constant 0 : index
      %66 = arith.index_cast %65 : i32 to index
      %c0_52 = arith.constant 0 : index
      %67 = vector.load %arg1[%c0_51, %66, %c0_52] : memref<1x9208x1xf32, #tpu.memory_space<vmem>>, vector<1x128x1xf32>
      %68 = vector.shape_cast %67 : vector<1x128x1xf32> to vector<128x1xf32>
      %c4 = arith.constant 4 : index
      %c0_53 = arith.constant 0 : index
      %c0_54 = arith.constant 0 : index
      %69 = vector.load %arg2[%c4, %c0_53, %c0_54] : memref<9x1x64xf32, #tpu.memory_space<vmem>>, vector<1x1x64xf32>
      %70 = vector.shape_cast %69 : vector<1x1x64xf32> to vector<1x64xf32>
      %71 = vector.broadcast %68 : vector<128x1xf32> to vector<128x64xf32>
      %72 = vector.broadcast %70 : vector<1x64xf32> to vector<128x64xf32>
      %73 = arith.mulf %71, %72 : vector<128x64xf32>
      %74 = arith.addf %63, %73 : vector<128x64xf32>
      %c80_i32_55 = arith.constant 80 : i32
      %75 = arith.addi %15, %c80_i32_55 : i32
      %c2_i32_56 = arith.constant 2 : i32
      %76 = arith.addi %75, %c2_i32_56 : i32
      %c0_57 = arith.constant 0 : index
      %77 = arith.index_cast %76 : i32 to index
      %c0_58 = arith.constant 0 : index
      %78 = vector.load %arg1[%c0_57, %77, %c0_58] : memref<1x9208x1xf32, #tpu.memory_space<vmem>>, vector<1x128x1xf32>
      %79 = vector.shape_cast %78 : vector<1x128x1xf32> to vector<128x1xf32>
      %c5 = arith.constant 5 : index
      %c0_59 = arith.constant 0 : index
      %c0_60 = arith.constant 0 : index
      %80 = vector.load %arg2[%c5, %c0_59, %c0_60] : memref<9x1x64xf32, #tpu.memory_space<vmem>>, vector<1x1x64xf32>
      %81 = vector.shape_cast %80 : vector<1x1x64xf32> to vector<1x64xf32>
      %82 = vector.broadcast %79 : vector<128x1xf32> to vector<128x64xf32>
      %83 = vector.broadcast %81 : vector<1x64xf32> to vector<128x64xf32>
      %84 = arith.mulf %82, %83 : vector<128x64xf32>
      %85 = arith.addf %74, %84 : vector<128x64xf32>
      %c160_i32 = arith.constant 160 : i32
      %86 = arith.addi %15, %c160_i32 : i32
      %c0_i32_61 = arith.constant 0 : i32
      %87 = arith.addi %86, %c0_i32_61 : i32
      %c0_62 = arith.constant 0 : index
      %88 = arith.index_cast %87 : i32 to index
      %c0_63 = arith.constant 0 : index
      %89 = vector.load %arg1[%c0_62, %88, %c0_63] : memref<1x9208x1xf32, #tpu.memory_space<vmem>>, vector<1x128x1xf32>
      %90 = vector.shape_cast %89 : vector<1x128x1xf32> to vector<128x1xf32>
      %c6 = arith.constant 6 : index
      %c0_64 = arith.constant 0 : index
      %c0_65 = arith.constant 0 : index
      %91 = vector.load %arg2[%c6, %c0_64, %c0_65] : memref<9x1x64xf32, #tpu.memory_space<vmem>>, vector<1x1x64xf32>
      %92 = vector.shape_cast %91 : vector<1x1x64xf32> to vector<1x64xf32>
      %93 = vector.broadcast %90 : vector<128x1xf32> to vector<128x64xf32>
      %94 = vector.broadcast %92 : vector<1x64xf32> to vector<128x64xf32>
      %95 = arith.mulf %93, %94 : vector<128x64xf32>
      %96 = arith.addf %85, %95 : vector<128x64xf32>
      %c160_i32_66 = arith.constant 160 : i32
      %97 = arith.addi %15, %c160_i32_66 : i32
      %c1_i32_67 = arith.constant 1 : i32
      %98 = arith.addi %97, %c1_i32_67 : i32
      %c0_68 = arith.constant 0 : index
      %99 = arith.index_cast %98 : i32 to index
      %c0_69 = arith.constant 0 : index
      %100 = vector.load %arg1[%c0_68, %99, %c0_69] : memref<1x9208x1xf32, #tpu.memory_space<vmem>>, vector<1x128x1xf32>
      %101 = vector.shape_cast %100 : vector<1x128x1xf32> to vector<128x1xf32>
      %c7 = arith.constant 7 : index
      %c0_70 = arith.constant 0 : index
      %c0_71 = arith.constant 0 : index
      %102 = vector.load %arg2[%c7, %c0_70, %c0_71] : memref<9x1x64xf32, #tpu.memory_space<vmem>>, vector<1x1x64xf32>
      %103 = vector.shape_cast %102 : vector<1x1x64xf32> to vector<1x64xf32>
      %104 = vector.broadcast %101 : vector<128x1xf32> to vector<128x64xf32>
      %105 = vector.broadcast %103 : vector<1x64xf32> to vector<128x64xf32>
      %106 = arith.mulf %104, %105 : vector<128x64xf32>
      %107 = arith.addf %96, %106 : vector<128x64xf32>
      %c160_i32_72 = arith.constant 160 : i32
      %108 = arith.addi %15, %c160_i32_72 : i32
      %c2_i32_73 = arith.constant 2 : i32
      %109 = arith.addi %108, %c2_i32_73 : i32
      %c0_74 = arith.constant 0 : index
      %110 = arith.index_cast %109 : i32 to index
      %c0_75 = arith.constant 0 : index
      %111 = vector.load %arg1[%c0_74, %110, %c0_75] : memref<1x9208x1xf32, #tpu.memory_space<vmem>>, vector<1x128x1xf32>
      %112 = vector.shape_cast %111 : vector<1x128x1xf32> to vector<128x1xf32>
      %c8 = arith.constant 8 : index
      %c0_76 = arith.constant 0 : index
      %c0_77 = arith.constant 0 : index
      %113 = vector.load %arg2[%c8, %c0_76, %c0_77] : memref<9x1x64xf32, #tpu.memory_space<vmem>>, vector<1x1x64xf32>
      %114 = vector.shape_cast %113 : vector<1x1x64xf32> to vector<1x64xf32>
      %115 = vector.broadcast %112 : vector<128x1xf32> to vector<128x64xf32>
      %116 = vector.broadcast %114 : vector<1x64xf32> to vector<128x64xf32>
      %117 = arith.mulf %115, %116 : vector<128x64xf32>
      %118 = arith.addf %107, %117 : vector<128x64xf32>
      %cst_78 = arith.constant 0.000000e+00 : f32
      %119 = vector.broadcast %cst_78 : f32 to vector<128x64xf32>
      %120 = arith.cmpf ogt, %118, %119 : vector<128x64xf32>
      %cst_79 = arith.constant 0.00999999977 : f32
      %121 = vector.broadcast %cst_79 : f32 to vector<128x64xf32>
      %122 = arith.mulf %121, %118 : vector<128x64xf32>
      %123 = arith.select %120, %118, %122 : vector<128x64xi1>, vector<128x64xf32>
      %124 = arith.index_cast %15 : i32 to index
      %c0_80 = arith.constant 0 : index
      %125 = vector.load %arg11[%124, %c0_80] : memref<9048x64xf32, #tpu.memory_space<vmem>>, vector<128x64xf32>
      tpu.vector_store %arg11[%124, %c0_80], %123 {strides = array<i32>} : memref<9048x64xf32, #tpu.memory_space<vmem>>, vector<128x64xf32>,
    }
    %c71_i32_4 = arith.constant 71 : i32
    %c0_i32_5 = arith.constant 0 : i32
    %c35_i32 = arith.constant 35 : i32
    %7 = arith.addi %c0_i32_5, %c35_i32 : i32
    %c1_i32_6 = arith.constant 1 : i32
    scf.for %arg16 = %c0_i32_5 to %7 step %c1_i32_6  : i32 {
      %c1_i32_21 = arith.constant 1 : i32
      %12 = arith.muli %arg16, %c1_i32_21 : i32
      %c0_i32_22 = arith.constant 0 : i32
      %13 = arith.addi %c0_i32_22, %12 : i32
      %c256_i32 = arith.constant 256 : i32
      %14 = arith.muli %13, %c256_i32 : i32
      %c8624_i32 = arith.constant 8624 : i32
      %15 = arith.minsi %14, %c8624_i32 : i32
      %cst_23 = arith.constant 0.000000e+00 : f32
      %16 = vector.broadcast %cst_23 : f32 to vector<256x32xf32>
      %c0_24 = arith.constant 0 : index
      %c0_25 = arith.constant 0 : index
      %17 = vector.load %arg5[%c0_24, %c0_25] : memref<1x32xf32, #tpu.memory_space<vmem>>, vector<1x32xf32>
      %18 = vector.broadcast %17 : vector<1x32xf32> to vector<256x32xf32>
      %19 = arith.addf %16, %18 : vector<256x32xf32>
      %c0_i32_26 = arith.constant 0 : i32
      %20 = arith.addi %15, %c0_i32_26 : i32
      %c0_i32_27 = arith.constant 0 : i32
      %21 = arith.addi %20, %c0_i32_27 : i32
      %22 = arith.index_cast %21 : i32 to index
      %c0_28 = arith.constant 0 : index
      %23 = vector.load %arg11[%22, %c0_28] : memref<9048x64xf32, #tpu.memory_space<vmem>>, vector<256x64xf32>
      %c0_29 = arith.constant 0 : index
      %c0_30 = arith.constant 0 : index
      %c0_31 = arith.constant 0 : index
      %24 = vector.load %arg4[%c0_29, %c0_30, %c0_31] : memref<9x64x32xf32, #tpu.memory_space<vmem>>, vector<1x64x32xf32>
      %25 = vector.shape_cast %24 : vector<1x64x32xf32> to vector<64x32xf32>
      %cst_32 = arith.constant dense<0.000000e+00> : vector<256x32xf32>
      %26 = tpu.matmul %23, %25, %cst_32 {dimension_numbers = #tpu.dot_dimension_numbers<[1], [0], [0], [1], [0, 0, 1, 1], [], []>} : vector<256x64xf32>, vector<64x32xf32>, vector<256x32xf32> -> vector<256x32xf32>
      %27 = arith.addf %19, %26 : vector<256x32xf32>
      %c0_i32_33 = arith.constant 0 : i32
      %28 = arith.addi %15, %c0_i32_33 : i32
      %c1_i32_34 = arith.constant 1 : i32
      %29 = arith.addi %28, %c1_i32_34 : i32
      %30 = arith.index_cast %29 : i32 to index
      %c0_35 = arith.constant 0 : index
      %31 = vector.load %arg11[%30, %c0_35] : memref<9048x64xf32, #tpu.memory_space<vmem>>, vector<256x64xf32>
      %c1 = arith.constant 1 : index
      %c0_36 = arith.constant 0 : index
      %c0_37 = arith.constant 0 : index
      %32 = vector.load %arg4[%c1, %c0_36, %c0_37] : memref<9x64x32xf32, #tpu.memory_space<vmem>>, vector<1x64x32xf32>
      %33 = vector.shape_cast %32 : vector<1x64x32xf32> to vector<64x32xf32>
      %cst_38 = arith.constant dense<0.000000e+00> : vector<256x32xf32>
      %34 = tpu.matmul %31, %33, %cst_38 {dimension_numbers = #tpu.dot_dimension_numbers<[1], [0], [0], [1], [0, 0, 1, 1], [], []>} : vector<256x64xf32>, vector<64x32xf32>, vector<256x32xf32> -> vector<256x32xf32>
      %35 = arith.addf %27, %34 : vector<256x32xf32>
      %c0_i32_39 = arith.constant 0 : i32
      %36 = arith.addi %15, %c0_i32_39 : i32
      %c2_i32 = arith.constant 2 : i32
      %37 = arith.addi %36, %c2_i32 : i32
      %38 = arith.index_cast %37 : i32 to index
      %c0_40 = arith.constant 0 : index
      %39 = vector.load %arg11[%38, %c0_40] : memref<9048x64xf32, #tpu.memory_space<vmem>>, vector<256x64xf32>
      %c2 = arith.constant 2 : index
      %c0_41 = arith.constant 0 : index
      %c0_42 = arith.constant 0 : index
      %40 = vector.load %arg4[%c2, %c0_41, %c0_42] : memref<9x64x32xf32, #tpu.memory_space<vmem>>, vector<1x64x32xf32>
      %41 = vector.shape_cast %40 : vector<1x64x32xf32> to vector<64x32xf32>
      %cst_43 = arith.constant dense<0.000000e+00> : vector<256x32xf32>
      %42 = tpu.matmul %39, %41, %cst_43 {dimension_numbers = #tpu.dot_dimension_numbers<[1], [0], [0], [1], [0, 0, 1, 1], [], []>} : vector<256x64xf32>, vector<64x32xf32>, vector<256x32xf32> -> vector<256x32xf32>
      %43 = arith.addf %35, %42 : vector<256x32xf32>
      %c80_i32 = arith.constant 80 : i32
      %44 = arith.addi %15, %c80_i32 : i32
      %c0_i32_44 = arith.constant 0 : i32
      %45 = arith.addi %44, %c0_i32_44 : i32
      %46 = arith.index_cast %45 : i32 to index
      %c0_45 = arith.constant 0 : index
      %47 = vector.load %arg11[%46, %c0_45] : memref<9048x64xf32, #tpu.memory_space<vmem>>, vector<256x64xf32>
      %c3 = arith.constant 3 : index
      %c0_46 = arith.constant 0 : index
      %c0_47 = arith.constant 0 : index
      %48 = vector.load %arg4[%c3, %c0_46, %c0_47] : memref<9x64x32xf32, #tpu.memory_space<vmem>>, vector<1x64x32xf32>
      %49 = vector.shape_cast %48 : vector<1x64x32xf32> to vector<64x32xf32>
      %cst_48 = arith.constant dense<0.000000e+00> : vector<256x32xf32>
      %50 = tpu.matmul %47, %49, %cst_48 {dimension_numbers = #tpu.dot_dimension_numbers<[1], [0], [0], [1], [0, 0, 1, 1], [], []>} : vector<256x64xf32>, vector<64x32xf32>, vector<256x32xf32> -> vector<256x32xf32>
      %51 = arith.addf %43, %50 : vector<256x32xf32>
      %c80_i32_49 = arith.constant 80 : i32
      %52 = arith.addi %15, %c80_i32_49 : i32
      %c1_i32_50 = arith.constant 1 : i32
      %53 = arith.addi %52, %c1_i32_50 : i32
      %54 = arith.index_cast %53 : i32 to index
      %c0_51 = arith.constant 0 : index
      %55 = vector.load %arg11[%54, %c0_51] : memref<9048x64xf32, #tpu.memory_space<vmem>>, vector<256x64xf32>
      %c4 = arith.constant 4 : index
      %c0_52 = arith.constant 0 : index
      %c0_53 = arith.constant 0 : index
      %56 = vector.load %arg4[%c4, %c0_52, %c0_53] : memref<9x64x32xf32, #tpu.memory_space<vmem>>, vector<1x64x32xf32>
      %57 = vector.shape_cast %56 : vector<1x64x32xf32> to vector<64x32xf32>
      %cst_54 = arith.constant dense<0.000000e+00> : vector<256x32xf32>
      %58 = tpu.matmul %55, %57, %cst_54 {dimension_numbers = #tpu.dot_dimension_numbers<[1], [0], [0], [1], [0, 0, 1, 1], [], []>} : vector<256x64xf32>, vector<64x32xf32>, vector<256x32xf32> -> vector<256x32xf32>
      %59 = arith.addf %51, %58 : vector<256x32xf32>
      %c80_i32_55 = arith.constant 80 : i32
      %60 = arith.addi %15, %c80_i32_55 : i32
      %c2_i32_56 = arith.constant 2 : i32
      %61 = arith.addi %60, %c2_i32_56 : i32
      %62 = arith.index_cast %61 : i32 to index
      %c0_57 = arith.constant 0 : index
      %63 = vector.load %arg11[%62, %c0_57] : memref<9048x64xf32, #tpu.memory_space<vmem>>, vector<256x64xf32>
      %c5 = arith.constant 5 : index
      %c0_58 = arith.constant 0 : index
      %c0_59 = arith.constant 0 : index
      %64 = vector.load %arg4[%c5, %c0_58, %c0_59] : memref<9x64x32xf32, #tpu.memory_space<vmem>>, vector<1x64x32xf32>
      %65 = vector.shape_cast %64 : vector<1x64x32xf32> to vector<64x32xf32>
      %cst_60 = arith.constant dense<0.000000e+00> : vector<256x32xf32>
      %66 = tpu.matmul %63, %65, %cst_60 {dimension_numbers = #tpu.dot_dimension_numbers<[1], [0], [0], [1], [0, 0, 1, 1], [], []>} : vector<256x64xf32>, vector<64x32xf32>, vector<256x32xf32> -> vector<256x32xf32>
      %67 = arith.addf %59, %66 : vector<256x32xf32>
      %c160_i32 = arith.constant 160 : i32
      %68 = arith.addi %15, %c160_i32 : i32
      %c0_i32_61 = arith.constant 0 : i32
      %69 = arith.addi %68, %c0_i32_61 : i32
      %70 = arith.index_cast %69 : i32 to index
      %c0_62 = arith.constant 0 : index
      %71 = vector.load %arg11[%70, %c0_62] : memref<9048x64xf32, #tpu.memory_space<vmem>>, vector<256x64xf32>
      %c6 = arith.constant 6 : index
      %c0_63 = arith.constant 0 : index
      %c0_64 = arith.constant 0 : index
      %72 = vector.load %arg4[%c6, %c0_63, %c0_64] : memref<9x64x32xf32, #tpu.memory_space<vmem>>, vector<1x64x32xf32>
      %73 = vector.shape_cast %72 : vector<1x64x32xf32> to vector<64x32xf32>
      %cst_65 = arith.constant dense<0.000000e+00> : vector<256x32xf32>
      %74 = tpu.matmul %71, %73, %cst_65 {dimension_numbers = #tpu.dot_dimension_numbers<[1], [0], [0], [1], [0, 0, 1, 1], [], []>} : vector<256x64xf32>, vector<64x32xf32>, vector<256x32xf32> -> vector<256x32xf32>
      %75 = arith.addf %67, %74 : vector<256x32xf32>
      %c160_i32_66 = arith.constant 160 : i32
      %76 = arith.addi %15, %c160_i32_66 : i32
      %c1_i32_67 = arith.constant 1 : i32
      %77 = arith.addi %76, %c1_i32_67 : i32
      %78 = arith.index_cast %77 : i32 to index
      %c0_68 = arith.constant 0 : index
      %79 = vector.load %arg11[%78, %c0_68] : memref<9048x64xf32, #tpu.memory_space<vmem>>, vector<256x64xf32>
      %c7 = arith.constant 7 : index
      %c0_69 = arith.constant 0 : index
      %c0_70 = arith.constant 0 : index
      %80 = vector.load %arg4[%c7, %c0_69, %c0_70] : memref<9x64x32xf32, #tpu.memory_space<vmem>>, vector<1x64x32xf32>
      %81 = vector.shape_cast %80 : vector<1x64x32xf32> to vector<64x32xf32>
      %cst_71 = arith.constant dense<0.000000e+00> : vector<256x32xf32>
      %82 = tpu.matmul %79, %81, %cst_71 {dimension_numbers = #tpu.dot_dimension_numbers<[1], [0], [0], [1], [0, 0, 1, 1], [], []>} : vector<256x64xf32>, vector<64x32xf32>, vector<256x32xf32> -> vector<256x32xf32>
      %83 = arith.addf %75, %82 : vector<256x32xf32>
      %c160_i32_72 = arith.constant 160 : i32
      %84 = arith.addi %15, %c160_i32_72 : i32
      %c2_i32_73 = arith.constant 2 : i32
      %85 = arith.addi %84, %c2_i32_73 : i32
      %86 = arith.index_cast %85 : i32 to index
      %c0_74 = arith.constant 0 : index
      %87 = vector.load %arg11[%86, %c0_74] : memref<9048x64xf32, #tpu.memory_space<vmem>>, vector<256x64xf32>
      %c8 = arith.constant 8 : index
      %c0_75 = arith.constant 0 : index
      %c0_76 = arith.constant 0 : index
      %88 = vector.load %arg4[%c8, %c0_75, %c0_76] : memref<9x64x32xf32, #tpu.memory_space<vmem>>, vector<1x64x32xf32>
      %89 = vector.shape_cast %88 : vector<1x64x32xf32> to vector<64x32xf32>
      %cst_77 = arith.constant dense<0.000000e+00> : vector<256x32xf32>
      %90 = tpu.matmul %87, %89, %cst_77 {dimension_numbers = #tpu.dot_dimension_numbers<[1], [0], [0], [1], [0, 0, 1, 1], [], []>} : vector<256x64xf32>, vector<64x32xf32>, vector<256x32xf32> -> vector<256x32xf32>
      %91 = arith.addf %83, %90 : vector<256x32xf32>
      %cst_78 = arith.constant 0.000000e+00 : f32
      %92 = vector.broadcast %cst_78 : f32 to vector<256x32xf32>
      %93 = arith.cmpf ogt, %91, %92 : vector<256x32xf32>
      %cst_79 = arith.constant 0.00999999977 : f32
      %94 = vector.broadcast %cst_79 : f32 to vector<256x32xf32>
      %95 = arith.mulf %94, %91 : vector<256x32xf32>
      %96 = arith.select %93, %91, %95 : vector<256x32xi1>, vector<256x32xf32>
      %97 = arith.index_cast %15 : i32 to index
      %c0_80 = arith.constant 0 : index
      %98 = vector.load %arg12[%97, %c0_80] : memref<8880x32xf32, #tpu.memory_space<vmem>>, vector<256x32xf32>
      tpu.vector_store %arg12[%97, %c0_80], %96 {strides = array<i32>} : memref<8880x32xf32, #tpu.memory_space<vmem>>, vector<256x32xf32>,
    }
    %c35_i32_7 = arith.constant 35 : i32
    %c0_i32_8 = arith.constant 0 : i32
    %c37_i32 = arith.constant 37 : i32
    %8 = arith.addi %c0_i32_8, %c37_i32 : i32
    %c1_i32_9 = arith.constant 1 : i32
    scf.for %arg16 = %c0_i32_8 to %8 step %c1_i32_9  : i32 {
      %c1_i32_21 = arith.constant 1 : i32
      %12 = arith.muli %arg16, %c1_i32_21 : i32
      %c0_i32_22 = arith.constant 0 : i32
      %13 = arith.addi %c0_i32_22, %12 : i32
      %c240_i32 = arith.constant 240 : i32
      %14 = arith.muli %c240_i32, %13 : i32
      %15 = arith.index_cast %14 : i32 to index
      %c0_23 = arith.constant 0 : index
      %16 = tpu.strided_load %arg12[%15, %c0_23] {strides = array<i32: 3, 1>} : memref<8880x32xf32, #tpu.memory_space<vmem>>, vector<25x32xf32>
      %c0_i32_24 = arith.constant 0 : i32
      %17 = arith.addi %14, %c0_i32_24 : i32
      %c1_i32_25 = arith.constant 1 : i32
      %18 = arith.addi %17, %c1_i32_25 : i32
      %19 = arith.index_cast %18 : i32 to index
      %c0_26 = arith.constant 0 : index
      %20 = tpu.strided_load %arg12[%19, %c0_26] {strides = array<i32: 3, 1>} : memref<8880x32xf32, #tpu.memory_space<vmem>>, vector<25x32xf32>
      %21 = arith.maximumf %16, %20 : vector<25x32xf32>
      %c0_i32_27 = arith.constant 0 : i32
      %22 = arith.addi %14, %c0_i32_27 : i32
      %c2_i32 = arith.constant 2 : i32
      %23 = arith.addi %22, %c2_i32 : i32
      %24 = arith.index_cast %23 : i32 to index
      %c0_28 = arith.constant 0 : index
      %25 = tpu.strided_load %arg12[%24, %c0_28] {strides = array<i32: 3, 1>} : memref<8880x32xf32, #tpu.memory_space<vmem>>, vector<25x32xf32>
      %26 = arith.maximumf %21, %25 : vector<25x32xf32>
      %c80_i32 = arith.constant 80 : i32
      %27 = arith.addi %14, %c80_i32 : i32
      %c0_i32_29 = arith.constant 0 : i32
      %28 = arith.addi %27, %c0_i32_29 : i32
      %29 = arith.index_cast %28 : i32 to index
      %c0_30 = arith.constant 0 : index
      %30 = tpu.strided_load %arg12[%29, %c0_30] {strides = array<i32: 3, 1>} : memref<8880x32xf32, #tpu.memory_space<vmem>>, vector<25x32xf32>
      %31 = arith.maximumf %26, %30 : vector<25x32xf32>
      %c80_i32_31 = arith.constant 80 : i32
      %32 = arith.addi %14, %c80_i32_31 : i32
      %c1_i32_32 = arith.constant 1 : i32
      %33 = arith.addi %32, %c1_i32_32 : i32
      %34 = arith.index_cast %33 : i32 to index
      %c0_33 = arith.constant 0 : index
      %35 = tpu.strided_load %arg12[%34, %c0_33] {strides = array<i32: 3, 1>} : memref<8880x32xf32, #tpu.memory_space<vmem>>, vector<25x32xf32>
      %36 = arith.maximumf %31, %35 : vector<25x32xf32>
      %c80_i32_34 = arith.constant 80 : i32
      %37 = arith.addi %14, %c80_i32_34 : i32
      %c2_i32_35 = arith.constant 2 : i32
      %38 = arith.addi %37, %c2_i32_35 : i32
      %39 = arith.index_cast %38 : i32 to index
      %c0_36 = arith.constant 0 : index
      %40 = tpu.strided_load %arg12[%39, %c0_36] {strides = array<i32: 3, 1>} : memref<8880x32xf32, #tpu.memory_space<vmem>>, vector<25x32xf32>
      %41 = arith.maximumf %36, %40 : vector<25x32xf32>
      %c160_i32 = arith.constant 160 : i32
      %42 = arith.addi %14, %c160_i32 : i32
      %c0_i32_37 = arith.constant 0 : i32
      %43 = arith.addi %42, %c0_i32_37 : i32
      %44 = arith.index_cast %43 : i32 to index
      %c0_38 = arith.constant 0 : index
      %45 = tpu.strided_load %arg12[%44, %c0_38] {strides = array<i32: 3, 1>} : memref<8880x32xf32, #tpu.memory_space<vmem>>, vector<25x32xf32>
      %46 = arith.maximumf %41, %45 : vector<25x32xf32>
      %c160_i32_39 = arith.constant 160 : i32
      %47 = arith.addi %14, %c160_i32_39 : i32
      %c1_i32_40 = arith.constant 1 : i32
      %48 = arith.addi %47, %c1_i32_40 : i32
      %49 = arith.index_cast %48 : i32 to index
      %c0_41 = arith.constant 0 : index
      %50 = tpu.strided_load %arg12[%49, %c0_41] {strides = array<i32: 3, 1>} : memref<8880x32xf32, #tpu.memory_space<vmem>>, vector<25x32xf32>
      %51 = arith.maximumf %46, %50 : vector<25x32xf32>
      %c160_i32_42 = arith.constant 160 : i32
      %52 = arith.addi %14, %c160_i32_42 : i32
      %c2_i32_43 = arith.constant 2 : i32
      %53 = arith.addi %52, %c2_i32_43 : i32
      %54 = arith.index_cast %53 : i32 to index
      %c0_44 = arith.constant 0 : index
      %55 = tpu.strided_load %arg12[%54, %c0_44] {strides = array<i32: 3, 1>} : memref<8880x32xf32, #tpu.memory_space<vmem>>, vector<25x32xf32>
      %56 = arith.maximumf %51, %55 : vector<25x32xf32>
      %c25_i32 = arith.constant 25 : i32
      %57 = arith.muli %c25_i32, %13 : i32
      %58 = arith.index_cast %57 : i32 to index
      %c0_45 = arith.constant 0 : index
      %59 = vector.load %arg13[%58, %c0_45] : memref<928x32xf32, #tpu.memory_space<vmem>>, vector<25x32xf32>
      tpu.vector_store %arg13[%58, %c0_45], %56 {strides = array<i32>} : memref<928x32xf32, #tpu.memory_space<vmem>>, vector<25x32xf32>,
    }
    %c37_i32_10 = arith.constant 37 : i32
    %c0_i32_11 = arith.constant 0 : i32
    %c7_i32 = arith.constant 7 : i32
    %9 = arith.addi %c0_i32_11, %c7_i32 : i32
    %c1_i32_12 = arith.constant 1 : i32
    scf.for %arg16 = %c0_i32_11 to %9 step %c1_i32_12  : i32 {
      %c1_i32_21 = arith.constant 1 : i32
      %12 = arith.muli %arg16, %c1_i32_21 : i32
      %c0_i32_22 = arith.constant 0 : i32
      %13 = arith.addi %c0_i32_22, %12 : i32
      %c128_i32 = arith.constant 128 : i32
      %14 = arith.muli %13, %c128_i32 : i32
      %c747_i32 = arith.constant 747 : i32
      %15 = arith.minsi %14, %c747_i32 : i32
      %cst_23 = arith.constant 0.000000e+00 : f32
      %16 = vector.broadcast %cst_23 : f32 to vector<128x128xf32>
      %c0_24 = arith.constant 0 : index
      %c0_25 = arith.constant 0 : index
      %17 = vector.load %arg7[%c0_24, %c0_25] : memref<1x128xf32, #tpu.memory_space<vmem>>, vector<1x128xf32>
      %18 = vector.broadcast %17 : vector<1x128xf32> to vector<128x128xf32>
      %19 = arith.addf %16, %18 : vector<128x128xf32>
      %c0_i32_26 = arith.constant 0 : i32
      %20 = arith.addi %15, %c0_i32_26 : i32
      %c0_i32_27 = arith.constant 0 : i32
      %21 = arith.addi %20, %c0_i32_27 : i32
      %22 = arith.index_cast %21 : i32 to index
      %c0_28 = arith.constant 0 : index
      %23 = vector.load %arg13[%22, %c0_28] : memref<928x32xf32, #tpu.memory_space<vmem>>, vector<128x32xf32>
      %c0_29 = arith.constant 0 : index
      %c0_30 = arith.constant 0 : index
      %c0_31 = arith.constant 0 : index
      %24 = vector.load %arg6[%c0_29, %c0_30, %c0_31] : memref<9x32x128xf32, #tpu.memory_space<vmem>>, vector<1x32x128xf32>
      %25 = vector.shape_cast %24 : vector<1x32x128xf32> to vector<32x128xf32>
      %cst_32 = arith.constant dense<0.000000e+00> : vector<128x128xf32>
      %26 = tpu.matmul %23, %25, %cst_32 {dimension_numbers = #tpu.dot_dimension_numbers<[1], [0], [0], [1], [0, 0, 1, 1], [], []>} : vector<128x32xf32>, vector<32x128xf32>, vector<128x128xf32> -> vector<128x128xf32>
      %27 = arith.addf %19, %26 : vector<128x128xf32>
      %c0_i32_33 = arith.constant 0 : i32
      %28 = arith.addi %15, %c0_i32_33 : i32
      %c1_i32_34 = arith.constant 1 : i32
      %29 = arith.addi %28, %c1_i32_34 : i32
      %30 = arith.index_cast %29 : i32 to index
      %c0_35 = arith.constant 0 : index
      %31 = vector.load %arg13[%30, %c0_35] : memref<928x32xf32, #tpu.memory_space<vmem>>, vector<128x32xf32>
      %c1 = arith.constant 1 : index
      %c0_36 = arith.constant 0 : index
      %c0_37 = arith.constant 0 : index
      %32 = vector.load %arg6[%c1, %c0_36, %c0_37] : memref<9x32x128xf32, #tpu.memory_space<vmem>>, vector<1x32x128xf32>
      %33 = vector.shape_cast %32 : vector<1x32x128xf32> to vector<32x128xf32>
      %cst_38 = arith.constant dense<0.000000e+00> : vector<128x128xf32>
      %34 = tpu.matmul %31, %33, %cst_38 {dimension_numbers = #tpu.dot_dimension_numbers<[1], [0], [0], [1], [0, 0, 1, 1], [], []>} : vector<128x32xf32>, vector<32x128xf32>, vector<128x128xf32> -> vector<128x128xf32>
      %35 = arith.addf %27, %34 : vector<128x128xf32>
      %c0_i32_39 = arith.constant 0 : i32
      %36 = arith.addi %15, %c0_i32_39 : i32
      %c2_i32 = arith.constant 2 : i32
      %37 = arith.addi %36, %c2_i32 : i32
      %38 = arith.index_cast %37 : i32 to index
      %c0_40 = arith.constant 0 : index
      %39 = vector.load %arg13[%38, %c0_40] : memref<928x32xf32, #tpu.memory_space<vmem>>, vector<128x32xf32>
      %c2 = arith.constant 2 : index
      %c0_41 = arith.constant 0 : index
      %c0_42 = arith.constant 0 : index
      %40 = vector.load %arg6[%c2, %c0_41, %c0_42] : memref<9x32x128xf32, #tpu.memory_space<vmem>>, vector<1x32x128xf32>
      %41 = vector.shape_cast %40 : vector<1x32x128xf32> to vector<32x128xf32>
      %cst_43 = arith.constant dense<0.000000e+00> : vector<128x128xf32>
      %42 = tpu.matmul %39, %41, %cst_43 {dimension_numbers = #tpu.dot_dimension_numbers<[1], [0], [0], [1], [0, 0, 1, 1], [], []>} : vector<128x32xf32>, vector<32x128xf32>, vector<128x128xf32> -> vector<128x128xf32>
      %43 = arith.addf %35, %42 : vector<128x128xf32>
      %c25_i32 = arith.constant 25 : i32
      %44 = arith.addi %15, %c25_i32 : i32
      %c0_i32_44 = arith.constant 0 : i32
      %45 = arith.addi %44, %c0_i32_44 : i32
      %46 = arith.index_cast %45 : i32 to index
      %c0_45 = arith.constant 0 : index
      %47 = vector.load %arg13[%46, %c0_45] : memref<928x32xf32, #tpu.memory_space<vmem>>, vector<128x32xf32>
      %c3 = arith.constant 3 : index
      %c0_46 = arith.constant 0 : index
      %c0_47 = arith.constant 0 : index
      %48 = vector.load %arg6[%c3, %c0_46, %c0_47] : memref<9x32x128xf32, #tpu.memory_space<vmem>>, vector<1x32x128xf32>
      %49 = vector.shape_cast %48 : vector<1x32x128xf32> to vector<32x128xf32>
      %cst_48 = arith.constant dense<0.000000e+00> : vector<128x128xf32>
      %50 = tpu.matmul %47, %49, %cst_48 {dimension_numbers = #tpu.dot_dimension_numbers<[1], [0], [0], [1], [0, 0, 1, 1], [], []>} : vector<128x32xf32>, vector<32x128xf32>, vector<128x128xf32> -> vector<128x128xf32>
      %51 = arith.addf %43, %50 : vector<128x128xf32>
      %c25_i32_49 = arith.constant 25 : i32
      %52 = arith.addi %15, %c25_i32_49 : i32
      %c1_i32_50 = arith.constant 1 : i32
      %53 = arith.addi %52, %c1_i32_50 : i32
      %54 = arith.index_cast %53 : i32 to index
      %c0_51 = arith.constant 0 : index
      %55 = vector.load %arg13[%54, %c0_51] : memref<928x32xf32, #tpu.memory_space<vmem>>, vector<128x32xf32>
      %c4 = arith.constant 4 : index
      %c0_52 = arith.constant 0 : index
      %c0_53 = arith.constant 0 : index
      %56 = vector.load %arg6[%c4, %c0_52, %c0_53] : memref<9x32x128xf32, #tpu.memory_space<vmem>>, vector<1x32x128xf32>
      %57 = vector.shape_cast %56 : vector<1x32x128xf32> to vector<32x128xf32>
      %cst_54 = arith.constant dense<0.000000e+00> : vector<128x128xf32>
      %58 = tpu.matmul %55, %57, %cst_54 {dimension_numbers = #tpu.dot_dimension_numbers<[1], [0], [0], [1], [0, 0, 1, 1], [], []>} : vector<128x32xf32>, vector<32x128xf32>, vector<128x128xf32> -> vector<128x128xf32>
      %59 = arith.addf %51, %58 : vector<128x128xf32>
      %c25_i32_55 = arith.constant 25 : i32
      %60 = arith.addi %15, %c25_i32_55 : i32
      %c2_i32_56 = arith.constant 2 : i32
      %61 = arith.addi %60, %c2_i32_56 : i32
      %62 = arith.index_cast %61 : i32 to index
      %c0_57 = arith.constant 0 : index
      %63 = vector.load %arg13[%62, %c0_57] : memref<928x32xf32, #tpu.memory_space<vmem>>, vector<128x32xf32>
      %c5 = arith.constant 5 : index
      %c0_58 = arith.constant 0 : index
      %c0_59 = arith.constant 0 : index
      %64 = vector.load %arg6[%c5, %c0_58, %c0_59] : memref<9x32x128xf32, #tpu.memory_space<vmem>>, vector<1x32x128xf32>
      %65 = vector.shape_cast %64 : vector<1x32x128xf32> to vector<32x128xf32>
      %cst_60 = arith.constant dense<0.000000e+00> : vector<128x128xf32>
      %66 = tpu.matmul %63, %65, %cst_60 {dimension_numbers = #tpu.dot_dimension_numbers<[1], [0], [0], [1], [0, 0, 1, 1], [], []>} : vector<128x32xf32>, vector<32x128xf32>, vector<128x128xf32> -> vector<128x128xf32>
      %67 = arith.addf %59, %66 : vector<128x128xf32>
      %c50_i32 = arith.constant 50 : i32
      %68 = arith.addi %15, %c50_i32 : i32
      %c0_i32_61 = arith.constant 0 : i32
      %69 = arith.addi %68, %c0_i32_61 : i32
      %70 = arith.index_cast %69 : i32 to index
      %c0_62 = arith.constant 0 : index
      %71 = vector.load %arg13[%70, %c0_62] : memref<928x32xf32, #tpu.memory_space<vmem>>, vector<128x32xf32>
      %c6 = arith.constant 6 : index
      %c0_63 = arith.constant 0 : index
      %c0_64 = arith.constant 0 : index
      %72 = vector.load %arg6[%c6, %c0_63, %c0_64] : memref<9x32x128xf32, #tpu.memory_space<vmem>>, vector<1x32x128xf32>
      %73 = vector.shape_cast %72 : vector<1x32x128xf32> to vector<32x128xf32>
      %cst_65 = arith.constant dense<0.000000e+00> : vector<128x128xf32>
      %74 = tpu.matmul %71, %73, %cst_65 {dimension_numbers = #tpu.dot_dimension_numbers<[1], [0], [0], [1], [0, 0, 1, 1], [], []>} : vector<128x32xf32>, vector<32x128xf32>, vector<128x128xf32> -> vector<128x128xf32>
      %75 = arith.addf %67, %74 : vector<128x128xf32>
      %c50_i32_66 = arith.constant 50 : i32
      %76 = arith.addi %15, %c50_i32_66 : i32
      %c1_i32_67 = arith.constant 1 : i32
      %77 = arith.addi %76, %c1_i32_67 : i32
      %78 = arith.index_cast %77 : i32 to index
      %c0_68 = arith.constant 0 : index
      %79 = vector.load %arg13[%78, %c0_68] : memref<928x32xf32, #tpu.memory_space<vmem>>, vector<128x32xf32>
      %c7 = arith.constant 7 : index
      %c0_69 = arith.constant 0 : index
      %c0_70 = arith.constant 0 : index
      %80 = vector.load %arg6[%c7, %c0_69, %c0_70] : memref<9x32x128xf32, #tpu.memory_space<vmem>>, vector<1x32x128xf32>
      %81 = vector.shape_cast %80 : vector<1x32x128xf32> to vector<32x128xf32>
      %cst_71 = arith.constant dense<0.000000e+00> : vector<128x128xf32>
      %82 = tpu.matmul %79, %81, %cst_71 {dimension_numbers = #tpu.dot_dimension_numbers<[1], [0], [0], [1], [0, 0, 1, 1], [], []>} : vector<128x32xf32>, vector<32x128xf32>, vector<128x128xf32> -> vector<128x128xf32>
      %83 = arith.addf %75, %82 : vector<128x128xf32>
      %c50_i32_72 = arith.constant 50 : i32
      %84 = arith.addi %15, %c50_i32_72 : i32
      %c2_i32_73 = arith.constant 2 : i32
      %85 = arith.addi %84, %c2_i32_73 : i32
      %86 = arith.index_cast %85 : i32 to index
      %c0_74 = arith.constant 0 : index
      %87 = vector.load %arg13[%86, %c0_74] : memref<928x32xf32, #tpu.memory_space<vmem>>, vector<128x32xf32>
      %c8 = arith.constant 8 : index
      %c0_75 = arith.constant 0 : index
      %c0_76 = arith.constant 0 : index
      %88 = vector.load %arg6[%c8, %c0_75, %c0_76] : memref<9x32x128xf32, #tpu.memory_space<vmem>>, vector<1x32x128xf32>
      %89 = vector.shape_cast %88 : vector<1x32x128xf32> to vector<32x128xf32>
      %cst_77 = arith.constant dense<0.000000e+00> : vector<128x128xf32>
      %90 = tpu.matmul %87, %89, %cst_77 {dimension_numbers = #tpu.dot_dimension_numbers<[1], [0], [0], [1], [0, 0, 1, 1], [], []>} : vector<128x32xf32>, vector<32x128xf32>, vector<128x128xf32> -> vector<128x128xf32>
      %91 = arith.addf %83, %90 : vector<128x128xf32>
      %cst_78 = arith.constant 0.000000e+00 : f32
      %92 = vector.broadcast %cst_78 : f32 to vector<128x128xf32>
      %93 = arith.cmpf ogt, %91, %92 : vector<128x128xf32>
      %cst_79 = arith.constant 0.00999999977 : f32
      %94 = vector.broadcast %cst_79 : f32 to vector<128x128xf32>
      %95 = arith.mulf %94, %91 : vector<128x128xf32>
      %96 = arith.select %93, %91, %95 : vector<128x128xi1>, vector<128x128xf32>
      %97 = arith.index_cast %15 : i32 to index
      %c0_80 = arith.constant 0 : index
      %98 = vector.load %arg14[%97, %c0_80] : memref<880x128xf32, #tpu.memory_space<vmem>>, vector<128x128xf32>
      tpu.vector_store %arg14[%97, %c0_80], %96 {strides = array<i32>} : memref<880x128xf32, #tpu.memory_space<vmem>>, vector<128x128xf32>,
    }
    %c7_i32_13 = arith.constant 7 : i32
    %c0_i32_14 = arith.constant 0 : i32
    %c7_i32_15 = arith.constant 7 : i32
    %10 = arith.addi %c0_i32_14, %c7_i32_15 : i32
    %c1_i32_16 = arith.constant 1 : i32
    scf.for %arg16 = %c0_i32_14 to %10 step %c1_i32_16  : i32 {
      %c1_i32_21 = arith.constant 1 : i32
      %12 = arith.muli %arg16, %c1_i32_21 : i32
      %c0_i32_22 = arith.constant 0 : i32
      %13 = arith.addi %c0_i32_22, %12 : i32
      %c128_i32 = arith.constant 128 : i32
      %14 = arith.muli %13, %c128_i32 : i32
      %c697_i32 = arith.constant 697 : i32
      %15 = arith.minsi %14, %c697_i32 : i32
      %cst_23 = arith.constant 0.000000e+00 : f32
      %16 = vector.broadcast %cst_23 : f32 to vector<128x64xf32>
      %c0_24 = arith.constant 0 : index
      %c0_25 = arith.constant 0 : index
      %17 = vector.load %arg9[%c0_24, %c0_25] : memref<1x64xf32, #tpu.memory_space<vmem>>, vector<1x64xf32>
      %18 = vector.broadcast %17 : vector<1x64xf32> to vector<128x64xf32>
      %19 = arith.addf %16, %18 : vector<128x64xf32>
      %c0_i32_26 = arith.constant 0 : i32
      %20 = arith.addi %15, %c0_i32_26 : i32
      %c0_i32_27 = arith.constant 0 : i32
      %21 = arith.addi %20, %c0_i32_27 : i32
      %22 = arith.index_cast %21 : i32 to index
      %c0_28 = arith.constant 0 : index
      %23 = vector.load %arg14[%22, %c0_28] : memref<880x128xf32, #tpu.memory_space<vmem>>, vector<128x128xf32>
      %c0_29 = arith.constant 0 : index
      %c0_30 = arith.constant 0 : index
      %c0_31 = arith.constant 0 : index
      %24 = vector.load %arg8[%c0_29, %c0_30, %c0_31] : memref<9x128x64xf32, #tpu.memory_space<vmem>>, vector<1x128x64xf32>
      %25 = vector.shape_cast %24 : vector<1x128x64xf32> to vector<128x64xf32>
      %cst_32 = arith.constant dense<0.000000e+00> : vector<128x64xf32>
      %26 = tpu.matmul %23, %25, %cst_32 {dimension_numbers = #tpu.dot_dimension_numbers<[1], [0], [0], [1], [0, 0, 1, 1], [], []>} : vector<128x128xf32>, vector<128x64xf32>, vector<128x64xf32> -> vector<128x64xf32>
      %27 = arith.addf %19, %26 : vector<128x64xf32>
      %c0_i32_33 = arith.constant 0 : i32
      %28 = arith.addi %15, %c0_i32_33 : i32
      %c1_i32_34 = arith.constant 1 : i32
      %29 = arith.addi %28, %c1_i32_34 : i32
      %30 = arith.index_cast %29 : i32 to index
      %c0_35 = arith.constant 0 : index
      %31 = vector.load %arg14[%30, %c0_35] : memref<880x128xf32, #tpu.memory_space<vmem>>, vector<128x128xf32>
      %c1 = arith.constant 1 : index
      %c0_36 = arith.constant 0 : index
      %c0_37 = arith.constant 0 : index
      %32 = vector.load %arg8[%c1, %c0_36, %c0_37] : memref<9x128x64xf32, #tpu.memory_space<vmem>>, vector<1x128x64xf32>
      %33 = vector.shape_cast %32 : vector<1x128x64xf32> to vector<128x64xf32>
      %cst_38 = arith.constant dense<0.000000e+00> : vector<128x64xf32>
      %34 = tpu.matmul %31, %33, %cst_38 {dimension_numbers = #tpu.dot_dimension_numbers<[1], [0], [0], [1], [0, 0, 1, 1], [], []>} : vector<128x128xf32>, vector<128x64xf32>, vector<128x64xf32> -> vector<128x64xf32>
      %35 = arith.addf %27, %34 : vector<128x64xf32>
      %c0_i32_39 = arith.constant 0 : i32
      %36 = arith.addi %15, %c0_i32_39 : i32
      %c2_i32 = arith.constant 2 : i32
      %37 = arith.addi %36, %c2_i32 : i32
      %38 = arith.index_cast %37 : i32 to index
      %c0_40 = arith.constant 0 : index
      %39 = vector.load %arg14[%38, %c0_40] : memref<880x128xf32, #tpu.memory_space<vmem>>, vector<128x128xf32>
      %c2 = arith.constant 2 : index
      %c0_41 = arith.constant 0 : index
      %c0_42 = arith.constant 0 : index
      %40 = vector.load %arg8[%c2, %c0_41, %c0_42] : memref<9x128x64xf32, #tpu.memory_space<vmem>>, vector<1x128x64xf32>
      %41 = vector.shape_cast %40 : vector<1x128x64xf32> to vector<128x64xf32>
      %cst_43 = arith.constant dense<0.000000e+00> : vector<128x64xf32>
      %42 = tpu.matmul %39, %41, %cst_43 {dimension_numbers = #tpu.dot_dimension_numbers<[1], [0], [0], [1], [0, 0, 1, 1], [], []>} : vector<128x128xf32>, vector<128x64xf32>, vector<128x64xf32> -> vector<128x64xf32>
      %43 = arith.addf %35, %42 : vector<128x64xf32>
      %c25_i32 = arith.constant 25 : i32
      %44 = arith.addi %15, %c25_i32 : i32
      %c0_i32_44 = arith.constant 0 : i32
      %45 = arith.addi %44, %c0_i32_44 : i32
      %46 = arith.index_cast %45 : i32 to index
      %c0_45 = arith.constant 0 : index
      %47 = vector.load %arg14[%46, %c0_45] : memref<880x128xf32, #tpu.memory_space<vmem>>, vector<128x128xf32>
      %c3 = arith.constant 3 : index
      %c0_46 = arith.constant 0 : index
      %c0_47 = arith.constant 0 : index
      %48 = vector.load %arg8[%c3, %c0_46, %c0_47] : memref<9x128x64xf32, #tpu.memory_space<vmem>>, vector<1x128x64xf32>
      %49 = vector.shape_cast %48 : vector<1x128x64xf32> to vector<128x64xf32>
      %cst_48 = arith.constant dense<0.000000e+00> : vector<128x64xf32>
      %50 = tpu.matmul %47, %49, %cst_48 {dimension_numbers = #tpu.dot_dimension_numbers<[1], [0], [0], [1], [0, 0, 1, 1], [], []>} : vector<128x128xf32>, vector<128x64xf32>, vector<128x64xf32> -> vector<128x64xf32>
      %51 = arith.addf %43, %50 : vector<128x64xf32>
      %c25_i32_49 = arith.constant 25 : i32
      %52 = arith.addi %15, %c25_i32_49 : i32
      %c1_i32_50 = arith.constant 1 : i32
      %53 = arith.addi %52, %c1_i32_50 : i32
      %54 = arith.index_cast %53 : i32 to index
      %c0_51 = arith.constant 0 : index
      %55 = vector.load %arg14[%54, %c0_51] : memref<880x128xf32, #tpu.memory_space<vmem>>, vector<128x128xf32>
      %c4 = arith.constant 4 : index
      %c0_52 = arith.constant 0 : index
      %c0_53 = arith.constant 0 : index
      %56 = vector.load %arg8[%c4, %c0_52, %c0_53] : memref<9x128x64xf32, #tpu.memory_space<vmem>>, vector<1x128x64xf32>
      %57 = vector.shape_cast %56 : vector<1x128x64xf32> to vector<128x64xf32>
      %cst_54 = arith.constant dense<0.000000e+00> : vector<128x64xf32>
      %58 = tpu.matmul %55, %57, %cst_54 {dimension_numbers = #tpu.dot_dimension_numbers<[1], [0], [0], [1], [0, 0, 1, 1], [], []>} : vector<128x128xf32>, vector<128x64xf32>, vector<128x64xf32> -> vector<128x64xf32>
      %59 = arith.addf %51, %58 : vector<128x64xf32>
      %c25_i32_55 = arith.constant 25 : i32
      %60 = arith.addi %15, %c25_i32_55 : i32
      %c2_i32_56 = arith.constant 2 : i32
      %61 = arith.addi %60, %c2_i32_56 : i32
      %62 = arith.index_cast %61 : i32 to index
      %c0_57 = arith.constant 0 : index
      %63 = vector.load %arg14[%62, %c0_57] : memref<880x128xf32, #tpu.memory_space<vmem>>, vector<128x128xf32>
      %c5 = arith.constant 5 : index
      %c0_58 = arith.constant 0 : index
      %c0_59 = arith.constant 0 : index
      %64 = vector.load %arg8[%c5, %c0_58, %c0_59] : memref<9x128x64xf32, #tpu.memory_space<vmem>>, vector<1x128x64xf32>
      %65 = vector.shape_cast %64 : vector<1x128x64xf32> to vector<128x64xf32>
      %cst_60 = arith.constant dense<0.000000e+00> : vector<128x64xf32>
      %66 = tpu.matmul %63, %65, %cst_60 {dimension_numbers = #tpu.dot_dimension_numbers<[1], [0], [0], [1], [0, 0, 1, 1], [], []>} : vector<128x128xf32>, vector<128x64xf32>, vector<128x64xf32> -> vector<128x64xf32>
      %67 = arith.addf %59, %66 : vector<128x64xf32>
      %c50_i32 = arith.constant 50 : i32
      %68 = arith.addi %15, %c50_i32 : i32
      %c0_i32_61 = arith.constant 0 : i32
      %69 = arith.addi %68, %c0_i32_61 : i32
      %70 = arith.index_cast %69 : i32 to index
      %c0_62 = arith.constant 0 : index
      %71 = vector.load %arg14[%70, %c0_62] : memref<880x128xf32, #tpu.memory_space<vmem>>, vector<128x128xf32>
      %c6 = arith.constant 6 : index
      %c0_63 = arith.constant 0 : index
      %c0_64 = arith.constant 0 : index
      %72 = vector.load %arg8[%c6, %c0_63, %c0_64] : memref<9x128x64xf32, #tpu.memory_space<vmem>>, vector<1x128x64xf32>
      %73 = vector.shape_cast %72 : vector<1x128x64xf32> to vector<128x64xf32>
      %cst_65 = arith.constant dense<0.000000e+00> : vector<128x64xf32>
      %74 = tpu.matmul %71, %73, %cst_65 {dimension_numbers = #tpu.dot_dimension_numbers<[1], [0], [0], [1], [0, 0, 1, 1], [], []>} : vector<128x128xf32>, vector<128x64xf32>, vector<128x64xf32> -> vector<128x64xf32>
      %75 = arith.addf %67, %74 : vector<128x64xf32>
      %c50_i32_66 = arith.constant 50 : i32
      %76 = arith.addi %15, %c50_i32_66 : i32
      %c1_i32_67 = arith.constant 1 : i32
      %77 = arith.addi %76, %c1_i32_67 : i32
      %78 = arith.index_cast %77 : i32 to index
      %c0_68 = arith.constant 0 : index
      %79 = vector.load %arg14[%78, %c0_68] : memref<880x128xf32, #tpu.memory_space<vmem>>, vector<128x128xf32>
      %c7 = arith.constant 7 : index
      %c0_69 = arith.constant 0 : index
      %c0_70 = arith.constant 0 : index
      %80 = vector.load %arg8[%c7, %c0_69, %c0_70] : memref<9x128x64xf32, #tpu.memory_space<vmem>>, vector<1x128x64xf32>
      %81 = vector.shape_cast %80 : vector<1x128x64xf32> to vector<128x64xf32>
      %cst_71 = arith.constant dense<0.000000e+00> : vector<128x64xf32>
      %82 = tpu.matmul %79, %81, %cst_71 {dimension_numbers = #tpu.dot_dimension_numbers<[1], [0], [0], [1], [0, 0, 1, 1], [], []>} : vector<128x128xf32>, vector<128x64xf32>, vector<128x64xf32> -> vector<128x64xf32>
      %83 = arith.addf %75, %82 : vector<128x64xf32>
      %c50_i32_72 = arith.constant 50 : i32
      %84 = arith.addi %15, %c50_i32_72 : i32
      %c2_i32_73 = arith.constant 2 : i32
      %85 = arith.addi %84, %c2_i32_73 : i32
      %86 = arith.index_cast %85 : i32 to index
      %c0_74 = arith.constant 0 : index
      %87 = vector.load %arg14[%86, %c0_74] : memref<880x128xf32, #tpu.memory_space<vmem>>, vector<128x128xf32>
      %c8 = arith.constant 8 : index
      %c0_75 = arith.constant 0 : index
      %c0_76 = arith.constant 0 : index
      %88 = vector.load %arg8[%c8, %c0_75, %c0_76] : memref<9x128x64xf32, #tpu.memory_space<vmem>>, vector<1x128x64xf32>
      %89 = vector.shape_cast %88 : vector<1x128x64xf32> to vector<128x64xf32>
      %cst_77 = arith.constant dense<0.000000e+00> : vector<128x64xf32>
      %90 = tpu.matmul %87, %89, %cst_77 {dimension_numbers = #tpu.dot_dimension_numbers<[1], [0], [0], [1], [0, 0, 1, 1], [], []>} : vector<128x128xf32>, vector<128x64xf32>, vector<128x64xf32> -> vector<128x64xf32>
      %91 = arith.addf %83, %90 : vector<128x64xf32>
      %cst_78 = arith.constant 0.000000e+00 : f32
      %92 = vector.broadcast %cst_78 : f32 to vector<128x64xf32>
      %93 = arith.cmpf ogt, %91, %92 : vector<128x64xf32>
      %cst_79 = arith.constant 0.00999999977 : f32
      %94 = vector.broadcast %cst_79 : f32 to vector<128x64xf32>
      %95 = arith.mulf %94, %91 : vector<128x64xf32>
      %96 = arith.select %93, %91, %95 : vector<128x64xi1>, vector<128x64xf32>
      %97 = arith.index_cast %15 : i32 to index
      %c0_80 = arith.constant 0 : index
      %98 = vector.load %arg15[%97, %c0_80] : memref<832x64xf32, #tpu.memory_space<vmem>>, vector<128x64xf32>
      tpu.vector_store %arg15[%97, %c0_80], %96 {strides = array<i32>} : memref<832x64xf32, #tpu.memory_space<vmem>>, vector<128x64xf32>,
    }
    %c7_i32_17 = arith.constant 7 : i32
    %c0_i32_18 = arith.constant 0 : i32
    %c11_i32 = arith.constant 11 : i32
    %11 = arith.addi %c0_i32_18, %c11_i32 : i32
    %c1_i32_19 = arith.constant 1 : i32
    scf.for %arg16 = %c0_i32_18 to %11 step %c1_i32_19  : i32 {
      %c1_i32_21 = arith.constant 1 : i32
      %12 = arith.muli %arg16, %c1_i32_21 : i32
      %c0_i32_22 = arith.constant 0 : i32
      %13 = arith.addi %c0_i32_22, %12 : i32
      %c75_i32 = arith.constant 75 : i32
      %14 = arith.muli %c75_i32, %13 : i32
      %15 = arith.index_cast %14 : i32 to index
      %c0_23 = arith.constant 0 : index
      %16 = tpu.strided_load %arg15[%15, %c0_23] {strides = array<i32: 3, 1>} : memref<832x64xf32, #tpu.memory_space<vmem>>, vector<7x64xf32>
      %c0_i32_24 = arith.constant 0 : i32
      %17 = arith.addi %14, %c0_i32_24 : i32
      %c1_i32_25 = arith.constant 1 : i32
      %18 = arith.addi %17, %c1_i32_25 : i32
      %19 = arith.index_cast %18 : i32 to index
      %c0_26 = arith.constant 0 : index
      %20 = tpu.strided_load %arg15[%19, %c0_26] {strides = array<i32: 3, 1>} : memref<832x64xf32, #tpu.memory_space<vmem>>, vector<7x64xf32>
      %21 = arith.maximumf %16, %20 : vector<7x64xf32>
      %c0_i32_27 = arith.constant 0 : i32
      %22 = arith.addi %14, %c0_i32_27 : i32
      %c2_i32 = arith.constant 2 : i32
      %23 = arith.addi %22, %c2_i32 : i32
      %24 = arith.index_cast %23 : i32 to index
      %c0_28 = arith.constant 0 : index
      %25 = tpu.strided_load %arg15[%24, %c0_28] {strides = array<i32: 3, 1>} : memref<832x64xf32, #tpu.memory_space<vmem>>, vector<7x64xf32>
      %26 = arith.maximumf %21, %25 : vector<7x64xf32>
      %c25_i32 = arith.constant 25 : i32
      %27 = arith.addi %14, %c25_i32 : i32
      %c0_i32_29 = arith.constant 0 : i32
      %28 = arith.addi %27, %c0_i32_29 : i32
      %29 = arith.index_cast %28 : i32 to index
      %c0_30 = arith.constant 0 : index
      %30 = tpu.strided_load %arg15[%29, %c0_30] {strides = array<i32: 3, 1>} : memref<832x64xf32, #tpu.memory_space<vmem>>, vector<7x64xf32>
      %31 = arith.maximumf %26, %30 : vector<7x64xf32>
      %c25_i32_31 = arith.constant 25 : i32
      %32 = arith.addi %14, %c25_i32_31 : i32
      %c1_i32_32 = arith.constant 1 : i32
      %33 = arith.addi %32, %c1_i32_32 : i32
      %34 = arith.index_cast %33 : i32 to index
      %c0_33 = arith.constant 0 : index
      %35 = tpu.strided_load %arg15[%34, %c0_33] {strides = array<i32: 3, 1>} : memref<832x64xf32, #tpu.memory_space<vmem>>, vector<7x64xf32>
      %36 = arith.maximumf %31, %35 : vector<7x64xf32>
      %c25_i32_34 = arith.constant 25 : i32
      %37 = arith.addi %14, %c25_i32_34 : i32
      %c2_i32_35 = arith.constant 2 : i32
      %38 = arith.addi %37, %c2_i32_35 : i32
      %39 = arith.index_cast %38 : i32 to index
      %c0_36 = arith.constant 0 : index
      %40 = tpu.strided_load %arg15[%39, %c0_36] {strides = array<i32: 3, 1>} : memref<832x64xf32, #tpu.memory_space<vmem>>, vector<7x64xf32>
      %41 = arith.maximumf %36, %40 : vector<7x64xf32>
      %c50_i32 = arith.constant 50 : i32
      %42 = arith.addi %14, %c50_i32 : i32
      %c0_i32_37 = arith.constant 0 : i32
      %43 = arith.addi %42, %c0_i32_37 : i32
      %44 = arith.index_cast %43 : i32 to index
      %c0_38 = arith.constant 0 : index
      %45 = tpu.strided_load %arg15[%44, %c0_38] {strides = array<i32: 3, 1>} : memref<832x64xf32, #tpu.memory_space<vmem>>, vector<7x64xf32>
      %46 = arith.maximumf %41, %45 : vector<7x64xf32>
      %c50_i32_39 = arith.constant 50 : i32
      %47 = arith.addi %14, %c50_i32_39 : i32
      %c1_i32_40 = arith.constant 1 : i32
      %48 = arith.addi %47, %c1_i32_40 : i32
      %49 = arith.index_cast %48 : i32 to index
      %c0_41 = arith.constant 0 : index
      %50 = tpu.strided_load %arg15[%49, %c0_41] {strides = array<i32: 3, 1>} : memref<832x64xf32, #tpu.memory_space<vmem>>, vector<7x64xf32>
      %51 = arith.maximumf %46, %50 : vector<7x64xf32>
      %c50_i32_42 = arith.constant 50 : i32
      %52 = arith.addi %14, %c50_i32_42 : i32
      %c2_i32_43 = arith.constant 2 : i32
      %53 = arith.addi %52, %c2_i32_43 : i32
      %54 = arith.index_cast %53 : i32 to index
      %c0_44 = arith.constant 0 : index
      %55 = tpu.strided_load %arg15[%54, %c0_44] {strides = array<i32: 3, 1>} : memref<832x64xf32, #tpu.memory_space<vmem>>, vector<7x64xf32>
      %56 = arith.maximumf %51, %55 : vector<7x64xf32>
      %c7_i32_45 = arith.constant 7 : i32
      %57 = arith.muli %c7_i32_45, %13 : i32
      %c0_46 = arith.constant 0 : index
      %58 = arith.index_cast %57 : i32 to index
      %c0_47 = arith.constant 0 : index
      %59 = vector.load %arg10[%c0_46, %58, %c0_47] : memref<1x77x64xf32, #tpu.memory_space<vmem>>, vector<1x7x64xf32>
      %60 = vector.shape_cast %59 : vector<1x7x64xf32> to vector<7x64xf32>
      %61 = vector.shape_cast %56 : vector<7x64xf32> to vector<1x7x64xf32>
      tpu.vector_store %arg10[%c0_46, %58, %c0_47], %61 {strides = array<i32>} : memref<1x77x64xf32, #tpu.memory_space<vmem>>, vector<1x7x64xf32>,
    }
    %c11_i32_20 = arith.constant 11 : i32
    return
  }
  func.func @transform_0(%arg0: i32) -> (i32, i32, i32) {
    %c0_i32 = arith.constant 0 : i32
    %c0_i32_0 = arith.constant 0 : i32
    %c0_i32_1 = arith.constant 0 : i32
    return %arg0, %c0_i32, %c0_i32_0 : i32, i32, i32
  }
  func.func @transform_1(%arg0: i32) -> (i32, i32, i32) {
    %c0_i32 = arith.constant 0 : i32
    %c0_i32_0 = arith.constant 0 : i32
    %c0_i32_1 = arith.constant 0 : i32
    %c0_i32_2 = arith.constant 0 : i32
    return %c0_i32, %c0_i32_0, %c0_i32_1 : i32, i32, i32
  }
  func.func @transform_2(%arg0: i32) -> (i32, i32) {
    %c0_i32 = arith.constant 0 : i32
    %c0_i32_0 = arith.constant 0 : i32
    %c0_i32_1 = arith.constant 0 : i32
    return %c0_i32, %c0_i32_0 : i32, i32
  }
  func.func @transform_3(%arg0: i32) -> (i32, i32, i32) {
    %c0_i32 = arith.constant 0 : i32
    %c0_i32_0 = arith.constant 0 : i32
    %c0_i32_1 = arith.constant 0 : i32
    %c0_i32_2 = arith.constant 0 : i32
    return %c0_i32, %c0_i32_0, %c0_i32_1 : i32, i32, i32
  }
  func.func @transform_4(%arg0: i32) -> (i32, i32) {
    %c0_i32 = arith.constant 0 : i32
    %c0_i32_0 = arith.constant 0 : i32
    %c0_i32_1 = arith.constant 0 : i32
    return %c0_i32, %c0_i32_0 : i32, i32
  }
  func.func @transform_5(%arg0: i32) -> (i32, i32, i32) {
    %c0_i32 = arith.constant 0 : i32
    %c0_i32_0 = arith.constant 0 : i32
    %c0_i32_1 = arith.constant 0 : i32
    %c0_i32_2 = arith.constant 0 : i32
    return %c0_i32, %c0_i32_0, %c0_i32_1 : i32, i32, i32
  }
  func.func @transform_6(%arg0: i32) -> (i32, i32) {
    %c0_i32 = arith.constant 0 : i32
    %c0_i32_0 = arith.constant 0 : i32
    %c0_i32_1 = arith.constant 0 : i32
    return %c0_i32, %c0_i32_0 : i32, i32
  }
  func.func @transform_7(%arg0: i32) -> (i32, i32, i32) {
    %c0_i32 = arith.constant 0 : i32
    %c0_i32_0 = arith.constant 0 : i32
    %c0_i32_1 = arith.constant 0 : i32
    %c0_i32_2 = arith.constant 0 : i32
    return %c0_i32, %c0_i32_0, %c0_i32_1 : i32, i32, i32
  }
  func.func @transform_8(%arg0: i32) -> (i32, i32) {
    %c0_i32 = arith.constant 0 : i32
    %c0_i32_0 = arith.constant 0 : i32
    %c0_i32_1 = arith.constant 0 : i32
    return %c0_i32, %c0_i32_0 : i32, i32
  }
  func.func @transform_9(%arg0: i32) -> (i32, i32, i32) {
    %c0_i32 = arith.constant 0 : i32
    %c0_i32_0 = arith.constant 0 : i32
    %c0_i32_1 = arith.constant 0 : i32
    return %arg0, %c0_i32, %c0_i32_0 : i32, i32, i32
  }
}

module attributes {stable_mosaic.version = 11 : i64} {
  func.func @_fc_head_kernel(%arg0: i32, %arg1: memref<2x256xf32, #tpu.memory_space<vmem>>, %arg2: memref<256x256xf32, #tpu.memory_space<vmem>>, %arg3: memref<1x256xf32, #tpu.memory_space<vmem>>, %arg4: memref<256x64xf32, #tpu.memory_space<vmem>>, %arg5: memref<1x64xf32, #tpu.memory_space<vmem>>, %arg6: memref<1x64xf32, #tpu.memory_space<vmem>>, %arg7: memref<1x1xf32, #tpu.memory_space<vmem>>, %arg8: memref<2x1xf32, #tpu.memory_space<vmem>>, %arg9: memref<2x256xf32, #tpu.memory_space<vmem>>) attributes {dimension_semantics = [#tpu.dimension_semantics<arbitrary>], iteration_bounds = array<i64: 20>, scalar_prefetch = 0 : i64, scratch_operands = 1 : i64, tpu.core_type = #tpu.core_type<tc>, window_params = [{transform_indices = @transform_0, window_bounds = array<i64: 2, 256>}, {transform_indices = @transform_1, window_bounds = array<i64: 256, 256>}, {pipeline_mode = #tpu.pipeline_mode<synchronous>, transform_indices = @transform_2, window_bounds = array<i64: 1, 256>}, {pipeline_mode = #tpu.pipeline_mode<synchronous>, transform_indices = @transform_3, window_bounds = array<i64: 256, 64>}, {pipeline_mode = #tpu.pipeline_mode<synchronous>, transform_indices = @transform_4, window_bounds = array<i64: 1, 64>}, {pipeline_mode = #tpu.pipeline_mode<synchronous>, transform_indices = @transform_5, window_bounds = array<i64: 1, 64>}, {pipeline_mode = #tpu.pipeline_mode<synchronous>, transform_indices = @transform_6, window_bounds = array<i64: 1, 1>}, {pipeline_mode = #tpu.pipeline_mode<synchronous>, transform_indices = @transform_7, window_bounds = array<i64: 2, 1>}]} {
    %c0_i32 = arith.constant 0 : i32
    %0 = arith.cmpi eq, %arg0, %c0_i32 : i32
    %1 = arith.extui %0 : i1 to i32
    %c0_i32_0 = arith.constant 0 : i32
    %2 = arith.cmpi ne, %1, %c0_i32_0 : i32
    scf.if %2 {
      %cst_9 = arith.constant 0.000000e+00 : f32
      %12 = vector.broadcast %cst_9 : f32 to vector<2x256xf32>
      %c0_10 = arith.constant 0 : index
      %c0_11 = arith.constant 0 : index
      %13 = vector.load %arg9[%c0_10, %c0_11] : memref<2x256xf32, #tpu.memory_space<vmem>>, vector<2x256xf32>
      tpu.vector_store %arg9[%c0_10, %c0_11], %12 {strides = array<i32>} : memref<2x256xf32, #tpu.memory_space<vmem>>, vector<2x256xf32>,
    } else {
    }
    %c0 = arith.constant 0 : index
    %c0_1 = arith.constant 0 : index
    %3 = vector.load %arg9[%c0, %c0_1] : memref<2x256xf32, #tpu.memory_space<vmem>>, vector<2x256xf32>
    %c0_2 = arith.constant 0 : index
    %c0_3 = arith.constant 0 : index
    %4 = vector.load %arg1[%c0_2, %c0_3] : memref<2x256xf32, #tpu.memory_space<vmem>>, vector<2x256xf32>
    %c0_4 = arith.constant 0 : index
    %c0_5 = arith.constant 0 : index
    %5 = vector.load %arg2[%c0_4, %c0_5] : memref<256x256xf32, #tpu.memory_space<vmem>>, vector<256x256xf32>
    %cst = arith.constant dense<0.000000e+00> : vector<2x256xf32>
    %6 = tpu.matmul %4, %5, %cst {dimension_numbers = #tpu.dot_dimension_numbers<[1], [0], [0], [1], [0, 0, 1, 1], [], []>} : vector<2x256xf32>, vector<256x256xf32>, vector<2x256xf32> -> vector<2x256xf32>
    %7 = arith.addf %3, %6 : vector<2x256xf32>
    %c0_6 = arith.constant 0 : index
    %c0_7 = arith.constant 0 : index
    %8 = vector.load %arg9[%c0_6, %c0_7] : memref<2x256xf32, #tpu.memory_space<vmem>>, vector<2x256xf32>
    tpu.vector_store %arg9[%c0_6, %c0_7], %7 {strides = array<i32>} : memref<2x256xf32, #tpu.memory_space<vmem>>, vector<2x256xf32>,
    %c19_i32 = arith.constant 19 : i32
    %9 = arith.cmpi eq, %arg0, %c19_i32 : i32
    %10 = arith.extui %9 : i1 to i32
    %c0_i32_8 = arith.constant 0 : i32
    %11 = arith.cmpi ne, %10, %c0_i32_8 : i32
    scf.if %11 {
      %c0_9 = arith.constant 0 : index
      %c0_10 = arith.constant 0 : index
      %12 = vector.load %arg9[%c0_9, %c0_10] : memref<2x256xf32, #tpu.memory_space<vmem>>, vector<2x256xf32>
      %c0_11 = arith.constant 0 : index
      %c0_12 = arith.constant 0 : index
      %13 = vector.load %arg3[%c0_11, %c0_12] : memref<1x256xf32, #tpu.memory_space<vmem>>, vector<1x256xf32>
      %14 = vector.broadcast %13 : vector<1x256xf32> to vector<2x256xf32>
      %15 = arith.addf %12, %14 : vector<2x256xf32>
      %cst_13 = arith.constant 0.000000e+00 : f32
      %16 = vector.broadcast %cst_13 : f32 to vector<2x256xf32>
      %17 = arith.cmpf ogt, %15, %16 : vector<2x256xf32>
      %cst_14 = arith.constant 0.00999999977 : f32
      %18 = vector.broadcast %cst_14 : f32 to vector<2x256xf32>
      %19 = arith.mulf %18, %15 : vector<2x256xf32>
      %20 = arith.select %17, %15, %19 : vector<2x256xi1>, vector<2x256xf32>
      %c0_15 = arith.constant 0 : index
      %c0_16 = arith.constant 0 : index
      %21 = vector.load %arg4[%c0_15, %c0_16] : memref<256x64xf32, #tpu.memory_space<vmem>>, vector<256x64xf32>
      %cst_17 = arith.constant dense<0.000000e+00> : vector<2x64xf32>
      %22 = tpu.matmul %20, %21, %cst_17 {dimension_numbers = #tpu.dot_dimension_numbers<[1], [0], [0], [1], [0, 0, 1, 1], [], []>} : vector<2x256xf32>, vector<256x64xf32>, vector<2x64xf32> -> vector<2x64xf32>
      %c0_18 = arith.constant 0 : index
      %c0_19 = arith.constant 0 : index
      %23 = vector.load %arg5[%c0_18, %c0_19] : memref<1x64xf32, #tpu.memory_space<vmem>>, vector<1x64xf32>
      %24 = vector.broadcast %23 : vector<1x64xf32> to vector<2x64xf32>
      %25 = arith.addf %22, %24 : vector<2x64xf32>
      %cst_20 = arith.constant 0.000000e+00 : f32
      %26 = vector.broadcast %cst_20 : f32 to vector<2x64xf32>
      %27 = arith.cmpf ogt, %25, %26 : vector<2x64xf32>
      %cst_21 = arith.constant 0.00999999977 : f32
      %28 = vector.broadcast %cst_21 : f32 to vector<2x64xf32>
      %29 = arith.mulf %28, %25 : vector<2x64xf32>
      %30 = arith.select %27, %25, %29 : vector<2x64xi1>, vector<2x64xf32>
      %c0_22 = arith.constant 0 : index
      %c0_23 = arith.constant 0 : index
      %31 = vector.load %arg6[%c0_22, %c0_23] : memref<1x64xf32, #tpu.memory_space<vmem>>, vector<1x64xf32>
      %32 = vector.broadcast %31 : vector<1x64xf32> to vector<2x64xf32>
      %33 = arith.mulf %30, %32 : vector<2x64xf32>
      %cst_24 = arith.constant dense<0.000000e+00> : vector<2xf32>
      %34 = vector.multi_reduction <add>, %33, %cst_24 [1] : vector<2x64xf32> to vector<2xf32>
      %35 = vector.shape_cast %34 : vector<2xf32> to vector<2x1xf32>
      %c0_25 = arith.constant 0 : index
      %c0_26 = arith.constant 0 : index
      %36 = vector.load %arg7[%c0_25, %c0_26] : memref<1x1xf32, #tpu.memory_space<vmem>>, vector<1x1xf32>
      %37 = vector.broadcast %36 : vector<1x1xf32> to vector<2x1xf32>
      %38 = arith.addf %35, %37 : vector<2x1xf32>
      %cst_27 = arith.constant 0.000000e+00 : f32
      %39 = vector.broadcast %cst_27 : f32 to vector<2x1xf32>
      %40 = arith.subf %39, %38 : vector<2x1xf32>
      %41 = math.exp %40 : vector<2x1xf32>
      %cst_28 = arith.constant 1.000000e+00 : f32
      %42 = vector.broadcast %cst_28 : f32 to vector<2x1xf32>
      %43 = arith.addf %42, %41 : vector<2x1xf32>
      %cst_29 = arith.constant 1.000000e+00 : f32
      %44 = vector.broadcast %cst_29 : f32 to vector<2x1xf32>
      %45 = arith.divf %44, %43 : vector<2x1xf32>
      %c0_30 = arith.constant 0 : index
      %c0_31 = arith.constant 0 : index
      %46 = vector.load %arg8[%c0_30, %c0_31] : memref<2x1xf32, #tpu.memory_space<vmem>>, vector<2x1xf32>
      tpu.vector_store %arg8[%c0_30, %c0_31], %45 {strides = array<i32>} : memref<2x1xf32, #tpu.memory_space<vmem>>, vector<2x1xf32>,
    } else {
    }
    return
  }
  func.func @transform_0(%arg0: i32) -> (i32, i32) {
    %c0_i32 = arith.constant 0 : i32
    %c0_i32_0 = arith.constant 0 : i32
    return %c0_i32, %arg0 : i32, i32
  }
  func.func @transform_1(%arg0: i32) -> (i32, i32) {
    %c0_i32 = arith.constant 0 : i32
    %c0_i32_0 = arith.constant 0 : i32
    return %arg0, %c0_i32 : i32, i32
  }
  func.func @transform_2(%arg0: i32) -> (i32, i32) {
    %c0_i32 = arith.constant 0 : i32
    %c0_i32_0 = arith.constant 0 : i32
    %c0_i32_1 = arith.constant 0 : i32
    return %c0_i32, %c0_i32_0 : i32, i32
  }
  func.func @transform_3(%arg0: i32) -> (i32, i32) {
    %c0_i32 = arith.constant 0 : i32
    %c0_i32_0 = arith.constant 0 : i32
    %c0_i32_1 = arith.constant 0 : i32
    return %c0_i32, %c0_i32_0 : i32, i32
  }
  func.func @transform_4(%arg0: i32) -> (i32, i32) {
    %c0_i32 = arith.constant 0 : i32
    %c0_i32_0 = arith.constant 0 : i32
    %c0_i32_1 = arith.constant 0 : i32
    return %c0_i32, %c0_i32_0 : i32, i32
  }
  func.func @transform_5(%arg0: i32) -> (i32, i32) {
    %c0_i32 = arith.constant 0 : i32
    %c0_i32_0 = arith.constant 0 : i32
    %c0_i32_1 = arith.constant 0 : i32
    return %c0_i32, %c0_i32_0 : i32, i32
  }
  func.func @transform_6(%arg0: i32) -> (i32, i32) {
    %c0_i32 = arith.constant 0 : i32
    %c0_i32_0 = arith.constant 0 : i32
    %c0_i32_1 = arith.constant 0 : i32
    return %c0_i32, %c0_i32_0 : i32, i32
  }
  func.func @transform_7(%arg0: i32) -> (i32, i32) {
    %c0_i32 = arith.constant 0 : i32
    %c0_i32_0 = arith.constant 0 : i32
    %c0_i32_1 = arith.constant 0 : i32
    return %c0_i32, %c0_i32_0 : i32, i32
  }
}

</mosaic_0001>

<bundles_post_ra>
// kernel: cnn_forward_pallas.3
= control target key start
LH: loop header
LB: loop body
LE: loop exit
PB: predicated region body
PF: predicated region fallthrough
CT: control target
= control target key end

     0   :  { %s894_s26 = smov 0   ;;  %s1104_s0 = inlined_call_operand.vmem [shape: f32[2,5120], index: 0, kind: input, shape index: {}]   ;;  %s1105_s1 = inlined_call_operand.vmem [shape: f32[5120,256], index: 1, kind: input, shape index: {}]   ;;  %s1106_s2 = inlined_call_operand.vmem [shape: f32[1,256], index: 2, kind: input, shape index: {}]   ;;  %s1107_s3 = inlined_call_operand.vmem [shape: f32[256,64], index: 3, kind: input, shape index: {}]   ;;  %s1108_s4 = inlined_call_operand.vmem [shape: f32[1,64], index: 4, kind: input, shape index: {}]   ;;  %s1109_s5 = inlined_call_operand.vmem [shape: f32[1,64], index: 5, kind: input, shape index: {}]   ;;  %s1110_s6 = inlined_call_operand.<no memory space> [shape: f32[1,1], index: 6, kind: input, shape index: {}]   ;;  %s1111_s7 = inlined_call_operand.vmem [shape: f32[2,1], index: 7, kind: output, shape index: {}]  }
   0x1   :  { %v12_v0 = vstv %s1110_s6 }
   0x2   :  { %13 = vst [vmem:[#allocation3] sm:$0x1] %v12_v0 }
   0x3 LB: > { %s900_s27 = sadd.s32 4294967295, %s847_s26   ;;  %p681_p0 = scmp.ge.s32.totalorder %s847_s26, 1  ;;  %s847_s26 = sphi %s894_s26, %s19_s26  }
   0x4   : > { %p247_p1 = scmp.lt.s32.totalorder %s847_s26, 21 }
   0x6   : > { %p248_p2 = pnand %p681_p0, %p247_p1 }
   0x7   : > { %s682_s6 = sshll.u32 (!%p248_p2), %s900_s27, 1  ;;  %s684_s28 = sshll.u32 (!%p248_p2), %s900_s27, 5 }
   0x8   : > { %251 = sbr.rel (%p248_p2) target bundleno = 725 (0x2d5), region = 48  ;;  %p281_p3 = scmp.lt.s32.totalorder (!%p248_p2), %s682_s6, 39 }
   0x9   : > { %p287_p4 = scmp.lt.s32.totalorder (!%p248_p2), %s684_s28, 639  ;;  %p687_p5 = scmp.ne.s32.totalorder (!%p248_p2), %s900_s27, 0 }
   0xf   : > { %s1113_s6 = smov (!%p281_p3, %s682_s6), 39  ;;  %s1115_s28 = smov (!%p287_p4, %s684_s28), 639 }
  0x10   : > { %s683_s29 = sshll.u32 %s1113_s6, 1  ;;  %s695_s10 = sshll.u32 %s1115_s28, 4  ;;  %v849_v1 = vmov (!%p687_p5), 0.0  }
  0x11   : > { %s909_s9 = scalar_lea.vmem %s1104_s0, %s683_s29  ;;  %s914_s13 = scalar_lea.vmem %s1105_s1, %s695_s10  ;;  %297 = vst [vmem:[#allocation2] sm:$0xf] (!%p687_p5), %v849_v1 }
  0x12   : > { %296 = sbr.rel (%p687_p5) target bundleno = 25 (0x19), region = 52 }
  0x19 PF: > { %v301_v2 = vld [vmem:[%s914_s13 + $0x8] sm:$0xff]  ;;  %v303_v3 = vld [vmem:[%s914_s13 + $0x18] sm:$0xff]  ;;  %v300_v4 = vld [vmem:[%s914_s13] sm:$0xff]  ;;  %p689_p6 = scmp.ne.s32.totalorder %s900_s27, 19 }
  0x1a   : > { %v731_v5 = vpack.c.bf16 %v303_v3, %v301_v2  ;;  %v302_v6 = vld [vmem:[%s914_s13 + $0x10] sm:$0xff]  ;;  %v305_v7 = vld [vmem:[%s914_s13 + $0x28] sm:$0xff]  ;;  %v307_v8 = vld [vmem:[%s914_s13 + $0x38] sm:$0xff]  ;;  %vm618_vm2 = vcmask (!%p689_p6), 517120   ;;  %vm636_vm3 = vcmask (!%p689_p6), 1024  }
  0x1b   : > { %v733_v9 = vpack.c.bf16 %v302_v6, %v300_v4  ;;  %v735_v10 = vpack.c.bf16 %v307_v8, %v305_v7  ;;  %v304_v11 = vld [vmem:[%s914_s13 + $0x20] sm:$0xff]  ;;  %v306_v12 = vld [vmem:[%s914_s13 + $0x30] sm:$0xff]  ;;  %v309_v13 = vld [vmem:[%s914_s13 + $0x48] sm:$0xff] }
  0x1c   : > { %732 = vmatprep.subr.bf16.mxu0 %v731_v5  ;;  %v311_v14 = vld [vmem:[%s914_s13 + $0x58] sm:$0xff]  ;;  %v737_v15 = vpack.c.bf16 %v306_v12, %v304_v11  ;;  %v308_v17 = vld [vmem:[%s914_s13 + $0x40] sm:$0xff]  ;;  %v310_v18 = vld [vmem:[%s914_s13 + $0x50] sm:$0xff] }
  0x1d   : > { %734 = vmatpush1.bf16.msra.mxu0 %v733_v9  ;;  %v739_v16 = vpack.c.bf16 %v311_v14, %v309_v13  ;;  %v313_v19 = vld [vmem:[%s914_s13 + $0x68] sm:$0xff]  ;;  %v315_v20 = vld [vmem:[%s914_s13 + $0x78] sm:$0xff]  ;;  %v741_v21 = vpack.c.bf16 %v310_v18, %v308_v17  ;;  %v312_v23 = vld [vmem:[%s914_s13 + $0x60] sm:$0xff] }
  0x1e   : > { %736 = vmatprep.subr.bf16.mxu0 %v735_v10  ;;  %v743_v22 = vpack.c.bf16 %v315_v20, %v313_v19  ;;  %v314_v24 = vld [vmem:[%s914_s13 + $0x70] sm:$0xff]  ;;  %v317_v25 = vld [vmem:[%s914_s13 + $0x88] sm:$0xff]  ;;  %v319_v26 = vld [vmem:[%s914_s13 + $0x98] sm:$0xff] }
  0x1f   : > { %v745_v27 = vpack.c.bf16 %v314_v24, %v312_v23  ;;  %v747_v28 = vpack.c.bf16 %v319_v26, %v317_v25  ;;  %v316_v29 = vld [vmem:[%s914_s13 + $0x80] sm:$0xff]  ;;  %v318_v30 = vld [vmem:[%s914_s13 + $0x90] sm:$0xff]  ;;  %v321_v31 = vld [vmem:[%s914_s13 + $0xa8] sm:$0xff] }
  0x20   : > { %v323_v32 = vld [vmem:[%s914_s13 + $0xb8] sm:$0xff]  ;;  %v749_v33 = vpack.c.bf16 %v318_v30, %v316_v29  ;;  %v320_v35 = vld [vmem:[%s914_s13 + $0xa0] sm:$0xff]  ;;  %v322_v36 = vld [vmem:[%s914_s13 + $0xb0] sm:$0xff] }
  0x21   : > { %738 = vmatpush1.bf16.msra.mxu0 %v737_v15  ;;  %v751_v34 = vpack.c.bf16 %v323_v32, %v321_v31  ;;  %v325_v37 = vld [vmem:[%s914_s13 + $0xc8] sm:$0xff]  ;;  %v327_v38 = vld [vmem:[%s914_s13 + $0xd8] sm:$0xff]  ;;  %v753_v39 = vpack.c.bf16 %v322_v36, %v320_v35  ;;  %v324_v41 = vld [vmem:[%s914_s13 + $0xc0] sm:$0xff]  ;;  %v850_v36 = vmov 1983009808  }
  0x22   : > { %740 = vmatprep.subr.bf16.mxu0 %v739_v16  ;;  %v755_v40 = vpack.c.bf16 %v327_v38, %v325_v37  ;;  %v326_v42 = vld [vmem:[%s914_s13 + $0xd0] sm:$0xff]  ;;  %v946_v43 = vld.sshfl [vmem:[%s909_s9] sm:$0x33 pattern:$0x76325410]  ;;  %v329_v44 = vld [vmem:[%s914_s13 + $0xe8] sm:$0xff]  ;;  %v450_v37 = vunpack.c.l.s4 %v850_v36  ;;  %v452_v38 = vlaneseq }
  0x23   : > { %v331_v45 = vld [vmem:[%s914_s13 + $0xf8] sm:$0xff]  ;;  %v372_v46 = vcombine.high %v946_v43, %v946_v43  ;;  %v757_v47 = vpack.c.bf16 %v326_v42, %v324_v41  ;;  %v328_v49 = vld [vmem:[%s914_s13 + $0xe0] sm:$0xff]  ;;  %v330_v50 = vld [vmem:[%s914_s13 + $0xf0] sm:$0xff] }
  0x24   : > { %v759_v48 = vpack.c.bf16 %v331_v45, %v329_v44  ;;  %v333_v51 = vld [vmem:[%s914_s13 + $0x108] sm:$0xff]  ;;  %v335_v52 = vld [vmem:[%s914_s13 + $0x118] sm:$0xff]  ;;  %v761_v53 = vpack.c.bf16 %v330_v50, %v328_v49  ;;  %v332_v55 = vld [vmem:[%s914_s13 + $0x100] sm:$0xff] }
  0x25   : > { %742 = vmatpush1.bf16.msra.mxu0 %v741_v21  ;;  %439 = vmatprep.mubr.f32.mxu0 %v372_v46  ;;  %v763_v54 = vpack.c.bf16 %v335_v52, %v333_v51  ;;  %v334_v56 = vld [vmem:[%s914_s13 + $0x110] sm:$0xff]  ;;  %v337_v57 = vld [vmem:[%s914_s13 + $0x128] sm:$0xff]  ;;  %v339_v58 = vld [vmem:[%s914_s13 + $0x138] sm:$0xff] }
  0x26   : > { %744 = vmatprep.subr.bf16.mxu0 %v743_v22  ;;  %v765_v59 = vpack.c.bf16 %v334_v56, %v332_v55  ;;  %v767_v60 = vpack.c.bf16 %v339_v58, %v337_v57  ;;  %v336_v61 = vld [vmem:[%s914_s13 + $0x120] sm:$0xff]  ;;  %v338_v62 = vld [vmem:[%s914_s13 + $0x130] sm:$0xff]  ;;  %v341_v63 = vld [vmem:[%s914_s13 + $0x148] sm:$0xff] }
  0x27   : > { %v343_v0 = vld [vmem:[%s914_s13 + $0x158] sm:$0xff]  ;;  %v769_v1 = vpack.c.bf16 %v338_v62, %v336_v61  ;;  %v340_v3 = vld [vmem:[%s914_s13 + $0x140] sm:$0xff]  ;;  %v342_v4 = vld [vmem:[%s914_s13 + $0x150] sm:$0xff] }
  0x28   : > { %v771_v2 = vpack.c.bf16 %v343_v0, %v341_v63  ;;  %v345_v5 = vld [vmem:[%s914_s13 + $0x168] sm:$0xff]  ;;  %v347_v6 = vld [vmem:[%s914_s13 + $0x178] sm:$0xff]  ;;  %v773_v7 = vpack.c.bf16 %v342_v4, %v340_v3  ;;  %v344_v9 = vld [vmem:[%s914_s13 + $0x160] sm:$0xff] }
  0x29   : > { %746 = vmatpush1.bf16.msra.mxu0 %v745_v27  ;;  %v775_v8 = vpack.c.bf16 %v347_v6, %v345_v5  ;;  %v346_v10 = vld [vmem:[%s914_s13 + $0x170] sm:$0xff]  ;;  %v349_v11 = vld [vmem:[%s914_s13 + $0x188] sm:$0xff]  ;;  %v351_v12 = vld [vmem:[%s914_s13 + $0x198] sm:$0xff] }
  0x2a   : > { %748 = vmatprep.subr.bf16.mxu0 %v747_v28  ;;  %v777_v13 = vpack.c.bf16 %v346_v10, %v344_v9  ;;  %v779_v14 = vpack.c.bf16 %v351_v12, %v349_v11  ;;  %v348_v15 = vld [vmem:[%s914_s13 + $0x180] sm:$0xff]  ;;  %v350_v16 = vld [vmem:[%s914_s13 + $0x190] sm:$0xff]  ;;  %v353_v17 = vld [vmem:[%s914_s13 + $0x1a8] sm:$0xff] }
  0x2b   : > { %v355_v18 = vld [vmem:[%s914_s13 + $0x1b8] sm:$0xff]  ;;  %v781_v19 = vpack.c.bf16 %v350_v16, %v348_v15  ;;  %v352_v21 = vld [vmem:[%s914_s13 + $0x1a0] sm:$0xff]  ;;  %v354_v22 = vld [vmem:[%s914_s13 + $0x1b0] sm:$0xff] }
  0x2c   : > { %v783_v20 = vpack.c.bf16 %v355_v18, %v353_v17  ;;  %v357_v23 = vld [vmem:[%s914_s13 + $0x1c8] sm:$0xff]  ;;  %v359_v24 = vld [vmem:[%s914_s13 + $0x1d8] sm:$0xff]  ;;  %v785_v25 = vpack.c.bf16 %v354_v22, %v352_v21  ;;  %v356_v27 = vld [vmem:[%s914_s13 + $0x1c0] sm:$0xff] }
  0x2d   : > { %750 = vmatpush1.bf16.msra.mxu0 %v749_v33  ;;  %v787_v26 = vpack.c.bf16 %v359_v24, %v357_v23  ;;  %v358_v28 = vld [vmem:[%s914_s13 + $0x1d0] sm:$0xff]  ;;  %v361_v29 = vld [vmem:[%s914_s13 + $0x1e8] sm:$0xff]  ;;  %v363_v30 = vld [vmem:[%s914_s13 + $0x1f8] sm:$0xff] }
  0x2e   : > { %752 = vmatprep.subr.bf16.mxu0 %v751_v34  ;;  %v789_v31 = vpack.c.bf16 %v358_v28, %v356_v27  ;;  %v791_v32 = vpack.c.bf16 %v363_v30, %v361_v29  ;;  %v360_v33 = vld [vmem:[%s914_s13 + $0x1e0] sm:$0xff]  ;;  %v362_v34 = vld [vmem:[%s914_s13 + $0x1f0] sm:$0xff]  ;;  %v504_v49 = vld [vmem:[%s1107_s3 + $0x88] sm:$0xff] (!%p689_p6) }
  0x2f   : > { %v793_v35 = vpack.c.bf16 %v362_v34, %v360_v33  ;;  %v298_v46 = vld [vmem:[#allocation2] sm:$0xf]  ;;  %v488_v52 = vld [vmem:[%s1107_s3 + $0x8] sm:$0xff] (!%p689_p6)  ;;  %v489_v57 = vld [vmem:[%s1107_s3 + $0x10] sm:$0xff] (!%p689_p6) }
  0x30   : > { %v487_v50 = vld [vmem:[%s1107_s3] sm:$0xff] (!%p689_p6)  ;;  %v490_v58 = vld [vmem:[%s1107_s3 + $0x18] sm:$0xff] (!%p689_p6)  ;;  %v492_v0 = vld [vmem:[%s1107_s3 + $0x28] sm:$0xff] (!%p689_p6) }
  0x31   : > { %754 = vmatpush1.bf16.msra.mxu0 %v753_v39  ;;  %v451_v39 = vunpack.c.0.s8 %v450_v37  ;;  %v797_v55 = vpack.c.bf16 (!%p689_p6), %v488_v52, %v487_v50  ;;  %v801_v61 = vpack.c.bf16 (!%p689_p6), %v490_v58, %v489_v57  ;;  %v491_v63 = vld [vmem:[%s1107_s3 + $0x20] sm:$0xff] (!%p689_p6)  ;;  %v512_v10 = vld [vmem:[%s1107_s3 + $0xc8] sm:$0xff] (!%p689_p6)  ;;  %v513_v18 = vld [vmem:[%s1107_s3 + $0xd0] sm:$0xff] (!%p689_p6) }
  0x32   : > { %756 = vmatprep.subr.bf16.mxu0 %v755_v40  ;;  %v453_v40 = vshrl.u32 %v452_v38, 7  ;;  %v805_v3 = vpack.c.bf16 (!%p689_p6), %v492_v0, %v491_v63  ;;  %v511_v9 = vld [vmem:[%s1107_s3 + $0xc0] sm:$0xff] (!%p689_p6)  ;;  %v496_v17 = vld [vmem:[%s1107_s3 + $0x48] sm:$0xff] (!%p689_p6)  ;;  %v518_v36 = vld [vmem:[%s1107_s3 + $0xf8] sm:$0xff] (!%p689_p6) }
  0x33   : > { %v464_v11 = vld [vmem:[%s1106_s2] sm:$0x3] (!%p689_p6)  ;;  %v811_v15 = vpack.c.bf16 (!%p689_p6), %v512_v10, %v511_v9  ;;  %v516_v28 = vld [vmem:[%s1107_s3 + $0xe8] sm:$0xff] (!%p689_p6) }
  0x34   : > { %v987_v42 = vsub.s32 %v451_v39, %v453_v40  ;;  %v468_v4 = vsub.s32 (!%p689_p6), 0, %v453_v40  ;;  %v472_v5 = vsub.s32 (!%p689_p6), 1, %v453_v40  ;;  %v495_v16 = vld [vmem:[%s1107_s3 + $0x40] sm:$0xff] (!%p689_p6)  ;;  %v500_v34 = vld [vmem:[%s1107_s3 + $0x68] sm:$0xff] (!%p689_p6) }
  0x35   : > { %758 = vmatpush1.bf16.msra.mxu0 %v757_v47  ;;  %v813_v22 = vpack.c.bf16 (!%p689_p6), %v496_v17, %v495_v16  ;;  %v515_v27 = vld [vmem:[%s1107_s3 + $0xe0] sm:$0xff] (!%p689_p6) }
  0x36   : > { %760 = vmatprep.subr.bf16.mxu0 %v759_v48  ;;  %v499_v33 = vld [vmem:[%s1107_s3 + $0x60] sm:$0xff] (!%p689_p6) }
  0x37   : > { %v821_v39 = vpack.c.bf16 (!%p689_p6), %v500_v34, %v499_v33 }
  0x39   : > { %762 = vmatpush1.bf16.msra.mxu0 %v761_v53  ;;  %v505_v53 = vld [vmem:[%s1107_s3 + $0x90] sm:$0xff] (!%p689_p6) }
  0x3a   : > { %764 = vmatprep.subr.bf16.mxu0 %v763_v54  ;;  %v506_v54 = vld [vmem:[%s1107_s3 + $0x98] sm:$0xff] (!%p689_p6) }
  0x3b   : > { %v799_v56 = vpack.c.bf16 (!%p689_p6), %v506_v54, %v505_v53 }
  0x3d   : > { %766 = vmatpush1.bf16.msra.mxu0 %v765_v59  ;;  %v507_v59 = vld [vmem:[%s1107_s3 + $0xa0] sm:$0xff] (!%p689_p6) }
  0x3e   : > { %768 = vmatprep.subr.bf16.mxu0 %v767_v60  ;;  %v508_v60 = vld [vmem:[%s1107_s3 + $0xa8] sm:$0xff] (!%p689_p6) }
  0x3f   : > { %v803_v62 = vpack.c.bf16 (!%p689_p6), %v508_v60, %v507_v59 }
  0x41   : > { %770 = vmatpush1.bf16.msra.mxu0 %v769_v1  ;;  %v509_v1 = vld [vmem:[%s1107_s3 + $0xb0] sm:$0xff] (!%p689_p6) }
  0x42   : > { %772 = vmatprep.subr.bf16.mxu0 %v771_v2  ;;  %v510_v2 = vld [vmem:[%s1107_s3 + $0xb8] sm:$0xff] (!%p689_p6) }
  0x43   : > { %v807_v6 = vpack.c.bf16 (!%p689_p6), %v510_v2, %v509_v1 }
  0x45   : > { %774 = vmatpush1.bf16.msra.mxu0 %v773_v7  ;;  %v493_v7 = vld [vmem:[%s1107_s3 + $0x30] sm:$0xff] (!%p689_p6) }
  0x46   : > { %776 = vmatprep.subr.bf16.mxu0 %v775_v8  ;;  %v494_v8 = vld [vmem:[%s1107_s3 + $0x38] sm:$0xff] (!%p689_p6) }
  0x47   : > { %v809_v12 = vpack.c.bf16 (!%p689_p6), %v494_v8, %v493_v7 }
  0x49   : > { %778 = vmatpush1.bf16.msra.mxu0 %v777_v13  ;;  %v469_v13 = vrot.slane (!%p689_p6), %v464_v11, %v468_v4 }
  0x4a   : > { %780 = vmatprep.subr.bf16.mxu0 %v779_v14  ;;  %v473_v14 = vrot.slane (!%p689_p6), %v464_v11, %v472_v5 }
  0x4d   : > { %782 = vmatpush1.bf16.msra.mxu0 %v781_v19  ;;  %v514_v19 = vld [vmem:[%s1107_s3 + $0xd8] sm:$0xff] (!%p689_p6) }
  0x4e   : > { %784 = vmatprep.subr.bf16.mxu0 %v783_v20  ;;  %v474_v20 = vcombine.low (!%p689_p6), %v469_v13, %v473_v14  ;;  %v815_v24 = vpack.c.bf16 (!%p689_p6), %v514_v19, %v513_v18 }
  0x50   : > { %v481_v23 = vrot.slane (!%p689_p6), %v474_v20, %v987_v42 }
  0x51   : > { %786 = vmatpush1.bf16.msra.mxu0 %v785_v25  ;;  %v497_v25 = vld [vmem:[%s1107_s3 + $0x50] sm:$0xff] (!%p689_p6) }
  0x52   : > { %788 = vmatprep.subr.bf16.mxu0 %v787_v26  ;;  %v498_v26 = vld [vmem:[%s1107_s3 + $0x58] sm:$0xff] (!%p689_p6) }
  0x53   : > { %v817_v30 = vpack.c.bf16 (!%p689_p6), %v498_v26, %v497_v25 }
  0x55   : > { %790 = vmatpush1.bf16.msra.mxu0 %v789_v31 }
  0x56   : > { %792 = vmatprep.subr.bf16.mxu0 %v791_v32  ;;  %v819_v32 = vpack.c.bf16 (!%p689_p6), %v516_v28, %v515_v27 }
  0x59   : > { %794 = vmatpush1.bf16.msra.mxu0 %v793_v35  ;;  %v517_v35 = vld [vmem:[%s1107_s3 + $0xf0] sm:$0xff] (!%p689_p6) }
  0x5a   : > { %v823_v40 = vpack.c.bf16 (!%p689_p6), %v518_v36, %v517_v35 }
  0x5c   : > { %440 = vmatmul.mubr.f32.vlgmr.msra.gmra.mrb[0].mxu0 %v946_v43  ;;  %v503_v43 = vld [vmem:[%s1107_s3 + $0x80] sm:$0xff] (!%p689_p6) }
  0x5d   : > { %v795_v51 = vpack.c.bf16 (!%p689_p6), %v504_v49, %v503_v43 }
  0x5f   : > { %796 = vmatprep.subr.bf16.mxu0 (!%p689_p6), %v795_v51  ;;  %v691_v51 = vld [vmem:[%s1109_s5] ss:$0 sm:$0xff] (!%p689_p6) }
  0x60   : > { %798 = vmatpush3.bf16.msra.mxu0 (!%p689_p6), %v797_v55  ;;  %v692_v55 = vld [vmem:[#allocation3] ss:$0 sm:$0xff] (!%p689_p6) }
  0x61   : > { %800 = vmatprep.subr.bf16.mxu0 (!%p689_p6), %v799_v56 }
  0x64   : > { %802 = vmatpush3.bf16.msra.mxu0 (!%p689_p6), %v801_v61 }
  0x65   : > { %804 = vmatprep.subr.bf16.mxu0 (!%p689_p6), %v803_v62 }
  0x68   : > { %806 = vmatpush3.bf16.msra.mxu0 (!%p689_p6), %v805_v3 }
  0x69   : > { %808 = vmatprep.subr.bf16.mxu0 (!%p689_p6), %v807_v6 }
  0x6c   : > { %810 = vmatpush3.bf16.msra.mxu0 (!%p689_p6), %v809_v12 }
  0x6d   : > { %812 = vmatprep.subr.bf16.mxu0 (!%p689_p6), %v811_v15 }
  0x70   : > { %814 = vmatpush3.bf16.msra.mxu0 (!%p689_p6), %v813_v22 }
  0x71   : > { %816 = vmatprep.subr.bf16.mxu0 (!%p689_p6), %v815_v24 }
  0x74   : > { %818 = vmatpush3.bf16.msra.mxu0 (!%p689_p6), %v817_v30 }
  0x75   : > { %820 = vmatprep.subr.bf16.mxu0 (!%p689_p6), %v819_v32 }
  0x78   : > { %822 = vmatpush3.bf16.msra.mxu0 (!%p689_p6), %v821_v39 }
  0x79   : > { %824 = vmatprep.subr.bf16.mxu0 (!%p689_p6), %v823_v40 }
 0x12f   : > { %v441_v41 = vpop.f32.mrb[0].mxu0 }
 0x130   : > { %v443_v44 = vpop.f32.mrb[1].mxu0 }
 0x131   : > { %v448_v45 = vcombine.low %v441_v41, %v443_v44  ;;  %462 = sbr.rel (%p689_p6) target bundleno = 725 (0x2d5), region = 56  ;;  %v501_v41 = vld [vmem:[%s1107_s3 + $0x70] sm:$0xff] (!%p689_p6)  ;;  %v502_v44 = vld [vmem:[%s1107_s3 + $0x78] sm:$0xff] (!%p689_p6) }
 0x133   : > { %v455_v47 = vrot.slane %v448_v45, %v987_v42 }
 0x135   : > { %v457_v48 = vadd.f32 %v455_v47, %v298_v46  ;;  %v825_v46 = vpack.c.bf16 (!%p689_p6), %v502_v44, %v501_v41  ;;  %v690_v47 = vld [vmem:[%s1108_s4] ss:$0 sm:$0xff] (!%p689_p6) }
 0x137   : > { %458 = vst [vmem:[#allocation2] sm:$0xf] %v457_v48  ;;  %826 = vmatpush3.bf16.msra.mxu0 (!%p689_p6), %v825_v46 }
 0x13e   : > { %v463_v21 = vld [vmem:[#allocation2] sm:$0xf] }
 0x13f   : > { %v483_v29 = vadd.f32 %v481_v23, %v463_v21 }
 0x141   : > { %vm484_vm0 = vcmp.gt.f32.partialorder %v483_v29, 0.0  ;;  %v485_v31 = vmul.f32 0.01, %v483_v29 }
 0x143   : > { %v486_v37 = vsel %vm484_vm0, %v483_v29, %v485_v31 }
 0x144   : > { %v533_v38 = vrot.slane %v486_v37, %v987_v42 }
 0x146   : > { %v534_v45 = vcombine.high %v533_v38, %v533_v38 }
 0x148   : > { %601 = vmatprep.mubr.f32.mxu0 %v534_v45 }
 0x149   : > { %602 = vmatmul.mubr.f32.vlgmr.msra.gmra.mrb[0].mxu0 %v533_v38 }
 0x21c   : > { %v728_v42 = vpop.f32.mrb[0].mxu0 }
 0x21d   : > { %v729_v48 = vpop.f32.mrb[1].mxu0 }
 0x21e   : > { %v730_v43 = vadd.f32 %v729_v48, %v728_v42 }
 0x220   : > { %v604_v49 = vadd.f32 %v730_v43, %v690_v47 }
 0x222   : > { %v608_v50 = vmul.f32 0.01, %v604_v49  ;;  %vm607_vm1 = vcmp.gt.f32.partialorder %v604_v49, 0.0 }
 0x224   : > { %v609_v52 = vsel %vm607_vm1, %v604_v49, %v608_v50 }
 0x225   : > { %v617_v53 = vmul.f32 %v691_v51, %v609_v52 }
 0x227   : > { %v619_v54 = vsel %vm618_vm2, %v617_v53, 0.0 }
 0x228   : > { %620 = vadd.xlane.f32.xlu0 %v619_v54 }
 0x2b5   : > { %v621_v56 = vpop.xlane.xlu0 %620 }
 0x2b6   : > { %v629_v57 = vadd.f32 %v692_v55, %v621_v56 }
 0x2b8   : > { %v630_v58 = vsub.f32 0.0, %v629_v57 }
 0x2ba   : > { %v631_v59 = vmul.f32 1.442695, %v630_v58 }
 0x2bc   : > { %837 = vpow2.f32 %v631_v59 }
 0x2c6   : > { %v838_v60 = vpop.eup %837 }
 0x2c7   : > { %v633_v61 = vadd.f32 1.0, %v838_v60 }
 0x2c9   : > { %839 = vrcp.f32 %v633_v61 }
 0x2d3   : > { %v840_v62 = vpop.eup %839 }
 0x2d4   : > { %637 = vst.msk [vmem:[%s1111_s7] sm:$0x3] %vm636_vm3, %v840_v62 }
 0x2d5 PF: > { %s19_s26 = sadd.s32 1, %s847_s26  }
 0x2d6   : > { %p16_p7 = scmp.ge.s32.totalorder %s19_s26, 22  }
 0x2d8   :  { %18 = sbr.rel (!%p16_p7) target bundleno = 3 (0x3), region = 85 }

// kernel: cnn_forward_pallas.2
= control target key start
LH: loop header
LB: loop body
LE: loop exit
PB: predicated region body
PF: predicated region fallthrough
CT: control target
= control target key end

     0   :  { %s14638_s30 = smov 0   ;;  %s18208_s0 = inlined_call_operand.vmem [shape: f32[2,9208,1], index: 0, kind: input, shape index: {}]   ;;  %s18209_s1 = inlined_call_operand.vmem [shape: f32[9,1,64], index: 1, kind: input, shape index: {}]   ;;  %s18210_s2 = inlined_call_operand.vmem [shape: f32[1,64], index: 2, kind: input, shape index: {}]   ;;  %s18211_s3 = inlined_call_operand.vmem [shape: f32[9,64,32], index: 3, kind: input, shape index: {}]   ;;  %s18212_s4 = inlined_call_operand.vmem [shape: f32[1,32], index: 4, kind: input, shape index: {}]   ;;  %s18213_s5 = inlined_call_operand.vmem [shape: f32[9,32,128], index: 5, kind: input, shape index: {}]   ;;  %s18214_s6 = inlined_call_operand.vmem [shape: f32[1,128], index: 6, kind: input, shape index: {}]   ;;  %s18215_s7 = inlined_call_operand.vmem [shape: f32[9,128,64], index: 7, kind: input, shape index: {}]   ;;  %s18216_s8 = inlined_call_operand.vmem [shape: f32[1,64], index: 8, kind: input, shape index: {}]   ;;  %s18217_s9 = inlined_call_operand.vmem [shape: f32[2,77,64], index: 9, kind: output, shape index: {}]  }
   0x1 LB: > { %s9791_s10 = sadd.s32 4294967295, %s14560_s30   ;;  %p9795_p0 = scmp.ge.s32.totalorder %s14560_s30, 1  ;;  %s14560_s30 = sphi %s14638_s30, %s19_s30  }
   0x2   : > { %p287_p1 = scmp.lt.s32.totalorder %s14560_s30, 3 }
   0x4   : > { %p288_p2 = pnand %p9795_p0, %p287_p1 }
   0x5   : > { %p323_p3 = scmp.lt.s32.totalorder (!%p288_p2), %s9791_s10, 1  ;;  %vm333_vm0 = vcmask (!%p288_p2), 523264   ;;  %vm335_vm1 = vcmask (!%p288_p2), 256000   ;;  %v14586_v0 = vmov (!%p288_p2), 0.0   ;;  %s14657_s19 = smov (!%p288_p2), 0  }
   0x6   : > { %291 = sbr.rel (%p288_p2) target bundleno = 1792 (0x700), region = 56  ;;  %334 = vst.msk [vmem:[#allocation2 + $0x2350] sm:$0xff] (!%p288_p2), %vm333_vm0, %v14586_v0  ;;  %337 = vst [vmem:[#allocation5 + $0x36b] sm:$0x1f] (!%p288_p2), %v14586_v0 }
   0x7   : > { %336 = vst.msk [vmem:[#allocation4 + $0x39d] sm:$0x7] (!%p288_p2), %vm335_vm1, %v14586_v0 }
   0xd   : > { %s18350_s10 = smov (!%p323_p3, %s9791_s10), 1 }
   0xe   : > { %s14468_s11 = smul.u32 9208, %s18350_s10 }
   0xf   : > { %s14469_s12 = smul.u32 80, %s18350_s10 }
  0x10   : > { %s14650_s15 = scalar_lea.vmem %s18208_s0, %s14468_s11 }
  0x11   : > { %s14655_s18 = scalar_lea.vmem %s18217_s9, %s14469_s12 }
  0x12 LB: >> { %v14587_v1 = vmov 0   ;;  %s9798_s20 = sshll.u32 %s14564_s19, 7  ;;  %s343_s19 = sadd.s32 1, %s14564_s19   ;;  %s14564_s19 = sphi %s14657_s19, %s343_s19  }
  0x13   : >> { %14529 = vset.pattern.permute.xlu1 %v14587_v1  ;;  %14528 = vset.pattern.permute.xlu0 %v14587_v1  ;;  %p345_p4 = scmp.lt.s32.totalorder %s9798_s20, 8912  ;;  %p340_p5 = scmp.ge.s32.totalorder %s343_s19, 71  }
  0x15   : >> { %s18352_s20 = smov (!%p345_p4, %s9798_s20), 8912 }
  0x16   : >> { %s14667_s21 = scalar_lea.vmem %s14650_s15, %s18352_s20  ;;  %s15413_s26 = scalar_lea.vmem [#allocation2], %s18352_s20 }
  0x17   : >> { %v358_v2 = vld [vmem:[%s14667_s21 + $0x10] sm:$0xff]  ;;  %v356_v3 = vld [vmem:[%s14667_s21] sm:$0xff]  ;;  %v359_v4 = vld [vmem:[%s14667_s21 + $0x18] sm:$0xff]  ;;  %s15496_s20 = smov (%p340_p5), 0  }
  0x18   : >> { %385 = vperm.xlu1 %14529, %v358_v2   ;;  %375 = vperm.xlu0 %14528, %v356_v3   ;;  %v357_v5 = vld [vmem:[%s14667_s21 + $0x8] sm:$0xff]  ;;  %v360_v7 = vld [vmem:[%s14667_s21 + $0x20] sm:$0xff]  ;;  %v363_v8 = vld [vmem:[%s14667_s21 + $0x38] sm:$0xff] }
  0x19   : >> { %v361_v6 = vld [vmem:[%s14667_s21 + $0x28] sm:$0xff]  ;;  %v362_v9 = vld [vmem:[%s14667_s21 + $0x30] sm:$0xff]  ;;  %v364_v11 = vld [vmem:[%s14667_s21 + $0x40] sm:$0xff] }
  0x1a   : >> { %v365_v10 = vld [vmem:[%s14667_s21 + $0x48] sm:$0xff]  ;;  %v14680_v12 = vld [vmem:[%s14667_s21 + $0x58] sm:$0xff]  ;;  %v14683_v13 = vld [vmem:[%s14667_s21 + $0x50] sm:$0xff] }
  0x1b   : >> { %v14688_v14 = vld [vmem:[%s14667_s21 + $0x68] sm:$0xff]  ;;  %v14691_v15 = vld [vmem:[%s14667_s21 + $0x60] sm:$0xff]  ;;  %v14696_v16 = vld [vmem:[%s14667_s21 + $0x78] sm:$0xff] }
  0x1c   : >> { %390 = vperm.xlu1 %14529, %v359_v4   ;;  %380 = vperm.xlu0 %14528, %v357_v5   ;;  %v14699_v17 = vld [vmem:[%s14667_s21 + $0x70] sm:$0xff]  ;;  %v9801_v19 = vld [vmem:[%s14667_s21 + $0x1] sm:$0xff]  ;;  %v9804_v20 = vld [vmem:[%s14667_s21 + $0x19] sm:$0xff] }
  0x1d   : >> { %v9802_v18 = vld [vmem:[%s14667_s21 + $0x9] sm:$0xff]  ;;  %v9803_v21 = vld [vmem:[%s14667_s21 + $0x11] sm:$0xff]  ;;  %v9805_v23 = vld [vmem:[%s14667_s21 + $0x21] sm:$0xff] }
  0x1e   : >> { %v9806_v22 = vld [vmem:[%s14667_s21 + $0x29] sm:$0xff]  ;;  %v9808_v24 = vld [vmem:[%s14667_s21 + $0x39] sm:$0xff]  ;;  %v9807_v25 = vld [vmem:[%s14667_s21 + $0x31] sm:$0xff] }
  0x1f   : >> { %v9810_v26 = vld [vmem:[%s14667_s21 + $0x49] sm:$0xff]  ;;  %v9809_v27 = vld [vmem:[%s14667_s21 + $0x41] sm:$0xff]  ;;  %v14714_v28 = vld [vmem:[%s14667_s21 + $0x59] sm:$0xff] }
  0x20   : >> { %400 = vperm.xlu1 %14529, %v361_v6   ;;  %395 = vperm.xlu0 %14528, %v360_v7   ;;  %v14717_v29 = vld [vmem:[%s14667_s21 + $0x51] sm:$0xff]  ;;  %v14722_v30 = vld [vmem:[%s14667_s21 + $0x69] sm:$0xff]  ;;  %v14725_v31 = vld [vmem:[%s14667_s21 + $0x61] sm:$0xff] }
  0x21   : >> { %v14730_v32 = vld [vmem:[%s14667_s21 + $0x79] sm:$0xff]  ;;  %v14733_v33 = vld [vmem:[%s14667_s21 + $0x71] sm:$0xff]  ;;  %v9819_v35 = vld [vmem:[%s14667_s21 + $0x2] sm:$0xff] }
  0x22   : >> { %v9820_v34 = vld [vmem:[%s14667_s21 + $0xa] sm:$0xff]  ;;  %v9822_v36 = vld [vmem:[%s14667_s21 + $0x1a] sm:$0xff]  ;;  %v9821_v37 = vld [vmem:[%s14667_s21 + $0x12] sm:$0xff] }
  0x23   : >> { %v9824_v38 = vld [vmem:[%s14667_s21 + $0x2a] sm:$0xff]  ;;  %v9823_v39 = vld [vmem:[%s14667_s21 + $0x22] sm:$0xff]  ;;  %v9826_v40 = vld [vmem:[%s14667_s21 + $0x3a] sm:$0xff] }
  0x24   : >> { %410 = vperm.xlu1 %14529, %v363_v8   ;;  %405 = vperm.xlu0 %14528, %v362_v9   ;;  %v9825_v41 = vld [vmem:[%s14667_s21 + $0x32] sm:$0xff]  ;;  %v9828_v42 = vld [vmem:[%s14667_s21 + $0x4a] sm:$0xff]  ;;  %v9827_v43 = vld [vmem:[%s14667_s21 + $0x42] sm:$0xff] }
  0x25   : >> { %v14748_v44 = vld [vmem:[%s14667_s21 + $0x5a] sm:$0xff]  ;;  %v14751_v45 = vld [vmem:[%s14667_s21 + $0x52] sm:$0xff]  ;;  %v14756_v46 = vld [vmem:[%s14667_s21 + $0x6a] sm:$0xff] }
  0x26   : >> { %v14759_v47 = vld [vmem:[%s14667_s21 + $0x62] sm:$0xff]  ;;  %v14764_v48 = vld [vmem:[%s14667_s21 + $0x7a] sm:$0xff]  ;;  %v14767_v49 = vld [vmem:[%s14667_s21 + $0x72] sm:$0xff] }
  0x27   : >> { %v9844_v50 = vld [vmem:[%s14667_s21 + $0x88] sm:$0xff]  ;;  %v9843_v51 = vld [vmem:[%s14667_s21 + $0x80] sm:$0xff]  ;;  %v9846_v52 = vld [vmem:[%s14667_s21 + $0x98] sm:$0xff] }
  0x28   : >> { %420 = vperm.xlu1 %14529, %v365_v10   ;;  %415 = vperm.xlu0 %14528, %v364_v11   ;;  %v9845_v53 = vld [vmem:[%s14667_s21 + $0x90] sm:$0xff]  ;;  %v14782_v54 = vld [vmem:[%s14667_s21 + $0xa8] sm:$0xff]  ;;  %v14785_v55 = vld [vmem:[%s14667_s21 + $0xa0] sm:$0xff] }
  0x29   : >> { %v14790_v56 = vld [vmem:[%s14667_s21 + $0xb8] sm:$0xff]  ;;  %v14793_v57 = vld [vmem:[%s14667_s21 + $0xb0] sm:$0xff]  ;;  %v14798_v58 = vld [vmem:[%s14667_s21 + $0xc8] sm:$0xff] }
  0x2a   : >> { %v14801_v59 = vld [vmem:[%s14667_s21 + $0xc0] sm:$0xff]  ;;  %v9862_v2 = vld [vmem:[%s14667_s21 + $0x89] sm:$0xff]  ;;  %v9863_v7 = vld [vmem:[%s14667_s21 + $0x91] sm:$0xff] }
  0x2b   : >> { %v9861_v3 = vld [vmem:[%s14667_s21 + $0x81] sm:$0xff]  ;;  %v9864_v6 = vld [vmem:[%s14667_s21 + $0x99] sm:$0xff]  ;;  %v14836_v10 = vld [vmem:[%s14667_s21 + $0xa9] sm:$0xff] }
  0x2c   : >> { %430 = vperm.xlu1 %14529, %v14680_v12   ;;  %425 = vperm.xlu0 %14528, %v14683_v13   ;;  %v14839_v11 = vld [vmem:[%s14667_s21 + $0xa1] sm:$0xff] }
  0x30   : >> { %440 = vperm.xlu1 %14529, %v14688_v14   ;;  %435 = vperm.xlu0 %14528, %v14691_v15  }
  0x34   : >> { %450 = vperm.xlu1 %14529, %v14696_v16   ;;  %445 = vperm.xlu0 %14528, %v14699_v17  }
  0x38   : >> { %518 = vperm.xlu1 %14529, %v9802_v18   ;;  %513 = vperm.xlu0 %14528, %v9801_v19   ;;  %v14860_v18 = vld [vmem:[%s14667_s21 + $0xc9] sm:$0xff]  ;;  %v14863_v19 = vld [vmem:[%s14667_s21 + $0xc1] sm:$0xff] }
  0x3c   : >> { %528 = vperm.xlu1 %14529, %v9804_v20   ;;  %523 = vperm.xlu0 %14528, %v9803_v21  }
  0x40   : >> { %538 = vperm.xlu1 %14529, %v9806_v22   ;;  %533 = vperm.xlu0 %14528, %v9805_v23  }
  0x44   : >> { %548 = vperm.xlu1 %14529, %v9808_v24   ;;  %543 = vperm.xlu0 %14528, %v9807_v25  }
  0x48   : >> { %558 = vperm.xlu1 %14529, %v9810_v26   ;;  %553 = vperm.xlu0 %14528, %v9809_v27  }
  0x4c   : >> { %568 = vperm.xlu1 %14529, %v14714_v28   ;;  %563 = vperm.xlu0 %14528, %v14717_v29  }
  0x50   : >> { %578 = vperm.xlu1 %14529, %v14722_v30   ;;  %573 = vperm.xlu0 %14528, %v14725_v31  }
  0x54   : >> { %588 = vperm.xlu1 %14529, %v14730_v32   ;;  %583 = vperm.xlu0 %14528, %v14733_v33  }
  0x58   : >> { %656 = vperm.xlu1 %14529, %v9820_v34   ;;  %651 = vperm.xlu0 %14528, %v9819_v35  }
  0x5c   : >> { %666 = vperm.xlu1 %14529, %v9822_v36   ;;  %661 = vperm.xlu0 %14528, %v9821_v37   ;;  %v14902_v36 = vld [vmem:[%s14667_s21 + $0xaa] sm:$0xff]  ;;  %v14905_v37 = vld [vmem:[%s14667_s21 + $0xa2] sm:$0xff] }
  0x60   : >> { %676 = vperm.xlu1 %14529, %v9824_v38   ;;  %671 = vperm.xlu0 %14528, %v9823_v39  }
  0x64   : >> { %686 = vperm.xlu1 %14529, %v9826_v40   ;;  %681 = vperm.xlu0 %14528, %v9825_v41   ;;  %v14914_v40 = vld [vmem:[%s14667_s21 + $0xba] sm:$0xff]  ;;  %v14917_v41 = vld [vmem:[%s14667_s21 + $0xb2] sm:$0xff] }
  0x68   : >> { %696 = vperm.xlu1 %14529, %v9828_v42   ;;  %691 = vperm.xlu0 %14528, %v9827_v43  }
  0x6c   : >> { %706 = vperm.xlu1 %14529, %v14748_v44   ;;  %701 = vperm.xlu0 %14528, %v14751_v45  }
  0x70   : >> { %716 = vperm.xlu1 %14529, %v14756_v46   ;;  %711 = vperm.xlu0 %14528, %v14759_v47  }
  0x74   : >> { %726 = vperm.xlu1 %14529, %v14764_v48   ;;  %721 = vperm.xlu0 %14528, %v14767_v49  }
  0x78   : >> { %794 = vperm.xlu1 %14529, %v14680_v12   ;;  %789 = vperm.xlu0 %14528, %v14683_v13  }
  0x7c   : >> { %804 = vperm.xlu1 %14529, %v14688_v14   ;;  %799 = vperm.xlu0 %14528, %v14691_v15   ;;  %v14848_v14 = vld [vmem:[%s14667_s21 + $0xb9] sm:$0xff]  ;;  %v14851_v15 = vld [vmem:[%s14667_s21 + $0xb1] sm:$0xff] }
  0x80   : >> { %814 = vperm.xlu1 %14529, %v14696_v16   ;;  %809 = vperm.xlu0 %14528, %v14699_v17  }
  0x84   : >> { %824 = vperm.xlu1 %14529, %v9844_v50   ;;  %819 = vperm.xlu0 %14528, %v9843_v51  }
  0x88   : >> { %834 = vperm.xlu1 %14529, %v9846_v52   ;;  %829 = vperm.xlu0 %14528, %v9845_v53  }
  0x8c   : >> { %844 = vperm.xlu1 %14529, %v14782_v54   ;;  %839 = vperm.xlu0 %14528, %v14785_v55  }
  0x90   : >> { %854 = vperm.xlu1 %14529, %v14790_v56   ;;  %849 = vperm.xlu0 %14528, %v14793_v57  }
  0x94   : >> { %864 = vperm.xlu1 %14529, %v14798_v58   ;;  %859 = vperm.xlu0 %14528, %v14801_v59  }
  0x97   : >> { %v14805_v60 = vpop.permute.xlu1 %385  ;;  %v14807_v61 = vpop.permute.xlu0 %375 }
  0x98   : >> { %932 = vperm.xlu1 %14529, %v14714_v28   ;;  %927 = vperm.xlu0 %14528, %v14717_v29   ;;  %v9880_v28 = vld [vmem:[%s14667_s21 + $0x8a] sm:$0xff]  ;;  %v9879_v29 = vld [vmem:[%s14667_s21 + $0x82] sm:$0xff] }
  0x9b   : >> { %v14811_v62 = vpop.permute.xlu1 %390  ;;  %v14813_v63 = vpop.permute.xlu0 %380 }
  0x9c   : >> { %942 = vperm.xlu1 %14529, %v14722_v30   ;;  %937 = vperm.xlu0 %14528, %v14725_v31  }
  0x9f   : >> { %v14817_v0 = vpop.permute.xlu1 %400  ;;  %v14819_v1 = vpop.permute.xlu0 %395 }
  0xa0   : >> { %952 = vperm.xlu1 %14529, %v14730_v32   ;;  %947 = vperm.xlu0 %14528, %v14733_v33   ;;  %v9882_v32 = vld [vmem:[%s14667_s21 + $0x9a] sm:$0xff]  ;;  %v9881_v33 = vld [vmem:[%s14667_s21 + $0x92] sm:$0xff] }
  0xa3   : >> { %v14825_v4 = vpop.permute.xlu1 %410  ;;  %v14827_v5 = vpop.permute.xlu0 %405 }
  0xa4   : >> { %962 = vperm.xlu1 %14529, %v9862_v2   ;;  %957 = vperm.xlu0 %14528, %v9861_v3  }
  0xa7   : >> { %v14831_v8 = vpop.permute.xlu1 %420  ;;  %v14833_v9 = vpop.permute.xlu0 %415 }
  0xa8   : >> { %972 = vperm.xlu1 %14529, %v9864_v6   ;;  %967 = vperm.xlu0 %14528, %v9863_v7  }
  0xab   : >> { %v14841_v12 = vpop.permute.xlu1 %430  ;;  %v14843_v13 = vpop.permute.xlu0 %425 }
  0xac   : >> { %982 = vperm.xlu1 %14529, %v14836_v10   ;;  %977 = vperm.xlu0 %14528, %v14839_v11  }
  0xaf   : >> { %v14853_v16 = vpop.permute.xlu1 %440  ;;  %v14855_v17 = vpop.permute.xlu0 %435 }
  0xb0   : >> { %992 = vperm.xlu1 %14529, %v14848_v14   ;;  %987 = vperm.xlu0 %14528, %v14851_v15  }
  0xb3   : >> { %v14865_v20 = vpop.permute.xlu1 %450  ;;  %v14867_v21 = vpop.permute.xlu0 %445 }
  0xb4   : >> { %1002 = vperm.xlu1 %14529, %v14860_v18   ;;  %997 = vperm.xlu0 %14528, %v14863_v19  }
  0xb7   : >> { %v14871_v22 = vpop.permute.xlu1 %518  ;;  %v14873_v23 = vpop.permute.xlu0 %513 }
  0xb8   : >> { %1070 = vperm.xlu1 %14529, %v14748_v44   ;;  %1065 = vperm.xlu0 %14528, %v14751_v45   ;;  %v14926_v44 = vld [vmem:[%s14667_s21 + $0xca] sm:$0xff]  ;;  %v14929_v45 = vld [vmem:[%s14667_s21 + $0xc2] sm:$0xff] }
  0xb9   : >> { %18254 = vst [vmem:[#allocation10_spill] sm:$0xff] %v14929_v45 }
  0xbb   : >> { %v14877_v24 = vpop.permute.xlu1 %528  ;;  %v14879_v25 = vpop.permute.xlu0 %523 }
  0xbc   : >> { %1080 = vperm.xlu1 %14529, %v14756_v46   ;;  %1075 = vperm.xlu0 %14528, %v14759_v47  }
  0xbf   : >> { %v14883_v26 = vpop.permute.xlu1 %538  ;;  %v14885_v27 = vpop.permute.xlu0 %533 }
  0xc0   : >> { %1090 = vperm.xlu1 %14529, %v14764_v48   ;;  %1085 = vperm.xlu0 %14528, %v14767_v49  }
  0xc3   : >> { %v14891_v30 = vpop.permute.xlu1 %548  ;;  %v14893_v31 = vpop.permute.xlu0 %543 }
  0xc4   : >> { %1100 = vperm.xlu1 %14529, %v9880_v28   ;;  %1095 = vperm.xlu0 %14528, %v9879_v29  }
  0xc7   : >> { %v14897_v34 = vpop.permute.xlu1 %558  ;;  %v14899_v35 = vpop.permute.xlu0 %553 }
  0xc8   : >> { %1110 = vperm.xlu1 %14529, %v9882_v32   ;;  %1105 = vperm.xlu0 %14528, %v9881_v33   ;;  %v9904_v32 = vld [vmem:[%s14667_s21 + $0x108] sm:$0xff]  ;;  %v9903_v33 = vld [vmem:[%s14667_s21 + $0x100] sm:$0xff] }
  0xcb   : >> { %v14907_v38 = vpop.permute.xlu1 %568  ;;  %v14909_v39 = vpop.permute.xlu0 %563 }
  0xcc   : >> { %18251 = vst [vmem:[#allocation7_spill] sm:$0xff] %v14909_v39  ;;  %1120 = vperm.xlu1 %14529, %v14902_v36   ;;  %1115 = vperm.xlu0 %14528, %v14905_v37  }
  0xcf   : >> { %v14919_v42 = vpop.permute.xlu1 %578  ;;  %v14921_v43 = vpop.permute.xlu0 %573 }
  0xd0   : >> { %18252 = vst [vmem:[#allocation8_spill] sm:$0xff] %v14919_v42  ;;  %18253 = vst [vmem:[#allocation9_spill] sm:$0xff] %v14921_v43  ;;  %1130 = vperm.xlu1 %14529, %v14914_v40   ;;  %1125 = vperm.xlu0 %14528, %v14917_v41   ;;  %v9906_v43 = vld [vmem:[%s14667_s21 + $0x118] sm:$0xff]  ;;  %v9905_v42 = vld [vmem:[%s14667_s21 + $0x110] sm:$0xff] }
  0xd3   : >> { %v14931_v46 = vpop.permute.xlu1 %588  ;;  %v14933_v47 = vpop.permute.xlu0 %583 }
  0xd4   : >> { %1140 = vperm.xlu1 %14529, %v14926_v44   ;;  %1135 = vperm.xlu0 %14528, %v14929_v45  }
  0xd7   : >> { %v14937_v48 = vpop.permute.xlu1 %656  ;;  %v14939_v49 = vpop.permute.xlu0 %651 }
  0xd8   : >> { %1208 = vperm.xlu1 %14529, %v14782_v54   ;;  %1203 = vperm.xlu0 %14528, %v14785_v55   ;;  %v9898_v54 = vld [vmem:[%s14667_s21 + $0xd8] sm:$0xff]  ;;  %v9897_v55 = vld [vmem:[%s14667_s21 + $0xd0] sm:$0xff] }
  0xdb   : >> { %v14943_v50 = vpop.permute.xlu1 %666  ;;  %v14945_v51 = vpop.permute.xlu0 %661 }
  0xdc   : >> { %1218 = vperm.xlu1 %14529, %v14790_v56   ;;  %1213 = vperm.xlu0 %14528, %v14793_v57   ;;  %v9900_v56 = vld [vmem:[%s14667_s21 + $0xe8] sm:$0xff]  ;;  %v9899_v57 = vld [vmem:[%s14667_s21 + $0xe0] sm:$0xff] }
  0xdf   : >> { %v14949_v52 = vpop.permute.xlu1 %676  ;;  %v14951_v53 = vpop.permute.xlu0 %671 }
  0xe0   : >> { %1228 = vperm.xlu1 %14529, %v14798_v58   ;;  %1223 = vperm.xlu0 %14528, %v14801_v59   ;;  %v9902_v58 = vld [vmem:[%s14667_s21 + $0xf8] sm:$0xff]  ;;  %v9901_v59 = vld [vmem:[%s14667_s21 + $0xf0] sm:$0xff] }
  0xe3   : >> { %v14957_v2 = vpop.permute.xlu1 %686  ;;  %v14959_v3 = vpop.permute.xlu0 %681 }
  0xe4   : >> { %1238 = vperm.xlu1 %14529, %v9898_v54   ;;  %1233 = vperm.xlu0 %14528, %v9897_v55  }
  0xe7   : >> { %v14963_v6 = vpop.permute.xlu1 %696  ;;  %v14965_v7 = vpop.permute.xlu0 %691 }
  0xe8   : >> { %18255 = vst [vmem:[#allocation11_spill] sm:$0xff] %v14963_v6  ;;  %18256 = vst [vmem:[#allocation12_spill] sm:$0xff] %v14965_v7  ;;  %1248 = vperm.xlu1 %14529, %v9900_v56   ;;  %1243 = vperm.xlu0 %14528, %v9899_v57   ;;  %v9918_v7 = vld [vmem:[%s14667_s21 + $0xe9] sm:$0xff]  ;;  %v9917_v6 = vld [vmem:[%s14667_s21 + $0xe1] sm:$0xff] }
  0xeb   : >> { %v14969_v28 = vpop.permute.xlu1 %706  ;;  %v14971_v29 = vpop.permute.xlu0 %701 }
  0xec   : >> { %18257 = vst [vmem:[#allocation13_spill] sm:$0xff] %v14969_v28  ;;  %18258 = vst [vmem:[#allocation14_spill] sm:$0xff] %v14971_v29  ;;  %1258 = vperm.xlu1 %14529, %v9902_v58   ;;  %1253 = vperm.xlu0 %14528, %v9901_v59  }
  0xef   : >> { %v14975_v54 = vpop.permute.xlu1 %716  ;;  %v14977_v55 = vpop.permute.xlu0 %711 }
  0xf0   : >> { %18259 = vst [vmem:[#allocation15_spill] sm:$0xff] %v14975_v54  ;;  %18260 = vst [vmem:[#allocation16_spill] sm:$0xff] %v14977_v55  ;;  %1268 = vperm.xlu1 %14529, %v9904_v32   ;;  %1263 = vperm.xlu0 %14528, %v9903_v33  }
  0xf3   : >> { %v14981_v56 = vpop.permute.xlu1 %726  ;;  %v14983_v57 = vpop.permute.xlu0 %721 }
  0xf4   : >> { %1278 = vperm.xlu1 %14529, %v9906_v43   ;;  %1273 = vperm.xlu0 %14528, %v9905_v42   ;;  %v9915_v43 = vld [vmem:[%s14667_s21 + $0xd1] sm:$0xff] }
  0xf7   : >> { %v14985_v58 = vpop.permute.xlu1 %794  ;;  %v14987_v59 = vpop.permute.xlu0 %789 }
  0xf8   : >> { %1346 = vperm.xlu1 %14529, %v14836_v10   ;;  %1341 = vperm.xlu0 %14528, %v14839_v11   ;;  %v15006_v10 = vld [vmem:[%s18209_s1] ss:$0 sm:$0xff] }
  0xf9   : >> { %v9916_v11 = vld [vmem:[%s14667_s21 + $0xd9] sm:$0xff]  ;;  %v461_v54 = vmul.f32 %v15006_v10, %v14805_v60  ;;  %v462_v29 = vmul.f32 %v15006_v10, %v14811_v62  ;;  %v460_v28 = vmul.f32 %v15006_v10, %v14813_v63  ;;  %v464_v60 = vmul.f32 %v15006_v10, %v14817_v0 }
  0xfa   : >> { %v468_v62 = vmul.f32 %v15006_v10, %v14831_v8  ;;  %v467_v45 = vmul.f32 %v15006_v10, %v14833_v9  ;;  %v470_v8 = vmul.f32 %v15006_v10, %v14841_v12 }
  0xfb   : >> { %v14991_v32 = vpop.permute.xlu1 %804  ;;  %v14993_v33 = vpop.permute.xlu0 %799 }
  0xfc   : >> { %1356 = vperm.xlu1 %14529, %v14848_v14   ;;  %1351 = vperm.xlu0 %14528, %v14851_v15  }
  0xff   : >> { %v14997_v55 = vpop.permute.xlu1 %814  ;;  %v14999_v42 = vpop.permute.xlu0 %809 }
 0x100   : >> { %1366 = vperm.xlu1 %14529, %v14860_v18   ;;  %1361 = vperm.xlu0 %14528, %v14863_v19   ;;  %v15019_v18 = vld [vmem:[%s18210_s2] ss:$0 sm:$0xff]  ;;  %v459_v19 = vmul.f32 %v15006_v10, %v14807_v61  ;;  %v465_v61 = vmul.f32 %v15006_v10, %v14827_v5 }
 0x101   : >> { %18261 = vst [vmem:[#allocation17_spill] sm:$0xff] %v15019_v18  ;;  %v477_v0 = vadd.f32 %v15019_v18, %v461_v54  ;;  %v476_v5 = vadd.f32 %v15019_v18, %v460_v28  ;;  %v9920_v54 = vld [vmem:[%s14667_s21 + $0xf9] sm:$0xff]  ;;  %v480_v9 = vadd.f32 %v15019_v18, %v464_v60  ;;  %v474_v28 = vmul.f32 %v15006_v10, %v14865_v20 }
 0x102   : >> { %v473_v60 = vmul.f32 %v15006_v10, %v14867_v21  ;;  %v15082_v20 = vadd.f32 %v15019_v18, %v467_v45 }
 0x103   : >> { %v15010_v14 = vpop.permute.xlu1 %824  ;;  %v15012_v15 = vpop.permute.xlu0 %819 }
 0x104   : >> { %1376 = vperm.xlu1 %14529, %v9916_v11   ;;  %1371 = vperm.xlu0 %14528, %v9915_v43   ;;  %v463_v11 = vmul.f32 %v15006_v10, %v14819_v1  ;;  %v466_v43 = vmul.f32 %v15006_v10, %v14825_v4  ;;  %v475_v1 = vadd.f32 %v15019_v18, %v459_v19 }
 0x105   : >> { %v478_v4 = vadd.f32 %v15019_v18, %v462_v29  ;;  %v15070_v29 = vadd.f32 %v15019_v18, %v465_v61  ;;  %v15073_v19 = vadd.f32 %v15019_v18, %v468_v62  ;;  %18266 = vst [vmem:[#allocation22_spill] sm:$0xff] %v15082_v20  ;;  %v15089_v62 = vadd.f32 %v15019_v18, %v470_v8  ;;  %v9921_v20 = vld [vmem:[%s14667_s21 + $0x101] sm:$0xff] }
 0x106   : >> { %v15067_v12 = vadd.f32 %v15019_v18, %v466_v43  ;;  %v472_v43 = vmul.f32 %v15006_v10, %v14853_v16 }
 0x107   : >> { %v15039_v63 = vpop.permute.xlu1 %834  ;;  %v15041_v39 = vpop.permute.xlu0 %829  ;;  %18267 = vst [vmem:[#allocation23_spill] sm:$0xff] %v15089_v62 }
 0x108   : >> { %18262 = vst [vmem:[#allocation18_spill] sm:$0xff] %v15039_v63  ;;  %18263 = vst [vmem:[#allocation19_spill] sm:$0xff] %v15041_v39  ;;  %1386 = vperm.xlu1 %14529, %v9918_v7   ;;  %1381 = vperm.xlu0 %14528, %v9917_v6   ;;  %v15054_v39 = vld [vmem:[%s18209_s1 + $0x1] ss:$0 sm:$0xff]  ;;  %v9919_v63 = vld [vmem:[%s14667_s21 + $0xf1] sm:$0xff]  ;;  %v15060_v6 = vadd.f32 %v15019_v18, %v463_v11  ;;  %v469_v7 = vmul.f32 %v15006_v10, %v14843_v13 }
 0x109   : >> { %v598_v61 = vmul.f32 %v15054_v39, %v14871_v22  ;;  %v597_v21 = vmul.f32 %v15054_v39, %v14873_v23  ;;  %v611_v45 = vmul.f32 %v15054_v39, %v14933_v47  ;;  %v490_v22 = vadd.f32 %v15019_v18, %v474_v28  ;;  %v15110_v23 = vld [vmem:[%s18209_s1 + $0x2] ss:$0 sm:$0xff] }
 0x10a   : >> { %v15100_v16 = vadd.f32 %v15019_v18, %v469_v7  ;;  %v599_v8 = vmul.f32 %v15054_v39, %v14879_v25  ;;  %v602_v47 = vmul.f32 %v15054_v39, %v14883_v26  ;;  %v15124_v28 = vadd.f32 %v15019_v18, %v472_v43  ;;  %v15133_v26 = vld [vmem:[%s18209_s1 + $0x3] ss:$0 sm:$0xff]  ;;  %v9924_v43 = vld [vmem:[%s14667_s21 + $0x119] sm:$0xff] }
 0x10b   : >> { %v15077_v11 = vpop.permute.xlu1 %844  ;;  %v15079_v13 = vpop.permute.xlu0 %839 }
 0x10c   : >> { %18264 = vst [vmem:[#allocation20_spill] sm:$0xff] %v15077_v11  ;;  %18265 = vst [vmem:[#allocation21_spill] sm:$0xff] %v15079_v13  ;;  %1396 = vperm.xlu1 %14529, %v9920_v54   ;;  %1391 = vperm.xlu0 %14528, %v9919_v63   ;;  %v612_v13 = vmul.f32 %v15054_v39, %v14931_v46  ;;  %v9922_v11 = vld [vmem:[%s14667_s21 + $0x109] sm:$0xff]  ;;  %v600_v63 = vmul.f32 %v15054_v39, %v14877_v24 }
 0x10d   : >> { %18268 = vst [vmem:[#allocation24_spill] sm:$0xff] %v15100_v16  ;;  %v489_v46 = vadd.f32 %v15019_v18, %v473_v60  ;;  %v750_v54 = vmul.f32 %v15110_v23, %v14981_v56  ;;  %v749_v24 = vmul.f32 %v15110_v23, %v14983_v57  ;;  %18271 = vst [vmem:[#allocation27_spill] sm:$0xff] %v15124_v28  ;;  %v9923_v28 = vld [vmem:[%s14667_s21 + $0x111] sm:$0xff] }
 0x10e   : >> { %v15128_v60 = vmul.f32 %v15006_v10, %v14855_v17  ;;  %v614_v16 = vadd.f32 %v598_v61, %v476_v5  ;;  %v613_v56 = vadd.f32 %v597_v21, %v475_v1  ;;  %v628_v57 = vadd.f32 %v612_v13, %v490_v22 }
 0x10f   : >> { %v15119_v7 = vpop.permute.xlu1 %854  ;;  %v15121_v25 = vpop.permute.xlu0 %849  ;;  %v616_v18 = vadd.f32 %v600_v63, %v478_v4  ;;  %v615_v62 = vadd.f32 %v599_v8, %v477_v0  ;;  %v601_v17 = vmul.f32 %v15054_v39, %v14885_v27  ;;  %v735_v10 = vmul.f32 %v15110_v23, %v14939_v49 }
 0x110   : >> { %18269 = vst [vmem:[#allocation25_spill] sm:$0xff] %v15119_v7  ;;  %18270 = vst [vmem:[#allocation26_spill] sm:$0xff] %v15121_v25  ;;  %1406 = vperm.xlu1 %14529, %v9922_v11   ;;  %1401 = vperm.xlu0 %14528, %v9921_v20   ;;  %v627_v7 = vadd.f32 %v611_v45, %v489_v46  ;;  %v736_v25 = vmul.f32 %v15110_v23, %v14937_v48 }
 0x111   : >> { %v618_v5 = vadd.f32 %v602_v47, %v480_v9  ;;  %v766_v61 = vadd.f32 %v750_v54, %v628_v57  ;;  %v874_v1 = vmul.f32 %v15133_v26, %v14985_v58  ;;  %v873_v48 = vmul.f32 %v15133_v26, %v14987_v59  ;;  %v15158_v59 = vld [vmem:[%s18209_s1 + $0x4] ss:$0 sm:$0xff] }
 0x112   : >> { %v765_v11 = vadd.f32 %v749_v24, %v627_v7  ;;  %v604_v27 = vmul.f32 %v15054_v39, %v14891_v30  ;;  %v752_v49 = vadd.f32 %v736_v25, %v614_v16  ;;  %v738_v9 = vmul.f32 %v15110_v23, %v14943_v50 }
 0x113   : >> { %v865_v13 = vpop.permute.xlu1 %864  ;;  %v860_v20 = vpop.permute.xlu0 %859  ;;  %v737_v58 = vmul.f32 %v15110_v23, %v14945_v51  ;;  %v617_v21 = vadd.f32 %v601_v17, %v15060_v6  ;;  %v751_v45 = vadd.f32 %v735_v10, %v613_v56  ;;  %v603_v30 = vmul.f32 %v15054_v39, %v14893_v31 }
 0x114   : >> { %v888_v4 = vmul.f32 %v15133_v26, %v865_v13  ;;  %v887_v0 = vmul.f32 %v15133_v26, %v860_v20  ;;  %1416 = vperm.xlu1 %14529, %v9924_v43   ;;  %1411 = vperm.xlu0 %14528, %v9923_v28   ;;  %v890_v16 = vadd.f32 %v874_v1, %v752_v49  ;;  %v18272_v20 = vld [vmem:[#allocation10_spill] sm:$0xff] }
 0x115   : >> { %v876_v50 = vmul.f32 %v15133_v26, %v14991_v32  ;;  %v875_v51 = vmul.f32 %v15133_v26, %v14993_v33  ;;  %v889_v47 = vadd.f32 %v873_v48, %v751_v45  ;;  %v620_v31 = vadd.f32 %v604_v27, %v15067_v12  ;;  %v9933_v49 = vld [vmem:[%s14667_s21 + $0xd2] sm:$0xff] }
 0x116   : >> { %v15161_v22 = vadd.f32 %v888_v4, %v766_v61  ;;  %v15163_v63 = vadd.f32 %v887_v0, %v765_v11  ;;  %v754_v24 = vadd.f32 %v738_v9, %v616_v18  ;;  %v753_v7 = vadd.f32 %v737_v58, %v615_v62  ;;  %v18275_v9 = vld [vmem:[#allocation22_spill] sm:$0xff] }
 0x117   : >> { %v933_v8 = vpop.permute.xlu1 %932  ;;  %v928_v46 = vpop.permute.xlu0 %927  ;;  %v740_v32 = vmul.f32 %v15110_v23, %v14949_v52  ;;  %v606_v33 = vmul.f32 %v15054_v39, %v14897_v34  ;;  %v739_v25 = vmul.f32 %v15110_v23, %v14951_v53  ;;  %v878_v18 = vmul.f32 %v15133_v26, %v14997_v55 }
 0x118   : >> { %v1012_v6 = vmul.f32 %v15158_v59, %v933_v8  ;;  %v1011_v54 = vmul.f32 %v15158_v59, %v928_v46  ;;  %1484 = vperm.xlu1 %14529, %v14902_v36   ;;  %1479 = vperm.xlu0 %14528, %v14905_v37   ;;  %v619_v36 = vadd.f32 %v603_v30, %v15070_v29  ;;  %v18278_v46 = vld [vmem:[#allocation18_spill] sm:$0xff] }
 0x119   : >> { %v892_v37 = vadd.f32 %v876_v50, %v754_v24  ;;  %v891_v57 = vadd.f32 %v875_v51, %v753_v7  ;;  %v877_v52 = vmul.f32 %v15133_v26, %v14999_v42  ;;  %v605_v29 = vmul.f32 %v15054_v39, %v14899_v35 }
 0x11a   : >> { %v15182_v28 = vadd.f32 %v1012_v6, %v890_v16  ;;  %v15184_v56 = vadd.f32 %v1011_v54, %v889_v47  ;;  %v756_v43 = vadd.f32 %v740_v32, %v618_v5  ;;  %v742_v55 = vmul.f32 %v15110_v23, %v14957_v2  ;;  %v18277_v16 = vld [vmem:[#allocation23_spill] sm:$0xff] }
 0x11b   : >> { %v943_v12 = vpop.permute.xlu1 %942  ;;  %v938_v62 = vpop.permute.xlu0 %937  ;;  %v741_v17 = vmul.f32 %v15110_v23, %v14959_v3  ;;  %v622_v42 = vadd.f32 %v606_v33, %v15073_v19  ;;  %v755_v10 = vadd.f32 %v739_v25, %v617_v21  ;;  %v879_v2 = vmul.f32 %v15133_v26, %v15012_v15  ;;  %v9934_v15 = vld [vmem:[%s14667_s21 + $0xda] sm:$0xff] }
 0x11c   : >> { %v1014_v34 = vmul.f32 %v15158_v59, %v943_v12  ;;  %v1013_v53 = vmul.f32 %v15158_v59, %v938_v62  ;;  %1494 = vperm.xlu1 %14529, %v14914_v40   ;;  %1489 = vperm.xlu0 %14528, %v14917_v41   ;;  %v608_v40 = vmul.f32 %v15054_v39, %v14907_v38  ;;  %v18273_v38 = vld [vmem:[#allocation7_spill] sm:$0xff]  ;;  %v18276_v21 = vld [vmem:[#allocation12_spill] sm:$0xff]  ;;  %v9936_v62 = vld [vmem:[%s14667_s21 + $0xea] sm:$0xff] }
 0x11d   : >> { %v894_v35 = vadd.f32 %v878_v18, %v756_v43  ;;  %v880_v41 = vmul.f32 %v15133_v26, %v15010_v14  ;;  %v893_v19 = vadd.f32 %v877_v52, %v755_v10  ;;  %v607_v48 = vmul.f32 %v15054_v39, %v18273_v38  ;;  %v18274_v14 = vld [vmem:[#allocation11_spill] sm:$0xff]  ;;  %v18280_v33 = vld [vmem:[#allocation24_spill] sm:$0xff]  ;;  %v18282_v18 = vld [vmem:[#allocation14_spill] sm:$0xff] }
 0x11e   : >> { %v15202_v61 = vadd.f32 %v1014_v34, %v892_v37  ;;  %v15204_v11 = vadd.f32 %v1013_v53, %v891_v57  ;;  %v758_v4 = vadd.f32 %v742_v55, %v620_v31  ;;  %v757_v0 = vadd.f32 %v741_v17, %v619_v36  ;;  %v18279_v31 = vld [vmem:[#allocation19_spill] sm:$0xff]  ;;  %v18281_v37 = vld [vmem:[#allocation13_spill] sm:$0xff]  ;;  %v18283_v34 = vld [vmem:[#allocation8_spill] sm:$0xff] }
 0x11f   : >> { %v953_v3 = vpop.permute.xlu1 %952  ;;  %v948_v5 = vpop.permute.xlu0 %947  ;;  %v744_v27 = vmul.f32 %v15110_v23, %v18274_v14  ;;  %v621_v58 = vadd.f32 %v605_v29, %v18275_v9  ;;  %v743_v45 = vmul.f32 %v15110_v23, %v18276_v21  ;;  %v624_v50 = vadd.f32 %v608_v40, %v18277_v16  ;;  %v9935_v52 = vld [vmem:[%s14667_s21 + $0xe2] sm:$0xff]  ;;  %v9938_v14 = vld [vmem:[%s14667_s21 + $0xfa] sm:$0xff] }
 0x120   : >> { %v1016_v1 = vmul.f32 %v15158_v59, %v953_v3  ;;  %v1015_v13 = vmul.f32 %v15158_v59, %v948_v5  ;;  %1504 = vperm.xlu1 %14529, %v14926_v44   ;;  %1499 = vperm.xlu0 %14528, %v18272_v20   ;;  %v896_v51 = vadd.f32 %v880_v41, %v758_v4  ;;  %v18284_v17 = vld [vmem:[#allocation9_spill] sm:$0xff]  ;;  %v18285_v40 = vld [vmem:[#allocation20_spill] sm:$0xff]  ;;  %v18288_v4 = vld [vmem:[#allocation15_spill] sm:$0xff] }
 0x121   : >> { %v895_v8 = vadd.f32 %v879_v2, %v757_v0  ;;  %v882_v47 = vmul.f32 %v15133_v26, %v18278_v46  ;;  %v881_v24 = vmul.f32 %v15133_v26, %v18279_v31  ;;  %v623_v25 = vadd.f32 %v607_v48, %v18280_v33  ;;  %v18286_v41 = vld [vmem:[#allocation21_spill] sm:$0xff]  ;;  %v18290_v9 = vld [vmem:[#allocation16_spill] sm:$0xff] }
 0x122   : >> { %v15225_v30 = vadd.f32 %v1016_v1, %v894_v35  ;;  %v15227_v44 = vadd.f32 %v1015_v13, %v893_v19  ;;  %v760_v36 = vadd.f32 %v744_v27, %v622_v42  ;;  %v746_v57 = vmul.f32 %v15110_v23, %v18281_v37  ;;  %v18287_v20 = vld [vmem:[#allocation17_spill] sm:$0xff]  ;;  %v9937_v27 = vld [vmem:[%s14667_s21 + $0xf2] sm:$0xff] }
 0x123   : >> { %v963_v6 = vpop.permute.xlu1 %962  ;;  %v958_v54 = vpop.permute.xlu0 %957  ;;  %v745_v12 = vmul.f32 %v15110_v23, %v18282_v18  ;;  %v610_v53 = vmul.f32 %v15054_v39, %v18283_v34  ;;  %v759_v29 = vadd.f32 %v743_v45, %v621_v58  ;;  %v609_v42 = vmul.f32 %v15054_v39, %v18284_v17  ;;  %v9941_v34 = vld [vmem:[%s14667_s21 + $0x112] sm:$0xff] }
 0x124   : >> { %v1018_v7 = vmul.f32 %v15158_v59, %v963_v6  ;;  %v1017_v32 = vmul.f32 %v15158_v59, %v958_v54  ;;  %1514 = vperm.xlu1 %14529, %v9934_v15   ;;  %1509 = vperm.xlu0 %14528, %v9933_v49   ;;  %v898_v10 = vadd.f32 %v882_v47, %v760_v36  ;;  %v18289_v15 = vld [vmem:[#allocation27_spill] sm:$0xff]  ;;  %v18292_v6 = vld [vmem:[#allocation26_spill] sm:$0xff] }
 0x125   : >> { %v884_v35 = vmul.f32 %v15133_v26, %v18285_v40  ;;  %v883_v2 = vmul.f32 %v15133_v26, %v18286_v41  ;;  %v897_v19 = vadd.f32 %v881_v24, %v759_v29  ;;  %v487_v39 = vadd.f32 %v18287_v20, %v15128_v60 }
 0x126   : >> { %v15245_v43 = vadd.f32 %v1018_v7, %v896_v51  ;;  %v15247_v55 = vadd.f32 %v1017_v32, %v895_v8  ;;  %v762_v38 = vadd.f32 %v746_v57, %v624_v50  ;;  %v761_v48 = vadd.f32 %v745_v12, %v623_v25  ;;  %v18291_v51 = vld [vmem:[#allocation25_spill] sm:$0xff] }
 0x127   : >> { %v973_v3 = vpop.permute.xlu1 %972  ;;  %v968_v5 = vpop.permute.xlu0 %967  ;;  %v748_v0 = vmul.f32 %v15110_v23, %v18288_v4  ;;  %v626_v49 = vadd.f32 %v610_v53, %v18289_v15  ;;  %v747_v58 = vmul.f32 %v15110_v23, %v18290_v9  ;;  %v625_v16 = vadd.f32 %v609_v42, %v487_v39  ;;  %v9940_v7 = vld [vmem:[%s14667_s21 + $0x10a] sm:$0xff]  ;;  %v9939_v32 = vld [vmem:[%s14667_s21 + $0x102] sm:$0xff] }
 0x128   : >> { %v1020_v1 = vmul.f32 %v15158_v59, %v973_v3  ;;  %v1019_v13 = vmul.f32 %v15158_v59, %v968_v5  ;;  %1524 = vperm.xlu1 %14529, %v9936_v62   ;;  %1519 = vperm.xlu0 %14528, %v9935_v52   ;;  %v900_v60 = vadd.f32 %v884_v35, %v762_v38  ;;  %v9942_v52 = vld [vmem:[%s14667_s21 + $0x11a] sm:$0xff]  ;;  %v9890_v35 = vld [vmem:[%s18209_s1 + $0x5] ss:$0 sm:$0xff] }
 0x129   : >> { %v899_v50 = vadd.f32 %v883_v2, %v761_v48  ;;  %v886_v8 = vmul.f32 %v15133_v26, %v18291_v51  ;;  %v885_v54 = vmul.f32 %v15133_v26, %v18292_v6  ;;  %v764_v24 = vadd.f32 %v748_v0, %v626_v49 }
 0x12a   : >> { %v15266_v21 = vadd.f32 %v1020_v1, %v898_v10  ;;  %v15268_v45 = vadd.f32 %v1019_v13, %v897_v19  ;;  %v763_v33 = vadd.f32 %v747_v58, %v625_v16 }
 0x12b   : >> { %v983_v46 = vpop.permute.xlu1 %982  ;;  %v978_v47 = vpop.permute.xlu0 %977  ;;  %v902_v37 = vadd.f32 %v886_v8, %v764_v24 }
 0x12c   : >> { %v1022_v31 = vmul.f32 %v15158_v59, %v983_v46  ;;  %v1021_v23 = vmul.f32 %v15158_v59, %v978_v47  ;;  %1534 = vperm.xlu1 %14529, %v9938_v14   ;;  %1529 = vperm.xlu0 %14528, %v9937_v27   ;;  %v901_v12 = vadd.f32 %v885_v54, %v763_v33 }
 0x12e   : >> { %v1038_v25 = vadd.f32 %v1022_v31, %v900_v60  ;;  %v1037_v36 = vadd.f32 %v1021_v23, %v899_v50 }
 0x12f   : >> { %v993_v57 = vpop.permute.xlu1 %992  ;;  %v988_v18 = vpop.permute.xlu0 %987 }
 0x130   : >> { %v1024_v26 = vmul.f32 %v15158_v59, %v993_v57  ;;  %v1023_v62 = vmul.f32 %v15158_v59, %v988_v18  ;;  %1544 = vperm.xlu1 %14529, %v9940_v7   ;;  %1539 = vperm.xlu0 %14528, %v9939_v32  }
 0x132   : >> { %v1040_v53 = vadd.f32 %v1024_v26, %v902_v37  ;;  %v1039_v29 = vadd.f32 %v1023_v62, %v901_v12 }
 0x133   : >> { %v1003_v17 = vpop.permute.xlu1 %1002  ;;  %v998_v42 = vpop.permute.xlu0 %997 }
 0x134   : >> { %v1026_v10 = vmul.f32 %v15158_v59, %v1003_v17  ;;  %v1025_v40 = vmul.f32 %v15158_v59, %v998_v42  ;;  %1554 = vperm.xlu1 %14529, %v9942_v52   ;;  %1549 = vperm.xlu0 %14528, %v9941_v34  }
 0x136   : >> { %v1042_v41 = vadd.f32 %v1026_v10, %v15161_v22  ;;  %v1041_v2 = vadd.f32 %v1025_v40, %v15163_v63 }
 0x137   : >> { %v1071_v3 = vpop.permute.xlu1 %1070  ;;  %v1066_v5 = vpop.permute.xlu0 %1065 }
 0x138   : >> { %v1150_v19 = vmul.f32 %v9890_v35, %v1071_v3  ;;  %v1149_v1 = vmul.f32 %v9890_v35, %v1066_v5 }
 0x13a   : >> { %v15290_v13 = vadd.f32 %v1150_v19, %v15182_v28  ;;  %v15293_v20 = vadd.f32 %v1149_v1, %v15184_v56 }
 0x13b   : >> { %v1081_v59 = vpop.permute.xlu1 %1080  ;;  %v1076_v39 = vpop.permute.xlu0 %1075 }
 0x13c   : >> { %v1152_v38 = vmul.f32 %v9890_v35, %v1081_v59  ;;  %v1151_v48 = vmul.f32 %v9890_v35, %v1076_v39 }
 0x13e   : >> { %v15296_v4 = vadd.f32 %v1152_v38, %v15202_v61  ;;  %v15299_v22 = vadd.f32 %v1151_v48, %v15204_v11 }
 0x13f   : >> { %v1091_v63 = vpop.permute.xlu1 %1090  ;;  %v1086_v0 = vpop.permute.xlu0 %1085 }
 0x140   : >> { %v1154_v14 = vmul.f32 %v9890_v35, %v1091_v63  ;;  %v1153_v27 = vmul.f32 %v9890_v35, %v1086_v0 }
 0x142   : >> { %v15302_v28 = vadd.f32 %v1154_v14, %v15225_v30  ;;  %v15305_v56 = vadd.f32 %v1153_v27, %v15227_v44 }
 0x143   : >> { %v1101_v15 = vpop.permute.xlu1 %1100  ;;  %v1096_v49 = vpop.permute.xlu0 %1095 }
 0x144   : >> { %v1156_v9 = vmul.f32 %v9890_v35, %v1101_v15  ;;  %v1155_v58 = vmul.f32 %v9890_v35, %v1096_v49  ;;  %v15358_v15 = vld [vmem:[%s18209_s1 + $0x6] ss:$0 sm:$0xff] }
 0x146   : >> { %v15308_v61 = vadd.f32 %v1156_v9, %v15245_v43  ;;  %v15311_v11 = vadd.f32 %v1155_v58, %v15247_v55  ;;  %v15367_v58 = vld [vmem:[%s18209_s1 + $0x7] ss:$0 sm:$0xff] }
 0x147   : >> { %v1111_v16 = vpop.permute.xlu1 %1110  ;;  %v1106_v60 = vpop.permute.xlu0 %1105 }
 0x148   : >> { %v1158_v50 = vmul.f32 %v9890_v35, %v1111_v16  ;;  %v1157_v51 = vmul.f32 %v9890_v35, %v1106_v60 }
 0x14a   : >> { %v15314_v30 = vadd.f32 %v1158_v50, %v15266_v21  ;;  %v15317_v44 = vadd.f32 %v1157_v51, %v15268_v45 }
 0x14b   : >> { %v1121_v8 = vpop.permute.xlu1 %1120  ;;  %v1116_v46 = vpop.permute.xlu0 %1115 }
 0x14c   : >> { %v1160_v47 = vmul.f32 %v9890_v35, %v1121_v8  ;;  %v1159_v6 = vmul.f32 %v9890_v35, %v1116_v46 }
 0x14e   : >> { %v15319_v54 = vadd.f32 %v1160_v47, %v1038_v25  ;;  %v15321_v43 = vadd.f32 %v1159_v6, %v1037_v36 }
 0x14f   : >> { %v1131_v55 = vpop.permute.xlu1 %1130  ;;  %v1126_v31 = vpop.permute.xlu0 %1125 }
 0x150   : >> { %v1162_v23 = vmul.f32 %v9890_v35, %v1131_v55  ;;  %v1161_v24 = vmul.f32 %v9890_v35, %v1126_v31 }
 0x152   : >> { %v15323_v7 = vadd.f32 %v1162_v23, %v1040_v53  ;;  %v15325_v32 = vadd.f32 %v1161_v24, %v1039_v29  ;;  %v15384_v23 = vld [vmem:[%s18209_s1 + $0x8] ss:$0 sm:$0xff] }
 0x153   : >> { %v1141_v21 = vpop.permute.xlu1 %1140  ;;  %v1136_v33 = vpop.permute.xlu0 %1135 }
 0x154   : >> { %v1164_v45 = vmul.f32 %v9890_v35, %v1141_v21  ;;  %v1163_v37 = vmul.f32 %v9890_v35, %v1136_v33 }
 0x156   : >> { %v15327_v57 = vadd.f32 %v1164_v45, %v1042_v41  ;;  %v15329_v18 = vadd.f32 %v1163_v37, %v1041_v2 }
 0x157   : >> { %v1209_v25 = vpop.permute.xlu1 %1208  ;;  %v1204_v12 = vpop.permute.xlu0 %1203 }
 0x158   : >> { %v1288_v16 = vmul.f32 %v15358_v15, %v1209_v25  ;;  %v1287_v60 = vmul.f32 %v15358_v15, %v1204_v12 }
 0x15a   : >> { %v1304_v24 = vadd.f32 %v1288_v16, %v15290_v13  ;;  %v1303_v21 = vadd.f32 %v1287_v60, %v15293_v20 }
 0x15b   : >> { %v1219_v36 = vpop.permute.xlu1 %1218  ;;  %v1214_v26 = vpop.permute.xlu0 %1213 }
 0x15c   : >> { %v1290_v50 = vmul.f32 %v15358_v15, %v1219_v36  ;;  %v1289_v51 = vmul.f32 %v15358_v15, %v1214_v26 }
 0x15e   : >> { %v1306_v37 = vadd.f32 %v1290_v50, %v15296_v4  ;;  %v1305_v25 = vadd.f32 %v1289_v51, %v15299_v22 }
 0x15f   : >> { %v1229_v62 = vpop.permute.xlu1 %1228  ;;  %v1224_v52 = vpop.permute.xlu0 %1223 }
 0x160   : >> { %v1292_v55 = vmul.f32 %v15358_v15, %v1229_v62  ;;  %v1291_v31 = vmul.f32 %v15358_v15, %v1224_v52 }
 0x163   : >> { %v1239_v34 = vpop.permute.xlu1 %1238  ;;  %v1234_v17 = vpop.permute.xlu0 %1233 }
 0x164   : >> { %v1294_v33 = vmul.f32 %v15358_v15, %v1239_v34  ;;  %v1293_v45 = vmul.f32 %v15358_v15, %v1234_v17  ;;  %v1308_v34 = vadd.f32 %v1292_v55, %v15302_v28  ;;  %v1307_v17 = vadd.f32 %v1291_v31, %v15305_v56 }
 0x167   : >> { %v1249_v53 = vpop.permute.xlu1 %1248  ;;  %v1244_v42 = vpop.permute.xlu0 %1243 }
 0x168   : >> { %v1296_v12 = vmul.f32 %v15358_v15, %v1249_v53  ;;  %v1295_v36 = vmul.f32 %v15358_v15, %v1244_v42  ;;  %v1310_v53 = vadd.f32 %v1294_v33, %v15308_v61  ;;  %v1309_v42 = vadd.f32 %v1293_v45, %v15311_v11 }
 0x16a   : >> { %v1312_v60 = vadd.f32 %v1296_v12, %v15314_v30  ;;  %v1311_v50 = vadd.f32 %v1295_v36, %v15317_v44 }
 0x16b   : >> { %v15331_v29 = vpop.permute.xlu1 %1258  ;;  %v15333_v10 = vpop.permute.xlu0 %1253 }
 0x16c   : >> { %v1298_v30 = vmul.f32 %v15358_v15, %v15331_v29  ;;  %v1297_v44 = vmul.f32 %v15358_v15, %v15333_v10 }
 0x16f   : >> { %v15335_v40 = vpop.permute.xlu1 %1268  ;;  %v15337_v35 = vpop.permute.xlu0 %1263 }
 0x173   : >> { %v15339_v41 = vpop.permute.xlu1 %1278  ;;  %v15341_v2 = vpop.permute.xlu0 %1273 }
 0x177   : >> { %v1347_v3 = vpop.permute.xlu1 %1346  ;;  %v1342_v5 = vpop.permute.xlu0 %1341 }
 0x178   : >> { %v1426_v47 = vmul.f32 %v15367_v58, %v1347_v3  ;;  %v1425_v6 = vmul.f32 %v15367_v58, %v1342_v5 }
 0x17a   : >> { %v1442_v52 = vadd.f32 %v1426_v47, %v1304_v24  ;;  %v1441_v3 = vadd.f32 %v1425_v6, %v1303_v21 }
 0x17b   : >> { %v1357_v19 = vpop.permute.xlu1 %1356  ;;  %v1352_v1 = vpop.permute.xlu0 %1351 }
 0x17c   : >> { %v1428_v4 = vmul.f32 %v15367_v58, %v1357_v19  ;;  %v1427_v22 = vmul.f32 %v15367_v58, %v1352_v1 }
 0x17e   : >> { %v1444_v61 = vadd.f32 %v1428_v4, %v1306_v37  ;;  %v1443_v6 = vadd.f32 %v1427_v22, %v1305_v25 }
 0x17f   : >> { %v1367_v59 = vpop.permute.xlu1 %1366  ;;  %v1362_v39 = vpop.permute.xlu0 %1361 }
 0x180   : >> { %v1430_v51 = vmul.f32 %v15367_v58, %v1367_v59  ;;  %v1429_v28 = vmul.f32 %v15367_v58, %v1362_v39 }
 0x182   : >> { %v1446_v31 = vadd.f32 %v1430_v51, %v1308_v34  ;;  %v1445_v24 = vadd.f32 %v1429_v28, %v1307_v17  ;;  %v1299_v51 = vmul.f32 %v15358_v15, %v15337_v35 }
 0x183   : >> { %v15343_v38 = vpop.permute.xlu1 %1376  ;;  %v15345_v48 = vpop.permute.xlu0 %1371 }
 0x184   : >> { %v1432_v29 = vmul.f32 %v15367_v58, %v15343_v38  ;;  %v1431_v10 = vmul.f32 %v15367_v58, %v15345_v48 }
 0x186   : >> { %v1448_v22 = vadd.f32 %v1432_v29, %v1310_v53  ;;  %v1301_v29 = vmul.f32 %v15358_v15, %v15341_v2 }
 0x187   : >> { %v15347_v63 = vpop.permute.xlu1 %1386  ;;  %v15349_v0 = vpop.permute.xlu0 %1381 }
 0x188   : >> { %v1434_v38 = vmul.f32 %v15367_v58, %v15347_v63  ;;  %v1433_v48 = vmul.f32 %v15367_v58, %v15349_v0 }
 0x18b   : >> { %v15351_v14 = vpop.permute.xlu1 %1396  ;;  %v15353_v27 = vpop.permute.xlu0 %1391 }
 0x18f   : >> { %v15360_v49 = vpop.permute.xlu1 %1406  ;;  %v15362_v9 = vpop.permute.xlu0 %1401 }
 0x193   : >> { %v15373_v8 = vpop.permute.xlu1 %1416  ;;  %v15375_v46 = vpop.permute.xlu0 %1411 }
 0x197   : >> { %v1485_v26 = vpop.permute.xlu1 %1484  ;;  %v1480_v62 = vpop.permute.xlu0 %1479 }
 0x198   : >> { %v1564_v13 = vmul.f32 %v15384_v23, %v1485_v26  ;;  %v1563_v20 = vmul.f32 %v15384_v23, %v1480_v62  ;;  %v1314_v62 = vadd.f32 %v1298_v30, %v15319_v54  ;;  %v1315_v30 = vadd.f32 %v1299_v51, %v15325_v32 }
 0x19a   : >> { %v1580_v5 = vadd.f32 %v1564_v13, %v1442_v52  ;;  %v1579_v16 = vadd.f32 %v1563_v20, %v1441_v3  ;;  %v1313_v52 = vadd.f32 %v1297_v44, %v15321_v43 }
 0x19b   : >> { %v1495_v47 = vpop.permute.xlu1 %1494  ;;  %v1490_v56 = vpop.permute.xlu0 %1489 }
 0x19c   : >> { %vm1596_vm2 = vcmp.gt.f32.partialorder %v1580_v5, 0.0  ;;  %v1612_v19 = vmul.f32 0.01, %v1580_v5  ;;  %vm1595_vm3 = vcmp.gt.f32.partialorder %v1579_v16, 0.0  ;;  %v1611_v1 = vmul.f32 0.01, %v1579_v16 }
 0x19d   : >> { %v1566_v11 = vmul.f32 %v15384_v23, %v1495_v47  ;;  %v1565_v55 = vmul.f32 %v15384_v23, %v1490_v56  ;;  %v1450_v56 = vadd.f32 %v1434_v38, %v1312_v60 }
 0x19e   : >> { %v1628_v59 = vsel %vm1596_vm2, %v1580_v5, %v1612_v19  ;;  %v1627_v39 = vsel %vm1595_vm3, %v1579_v16, %v1611_v1  ;;  %v1447_v5 = vadd.f32 %v1431_v10, %v1309_v42  ;;  %v1300_v16 = vmul.f32 %v15358_v15, %v15335_v40 }
 0x19f   : >> { %1645 = vst.msk [vmem:[%s15413_s26 + $0x8] sm:$0xff] %vm333_vm0, %v1628_v59  ;;  %1644 = vst.msk [vmem:[%s15413_s26] sm:$0xff] %vm333_vm0, %v1627_v39  ;;  %v1582_v21 = vadd.f32 %v1566_v11, %v1444_v61  ;;  %v1581_v33 = vadd.f32 %v1565_v55, %v1443_v6  ;;  %v1505_v45 = vpop.permute.xlu1 %1504  ;;  %v1500_v37 = vpop.permute.xlu0 %1499  ;;  %v1449_v19 = vadd.f32 %v1433_v48, %v1311_v50 }
 0x1a0   : >> { %v1568_v25 = vmul.f32 %v15384_v23, %v1505_v45  ;;  %v1567_v12 = vmul.f32 %v15384_v23, %v1500_v37  ;;  %v1436_v6 = vmul.f32 %v15367_v58, %v15351_v14  ;;  %v1435_v40 = vmul.f32 %v15367_v58, %v15353_v27 }
 0x1a1   : >> { %vm1598_vm4 = vcmp.gt.f32.partialorder %v1582_v21, 0.0  ;;  %v1614_v36 = vmul.f32 0.01, %v1582_v21  ;;  %vm1597_vm5 = vcmp.gt.f32.partialorder %v1581_v33, 0.0  ;;  %v1613_v26 = vmul.f32 0.01, %v1581_v33 }
 0x1a2   : >> { %v1584_v3 = vadd.f32 %v1568_v25, %v1446_v31  ;;  %v1583_v13 = vadd.f32 %v1567_v12, %v1445_v24  ;;  %v1316_v55 = vadd.f32 %v1300_v16, %v15323_v7  ;;  %v1438_v14 = vmul.f32 %v15367_v58, %v15360_v49 }
 0x1a3   : >> { %v1630_v20 = vsel %vm1598_vm4, %v1582_v21, %v1614_v36  ;;  %v1629_v34 = vsel %vm1597_vm5, %v1581_v33, %v1613_v26  ;;  %v1515_v17 = vpop.permute.xlu1 %1514  ;;  %v1510_v4 = vpop.permute.xlu0 %1509  ;;  %v1437_v27 = vmul.f32 %v15367_v58, %v15362_v9  ;;  %v1452_v33 = vadd.f32 %v1436_v6, %v1314_v62 }
 0x1a4   : >> { %1647 = vst.msk [vmem:[%s15413_s26 + $0x18] sm:$0xff] %vm333_vm0, %v1630_v20  ;;  %1646 = vst.msk [vmem:[%s15413_s26 + $0x10] sm:$0xff] %vm333_vm0, %v1629_v34  ;;  %vm1600_vm6 = vcmp.gt.f32.partialorder %v1584_v3, 0.0  ;;  %v1616_v54 = vmul.f32 0.01, %v1584_v3  ;;  %vm1599_vm7 = vcmp.gt.f32.partialorder %v1583_v13, 0.0  ;;  %v1570_v63 = vmul.f32 %v15384_v23, %v1515_v17 }
 0x1a5   : >> { %v1615_v43 = vmul.f32 0.01, %v1583_v13  ;;  %v1569_v0 = vmul.f32 %v15384_v23, %v1510_v4  ;;  %v1451_v45 = vadd.f32 %v1435_v40, %v1313_v52  ;;  %v1302_v37 = vmul.f32 %v15358_v15, %v15339_v41 }
 0x1a6   : >> { %v1632_v28 = vsel %vm1600_vm6, %v1584_v3, %v1616_v54  ;;  %v1586_v53 = vadd.f32 %v1570_v63, %v1448_v22  ;;  %v1454_v12 = vadd.f32 %v1438_v14, %v1316_v55  ;;  %v1453_v36 = vadd.f32 %v1437_v27, %v1315_v30 }
 0x1a7   : >> { %v1631_v47 = vsel %vm1599_vm7, %v1583_v13, %v1615_v43  ;;  %1649 = vst.msk [vmem:[%s15413_s26 + $0x28] sm:$0xff] %vm333_vm0, %v1632_v28  ;;  %v1585_v42 = vadd.f32 %v1569_v0, %v1447_v5  ;;  %v1525_v1 = vpop.permute.xlu1 %1524  ;;  %v1520_v61 = vpop.permute.xlu0 %1519  ;;  %v1440_v13 = vmul.f32 %v15367_v58, %v15373_v8  ;;  %v1439_v41 = vmul.f32 %v15367_v58, %v15375_v46 }
 0x1a8   : >> { %1648 = vst.msk [vmem:[%s15413_s26 + $0x20] sm:$0xff] %vm333_vm0, %v1631_v47  ;;  %v1572_v35 = vmul.f32 %v15384_v23, %v1525_v1  ;;  %v1571_v60 = vmul.f32 %v15384_v23, %v1520_v61  ;;  %vm1602_vm8 = vcmp.gt.f32.partialorder %v1586_v53, 0.0  ;;  %v1618_v50 = vmul.f32 0.01, %v1586_v53 }
 0x1a9   : >> { %vm1601_vm9 = vcmp.gt.f32.partialorder %v1585_v42, 0.0  ;;  %v1617_v11 = vmul.f32 0.01, %v1585_v42  ;;  %v1318_v17 = vadd.f32 %v1302_v37, %v15327_v57  ;;  %v1317_v4 = vadd.f32 %v1301_v29, %v15329_v18 }
 0x1aa   : >> { %v1588_v44 = vadd.f32 %v1572_v35, %v1450_v56  ;;  %v1587_v59 = vadd.f32 %v1571_v60, %v1449_v19  ;;  %v1634_v39 = vsel %vm1602_vm8, %v1586_v53, %v1618_v50 }
 0x1ab   : >> { %v1633_v31 = vsel %vm1601_vm9, %v1585_v42, %v1617_v11  ;;  %v1535_v24 = vpop.permute.xlu1 %1534  ;;  %v1530_v21 = vpop.permute.xlu0 %1529  ;;  %1651 = vst.msk [vmem:[%s15413_s26 + $0x38] sm:$0xff] %vm333_vm0, %v1634_v39  ;;  %v1456_v5 = vadd.f32 %v1440_v13, %v1318_v17  ;;  %v1455_v63 = vadd.f32 %v1439_v41, %v1317_v4 }
 0x1ac   : >> { %1650 = vst.msk [vmem:[%s15413_s26 + $0x30] sm:$0xff] %vm333_vm0, %v1633_v31  ;;  %vm1604_vm10 = vcmp.gt.f32.partialorder %v1588_v44, 0.0  ;;  %v1620_v7 = vmul.f32 0.01, %v1588_v44  ;;  %vm1603_vm11 = vcmp.gt.f32.partialorder %v1587_v59, 0.0  ;;  %v1574_v49 = vmul.f32 %v15384_v23, %v1535_v24 }
 0x1ad   : >> { %v1619_v32 = vmul.f32 0.01, %v1587_v59  ;;  %v1573_v9 = vmul.f32 %v15384_v23, %v1530_v21 }
 0x1ae   : >> { %v1636_v10 = vsel %vm1604_vm10, %v1588_v44, %v1620_v7  ;;  %v1590_v26 = vadd.f32 %v1574_v49, %v1452_v33 }
 0x1af   : >> { %v1635_v25 = vsel %vm1603_vm11, %v1587_v59, %v1619_v32  ;;  %1653 = vst.msk [vmem:[%s15413_s26 + $0x48] sm:$0xff] %vm333_vm0, %v1636_v10  ;;  %v1589_v62 = vadd.f32 %v1573_v9, %v1451_v45  ;;  %v1545_v52 = vpop.permute.xlu1 %1544  ;;  %v1540_v3 = vpop.permute.xlu0 %1539 }
 0x1b0   : >> { %1652 = vst.msk [vmem:[%s15413_s26 + $0x40] sm:$0xff] %vm333_vm0, %v1635_v25  ;;  %v1576_v2 = vmul.f32 %v15384_v23, %v1545_v52  ;;  %v1575_v15 = vmul.f32 %v15384_v23, %v1540_v3  ;;  %vm1606_vm12 = vcmp.gt.f32.partialorder %v1590_v26, 0.0  ;;  %v1622_v38 = vmul.f32 0.01, %v1590_v26 }
 0x1b1   : >> { %vm1605_vm13 = vcmp.gt.f32.partialorder %v1589_v62, 0.0  ;;  %v1621_v48 = vmul.f32 0.01, %v1589_v62 }
 0x1b2   : >> { %v1592_v20 = vadd.f32 %v1576_v2, %v1454_v12  ;;  %v1591_v34 = vadd.f32 %v1575_v15, %v1453_v36  ;;  %v1638_v8 = vsel %vm1606_vm12, %v1590_v26, %v1622_v38 }
 0x1b3   : >> { %v1637_v54 = vsel %vm1605_vm13, %v1589_v62, %v1621_v48  ;;  %v1555_v58 = vpop.permute.xlu1 %1554  ;;  %v1550_v46 = vpop.permute.xlu0 %1549  ;;  %1655 = vst.msk [vmem:[%s15413_s26 + $0x58] sm:$0xff] %vm333_vm0, %v1638_v8 }
 0x1b4   : >> { %1654 = vst.msk [vmem:[%s15413_s26 + $0x50] sm:$0xff] %vm333_vm0, %v1637_v54  ;;  %vm1608_vm14 = vcmp.gt.f32.partialorder %v1592_v20, 0.0  ;;  %v1624_v43 = vmul.f32 0.01, %v1592_v20  ;;  %vm1607_vm15 = vcmp.gt.f32.partialorder %v1591_v34, 0.0  ;;  %v1578_v57 = vmul.f32 %v15384_v23, %v1555_v58 }
 0x1b5   : >> { %v1623_v22 = vmul.f32 0.01, %v1591_v34  ;;  %v1577_v18 = vmul.f32 %v15384_v23, %v1550_v46 }
 0x1b6   : >> { %v1640_v0 = vsel %vm1608_vm14, %v1592_v20, %v1624_v43  ;;  %v1594_v51 = vadd.f32 %v1578_v57, %v1456_v5  ;;  %342 = sbr.rel (!%p340_p5) target bundleno = 18 (0x12), region = 247 }
 0x1b7   : >> { %v1639_v16 = vsel %vm1607_vm15, %v1591_v34, %v1623_v22  ;;  %1657 = vst.msk [vmem:[%s15413_s26 + $0x68] sm:$0xff] %vm333_vm0, %v1640_v0  ;;  %v1593_v28 = vadd.f32 %v1577_v18, %v1455_v63 }
 0x1b8   : >> { %1656 = vst.msk [vmem:[%s15413_s26 + $0x60] sm:$0xff] %vm333_vm0, %v1639_v16  ;;  %vm1610_vm1 = vcmp.gt.f32.partialorder %v1594_v51, 0.0  ;;  %v1626_v47 = vmul.f32 0.01, %v1594_v51 }
 0x1b9   : >> { %vm1609_vm2 = vcmp.gt.f32.partialorder %v1593_v28, 0.0  ;;  %v1625_v56 = vmul.f32 0.01, %v1593_v28 }
 0x1ba   : >> { %v1642_v19 = vsel %vm1610_vm1, %v1594_v51, %v1626_v47 }
 0x1bb   : >> { %v1641_v53 = vsel %vm1609_vm2, %v1593_v28, %v1625_v56  ;;  %1659 = vst.msk [vmem:[%s15413_s26 + $0x78] sm:$0xff] %vm333_vm0, %v1642_v19 }
 0x1bc   : >> { %1658 = vst.msk [vmem:[%s15413_s26 + $0x70] sm:$0xff] %vm333_vm0, %v1641_v53 }
 0x1bd LB: >> { %v1710_v23 = vld [vmem:[%s18211_s3] sm:$0xff]  ;;  %v1711_v42 = vld [vmem:[%s18211_s3 + $0x8] sm:$0xff]  ;;  %v1712_v40 = vld [vmem:[%s18211_s3 + $0x10] sm:$0xff]  ;;  %s9945_s27 = sshll.u32 %s14568_s20, 8  ;;  %vm5336_vm4 = vcmask 261120   ;;  %s1665_s20 = sadd.s32 1, %s14568_s20   ;;  %s14568_s20 = sphi %s15496_s20, %s1665_s20  }
 0x1be   : >> { %v10227_v1 = vld [vmem:[%s18211_s3 + $0x100] sm:$0xff]  ;;  %v13360_v61 = vpack.c.bf16 %v1711_v42, %v1710_v23  ;;  %v10228_v6 = vld [vmem:[%s18211_s3 + $0x108] sm:$0xff]  ;;  %v1713_v35 = vld [vmem:[%s18211_s3 + $0x18] sm:$0xff]  ;;  %p1667_p6 = scmp.lt.s32.totalorder %s9945_s27, 8624  ;;  %p1662_p7 = scmp.ge.s32.totalorder %s1665_s20, 35  }
 0x1bf   : >> { %v15519_v60 = vpack.c.bf16 %v10228_v6, %v10227_v1  ;;  %v13364_v50 = vpack.c.bf16 %v1713_v35, %v1712_v40  ;;  %v10229_v11 = vld [vmem:[%s18211_s3 + $0x110] sm:$0xff]  ;;  %v10230_v55 = vld [vmem:[%s18211_s3 + $0x118] sm:$0xff]  ;;  %v1714_v30 = vld [vmem:[%s18211_s3 + $0x20] sm:$0xff] }
 0x1c0   : >> { %13361 = vmatprep.subr.bf16.mxu1 %v13360_v61  ;;  %v15531_v44 = vpack.c.bf16 %v10230_v55, %v10229_v11  ;;  %v1715_v59 = vld [vmem:[%s18211_s3 + $0x28] sm:$0xff]  ;;  %v10231_v14 = vld [vmem:[%s18211_s3 + $0x120] sm:$0xff]  ;;  %s18354_s27 = smov (!%p1667_p6, %s9945_s27), 8624  ;;  %v1716_v24 = vld [vmem:[%s18211_s3 + $0x30] sm:$0xff] }
 0x1c1   : >> { %v10232_v27 = vld [vmem:[%s18211_s3 + $0x128] sm:$0xff]  ;;  %13425 = vmatprep.subr.bf16.mxu0 %v15519_v60  ;;  %13363 = vmatpush3.bf16.msra.mxu1 %v13360_v61  ;;  %v13368_v39 = vpack.c.bf16 %v1715_v59, %v1714_v30  ;;  %v1717_v21 = vld [vmem:[%s18211_s3 + $0x38] sm:$0xff]  ;;  %v10233_v7 = vld [vmem:[%s18211_s3 + $0x130] sm:$0xff]  ;;  %s15562_s24 = scalar_lea.vmem [#allocation2], %s18354_s27  ;;  %s16649_s26 = scalar_lea.vmem [#allocation3], %s18354_s27 }
 0x1c2   : >> { %18293 = vst [vmem:[#allocation28_spill] sm:$0xff] %v15531_v44  ;;  %13427 = vmatpush3.bf16.msra.mxu0 %v15519_v60  ;;  %13365 = vmatprep.subr.bf16.mxu1 %v13364_v50  ;;  %v15547_v31 = vpack.c.bf16 %v10232_v27, %v10231_v14  ;;  %v10234_v32 = vld [vmem:[%s18211_s3 + $0x138] sm:$0xff]  ;;  %v13372_v49 = vpack.c.bf16 %v1717_v21, %v1716_v24  ;;  %v10011_v37 = vld [vmem:[%s18211_s3 + $0x40] sm:$0xff]  ;;  %v10012_v29 = vld [vmem:[%s18211_s3 + $0x48] sm:$0xff]  ;;  %s16752_s27 = smov (%p1662_p7), 0  }
 0x1c3   : >> { %13429 = vmatprep.subr.bf16.mxu0 %v15531_v44  ;;  %v1678_v33 = vld [vmem:[%s15562_s24] sm:$0xff]  ;;  %v15566_v45 = vld [vmem:[%s15562_s24 + $0x51] sm:$0xff]  ;;  %v15570_v9 = vpack.c.bf16 %v10234_v32, %v10233_v7  ;;  %v10300_v25 = vld [vmem:[%s18211_s3 + $0x148] sm:$0xff]  ;;  %v13376_v12 = vpack.c.bf16 %v10012_v29, %v10011_v37 }
 0x1c4   : >> { %18294 = vst [vmem:[#allocation29_spill] sm:$0xff] %v15547_v31  ;;  %12008 = vmatprep.mubr.msk.f32.mxu1 %vm333_vm0, %v1678_v33  ;;  %12264 = vmatprep.mubr.msk.f32.mxu0 %vm333_vm0, %v15566_v45  ;;  %v10299_v10 = vld [vmem:[%s18211_s3 + $0x140] sm:$0xff]  ;;  %v10013_v26 = vld [vmem:[%s18211_s3 + $0x50] sm:$0xff]  ;;  %v10014_v62 = vld [vmem:[%s18211_s3 + $0x58] sm:$0xff] }
 0x1c5   : >> { %13367 = vmatpush3.bf16.msra.mxu1 %v13364_v50  ;;  %18295 = vst [vmem:[#allocation30_spill] sm:$0xff] %v15570_v9  ;;  %v13440_v36 = vpack.c.bf16 %v10300_v25, %v10299_v10  ;;  %v1679_v52 = vld [vmem:[%s15562_s24 + $0x8] sm:$0xff]  ;;  %v10301_v3 = vld [vmem:[%s18211_s3 + $0x150] sm:$0xff]  ;;  %v10302_v13 = vld [vmem:[%s18211_s3 + $0x158] sm:$0xff]  ;;  %v13380_v38 = vpack.c.bf16 %v10014_v62, %v10013_v26 }
 0x1c6   : >> { %13431 = vmatpush3.bf16.msra.mxu0 %v15531_v44  ;;  %13369 = vmatprep.subr.bf16.mxu1 %v13368_v39  ;;  %v15604_v41 = vld [vmem:[%s15562_s24 + $0x59] sm:$0xff]  ;;  %v1680_v2 = vld [vmem:[%s15562_s24 + $0x10] sm:$0xff]  ;;  %v15608_v15 = vld [vmem:[%s15562_s24 + $0x61] sm:$0xff]  ;;  %v13444_v20 = vpack.c.bf16 %v10302_v13, %v10301_v3 }
 0x1c7   : >> { %13433 = vmatprep.subr.bf16.mxu0 %v15547_v31  ;;  %v1681_v48 = vld [vmem:[%s15562_s24 + $0x18] sm:$0xff]  ;;  %v15615_v34 = vld [vmem:[%s15562_s24 + $0x69] sm:$0xff]  ;;  %v10303_v17 = vld [vmem:[%s18211_s3 + $0x160] sm:$0xff] }
 0x1c8   : >> { %v10304_v4 = vld [vmem:[%s18211_s3 + $0x168] sm:$0xff]  ;;  %v1682_v8 = vld [vmem:[%s15562_s24 + $0x20] sm:$0xff]  ;;  %v15634_v46 = vld [vmem:[%s15562_s24 + $0x71] sm:$0xff] }
 0x1c9   : >> { %13371 = vmatpush3.bf16.msra.mxu1 %v13368_v39  ;;  %v10015_v54 = vld [vmem:[%s18211_s3 + $0x60] sm:$0xff]  ;;  %v10016_v58 = vld [vmem:[%s18211_s3 + $0x68] sm:$0xff]  ;;  %v13448_v22 = vpack.c.bf16 %v10304_v4, %v10303_v17  ;;  %v10305_v63 = vld [vmem:[%s18211_s3 + $0x170] sm:$0xff] }
 0x1ca   : >> { %13435 = vmatpush3.bf16.msra.mxu0 %v15547_v31  ;;  %13373 = vmatprep.subr.bf16.mxu1 %v13372_v49  ;;  %v13384_v43 = vpack.c.bf16 %v10016_v58, %v10015_v54  ;;  %v1683_v5 = vld [vmem:[%s15562_s24 + $0x28] sm:$0xff]  ;;  %v10306_v57 = vld [vmem:[%s18211_s3 + $0x178] sm:$0xff]  ;;  %v1684_v0 = vld [vmem:[%s15562_s24 + $0x30] sm:$0xff] }
 0x1cb   : >> { %13437 = vmatprep.subr.bf16.mxu0 %v15570_v9  ;;  %v15650_v18 = vld [vmem:[%s15562_s24 + $0x79] sm:$0xff]  ;;  %v15654_v16 = vld [vmem:[%s15562_s24 + $0x81] sm:$0xff]  ;;  %v13452_v28 = vpack.c.bf16 %v10306_v57, %v10305_v63  ;;  %v10017_v47 = vld [vmem:[%s18211_s3 + $0x70] sm:$0xff] }
 0x1cc   : >> { %v1685_v51 = vld [vmem:[%s15562_s24 + $0x38] sm:$0xff]  ;;  %v10371_v56 = vld [vmem:[%s18211_s3 + $0x180] sm:$0xff]  ;;  %v10372_v19 = vld [vmem:[%s18211_s3 + $0x188] sm:$0xff] }
 0x1cd   : >> { %13375 = vmatpush3.bf16.msra.mxu1 %v13372_v49  ;;  %v10018_v53 = vld [vmem:[%s18211_s3 + $0x78] sm:$0xff]  ;;  %v15676_v23 = vld [vmem:[%s15562_s24 + $0x89] sm:$0xff]  ;;  %v1686_v42 = vld [vmem:[%s15562_s24 + $0x40] sm:$0xff]  ;;  %v13456_v6 = vpack.c.bf16 %v10372_v19, %v10371_v56 }
 0x1ce   : >> { %13439 = vmatpush3.bf16.msra.mxu0 %v15570_v9  ;;  %13377 = vmatprep.subr.bf16.mxu1 %v13376_v12  ;;  %v13388_v1 = vpack.c.bf16 %v10018_v53, %v10017_v47  ;;  %v15680_v61 = vld [vmem:[%s15562_s24 + $0x91] sm:$0xff]  ;;  %v1687_v40 = vld [vmem:[%s15562_s24 + $0x48] sm:$0xff]  ;;  %v15690_v35 = vld [vmem:[%s15562_s24 + $0x99] sm:$0xff] }
 0x1cf   : >> { %13441 = vmatprep.subr.bf16.mxu0 %v13440_v36  ;;  %v15693_v50 = vld [vmem:[%s15562_s24 + $0x50] sm:$0xff]  ;;  %v15696_v11 = vld [vmem:[%s15562_s24 + $0xa1] sm:$0xff]  ;;  %v15712_v14 = vld [vmem:[%s15562_s24 + $0x58] sm:$0xff] }
 0x1d0   : >> { %12009 = vmatmul.mubr.msk.f32.vlgmr.msra.gmra.mrb[0].mxu1 %vm333_vm0, %v1679_v52  ;;  %v10083_v55 = vld [vmem:[%s18211_s3 + $0x80] sm:$0xff]  ;;  %v10084_v30 = vld [vmem:[%s18211_s3 + $0x88] sm:$0xff]  ;;  %18296 = vst [vmem:[#allocation31_spill] sm:$0xff] %v15712_v14  ;;  %v15724_v24 = vld [vmem:[%s15562_s24 + $0xb1] sm:$0xff] }
 0x1d1   : >> { %12265 = vmatmul.mubr.msk.f32.vlgmr.msra.gmra.mrb[0].mxu0 %vm333_vm0, %v15604_v41  ;;  %13379 = vmatpush3.bf16.msra.mxu1 %v13376_v12  ;;  %v15705_v59 = vpack.c.bf16 %v10084_v30, %v10083_v55  ;;  %v15717_v27 = vld [vmem:[%s15562_s24 + $0xa9] sm:$0xff]  ;;  %v15720_v39 = vld [vmem:[%s15562_s24 + $0x60] sm:$0xff]  ;;  %v15753_v49 = vld [vmem:[%s15562_s24 + $0x78] sm:$0xff] }
 0x1d2   : >> { %12011 = vmatprep.mubr.msk.f32.mxu1 %vm333_vm0, %v1680_v2  ;;  %12267 = vmatprep.mubr.msk.f32.mxu0 %vm333_vm0, %v15608_v15  ;;  %18297 = vst [vmem:[#allocation32_spill] sm:$0xff] %v15720_v39  ;;  %v15733_v21 = vld [vmem:[%s15562_s24 + $0x68] sm:$0xff]  ;;  %v15738_v7 = vld [vmem:[%s15562_s24 + $0xb9] sm:$0xff]  ;;  %v15741_v32 = vld [vmem:[%s15562_s24 + $0x70] sm:$0xff] }
 0x1d3   : >> { %13443 = vmatpush3.bf16.msra.mxu0 %v13440_v36  ;;  %13381 = vmatprep.subr.bf16.mxu1 %v13380_v38  ;;  %18298 = vst [vmem:[#allocation33_spill] sm:$0xff] %v15733_v21  ;;  %18299 = vst [vmem:[#allocation34_spill] sm:$0xff] %v15741_v32  ;;  %v15744_v33 = vld [vmem:[%s15562_s24 + $0xc1] sm:$0xff]  ;;  %v15758_v37 = vld [vmem:[%s15562_s24 + $0xc9] sm:$0xff] }
 0x1d4   : >> { %12012 = vmatmul.mubr.msk.f32.gmra.mrb[2].mxu1 %vm333_vm0, %v1681_v48  ;;  %13445 = vmatprep.subr.bf16.mxu0 %v13444_v20  ;;  %18300 = vst [vmem:[#allocation35_spill] sm:$0xff] %v15753_v49  ;;  %v15761_v29 = vld [vmem:[%s15562_s24 + $0x80] sm:$0xff]  ;;  %v15764_v10 = vld [vmem:[%s15562_s24 + $0x52] sm:$0xff]  ;;  %v15779_v36 = vld [vmem:[%s15562_s24 + $0x88] sm:$0xff] }
 0x1d5   : >> { %12268 = vmatmul.mubr.msk.f32.gmra.mrb[2].mxu0 %vm333_vm0, %v15615_v34  ;;  %12014 = vmatprep.mubr.msk.f32.mxu1 %vm333_vm0, %v1682_v8  ;;  %18301 = vst [vmem:[#allocation36_spill] sm:$0xff] %v15761_v29  ;;  %v10373_v25 = vld [vmem:[%s18211_s3 + $0x190] sm:$0xff]  ;;  %v10374_v12 = vld [vmem:[%s18211_s3 + $0x198] sm:$0xff]  ;;  %18302 = vst [vmem:[#allocation37_spill] sm:$0xff] %v15779_v36 }
 0x1d6   : >> { %12270 = vmatprep.mubr.msk.f32.mxu0 %vm333_vm0, %v15634_v46  ;;  %13383 = vmatpush3.bf16.msra.mxu1 %v13380_v38  ;;  %v15784_v26 = vld [vmem:[%s15562_s24 + $0x5a] sm:$0xff]  ;;  %v15787_v62 = vld [vmem:[%s15562_s24 + $0x90] sm:$0xff]  ;;  %v15790_v52 = vld [vmem:[%s15562_s24 + $0x62] sm:$0xff]  ;;  %v13460_v3 = vpack.c.bf16 %v10374_v12, %v10373_v25 }
 0x1d7   : >> { %13447 = vmatpush3.bf16.msra.mxu0 %v13444_v20  ;;  %13385 = vmatprep.subr.bf16.mxu1 %v13384_v43  ;;  %18303 = vst [vmem:[#allocation38_spill] sm:$0xff] %v15787_v62  ;;  %v10375_v13 = vld [vmem:[%s18211_s3 + $0x1a0] sm:$0xff]  ;;  %v10376_v2 = vld [vmem:[%s18211_s3 + $0x1a8] sm:$0xff]  ;;  %v15805_v38 = vld [vmem:[%s15562_s24 + $0x98] sm:$0xff] }
 0x1d8   : >> { %12015 = vmatmul.mubr.msk.f32.gmra.mrb[4].mxu1 %vm333_vm0, %v1683_v5  ;;  %13449 = vmatprep.subr.bf16.mxu0 %v13448_v22  ;;  %18304 = vst [vmem:[#allocation39_spill] sm:$0xff] %v15805_v38  ;;  %v15810_v48 = vld [vmem:[%s15562_s24 + $0x6a] sm:$0xff]  ;;  %v15813_v20 = vld [vmem:[%s15562_s24 + $0xa0] sm:$0xff]  ;;  %v15816_v17 = vld [vmem:[%s15562_s24 + $0x72] sm:$0xff]  ;;  %v13464_v4 = vpack.c.bf16 %v10376_v2, %v10375_v13 }
 0x1d9   : >> { %12271 = vmatmul.mubr.msk.f32.gmra.mrb[4].mxu0 %vm333_vm0, %v15650_v18  ;;  %12017 = vmatprep.mubr.msk.f32.mxu1 %vm333_vm0, %v1684_v0  ;;  %v10377_v8 = vld [vmem:[%s18211_s3 + $0x1b0] sm:$0xff]  ;;  %v10378_v54 = vld [vmem:[%s18211_s3 + $0x1b8] sm:$0xff]  ;;  %v15831_v58 = vld [vmem:[%s15562_s24 + $0xa8] sm:$0xff] }
 0x1da   : >> { %12273 = vmatprep.mubr.msk.f32.mxu0 %vm333_vm0, %v15654_v16  ;;  %13387 = vmatpush3.bf16.msra.mxu1 %v13384_v43  ;;  %v15836_v43 = vld [vmem:[%s15562_s24 + $0x7a] sm:$0xff]  ;;  %v15842_v5 = vld [vmem:[%s15562_s24 + $0x82] sm:$0xff]  ;;  %v13468_v63 = vpack.c.bf16 %v10378_v54, %v10377_v8  ;;  %v15868_v56 = vld [vmem:[%s15562_s24 + $0x92] sm:$0xff] }
 0x1db   : >> { %13451 = vmatpush3.bf16.msra.mxu0 %v13448_v22  ;;  %13389 = vmatprep.subr.bf16.mxu1 %v13388_v1  ;;  %v15839_v22 = vld [vmem:[%s15562_s24 + $0xb0] sm:$0xff]  ;;  %v10443_v57 = vld [vmem:[%s18211_s3 + $0x1c0] sm:$0xff]  ;;  %v10444_v0 = vld [vmem:[%s18211_s3 + $0x1c8] sm:$0xff] }
 0x1dc   : >> { %12018 = vmatmul.mubr.msk.f32.gmra.mrb[6].mxu1 %vm333_vm0, %v1685_v51  ;;  %13453 = vmatprep.subr.bf16.mxu0 %v13452_v28  ;;  %v15857_v51 = vld [vmem:[%s15562_s24 + $0xb8] sm:$0xff]  ;;  %v15865_v47 = vld [vmem:[%s15562_s24 + $0xc0] sm:$0xff]  ;;  %v15870_v19 = vpack.c.bf16 %v10444_v0, %v10443_v57  ;;  %v15879_v53 = vld [vmem:[%s15562_s24 + $0xc8] sm:$0xff] }
 0x1dd   : >> { %12274 = vmatmul.mubr.msk.f32.gmra.mrb[6].mxu0 %vm333_vm0, %v15676_v23  ;;  %12020 = vmatprep.mubr.msk.f32.mxu1 %vm333_vm0, %v1686_v42  ;;  %v15884_v42 = vld [vmem:[%s15562_s24 + $0x9a] sm:$0xff]  ;;  %v15905_v55 = vld [vmem:[%s15562_s24 + $0xaa] sm:$0xff]  ;;  %v15911_v25 = vld [vmem:[%s15562_s24 + $0xb2] sm:$0xff] }
 0x1de   : >> { %12276 = vmatprep.mubr.msk.f32.mxu0 %vm333_vm0, %v15680_v61  ;;  %13391 = vmatpush3.bf16.msra.mxu1 %v13388_v1  ;;  %v15887_v1 = vld [vmem:[%s15562_s24 + $0xd0] sm:$0xff]  ;;  %v15908_v30 = vld [vmem:[%s15562_s24 + $0xe0] sm:$0xff]  ;;  %v15920_v12 = vld [vmem:[%s15562_s24 + $0xe8] sm:$0xff] }
 0x1df   : >> { %13455 = vmatpush3.bf16.msra.mxu0 %v13452_v28  ;;  %13393 = vmatprep.subr.bf16.mxu1 %v15705_v59  ;;  %v15862_v28 = vld [vmem:[%s15562_s24 + $0x8a] sm:$0xff]  ;;  %v15931_v2 = vld [vmem:[%s15562_s24 + $0xc2] sm:$0xff]  ;;  %v10086_v0 = vld [vmem:[%s18211_s3 + $0x98] sm:$0xff] }
 0x1e0   : >> { %12021 = vmatmul.mubr.msk.f32.gmra.mrb[8].mxu1 %vm333_vm0, %v1687_v40  ;;  %13457 = vmatprep.subr.bf16.mxu0 %v13456_v6  ;;  %v15900_v40 = vld [vmem:[%s15562_s24 + $0xd8] sm:$0xff]  ;;  %v15928_v13 = vld [vmem:[%s15562_s24 + $0xf0] sm:$0xff]  ;;  %v9979_v54 = vld [vmem:[%s15562_s24 + $0x1] sm:$0xff] }
 0x1e1   : >> { %12277 = vmatmul.mubr.msk.f32.gmra.mrb[8].mxu0 %vm333_vm0, %v15690_v35  ;;  %12023 = vmatprep.mubr.msk.f32.mxu1 %vm333_vm0, %v15693_v50  ;;  %v15945_v8 = vld [vmem:[%s15562_s24 + $0xca] sm:$0xff]  ;;  %v15970_v9 = vld [vmem:[%s15562_s24 + $0xe2] sm:$0xff]  ;;  %v9982_v31 = vld [vmem:[%s15562_s24 + $0x19] sm:$0xff] }
 0x1e2   : >> { %12279 = vmatprep.mubr.msk.f32.mxu0 %vm333_vm0, %v15696_v11  ;;  %v10085_v57 = vld [vmem:[%s18211_s3 + $0x90] sm:$0xff] }
 0x1e4   : >> { %12024 = vmatmul.mubr.msk.f32.gmra.mrb[10].mxu1 %vm333_vm0, %v15712_v14 }
 0x1e5   : >> { %12280 = vmatmul.mubr.msk.f32.gmra.mrb[10].mxu0 %vm333_vm0, %v15717_v27  ;;  %12026 = vmatprep.mubr.msk.f32.mxu1 %vm333_vm0, %v15720_v39  ;;  %v10156_v39 = vld [vmem:[%s18211_s3 + $0xc8] sm:$0xff] }
 0x1e6   : >> { %12282 = vmatprep.mubr.msk.f32.mxu0 %vm333_vm0, %v15724_v24 }
 0x1e8   : >> { %12027 = vmatmul.mubr.msk.f32.gmra.mrb[12].mxu1 %vm333_vm0, %v15733_v21  ;;  %v9984_v21 = vld [vmem:[%s15562_s24 + $0x29] sm:$0xff] }
 0x1e9   : >> { %12283 = vmatmul.mubr.msk.f32.gmra.mrb[12].mxu0 %vm333_vm0, %v15738_v7  ;;  %12029 = vmatprep.mubr.msk.f32.mxu1 %vm333_vm0, %v15741_v32 }
 0x1ea   : >> { %12285 = vmatprep.mubr.msk.f32.mxu0 %vm333_vm0, %v15744_v33 }
 0x1ec   : >> { %12030 = vmatmul.mubr.msk.f32.gmra.mrb[14].mxu1 %vm333_vm0, %v15753_v49  ;;  %v10087_v49 = vld [vmem:[%s18211_s3 + $0xa0] sm:$0xff] }
 0x1ed   : >> { %12286 = vmatmul.mubr.msk.f32.gmra.mrb[14].mxu0 %vm333_vm0, %v15758_v37  ;;  %12032 = vmatprep.mubr.msk.f32.mxu1 %vm333_vm0, %v15761_v29  ;;  %v13396_v29 = vpack.c.bf16 %v10086_v0, %v10085_v57  ;;  %v9983_v57 = vld [vmem:[%s15562_s24 + $0x21] sm:$0xff]  ;;  %v15991_v0 = vld [vmem:[%s15562_s24 + $0xf2] sm:$0xff] }
 0x1ee   : >> { %12328 = vmatprep.mubr.msk.f32.mxu0 %vm333_vm0, %v15764_v10 }
 0x1f0   : >> { %12033 = vmatmul.mubr.msk.f32.gmra.mrb[16].mxu1 %vm333_vm0, %v15779_v36  ;;  %v9981_v36 = vld [vmem:[%s15562_s24 + $0x11] sm:$0xff] }
 0x1f1   : >> { %12329 = vmatmul.mubr.msk.f32.vlgmr.msra.gmra.mrb[0].mxu0 %vm333_vm0, %v15784_v26  ;;  %12035 = vmatprep.mubr.msk.f32.mxu1 %vm333_vm0, %v15787_v62  ;;  %v15966_v62 = vld [vmem:[%s15562_s24 + $0xda] sm:$0xff] }
 0x1f2   : >> { %12331 = vmatprep.mubr.msk.f32.mxu0 %vm333_vm0, %v15790_v52  ;;  %13459 = vmatpush3.bf16.msra.mxu0 %v13456_v6  ;;  %v15890_v6 = vld [vmem:[%s15562_s24 + $0xa2] sm:$0xff] }
 0x1f3   : >> { %13461 = vmatprep.subr.bf16.mxu0 %v13460_v3 }
 0x1f4   : >> { %12036 = vmatmul.mubr.msk.f32.gmra.mrb[18].mxu1 %vm333_vm0, %v15805_v38  ;;  %v9980_v38 = vld [vmem:[%s15562_s24 + $0x9] sm:$0xff] }
 0x1f5   : >> { %12332 = vmatmul.mubr.msk.f32.gmra.mrb[2].mxu0 %vm333_vm0, %v15810_v48  ;;  %12038 = vmatprep.mubr.msk.f32.mxu1 %vm333_vm0, %v15813_v20 }
 0x1f6   : >> { %12334 = vmatprep.mubr.msk.f32.mxu0 %vm333_vm0, %v15816_v17  ;;  %13463 = vmatpush3.bf16.msra.mxu0 %v13460_v3  ;;  %v15925_v3 = vld [vmem:[%s15562_s24 + $0xba] sm:$0xff] }
 0x1f7   : >> { %13465 = vmatprep.subr.bf16.mxu0 %v13464_v4 }
 0x1f8   : >> { %12039 = vmatmul.mubr.msk.f32.gmra.mrb[20].mxu1 %vm333_vm0, %v15831_v58 }
 0x1f9   : >> { %12335 = vmatmul.mubr.msk.f32.gmra.mrb[4].mxu0 %vm333_vm0, %v15836_v43  ;;  %12041 = vmatprep.mubr.msk.f32.mxu1 %vm333_vm0, %v15839_v22 }
 0x1fa   : >> { %12337 = vmatprep.mubr.msk.f32.mxu0 %vm333_vm0, %v15842_v5  ;;  %13467 = vmatpush3.bf16.msra.mxu0 %v13464_v4  ;;  %v15940_v4 = vld [vmem:[%s15562_s24 + $0xf8] sm:$0xff] }
 0x1fb   : >> { %13469 = vmatprep.subr.bf16.mxu0 %v13468_v63 }
 0x1fc   : >> { %12042 = vmatmul.mubr.msk.f32.gmra.mrb[22].mxu1 %vm333_vm0, %v15857_v51 }
 0x1fd   : >> { %12338 = vmatmul.mubr.msk.f32.gmra.mrb[6].mxu0 %vm333_vm0, %v15862_v28  ;;  %12044 = vmatprep.mubr.msk.f32.mxu1 %vm333_vm0, %v15865_v47 }
 0x1fe   : >> { %12340 = vmatprep.mubr.msk.f32.mxu0 %vm333_vm0, %v15868_v56  ;;  %13471 = vmatpush3.bf16.msra.mxu0 %v13468_v63  ;;  %v15949_v63 = vld [vmem:[%s15562_s24 + $0xd2] sm:$0xff] }
 0x1ff   : >> { %13473 = vmatprep.subr.bf16.mxu0 %v15870_v19 }
 0x200   : >> { %12045 = vmatmul.mubr.msk.f32.gmra.mrb[24].mxu1 %vm333_vm0, %v15879_v53 }
 0x201   : >> { %12341 = vmatmul.mubr.msk.f32.gmra.mrb[8].mxu0 %vm333_vm0, %v15884_v42  ;;  %12047 = vmatprep.mubr.msk.f32.mxu1 %vm333_vm0, %v15887_v1 }
 0x202   : >> { %12343 = vmatprep.mubr.msk.f32.mxu0 %vm333_vm0, %v15890_v6 }
 0x204   : >> { %12048 = vmatmul.mubr.msk.f32.gmra.mrb[26].mxu1 %vm333_vm0, %v15900_v40 }
 0x205   : >> { %12344 = vmatmul.mubr.msk.f32.gmra.mrb[10].mxu0 %vm333_vm0, %v15905_v55  ;;  %12050 = vmatprep.mubr.msk.f32.mxu1 %vm333_vm0, %v15908_v30 }
 0x206   : >> { %12346 = vmatprep.mubr.msk.f32.mxu0 %vm333_vm0, %v15911_v25 }
 0x208   : >> { %12051 = vmatmul.mubr.msk.f32.gmra.mrb[28].mxu1 %vm333_vm0, %v15920_v12 }
 0x209   : >> { %12347 = vmatmul.mubr.msk.f32.gmra.mrb[12].mxu0 %vm333_vm0, %v15925_v3  ;;  %12053 = vmatprep.mubr.msk.f32.mxu1 %vm333_vm0, %v15928_v13 }
 0x20a   : >> { %12349 = vmatprep.mubr.msk.f32.mxu0 %vm333_vm0, %v15931_v2 }
 0x20c   : >> { %12054 = vmatmul.mubr.msk.f32.gmra.mrb[30].mxu1 %vm333_vm0, %v15940_v4 }
 0x20d   : >> { %12350 = vmatmul.mubr.msk.f32.gmra.mrb[14].mxu0 %vm333_vm0, %v15945_v8  ;;  %12072 = vmatprep.mubr.msk.f32.mxu1 %vm333_vm0, %v9979_v54  ;;  %v10088_v54 = vld [vmem:[%s18211_s3 + $0xa8] sm:$0xff] }
 0x20e   : >> { %12352 = vmatprep.mubr.msk.f32.mxu0 %vm333_vm0, %v15949_v63  ;;  %v13400_v32 = vpack.c.bf16 %v10088_v54, %v10087_v49  ;;  %v9985_v49 = vld [vmem:[%s15562_s24 + $0x31] sm:$0xff]  ;;  %v16011_v54 = vld [vmem:[%s15562_s24 + $0x102] sm:$0xff] }
 0x20f   : >> { %18305 = vst [vmem:[#allocation40_spill] sm:$0xff] %v16011_v54 }
 0x210   : >> { %12073 = vmatmul.mubr.msk.f32.vlgmr.msra.gmra.mrb[0].mxu1 %vm333_vm0, %v9980_v38  ;;  %v15987_v38 = vld [vmem:[%s15562_s24 + $0xea] sm:$0xff] }
 0x211   : >> { %12353 = vmatmul.mubr.msk.f32.gmra.mrb[16].mxu0 %vm333_vm0, %v15966_v62  ;;  %13395 = vmatpush3.bf16.msra.mxu1 %v15705_v59  ;;  %v10089_v59 = vld [vmem:[%s18211_s3 + $0xb0] sm:$0xff] }
 0x212   : >> { %12075 = vmatprep.mubr.msk.f32.mxu1 %vm333_vm0, %v9981_v36  ;;  %12355 = vmatprep.mubr.msk.f32.mxu0 %vm333_vm0, %v15970_v9  ;;  %v10090_v36 = vld [vmem:[%s18211_s3 + $0xb8] sm:$0xff] }
 0x213   : >> { %13397 = vmatprep.subr.bf16.mxu1 %v13396_v29  ;;  %v13404_v44 = vpack.c.bf16 %v10090_v36, %v10089_v59  ;;  %v9987_v59 = vld [vmem:[%s15562_s24 + $0x41] sm:$0xff]  ;;  %v16031_v36 = vld [vmem:[%s15562_s24 + $0x112] sm:$0xff] }
 0x214   : >> { %12076 = vmatmul.mubr.msk.f32.gmra.mrb[2].mxu1 %vm333_vm0, %v9982_v31  ;;  %v16007_v31 = vld [vmem:[%s15562_s24 + $0xfa] sm:$0xff]  ;;  %18307 = vst [vmem:[#allocation42_spill] sm:$0xff] %v16031_v36 }
 0x215   : >> { %12356 = vmatmul.mubr.msk.f32.gmra.mrb[18].mxu0 %vm333_vm0, %v15987_v38  ;;  %12078 = vmatprep.mubr.msk.f32.mxu1 %vm333_vm0, %v9983_v57  ;;  %v10155_v57 = vld [vmem:[%s18211_s3 + $0xc0] sm:$0xff] }
 0x216   : >> { %12358 = vmatprep.mubr.msk.f32.mxu0 %vm333_vm0, %v15991_v0  ;;  %13399 = vmatpush3.bf16.msra.mxu1 %v13396_v29  ;;  %v9986_v29 = vld [vmem:[%s15562_s24 + $0x39] sm:$0xff]  ;;  %v16033_v14 = vpack.c.bf16 %v10156_v39, %v10155_v57  ;;  %v16057_v39 = vld [vmem:[%s15562_s24 + $0x12a] sm:$0xff] }
 0x217   : >> { %13401 = vmatprep.subr.bf16.mxu1 %v13400_v32  ;;  %18310 = vst [vmem:[#allocation45_spill] sm:$0xff] %v16057_v39  ;;  %v16060_v57 = vld [vmem:[%s15562_s24 + $0x132] sm:$0xff] }
 0x218   : >> { %12079 = vmatmul.mubr.msk.f32.gmra.mrb[4].mxu1 %vm333_vm0, %v9984_v21  ;;  %v16027_v21 = vld [vmem:[%s15562_s24 + $0x10a] sm:$0xff]  ;;  %18311 = vst [vmem:[#allocation46_spill] sm:$0xff] %v16060_v57 }
 0x219   : >> { %12359 = vmatmul.mubr.msk.f32.gmra.mrb[20].mxu0 %vm333_vm0, %v16007_v31  ;;  %12081 = vmatprep.mubr.msk.f32.mxu1 %vm333_vm0, %v9985_v49  ;;  %18306 = vst [vmem:[#allocation41_spill] sm:$0xff] %v16027_v21  ;;  %v9988_v49 = vld [vmem:[%s15562_s24 + $0x49] sm:$0xff] }
 0x21a   : >> { %12361 = vmatprep.mubr.msk.f32.mxu0 %vm333_vm0, %v16011_v54  ;;  %13403 = vmatpush3.bf16.msra.mxu1 %v13400_v32  ;;  %v16043_v32 = vld [vmem:[%s15562_s24 + $0x11a] sm:$0xff]  ;;  %v16046_v54 = vld [vmem:[%s15562_s24 + $0x122] sm:$0xff] }
 0x21b   : >> { %13405 = vmatprep.subr.bf16.mxu1 %v13404_v44  ;;  %18308 = vst [vmem:[#allocation43_spill] sm:$0xff] %v16043_v32  ;;  %18309 = vst [vmem:[#allocation44_spill] sm:$0xff] %v16046_v54 }
 0x21c   : >> { %12082 = vmatmul.mubr.msk.f32.gmra.mrb[6].mxu1 %vm333_vm0, %v9986_v29  ;;  %v10448_v29 = vld [vmem:[%s18211_s3 + $0x1e8] sm:$0xff] }
 0x21d   : >> { %12362 = vmatmul.mubr.msk.f32.gmra.mrb[22].mxu0 %vm333_vm0, %v16027_v21  ;;  %12084 = vmatprep.mubr.msk.f32.mxu1 %vm333_vm0, %v9987_v59  ;;  %v10450_v59 = vld [vmem:[%s18211_s3 + $0x1f8] sm:$0xff]  ;;  %v10159_v21 = vld [vmem:[%s18211_s3 + $0xe0] sm:$0xff] }
 0x21e   : >> { %12364 = vmatprep.mubr.msk.f32.mxu0 %vm333_vm0, %v16031_v36  ;;  %13407 = vmatpush3.bf16.msra.mxu1 %v13404_v44  ;;  %v16071_v44 = vld [vmem:[%s15562_s24 + $0x13a] sm:$0xff] }
 0x21f   : >> { %13409 = vmatprep.subr.bf16.mxu1 %v16033_v14  ;;  %18312 = vst [vmem:[#allocation47_spill] sm:$0xff] %v16071_v44 }
 0x220   : >> { %12085 = vmatmul.mubr.msk.f32.gmra.mrb[8].mxu1 %vm333_vm0, %v9988_v49 }
 0x221   : >> { %12365 = vmatmul.mubr.msk.f32.gmra.mrb[24].mxu0 %vm333_vm0, %v16043_v32  ;;  %12087 = vmatprep.mubr.msk.f32.mxu1 %vm333_vm0, %v15566_v45  ;;  %v16074_v45 = vld [vmem:[%s15562_s24 + $0x142] sm:$0xff]  ;;  %v16232_v32 = vld [vmem:[%s15562_s24 + $0x130] sm:$0xff] }
 0x222   : >> { %12367 = vmatprep.mubr.msk.f32.mxu0 %vm333_vm0, %v16046_v54  ;;  %18313 = vst [vmem:[#allocation48_spill] sm:$0xff] %v16074_v45  ;;  %v10053_v54 = vld [vmem:[%s15562_s24 + $0x12] sm:$0xff]  ;;  %18318 = vst [vmem:[#allocation53_spill] sm:$0xff] %v16232_v32 }
 0x224   : >> { %12088 = vmatmul.mubr.msk.f32.gmra.mrb[10].mxu1 %vm333_vm0, %v15604_v41  ;;  %v16085_v41 = vld [vmem:[%s15562_s24 + $0x14a] sm:$0xff] }
 0x225   : >> { %12368 = vmatmul.mubr.msk.f32.gmra.mrb[26].mxu0 %vm333_vm0, %v16057_v39  ;;  %12090 = vmatprep.mubr.msk.f32.mxu1 %vm333_vm0, %v15608_v15  ;;  %18314 = vst [vmem:[#allocation49_spill] sm:$0xff] %v16085_v41  ;;  %v10445_v15 = vld [vmem:[%s18211_s3 + $0x1d0] sm:$0xff]  ;;  %v16228_v39 = vld [vmem:[%s15562_s24 + $0x128] sm:$0xff] }
 0x226   : >> { %12370 = vmatprep.mubr.msk.f32.mxu0 %vm333_vm0, %v16060_v57  ;;  %v10052_v57 = vld [vmem:[%s15562_s24 + $0xa] sm:$0xff]  ;;  %18317 = vst [vmem:[#allocation52_spill] sm:$0xff] %v16228_v39 }
 0x228   : >> { %12091 = vmatmul.mubr.msk.f32.gmra.mrb[12].mxu1 %vm333_vm0, %v15615_v34  ;;  %v10446_v34 = vld [vmem:[%s18211_s3 + $0x1d8] sm:$0xff] }
 0x229   : >> { %12371 = vmatmul.mubr.msk.f32.gmra.mrb[28].mxu0 %vm333_vm0, %v16071_v44  ;;  %12093 = vmatprep.mubr.msk.f32.mxu1 %vm333_vm0, %v15634_v46  ;;  %v13476_v46 = vpack.c.bf16 %v10446_v34, %v10445_v15  ;;  %v16155_v15 = vld [vmem:[%s15562_s24 + $0xd1] sm:$0xff]  ;;  %v16165_v34 = vld [vmem:[%s15562_s24 + $0xd9] sm:$0xff] }
 0x22a   : >> { %12373 = vmatprep.mubr.msk.f32.mxu0 %vm333_vm0, %v16074_v45  ;;  %v10157_v45 = vld [vmem:[%s18211_s3 + $0xd0] sm:$0xff]  ;;  %v10158_v44 = vld [vmem:[%s18211_s3 + $0xd8] sm:$0xff] }
 0x22b   : >> { %v13412_v36 = vpack.c.bf16 %v10158_v44, %v10157_v45  ;;  %v10055_v44 = vld [vmem:[%s15562_s24 + $0x22] sm:$0xff] }
 0x22c   : >> { %12094 = vmatmul.mubr.msk.f32.gmra.mrb[14].mxu1 %vm333_vm0, %v15650_v18  ;;  %v10447_v18 = vld [vmem:[%s18211_s3 + $0x1e0] sm:$0xff] }
 0x22d   : >> { %12374 = vmatmul.mubr.msk.f32.gmra.mrb[30].mxu0 %vm333_vm0, %v16085_v41  ;;  %12096 = vmatprep.mubr.msk.f32.mxu1 %vm333_vm0, %v15654_v16  ;;  %v13480_v16 = vpack.c.bf16 %v10448_v29, %v10447_v18  ;;  %v16173_v18 = vld [vmem:[%s15562_s24 + $0x100] sm:$0xff]  ;;  %v16182_v29 = vld [vmem:[%s15562_s24 + $0xe9] sm:$0xff] }
 0x22e   : >> { %12392 = vmatprep.mubr.msk.f32.mxu0 %vm333_vm0, %v15813_v20  ;;  %v16211_v41 = vld [vmem:[%s15562_s24 + $0x120] sm:$0xff] }
 0x22f   : >> { %18316 = vst [vmem:[#allocation51_spill] sm:$0xff] %v16211_v41  ;;  %v16253_v45 = vld [vmem:[%s15562_s24 + $0x140] sm:$0xff] }
 0x230   : >> { %12097 = vmatmul.mubr.msk.f32.gmra.mrb[16].mxu1 %vm333_vm0, %v15676_v23  ;;  %v10449_v23 = vld [vmem:[%s18211_s3 + $0x1f0] sm:$0xff]  ;;  %18320 = vst [vmem:[#allocation55_spill] sm:$0xff] %v16253_v45 }
 0x231   : >> { %12393 = vmatmul.mubr.msk.f32.vlgmr.msra.gmra.mrb[0].mxu0 %vm333_vm0, %v15831_v58  ;;  %12099 = vmatprep.mubr.msk.f32.mxu1 %vm333_vm0, %v15680_v61  ;;  %v13484_v61 = vpack.c.bf16 %v10450_v59, %v10449_v23  ;;  %v16190_v23 = vld [vmem:[%s15562_s24 + $0xf1] sm:$0xff] }
 0x232   : >> { %12395 = vmatprep.mubr.msk.f32.mxu0 %vm333_vm0, %v15839_v22  ;;  %13475 = vmatpush3.bf16.msra.mxu0 %v15870_v19  ;;  %v10516_v19 = vld [vmem:[%s18211_s3 + $0x208] sm:$0xff]  ;;  %v16193_v59 = vld [vmem:[%s15562_s24 + $0x110] sm:$0xff] }
 0x233   : >> { %13477 = vmatprep.subr.bf16.mxu0 %v13476_v46 }
 0x234   : >> { %12100 = vmatmul.mubr.msk.f32.gmra.mrb[18].mxu1 %vm333_vm0, %v15690_v35  ;;  %v10515_v35 = vld [vmem:[%s18211_s3 + $0x200] sm:$0xff] }
 0x235   : >> { %12396 = vmatmul.mubr.msk.f32.gmra.mrb[2].mxu0 %vm333_vm0, %v15857_v51  ;;  %12102 = vmatprep.mubr.msk.f32.mxu1 %vm333_vm0, %v15696_v11  ;;  %v16144_v49 = vpack.c.bf16 %v10516_v19, %v10515_v35  ;;  %v16207_v35 = vld [vmem:[%s15562_s24 + $0x118] sm:$0xff]  ;;  %v10051_v19 = vld [vmem:[%s15562_s24 + $0x2] sm:$0xff] }
 0x236   : >> { %12398 = vmatprep.mubr.msk.f32.mxu0 %vm333_vm0, %v15865_v47  ;;  %13479 = vmatpush3.bf16.msra.mxu0 %v13476_v46  ;;  %v16170_v46 = vld [vmem:[%s15562_s24 + $0xe1] sm:$0xff]  ;;  %18315 = vst [vmem:[#allocation50_spill] sm:$0xff] %v16207_v35 }
 0x237   : >> { %13481 = vmatprep.subr.bf16.mxu0 %v13480_v16 }
 0x238   : >> { %12103 = vmatmul.mubr.msk.f32.gmra.mrb[20].mxu1 %vm333_vm0, %v15717_v27 }
 0x239   : >> { %12399 = vmatmul.mubr.msk.f32.gmra.mrb[4].mxu0 %vm333_vm0, %v15879_v53  ;;  %12105 = vmatprep.mubr.msk.f32.mxu1 %vm333_vm0, %v15724_v24 }
 0x23a   : >> { %12401 = vmatprep.mubr.msk.f32.mxu0 %vm333_vm0, %v15887_v1  ;;  %13483 = vmatpush3.bf16.msra.mxu0 %v13480_v16  ;;  %v16187_v16 = vld [vmem:[%s15562_s24 + $0x108] sm:$0xff] }
 0x23b   : >> { %13485 = vmatprep.subr.bf16.mxu0 %v13484_v61 }
 0x23c   : >> { %12106 = vmatmul.mubr.msk.f32.gmra.mrb[22].mxu1 %vm333_vm0, %v15738_v7 }
 0x23d   : >> { %12402 = vmatmul.mubr.msk.f32.gmra.mrb[6].mxu0 %vm333_vm0, %v15900_v40  ;;  %12108 = vmatprep.mubr.msk.f32.mxu1 %vm333_vm0, %v15744_v33 }
 0x23e   : >> { %12404 = vmatprep.mubr.msk.f32.mxu0 %vm333_vm0, %v15908_v30  ;;  %13487 = vmatpush3.bf16.msra.mxu0 %v13484_v61  ;;  %v16202_v61 = vld [vmem:[%s15562_s24 + $0xf9] sm:$0xff] }
 0x23f   : >> { %13489 = vmatprep.subr.bf16.mxu0 %v16144_v49 }
 0x240   : >> { %12109 = vmatmul.mubr.msk.f32.gmra.mrb[24].mxu1 %vm333_vm0, %v15758_v37 }
 0x241   : >> { %12405 = vmatmul.mubr.msk.f32.gmra.mrb[8].mxu0 %vm333_vm0, %v15920_v12  ;;  %12111 = vmatprep.mubr.msk.f32.mxu1 %vm333_vm0, %v16155_v15 }
 0x242   : >> { %12407 = vmatprep.mubr.msk.f32.mxu0 %vm333_vm0, %v15928_v13 }
 0x244   : >> { %12112 = vmatmul.mubr.msk.f32.gmra.mrb[26].mxu1 %vm333_vm0, %v16165_v34 }
 0x245   : >> { %12408 = vmatmul.mubr.msk.f32.gmra.mrb[10].mxu0 %vm333_vm0, %v15940_v4  ;;  %12114 = vmatprep.mubr.msk.f32.mxu1 %vm333_vm0, %v16170_v46 }
 0x246   : >> { %12410 = vmatprep.mubr.msk.f32.mxu0 %vm333_vm0, %v16173_v18 }
 0x248   : >> { %12115 = vmatmul.mubr.msk.f32.gmra.mrb[28].mxu1 %vm333_vm0, %v16182_v29 }
 0x249   : >> { %12411 = vmatmul.mubr.msk.f32.gmra.mrb[12].mxu0 %vm333_vm0, %v16187_v16  ;;  %12117 = vmatprep.mubr.msk.f32.mxu1 %vm333_vm0, %v16190_v23 }
 0x24a   : >> { %12413 = vmatprep.mubr.msk.f32.mxu0 %vm333_vm0, %v16193_v59 }
 0x24c   : >> { %12118 = vmatmul.mubr.msk.f32.gmra.mrb[30].mxu1 %vm333_vm0, %v16202_v61 }
 0x24d   : >> { %12414 = vmatmul.mubr.msk.f32.gmra.mrb[14].mxu0 %vm333_vm0, %v16207_v35  ;;  %12136 = vmatprep.mubr.msk.f32.mxu1 %vm333_vm0, %v10051_v19  ;;  %v10160_v19 = vld [vmem:[%s18211_s3 + $0xe8] sm:$0xff] }
 0x24e   : >> { %12416 = vmatprep.mubr.msk.f32.mxu0 %vm333_vm0, %v16211_v41  ;;  %v10054_v41 = vld [vmem:[%s15562_s24 + $0x1a] sm:$0xff]  ;;  %v13416_v35 = vpack.c.bf16 %v10160_v19, %v10159_v21  ;;  %v16269_v21 = vld [vmem:[%s15562_s24 + $0x148] sm:$0xff]  ;;  %v10361_v19 = vld [vmem:[%s15562_s24 + $0x150] sm:$0xff] }
 0x250   : >> { %12137 = vmatmul.mubr.msk.f32.vlgmr.msra.gmra.mrb[0].mxu1 %vm333_vm0, %v10052_v57  ;;  %v16249_v57 = vld [vmem:[%s15562_s24 + $0x138] sm:$0xff] }
 0x251   : >> { %12417 = vmatmul.mubr.msk.f32.gmra.mrb[16].mxu0 %vm333_vm0, %v16228_v39  ;;  %13411 = vmatpush3.bf16.msra.mxu1 %v16033_v14  ;;  %18319 = vst [vmem:[#allocation54_spill] sm:$0xff] %v16249_v57  ;;  %v10161_v14 = vld [vmem:[%s18211_s3 + $0xf0] sm:$0xff] }
 0x252   : >> { %12139 = vmatprep.mubr.msk.f32.mxu1 %vm333_vm0, %v10053_v54  ;;  %12419 = vmatprep.mubr.msk.f32.mxu0 %vm333_vm0, %v16232_v32  ;;  %v10162_v54 = vld [vmem:[%s18211_s3 + $0xf8] sm:$0xff]  ;;  %v10056_v32 = vld [vmem:[%s15562_s24 + $0x2a] sm:$0xff] }
 0x253   : >> { %13413 = vmatprep.subr.bf16.mxu1 %v13412_v36  ;;  %v13420_v39 = vpack.c.bf16 %v10162_v54, %v10161_v14  ;;  %v10364_v14 = vld [vmem:[%s15562_s24 + $0x168] sm:$0xff]  ;;  %v10365_v54 = vld [vmem:[%s15562_s24 + $0x170] sm:$0xff] }
 0x254   : >> { %12140 = vmatmul.mubr.msk.f32.gmra.mrb[2].mxu1 %vm333_vm0, %v10054_v41  ;;  %v10057_v41 = vld [vmem:[%s15562_s24 + $0x32] sm:$0xff] }
 0x255   : >> { %12420 = vmatmul.mubr.msk.f32.gmra.mrb[18].mxu0 %vm333_vm0, %v16249_v57  ;;  %12142 = vmatprep.mubr.msk.f32.mxu1 %vm333_vm0, %v10055_v44  ;;  %v10058_v44 = vld [vmem:[%s15562_s24 + $0x3a] sm:$0xff]  ;;  %v10059_v57 = vld [vmem:[%s15562_s24 + $0x42] sm:$0xff] }
 0x256   : >> { %12422 = vmatprep.mubr.msk.f32.mxu0 %vm333_vm0, %v16253_v45  ;;  %13415 = vmatpush3.bf16.msra.mxu1 %v13412_v36  ;;  %v10362_v45 = vld [vmem:[%s15562_s24 + $0x158] sm:$0xff]  ;;  %v10363_v36 = vld [vmem:[%s15562_s24 + $0x160] sm:$0xff] }
 0x257   : >> { %13417 = vmatprep.subr.bf16.mxu1 %v13416_v35 }
 0x258   : >> { %12143 = vmatmul.mubr.msk.f32.gmra.mrb[4].mxu1 %vm333_vm0, %v10056_v32  ;;  %v10060_v32 = vld [vmem:[%s15562_s24 + $0x4a] sm:$0xff] }
 0x259   : >> { %12423 = vmatmul.mubr.msk.f32.gmra.mrb[20].mxu0 %vm333_vm0, %v16269_v21  ;;  %12145 = vmatprep.mubr.msk.f32.mxu1 %vm333_vm0, %v10057_v41  ;;  %v18321_v41 = vld [vmem:[#allocation31_spill] sm:$0xff] }
 0x25a   : >> { %12425 = vmatprep.mubr.msk.f32.mxu0 %vm333_vm0, %v10361_v19  ;;  %13419 = vmatpush3.bf16.msra.mxu1 %v13416_v35  ;;  %v10366_v35 = vld [vmem:[%s15562_s24 + $0x178] sm:$0xff] }
 0x25b   : >> { %13421 = vmatprep.subr.bf16.mxu1 %v13420_v39  ;;  %v18322_v19 = vld [vmem:[#allocation32_spill] sm:$0xff] }
 0x25c   : >> { %12146 = vmatmul.mubr.msk.f32.gmra.mrb[6].mxu1 %vm333_vm0, %v10058_v44  ;;  %v16436_v44 = vld [vmem:[%s15562_s24 + $0x141] sm:$0xff] }
 0x25d   : >> { %12426 = vmatmul.mubr.msk.f32.gmra.mrb[22].mxu0 %vm333_vm0, %v10362_v45  ;;  %12148 = vmatprep.mubr.msk.f32.mxu1 %vm333_vm0, %v10059_v57  ;;  %v10367_v57 = vld [vmem:[%s15562_s24 + $0x180] sm:$0xff]  ;;  %v10369_v45 = vld [vmem:[%s15562_s24 + $0x190] sm:$0xff] }
 0x25e   : >> { %12428 = vmatprep.mubr.msk.f32.mxu0 %vm333_vm0, %v10363_v36  ;;  %13423 = vmatpush3.bf16.msra.mxu1 %v13420_v39  ;;  %v10368_v39 = vld [vmem:[%s15562_s24 + $0x188] sm:$0xff]  ;;  %v18323_v36 = vld [vmem:[#allocation28_spill] sm:$0xff] }
 0x25f   : >> { %13864 = vmatprep.subr.bf16.mxu1 %v15519_v60 }
 0x260   : >> { %12149 = vmatmul.mubr.msk.f32.gmra.mrb[8].mxu1 %vm333_vm0, %v10060_v32  ;;  %v18324_v32 = vld [vmem:[#allocation33_spill] sm:$0xff] }
 0x261   : >> { %12429 = vmatmul.mubr.msk.f32.gmra.mrb[24].mxu0 %vm333_vm0, %v10364_v14  ;;  %12151 = vmatprep.mubr.msk.f32.mxu1 %vm333_vm0, %v15764_v10  ;;  %v10370_v10 = vld [vmem:[%s15562_s24 + $0x198] sm:$0xff]  ;;  %v16448_v14 = vld [vmem:[%s15562_s24 + $0x149] sm:$0xff] }
 0x262   : >> { %12431 = vmatprep.mubr.msk.f32.mxu0 %vm333_vm0, %v10365_v54  ;;  %v10433_v54 = vld [vmem:[%s15562_s24 + $0x151] sm:$0xff] }
 0x264   : >> { %12152 = vmatmul.mubr.msk.f32.gmra.mrb[10].mxu1 %vm333_vm0, %v15784_v26  ;;  %v10517_v26 = vld [vmem:[%s18211_s3 + $0x210] sm:$0xff] }
 0x265   : >> { %12432 = vmatmul.mubr.msk.f32.gmra.mrb[26].mxu0 %vm333_vm0, %v10366_v35  ;;  %12154 = vmatprep.mubr.msk.f32.mxu1 %vm333_vm0, %v15790_v52  ;;  %v10518_v52 = vld [vmem:[%s18211_s3 + $0x218] sm:$0xff]  ;;  %v18326_v35 = vld [vmem:[#allocation29_spill] sm:$0xff] }
 0x266   : >> { %12434 = vmatprep.mubr.msk.f32.mxu0 %vm333_vm0, %v10367_v57  ;;  %v18327_v57 = vld [vmem:[#allocation35_spill] sm:$0xff] }
 0x268   : >> { %12155 = vmatmul.mubr.msk.f32.gmra.mrb[12].mxu1 %vm333_vm0, %v15810_v48  ;;  %v13492_v48 = vpack.c.bf16 %v10518_v52, %v10517_v26  ;;  %v18329_v26 = vld [vmem:[#allocation30_spill] sm:$0xff]  ;;  %v18330_v52 = vld [vmem:[#allocation37_spill] sm:$0xff] }
 0x269   : >> { %12435 = vmatmul.mubr.msk.f32.gmra.mrb[28].mxu0 %vm333_vm0, %v10368_v39  ;;  %12157 = vmatprep.mubr.msk.f32.mxu1 %vm333_vm0, %v15816_v17  ;;  %v10519_v17 = vld [vmem:[%s18211_s3 + $0x220] sm:$0xff]  ;;  %v18328_v39 = vld [vmem:[#allocation36_spill] sm:$0xff] }
 0x26a   : >> { %12437 = vmatprep.mubr.msk.f32.mxu0 %vm333_vm0, %v10369_v45  ;;  %v10434_v45 = vld [vmem:[%s15562_s24 + $0x159] sm:$0xff] }
 0x26c   : >> { %12158 = vmatmul.mubr.msk.f32.gmra.mrb[14].mxu1 %vm333_vm0, %v15836_v43  ;;  %v10520_v43 = vld [vmem:[%s18211_s3 + $0x228] sm:$0xff] }
 0x26d   : >> { %12438 = vmatmul.mubr.msk.f32.gmra.mrb[30].mxu0 %vm333_vm0, %v10370_v10  ;;  %12160 = vmatprep.mubr.msk.f32.mxu1 %vm333_vm0, %v15842_v5  ;;  %v10521_v5 = vld [vmem:[%s18211_s3 + $0x230] sm:$0xff]  ;;  %v10435_v10 = vld [vmem:[%s15562_s24 + $0x161] sm:$0xff] }
 0x26e   : >> { %12456 = vmatprep.mubr.msk.f32.mxu0 %vm333_vm0, %v15696_v11  ;;  %v13496_v11 = vpack.c.bf16 %v10520_v43, %v10519_v17  ;;  %v10436_v17 = vld [vmem:[%s15562_s24 + $0x169] sm:$0xff]  ;;  %v10437_v43 = vld [vmem:[%s15562_s24 + $0x171] sm:$0xff] }
 0x270   : >> { %12161 = vmatmul.mubr.msk.f32.gmra.mrb[16].mxu1 %vm333_vm0, %v15862_v28  ;;  %v16404_v28 = vld [vmem:[%s15562_s24 + $0x119] sm:$0xff] }
 0x271   : >> { %12457 = vmatmul.mubr.msk.f32.vlgmr.msra.gmra.mrb[0].mxu0 %vm333_vm0, %v15717_v27  ;;  %12163 = vmatprep.mubr.msk.f32.mxu1 %vm333_vm0, %v15868_v56  ;;  %v10522_v27 = vld [vmem:[%s18211_s3 + $0x238] sm:$0xff]  ;;  %v16407_v56 = vld [vmem:[%s15562_s24 + $0x121] sm:$0xff] }
 0x272   : >> { %12459 = vmatprep.mubr.msk.f32.mxu0 %vm333_vm0, %v15724_v24  ;;  %13491 = vmatpush3.bf16.msra.mxu0 %v16144_v49  ;;  %v13500_v24 = vpack.c.bf16 %v10522_v27, %v10521_v5  ;;  %v16421_v49 = vld [vmem:[%s15562_s24 + $0x131] sm:$0xff]  ;;  %v10438_v5 = vld [vmem:[%s15562_s24 + $0x179] sm:$0xff]  ;;  %v10439_v27 = vld [vmem:[%s15562_s24 + $0x181] sm:$0xff] }
 0x273   : >> { %13493 = vmatprep.subr.bf16.mxu0 %v13492_v48 }
 0x274   : >> { %12164 = vmatmul.mubr.msk.f32.gmra.mrb[18].mxu1 %vm333_vm0, %v15884_v42  ;;  %v16418_v42 = vld [vmem:[%s15562_s24 + $0x129] sm:$0xff] }
 0x275   : >> { %12460 = vmatmul.mubr.msk.f32.gmra.mrb[2].mxu0 %vm333_vm0, %v15738_v7  ;;  %12166 = vmatprep.mubr.msk.f32.mxu1 %vm333_vm0, %v15890_v6  ;;  %v16379_v7 = vld [vmem:[%s15562_s24 + $0x101] sm:$0xff] }
 0x276   : >> { %12462 = vmatprep.mubr.msk.f32.mxu0 %vm333_vm0, %v15744_v33  ;;  %13495 = vmatpush3.bf16.msra.mxu0 %v13492_v48  ;;  %v16390_v33 = vld [vmem:[%s15562_s24 + $0x109] sm:$0xff] }
 0x277   : >> { %13497 = vmatprep.subr.bf16.mxu0 %v13496_v11  ;;  %v18331_v48 = vld [vmem:[#allocation38_spill] sm:$0xff] }
 0x278   : >> { %12167 = vmatmul.mubr.msk.f32.gmra.mrb[20].mxu1 %vm333_vm0, %v15905_v55 }
 0x279   : >> { %12463 = vmatmul.mubr.msk.f32.gmra.mrb[4].mxu0 %vm333_vm0, %v15758_v37  ;;  %12169 = vmatprep.mubr.msk.f32.mxu1 %vm333_vm0, %v15911_v25  ;;  %v16393_v37 = vld [vmem:[%s15562_s24 + $0x111] sm:$0xff] }
 0x27a   : >> { %12465 = vmatprep.mubr.msk.f32.mxu0 %vm333_vm0, %v16155_v15  ;;  %13499 = vmatpush3.bf16.msra.mxu0 %v13496_v11  ;;  %v18332_v11 = vld [vmem:[#allocation39_spill] sm:$0xff] }
 0x27b   : >> { %13501 = vmatprep.subr.bf16.mxu0 %v13500_v24 }
 0x27c   : >> { %12170 = vmatmul.mubr.msk.f32.gmra.mrb[22].mxu1 %vm333_vm0, %v15925_v3 }
 0x27d   : >> { %12466 = vmatmul.mubr.msk.f32.gmra.mrb[6].mxu0 %vm333_vm0, %v16165_v34  ;;  %12172 = vmatprep.mubr.msk.f32.mxu1 %vm333_vm0, %v15931_v2 }
 0x27e   : >> { %12468 = vmatprep.mubr.msk.f32.mxu0 %vm333_vm0, %v16170_v46  ;;  %13503 = vmatpush3.bf16.msra.mxu0 %v13500_v24  ;;  %v10440_v24 = vld [vmem:[%s15562_s24 + $0x189] sm:$0xff] }
 0x280   : >> { %12173 = vmatmul.mubr.msk.f32.gmra.mrb[24].mxu1 %vm333_vm0, %v15945_v8 }
 0x281   : >> { %12469 = vmatmul.mubr.msk.f32.gmra.mrb[8].mxu0 %vm333_vm0, %v16182_v29  ;;  %12175 = vmatprep.mubr.msk.f32.mxu1 %vm333_vm0, %v15949_v63 }
 0x282   : >> { %12471 = vmatprep.mubr.msk.f32.mxu0 %vm333_vm0, %v16190_v23 }
 0x284   : >> { %12176 = vmatmul.mubr.msk.f32.gmra.mrb[26].mxu1 %vm333_vm0, %v15966_v62 }
 0x285   : >> { %12472 = vmatmul.mubr.msk.f32.gmra.mrb[10].mxu0 %vm333_vm0, %v16202_v61  ;;  %12178 = vmatprep.mubr.msk.f32.mxu1 %vm333_vm0, %v15970_v9 }
 0x286   : >> { %12474 = vmatprep.mubr.msk.f32.mxu0 %vm333_vm0, %v16379_v7 }
 0x288   : >> { %12179 = vmatmul.mubr.msk.f32.gmra.mrb[28].mxu1 %vm333_vm0, %v15987_v38 }
 0x289   : >> { %12475 = vmatmul.mubr.msk.f32.gmra.mrb[12].mxu0 %vm333_vm0, %v16390_v33  ;;  %12181 = vmatprep.mubr.msk.f32.mxu1 %vm333_vm0, %v15991_v0 }
 0x28a   : >> { %12477 = vmatprep.mubr.msk.f32.mxu0 %vm333_vm0, %v16393_v37 }
 0x28c   : >> { %12182 = vmatmul.mubr.msk.f32.gmra.mrb[30].mxu1 %vm333_vm0, %v16007_v31 }
 0x28d   : >> { %12478 = vmatmul.mubr.msk.f32.gmra.mrb[14].mxu0 %vm333_vm0, %v16404_v28  ;;  %12200 = vmatprep.mubr.msk.f32.mxu1 %vm333_vm0, %v15693_v50  ;;  %v16433_v50 = vld [vmem:[%s15562_s24 + $0x139] sm:$0xff] }
 0x28e   : >> { %12480 = vmatprep.mubr.msk.f32.mxu0 %vm333_vm0, %v16407_v56 }
 0x290   : >> { %12201 = vmatmul.mubr.msk.f32.vlgmr.msra.gmra.mrb[0].mxu1 %vm333_vm0, %v18321_v41  ;;  %v10441_v41 = vld [vmem:[%s15562_s24 + $0x191] sm:$0xff] }
 0x291   : >> { %12481 = vmatmul.mubr.msk.f32.gmra.mrb[16].mxu0 %vm333_vm0, %v16418_v42  ;;  %13868 = vmatpush3.bf16.msra.mxu1 %v15519_v60  ;;  %v18325_v60 = vld [vmem:[#allocation34_spill] sm:$0xff] }
 0x292   : >> { %12203 = vmatprep.mubr.msk.f32.mxu1 %vm333_vm0, %v18322_v19  ;;  %12483 = vmatprep.mubr.msk.f32.mxu0 %vm333_vm0, %v16421_v49 }
 0x293   : >> { %13865 = vmatprep.subr.bf16.mxu1 %v18323_v36 }
 0x294   : >> { %12204 = vmatmul.mubr.msk.f32.gmra.mrb[2].mxu1 %vm333_vm0, %v18324_v32 }
 0x295   : >> { %12484 = vmatmul.mubr.msk.f32.gmra.mrb[18].mxu0 %vm333_vm0, %v16433_v50  ;;  %12206 = vmatprep.mubr.msk.f32.mxu1 %vm333_vm0, %v18325_v60 }
 0x296   : >> { %12486 = vmatprep.mubr.msk.f32.mxu0 %vm333_vm0, %v16436_v44  ;;  %13869 = vmatpush3.bf16.msra.mxu1 %v18323_v36 }
 0x297   : >> { %13866 = vmatprep.subr.bf16.mxu1 %v18326_v35 }
 0x298   : >> { %12207 = vmatmul.mubr.msk.f32.gmra.mrb[4].mxu1 %vm333_vm0, %v18327_v57 }
 0x299   : >> { %12487 = vmatmul.mubr.msk.f32.gmra.mrb[20].mxu0 %vm333_vm0, %v16448_v14  ;;  %12209 = vmatprep.mubr.msk.f32.mxu1 %vm333_vm0, %v18328_v39 }
 0x29a   : >> { %12489 = vmatprep.mubr.msk.f32.mxu0 %vm333_vm0, %v10433_v54  ;;  %13870 = vmatpush3.bf16.msra.mxu1 %v18326_v35 }
 0x29b   : >> { %13867 = vmatprep.subr.bf16.mxu1 %v18329_v26 }
 0x29c   : >> { %12210 = vmatmul.mubr.msk.f32.gmra.mrb[6].mxu1 %vm333_vm0, %v18330_v52 }
 0x29d   : >> { %12490 = vmatmul.mubr.msk.f32.gmra.mrb[22].mxu0 %vm333_vm0, %v10434_v45  ;;  %12212 = vmatprep.mubr.msk.f32.mxu1 %vm333_vm0, %v18331_v48 }
 0x29e   : >> { %12492 = vmatprep.mubr.msk.f32.mxu0 %vm333_vm0, %v10435_v10  ;;  %13871 = vmatpush3.bf16.msra.mxu1 %v18329_v26 }
 0x2a0   : >> { %12213 = vmatmul.mubr.msk.f32.gmra.mrb[8].mxu1 %vm333_vm0, %v18332_v11 }
 0x2a1   : >> { %12493 = vmatmul.mubr.msk.f32.gmra.mrb[24].mxu0 %vm333_vm0, %v10436_v17  ;;  %12215 = vmatprep.mubr.msk.f32.mxu1 %vm333_vm0, %v15813_v20  ;;  %v10442_v20 = vld [vmem:[%s15562_s24 + $0x199] sm:$0xff] }
 0x2a2   : >> { %12495 = vmatprep.mubr.msk.f32.mxu0 %vm333_vm0, %v10437_v43 }
 0x2a4   : >> { %12216 = vmatmul.mubr.msk.f32.gmra.mrb[10].mxu1 %vm333_vm0, %v15831_v58  ;;  %v18333_v58 = vld [vmem:[#allocation50_spill] sm:$0xff] }
 0x2a5   : >> { %12496 = vmatmul.mubr.msk.f32.gmra.mrb[26].mxu0 %vm333_vm0, %v10438_v5  ;;  %12218 = vmatprep.mubr.msk.f32.mxu1 %vm333_vm0, %v15839_v22  ;;  %v18334_v22 = vld [vmem:[#allocation51_spill] sm:$0xff] }
 0x2a6   : >> { %12498 = vmatprep.mubr.msk.f32.mxu0 %vm333_vm0, %v10439_v27 }
 0x2a8   : >> { %12219 = vmatmul.mubr.msk.f32.gmra.mrb[12].mxu1 %vm333_vm0, %v15857_v51  ;;  %v18335_v51 = vld [vmem:[#allocation52_spill] sm:$0xff] }
 0x2a9   : >> { %12499 = vmatmul.mubr.msk.f32.gmra.mrb[28].mxu0 %vm333_vm0, %v10440_v24  ;;  %12221 = vmatprep.mubr.msk.f32.mxu1 %vm333_vm0, %v15865_v47  ;;  %v18338_v47 = vld [vmem:[#allocation54_spill] sm:$0xff] }
 0x2aa   : >> { %12501 = vmatprep.mubr.msk.f32.mxu0 %vm333_vm0, %v10441_v41 }
 0x2ac   : >> { %12222 = vmatmul.mubr.msk.f32.gmra.mrb[14].mxu1 %vm333_vm0, %v15879_v53  ;;  %v18339_v53 = vld [vmem:[#allocation41_spill] sm:$0xff] }
 0x2ad   : >> { %12502 = vmatmul.mubr.msk.f32.gmra.mrb[30].mxu0 %vm333_vm0, %v10442_v20  ;;  %12224 = vmatprep.mubr.msk.f32.mxu1 %vm333_vm0, %v15887_v1  ;;  %v18340_v1 = vld [vmem:[#allocation55_spill] sm:$0xff] }
 0x2ae   : >> { %12520 = vmatprep.mubr.msk.f32.mxu0 %vm333_vm0, %v15890_v6  ;;  %v18341_v6 = vld [vmem:[#allocation42_spill] sm:$0xff] }
 0x2b0   : >> { %12225 = vmatmul.mubr.msk.f32.gmra.mrb[16].mxu1 %vm333_vm0, %v15900_v40  ;;  %v18342_v40 = vld [vmem:[#allocation43_spill] sm:$0xff] }
 0x2b1   : >> { %12521 = vmatmul.mubr.msk.f32.vlgmr.msra.gmra.mrb[0].mxu0 %vm333_vm0, %v15905_v55  ;;  %12227 = vmatprep.mubr.msk.f32.mxu1 %vm333_vm0, %v15908_v30  ;;  %v18343_v55 = vld [vmem:[#allocation44_spill] sm:$0xff]  ;;  %v18344_v30 = vld [vmem:[#allocation45_spill] sm:$0xff] }
 0x2b2   : >> { %12523 = vmatprep.mubr.msk.f32.mxu0 %vm333_vm0, %v15911_v25  ;;  %v18345_v25 = vld [vmem:[#allocation46_spill] sm:$0xff] }
 0x2b4   : >> { %12228 = vmatmul.mubr.msk.f32.gmra.mrb[18].mxu1 %vm333_vm0, %v15920_v12  ;;  %v18346_v12 = vld [vmem:[#allocation47_spill] sm:$0xff] }
 0x2b5   : >> { %12524 = vmatmul.mubr.msk.f32.gmra.mrb[2].mxu0 %vm333_vm0, %v15925_v3  ;;  %12230 = vmatprep.mubr.msk.f32.mxu1 %vm333_vm0, %v15928_v13  ;;  %v18347_v3 = vld [vmem:[#allocation48_spill] sm:$0xff] }
 0x2b6   : >> { %12526 = vmatprep.mubr.msk.f32.mxu0 %vm333_vm0, %v15931_v2  ;;  %v10505_v13 = vld [vmem:[%s15562_s24 + $0x152] sm:$0xff]  ;;  %v18348_v2 = vld [vmem:[#allocation49_spill] sm:$0xff] }
 0x2b8   : >> { %12231 = vmatmul.mubr.msk.f32.gmra.mrb[20].mxu1 %vm333_vm0, %v15940_v4  ;;  %v10506_v4 = vld [vmem:[%s15562_s24 + $0x15a] sm:$0xff] }
 0x2b9   : >> { %12527 = vmatmul.mubr.msk.f32.gmra.mrb[4].mxu0 %vm333_vm0, %v15945_v8  ;;  %12233 = vmatprep.mubr.msk.f32.mxu1 %vm333_vm0, %v16173_v18  ;;  %v10507_v8 = vld [vmem:[%s15562_s24 + $0x162] sm:$0xff] }
 0x2ba   : >> { %12529 = vmatprep.mubr.msk.f32.mxu0 %vm333_vm0, %v15949_v63  ;;  %v10508_v63 = vld [vmem:[%s15562_s24 + $0x16a] sm:$0xff] }
 0x2bc   : >> { %12234 = vmatmul.mubr.msk.f32.gmra.mrb[22].mxu1 %vm333_vm0, %v16187_v16 }
 0x2bd   : >> { %12530 = vmatmul.mubr.msk.f32.gmra.mrb[6].mxu0 %vm333_vm0, %v15966_v62  ;;  %12236 = vmatprep.mubr.msk.f32.mxu1 %vm333_vm0, %v16193_v59  ;;  %v18336_v62 = vld [vmem:[#allocation53_spill] sm:$0xff] }
 0x2be   : >> { %12532 = vmatprep.mubr.msk.f32.mxu0 %vm333_vm0, %v15970_v9  ;;  %v18337_v9 = vld [vmem:[#allocation40_spill] sm:$0xff] }
 0x2c0   : >> { %12237 = vmatmul.mubr.msk.f32.gmra.mrb[24].mxu1 %vm333_vm0, %v18333_v58 }
 0x2c1   : >> { %12533 = vmatmul.mubr.msk.f32.gmra.mrb[8].mxu0 %vm333_vm0, %v15987_v38  ;;  %12239 = vmatprep.mubr.msk.f32.mxu1 %vm333_vm0, %v18334_v22  ;;  %v10509_v38 = vld [vmem:[%s15562_s24 + $0x172] sm:$0xff] }
 0x2c2   : >> { %12535 = vmatprep.mubr.msk.f32.mxu0 %vm333_vm0, %v15991_v0  ;;  %v10510_v0 = vld [vmem:[%s15562_s24 + $0x17a] sm:$0xff] }
 0x2c4   : >> { %12240 = vmatmul.mubr.msk.f32.gmra.mrb[26].mxu1 %vm333_vm0, %v18335_v51 }
 0x2c5   : >> { %12536 = vmatmul.mubr.msk.f32.gmra.mrb[10].mxu0 %vm333_vm0, %v16007_v31  ;;  %12242 = vmatprep.mubr.msk.f32.mxu1 %vm333_vm0, %v18336_v62  ;;  %v10511_v31 = vld [vmem:[%s15562_s24 + $0x182] sm:$0xff] }
 0x2c6   : >> { %12538 = vmatprep.mubr.msk.f32.mxu0 %vm333_vm0, %v18337_v9 }
 0x2c8   : >> { %12243 = vmatmul.mubr.msk.f32.gmra.mrb[28].mxu1 %vm333_vm0, %v18338_v47 }
 0x2c9   : >> { %12539 = vmatmul.mubr.msk.f32.gmra.mrb[12].mxu0 %vm333_vm0, %v18339_v53  ;;  %12245 = vmatprep.mubr.msk.f32.mxu1 %vm333_vm0, %v18340_v1 }
 0x2ca   : >> { %12541 = vmatprep.mubr.msk.f32.mxu0 %vm333_vm0, %v18341_v6 }
 0x2cc   : >> { %12246 = vmatmul.mubr.msk.f32.gmra.mrb[30].mxu1 %vm333_vm0, %v16269_v21 }
 0x2cd   : >> { %12542 = vmatmul.mubr.msk.f32.gmra.mrb[14].mxu0 %vm333_vm0, %v18342_v40  ;;  %12288 = vmatprep.mubr.msk.f32.mxu1 %vm333_vm0, %v16155_v15  ;;  %v10512_v15 = vld [vmem:[%s15562_s24 + $0x18a] sm:$0xff] }
 0x2ce   : >> { %12544 = vmatprep.mubr.msk.f32.mxu0 %vm333_vm0, %v18343_v55 }
 0x2d0   : >> { %12289 = vmatmul.mubr.msk.f32.vlgmr.msra.gmra.mrb[16].mxu1 %vm333_vm0, %v16165_v34  ;;  %v10513_v34 = vld [vmem:[%s15562_s24 + $0x192] sm:$0xff] }
 0x2d1   : >> { %12545 = vmatmul.mubr.msk.f32.gmra.mrb[16].mxu0 %vm333_vm0, %v18344_v30  ;;  %12291 = vmatprep.mubr.msk.f32.mxu1 %vm333_vm0, %v16170_v46  ;;  %v10514_v46 = vld [vmem:[%s15562_s24 + $0x19a] sm:$0xff] }
 0x2d2   : >> { %12547 = vmatprep.mubr.msk.f32.mxu0 %vm333_vm0, %v18345_v25 }
 0x2d4   : >> { %12292 = vmatmul.mubr.msk.f32.gmra.mrb[18].mxu1 %vm333_vm0, %v16182_v29 }
 0x2d5   : >> { %12548 = vmatmul.mubr.msk.f32.gmra.mrb[18].mxu0 %vm333_vm0, %v18346_v12  ;;  %12294 = vmatprep.mubr.msk.f32.mxu1 %vm333_vm0, %v16190_v23 }
 0x2d6   : >> { %12550 = vmatprep.mubr.msk.f32.mxu0 %vm333_vm0, %v18347_v3 }
 0x2d8   : >> { %12295 = vmatmul.mubr.msk.f32.gmra.mrb[20].mxu1 %vm333_vm0, %v16202_v61 }
 0x2d9   : >> { %12551 = vmatmul.mubr.msk.f32.gmra.mrb[20].mxu0 %vm333_vm0, %v18348_v2  ;;  %12297 = vmatprep.mubr.msk.f32.mxu1 %vm333_vm0, %v16379_v7 }
 0x2da   : >> { %12553 = vmatprep.mubr.msk.f32.mxu0 %vm333_vm0, %v10505_v13 }
 0x2dc   : >> { %12298 = vmatmul.mubr.msk.f32.gmra.mrb[22].mxu1 %vm333_vm0, %v16390_v33 }
 0x2dd   : >> { %12554 = vmatmul.mubr.msk.f32.gmra.mrb[22].mxu0 %vm333_vm0, %v10506_v4  ;;  %12300 = vmatprep.mubr.msk.f32.mxu1 %vm333_vm0, %v16393_v37 }
 0x2de   : >> { %12556 = vmatprep.mubr.msk.f32.mxu0 %vm333_vm0, %v10507_v8 }
 0x2e0   : >> { %12301 = vmatmul.mubr.msk.f32.gmra.mrb[24].mxu1 %vm333_vm0, %v16404_v28 }
 0x2e1   : >> { %12557 = vmatmul.mubr.msk.f32.gmra.mrb[24].mxu0 %vm333_vm0, %v10508_v63  ;;  %12303 = vmatprep.mubr.msk.f32.mxu1 %vm333_vm0, %v16407_v56 }
 0x2e2   : >> { %12559 = vmatprep.mubr.msk.f32.mxu0 %vm333_vm0, %v10509_v38 }
 0x2e4   : >> { %12304 = vmatmul.mubr.msk.f32.gmra.mrb[26].mxu1 %vm333_vm0, %v16418_v42 }
 0x2e5   : >> { %12560 = vmatmul.mubr.msk.f32.gmra.mrb[26].mxu0 %vm333_vm0, %v10510_v0  ;;  %12306 = vmatprep.mubr.msk.f32.mxu1 %vm333_vm0, %v16421_v49 }
 0x2e6   : >> { %12562 = vmatprep.mubr.msk.f32.mxu0 %vm333_vm0, %v10511_v31 }
 0x2e8   : >> { %12307 = vmatmul.mubr.msk.f32.gmra.mrb[28].mxu1 %vm333_vm0, %v16433_v50  ;;  %v16640_v50 = vld [vmem:[%s18212_s4] ss:$0 sm:$0xff] }
 0x2e9   : >> { %12563 = vmatmul.mubr.msk.f32.gmra.mrb[28].mxu0 %vm333_vm0, %v10512_v15  ;;  %12309 = vmatprep.mubr.msk.f32.mxu1 %vm333_vm0, %v16436_v44 }
 0x2ea   : >> { %12565 = vmatprep.mubr.msk.f32.mxu0 %vm333_vm0, %v10513_v34 }
 0x2ec   : >> { %12310 = vmatmul.mubr.msk.f32.gmra.mrb[30].mxu1 %vm333_vm0, %v16448_v14 }
 0x2ed   : >> { %12566 = vmatmul.mubr.msk.f32.gmra.mrb[30].mxu0 %vm333_vm0, %v10514_v46 }
 0x363   : >> { %v12202_v18 = vpop.f32.mrb[0].mxu1 }
 0x364   : >> { %v3068_v29 = vpop.f32.mrb[1].mxu1  ;;  %v13872_v36 = vadd.f32 %v12202_v18, %v16640_v50 }
 0x365   : >> { %v13874_v32 = vadd.f32 %v16640_v50, %v3068_v29 }
 0x367   : >> { %v12205_v16 = vpop.f32.mrb[2].mxu1 }
 0x368   : >> { %v3078_v23 = vpop.f32.mrb[3].mxu1  ;;  %v13876_v57 = vadd.f32 %v12205_v16, %v16640_v50 }
 0x369   : >> { %v13878_v45 = vadd.f32 %v16640_v50, %v3078_v23 }
 0x36b   : >> { %v12208_v59 = vpop.f32.mrb[4].mxu1 }
 0x36c   : >> { %v3088_v61 = vpop.f32.mrb[5].mxu1  ;;  %v13880_v5 = vadd.f32 %v12208_v59, %v16640_v50 }
 0x36d   : >> { %v13882_v24 = vadd.f32 %v16640_v50, %v3088_v61 }
 0x36f   : >> { %v12211_v21 = vpop.f32.mrb[6].mxu1 }
 0x370   : >> { %v3098_v7 = vpop.f32.mrb[7].mxu1  ;;  %v13884_v47 = vadd.f32 %v12211_v21, %v16640_v50 }
 0x371   : >> { %v13886_v1 = vadd.f32 %v16640_v50, %v3098_v7 }
 0x373   : >> { %v12214_v33 = vpop.f32.mrb[8].mxu1 }
 0x374   : >> { %v3108_v37 = vpop.f32.mrb[9].mxu1  ;;  %v13888_v13 = vadd.f32 %v12214_v33, %v16640_v50 }
 0x375   : >> { %v13890_v4 = vadd.f32 %v16640_v50, %v3108_v37 }
 0x377   : >> { %v16627_v28 = vpop.f32.mrb[10].mxu1 }
 0x378   : >> { %v16629_v56 = vpop.f32.mrb[11].mxu1  ;;  %v13892_v46 = vadd.f32 %v16627_v28, %v16640_v50 }
 0x379   : >> { %v13894_v29 = vadd.f32 %v16640_v50, %v16629_v56 }
 0x37b   : >> { %v16631_v42 = vpop.f32.mrb[12].mxu1 }
 0x37c   : >> { %v16633_v49 = vpop.f32.mrb[13].mxu1  ;;  %v13896_v37 = vadd.f32 %v16631_v42, %v16640_v50 }
 0x37d   : >> { %v13898_v56 = vadd.f32 %v16640_v50, %v16633_v49 }
 0x37f   : >> { %v16635_v19 = vpop.f32.mrb[14].mxu1 }
 0x380   : >> { %v16642_v44 = vpop.f32.mrb[15].mxu1  ;;  %v13900_v42 = vadd.f32 %v16635_v19, %v16640_v50 }
 0x381   : >> { %v13902_v49 = vadd.f32 %v16640_v50, %v16642_v44 }
 0x384   : >> { %v12522_v60 = vpop.f32.mrb[0].mxu0 }
 0x385   : >> { %v13873_v14 = vadd.f32 %v13872_v36, %v12522_v60  ;;  %v5048_v54 = vpop.f32.mrb[1].mxu0 }
 0x386   : >> { %v13875_v35 = vadd.f32 %v13874_v32, %v5048_v54 }
 0x387   : >> { %vm5240_vm3 = vcmp.gt.f32.partialorder %v13873_v14, 0.0  ;;  %v5272_v39 = vmul.f32 0.01, %v13873_v14 }
 0x388   : >> { %vm5239_vm5 = vcmp.gt.f32.partialorder %v13875_v35, 0.0  ;;  %v5271_v10 = vmul.f32 0.01, %v13875_v35  ;;  %v12525_v26 = vpop.f32.mrb[2].mxu0 }
 0x389   : >> { %v5304_v52 = vsel %vm5240_vm3, %v13873_v14, %v5272_v39  ;;  %v13877_v48 = vadd.f32 %v13876_v57, %v12525_v26  ;;  %v5058_v17 = vpop.f32.mrb[3].mxu0 }
 0x38a   : >> { %5338 = vst.msk [vmem:[%s16649_s26 + $0x8] sm:$0xff] %vm5336_vm4, %v5304_v52  ;;  %v5303_v43 = vsel %vm5239_vm5, %v13875_v35, %v5271_v10  ;;  %v13879_v11 = vadd.f32 %v13878_v45, %v5058_v17 }
 0x38b   : >> { %5337 = vst.msk [vmem:[%s16649_s26] sm:$0xff] %vm5336_vm4, %v5303_v43  ;;  %vm5242_vm6 = vcmp.gt.f32.partialorder %v13877_v48, 0.0  ;;  %v5274_v27 = vmul.f32 0.01, %v13877_v48 }
 0x38c   : >> { %vm5241_vm7 = vcmp.gt.f32.partialorder %v13879_v11, 0.0  ;;  %v5273_v41 = vmul.f32 0.01, %v13879_v11  ;;  %v12528_v20 = vpop.f32.mrb[4].mxu0 }
 0x38d   : >> { %v5306_v58 = vsel %vm5242_vm6, %v13877_v48, %v5274_v27  ;;  %v13881_v22 = vadd.f32 %v13880_v5, %v12528_v20  ;;  %v5068_v51 = vpop.f32.mrb[5].mxu0 }
 0x38e   : >> { %5340 = vst.msk [vmem:[%s16649_s26 + $0x18] sm:$0xff] %vm5336_vm4, %v5306_v58  ;;  %v5305_v62 = vsel %vm5241_vm7, %v13879_v11, %v5273_v41  ;;  %v13883_v9 = vadd.f32 %v13882_v24, %v5068_v51 }
 0x38f   : >> { %5339 = vst.msk [vmem:[%s16649_s26 + $0x10] sm:$0xff] %vm5336_vm4, %v5305_v62  ;;  %vm5244_vm8 = vcmp.gt.f32.partialorder %v13881_v22, 0.0  ;;  %v5276_v53 = vmul.f32 0.01, %v13881_v22 }
 0x390   : >> { %vm5243_vm9 = vcmp.gt.f32.partialorder %v13883_v9, 0.0  ;;  %v5275_v6 = vmul.f32 0.01, %v13883_v9  ;;  %v12531_v40 = vpop.f32.mrb[6].mxu0 }
 0x391   : >> { %v5308_v55 = vsel %vm5244_vm8, %v13881_v22, %v5276_v53  ;;  %v13885_v30 = vadd.f32 %v13884_v47, %v12531_v40  ;;  %v5078_v25 = vpop.f32.mrb[7].mxu0 }
 0x392   : >> { %5342 = vst.msk [vmem:[%s16649_s26 + $0x28] sm:$0xff] %vm5336_vm4, %v5308_v55  ;;  %v5307_v12 = vsel %vm5243_vm9, %v13883_v9, %v5275_v6  ;;  %v13887_v3 = vadd.f32 %v13886_v1, %v5078_v25 }
 0x393   : >> { %5341 = vst.msk [vmem:[%s16649_s26 + $0x20] sm:$0xff] %vm5336_vm4, %v5307_v12  ;;  %vm5246_vm10 = vcmp.gt.f32.partialorder %v13885_v30, 0.0  ;;  %v5278_v2 = vmul.f32 0.01, %v13885_v30 }
 0x394   : >> { %vm5245_vm11 = vcmp.gt.f32.partialorder %v13887_v3, 0.0  ;;  %v5277_v8 = vmul.f32 0.01, %v13887_v3  ;;  %v12534_v63 = vpop.f32.mrb[8].mxu0 }
 0x395   : >> { %v5310_v38 = vsel %vm5246_vm10, %v13885_v30, %v5278_v2  ;;  %v13889_v0 = vadd.f32 %v13888_v13, %v12534_v63  ;;  %v5088_v31 = vpop.f32.mrb[9].mxu0 }
 0x396   : >> { %5344 = vst.msk [vmem:[%s16649_s26 + $0x38] sm:$0xff] %vm5336_vm4, %v5310_v38  ;;  %v5309_v15 = vsel %vm5245_vm11, %v13887_v3, %v5277_v8  ;;  %v13891_v34 = vadd.f32 %v13890_v4, %v5088_v31 }
 0x397   : >> { %5343 = vst.msk [vmem:[%s16649_s26 + $0x30] sm:$0xff] %vm5336_vm4, %v5309_v15  ;;  %vm5248_vm12 = vcmp.gt.f32.partialorder %v13889_v0, 0.0  ;;  %v5280_v18 = vmul.f32 0.01, %v13889_v0 }
 0x398   : >> { %vm5247_vm13 = vcmp.gt.f32.partialorder %v13891_v34, 0.0  ;;  %v5279_v16 = vmul.f32 0.01, %v13891_v34  ;;  %v12537_v23 = vpop.f32.mrb[10].mxu0 }
 0x399   : >> { %v5312_v59 = vsel %vm5248_vm12, %v13889_v0, %v5280_v18  ;;  %v13893_v61 = vadd.f32 %v13892_v46, %v12537_v23  ;;  %v5098_v21 = vpop.f32.mrb[11].mxu0 }
 0x39a   : >> { %5346 = vst.msk [vmem:[%s16649_s26 + $0x48] sm:$0xff] %vm5336_vm4, %v5312_v59  ;;  %v5311_v7 = vsel %vm5247_vm13, %v13891_v34, %v5279_v16  ;;  %v13895_v33 = vadd.f32 %v13894_v29, %v5098_v21 }
 0x39b   : >> { %5345 = vst.msk [vmem:[%s16649_s26 + $0x40] sm:$0xff] %vm5336_vm4, %v5311_v7  ;;  %vm5250_vm14 = vcmp.gt.f32.partialorder %v13893_v61, 0.0  ;;  %v5282_v28 = vmul.f32 0.01, %v13893_v61 }
 0x39c   : >> { %vm5249_vm15 = vcmp.gt.f32.partialorder %v13895_v33, 0.0  ;;  %v5281_v36 = vmul.f32 0.01, %v13895_v33  ;;  %v12540_v32 = vpop.f32.mrb[12].mxu0 }
 0x39d   : >> { %v5314_v60 = vsel %vm5250_vm14, %v13893_v61, %v5282_v28  ;;  %v13897_v14 = vadd.f32 %v13896_v37, %v12540_v32  ;;  %v5108_v54 = vpop.f32.mrb[13].mxu0 }
 0x39e   : >> { %5348 = vst.msk [vmem:[%s16649_s26 + $0x58] sm:$0xff] %vm5336_vm4, %v5314_v60  ;;  %v5313_v35 = vsel %vm5249_vm15, %v13895_v33, %v5281_v36  ;;  %v13899_v57 = vadd.f32 %v13898_v56, %v5108_v54 }
 0x39f   : >> { %5347 = vst.msk [vmem:[%s16649_s26 + $0x50] sm:$0xff] %vm5336_vm4, %v5313_v35  ;;  %vm5252_vm1 = vcmp.gt.f32.partialorder %v13897_v14, 0.0  ;;  %v5284_v39 = vmul.f32 0.01, %v13897_v14 }
 0x3a0   : >> { %vm5251_vm2 = vcmp.gt.f32.partialorder %v13899_v57, 0.0  ;;  %v5283_v45 = vmul.f32 0.01, %v13899_v57  ;;  %v12543_v10 = vpop.f32.mrb[14].mxu0 }
 0x3a1   : >> { %v5316_v26 = vsel %vm5252_vm1, %v13897_v14, %v5284_v39  ;;  %v13901_v52 = vadd.f32 %v13900_v42, %v12543_v10  ;;  %v5118_v48 = vpop.f32.mrb[15].mxu0 }
 0x3a2   : >> { %5350 = vst.msk [vmem:[%s16649_s26 + $0x68] sm:$0xff] %vm5336_vm4, %v5316_v26  ;;  %v5315_v17 = vsel %vm5251_vm2, %v13899_v57, %v5283_v45  ;;  %v13903_v43 = vadd.f32 %v13902_v49, %v5118_v48 }
 0x3a3   : >> { %5349 = vst.msk [vmem:[%s16649_s26 + $0x60] sm:$0xff] %vm5336_vm4, %v5315_v17  ;;  %vm5254_vm3 = vcmp.gt.f32.partialorder %v13901_v52, 0.0  ;;  %v5286_v19 = vmul.f32 0.01, %v13901_v52  ;;  %v12290_v11 = vpop.f32.mrb[16].mxu1 }
 0x3a4   : >> { %vm5253_vm5 = vcmp.gt.f32.partialorder %v13903_v43, 0.0  ;;  %v5285_v5 = vmul.f32 0.01, %v13903_v43  ;;  %v13904_v44 = vadd.f32 %v12290_v11, %v16640_v50  ;;  %v12546_v27 = vpop.f32.mrb[16].mxu0  ;;  %v3544_v24 = vpop.f32.mrb[17].mxu1 }
 0x3a5   : >> { %v5318_v41 = vsel %vm5254_vm3, %v13901_v52, %v5286_v19  ;;  %v13906_v20 = vadd.f32 %v16640_v50, %v3544_v24  ;;  %v5128_v58 = vpop.f32.mrb[17].mxu0 }
 0x3a6   : >> { %5352 = vst.msk [vmem:[%s16649_s26 + $0x78] sm:$0xff] %vm5336_vm4, %v5318_v41  ;;  %v5317_v22 = vsel %vm5253_vm5, %v13903_v43, %v5285_v5  ;;  %v13905_v51 = vadd.f32 %v13904_v44, %v12546_v27 }
 0x3a7   : >> { %5351 = vst.msk [vmem:[%s16649_s26 + $0x70] sm:$0xff] %vm5336_vm4, %v5317_v22  ;;  %v13907_v62 = vadd.f32 %v13906_v20, %v5128_v58  ;;  %v12293_v9 = vpop.f32.mrb[18].mxu1 }
 0x3a8   : >> { %vm5256_vm6 = vcmp.gt.f32.partialorder %v13905_v51, 0.0  ;;  %v5288_v47 = vmul.f32 0.01, %v13905_v51  ;;  %v13908_v53 = vadd.f32 %v12293_v9, %v16640_v50  ;;  %v12549_v1 = vpop.f32.mrb[18].mxu0  ;;  %v3554_v6 = vpop.f32.mrb[19].mxu1 }
 0x3a9   : >> { %vm5255_vm7 = vcmp.gt.f32.partialorder %v13907_v62, 0.0  ;;  %v5287_v40 = vmul.f32 0.01, %v13907_v62  ;;  %v13910_v55 = vadd.f32 %v16640_v50, %v3554_v6  ;;  %v5138_v30 = vpop.f32.mrb[19].mxu0 }
 0x3aa   : >> { %v5320_v25 = vsel %vm5256_vm6, %v13905_v51, %v5288_v47  ;;  %v13909_v12 = vadd.f32 %v13908_v53, %v12549_v1 }
 0x3ab   : >> { %5354 = vst.msk [vmem:[%s16649_s26 + $0x88] sm:$0xff] %vm5336_vm4, %v5320_v25  ;;  %v5319_v3 = vsel %vm5255_vm7, %v13907_v62, %v5287_v40  ;;  %v13911_v13 = vadd.f32 %v13910_v55, %v5138_v30  ;;  %v12296_v2 = vpop.f32.mrb[20].mxu1 }
 0x3ac   : >> { %5353 = vst.msk [vmem:[%s16649_s26 + $0x80] sm:$0xff] %vm5336_vm4, %v5319_v3  ;;  %vm5258_vm8 = vcmp.gt.f32.partialorder %v13909_v12, 0.0  ;;  %v5290_v4 = vmul.f32 0.01, %v13909_v12  ;;  %v13912_v8 = vadd.f32 %v12296_v2, %v16640_v50  ;;  %v12552_v63 = vpop.f32.mrb[20].mxu0  ;;  %v3564_v38 = vpop.f32.mrb[21].mxu1 }
 0x3ad   : >> { %vm5257_vm9 = vcmp.gt.f32.partialorder %v13911_v13, 0.0  ;;  %v5289_v0 = vmul.f32 0.01, %v13911_v13  ;;  %v13914_v31 = vadd.f32 %v16640_v50, %v3564_v38  ;;  %v5148_v15 = vpop.f32.mrb[21].mxu0 }
 0x3ae   : >> { %v5322_v34 = vsel %vm5258_vm8, %v13909_v12, %v5290_v4  ;;  %v13913_v46 = vadd.f32 %v13912_v8, %v12552_v63 }
 0x3af   : >> { %5356 = vst.msk [vmem:[%s16649_s26 + $0x98] sm:$0xff] %vm5336_vm4, %v5322_v34  ;;  %v5321_v18 = vsel %vm5257_vm9, %v13911_v13, %v5289_v0  ;;  %v13915_v29 = vadd.f32 %v13914_v31, %v5148_v15  ;;  %v12299_v16 = vpop.f32.mrb[22].mxu1 }
 0x3b0   : >> { %5355 = vst.msk [vmem:[%s16649_s26 + $0x90] sm:$0xff] %vm5336_vm4, %v5321_v18  ;;  %vm5260_vm10 = vcmp.gt.f32.partialorder %v13913_v46, 0.0  ;;  %v5292_v23 = vmul.f32 0.01, %v13913_v46  ;;  %v13916_v59 = vadd.f32 %v12299_v16, %v16640_v50  ;;  %v12555_v61 = vpop.f32.mrb[22].mxu0  ;;  %v3574_v21 = vpop.f32.mrb[23].mxu1 }
 0x3b1   : >> { %vm5259_vm11 = vcmp.gt.f32.partialorder %v13915_v29, 0.0  ;;  %v5291_v7 = vmul.f32 0.01, %v13915_v29  ;;  %v13918_v33 = vadd.f32 %v16640_v50, %v3574_v21  ;;  %v5158_v37 = vpop.f32.mrb[23].mxu0 }
 0x3b2   : >> { %v5324_v28 = vsel %vm5260_vm10, %v13913_v46, %v5292_v23  ;;  %v13917_v56 = vadd.f32 %v13916_v59, %v12555_v61 }
 0x3b3   : >> { %5358 = vst.msk [vmem:[%s16649_s26 + $0xa8] sm:$0xff] %vm5336_vm4, %v5324_v28  ;;  %v5323_v36 = vsel %vm5259_vm11, %v13915_v29, %v5291_v7  ;;  %v13919_v32 = vadd.f32 %v13918_v33, %v5158_v37  ;;  %v12302_v60 = vpop.f32.mrb[24].mxu1 }
 0x3b4   : >> { %5357 = vst.msk [vmem:[%s16649_s26 + $0xa0] sm:$0xff] %vm5336_vm4, %v5323_v36  ;;  %vm5262_vm12 = vcmp.gt.f32.partialorder %v13917_v56, 0.0  ;;  %v5294_v14 = vmul.f32 0.01, %v13917_v56  ;;  %v13920_v54 = vadd.f32 %v12302_v60, %v16640_v50  ;;  %v12558_v35 = vpop.f32.mrb[24].mxu0  ;;  %v3584_v57 = vpop.f32.mrb[25].mxu1 }
 0x3b5   : >> { %vm5261_vm13 = vcmp.gt.f32.partialorder %v13919_v32, 0.0  ;;  %v5293_v42 = vmul.f32 0.01, %v13919_v32  ;;  %v13922_v39 = vadd.f32 %v16640_v50, %v3584_v57  ;;  %v5168_v49 = vpop.f32.mrb[25].mxu0 }
 0x3b6   : >> { %v5326_v45 = vsel %vm5262_vm12, %v13917_v56, %v5294_v14  ;;  %v13921_v10 = vadd.f32 %v13920_v54, %v12558_v35 }
 0x3b7   : >> { %5360 = vst.msk [vmem:[%s16649_s26 + $0xb8] sm:$0xff] %vm5336_vm4, %v5326_v45  ;;  %v5325_v26 = vsel %vm5261_vm13, %v13919_v32, %v5293_v42  ;;  %v13923_v52 = vadd.f32 %v13922_v39, %v5168_v49  ;;  %v12305_v48 = vpop.f32.mrb[26].mxu1 }
 0x3b8   : >> { %5359 = vst.msk [vmem:[%s16649_s26 + $0xb0] sm:$0xff] %vm5336_vm4, %v5325_v26  ;;  %vm5264_vm14 = vcmp.gt.f32.partialorder %v13921_v10, 0.0  ;;  %v5296_v17 = vmul.f32 0.01, %v13921_v10  ;;  %v13924_v43 = vadd.f32 %v12305_v48, %v16640_v50  ;;  %v12561_v19 = vpop.f32.mrb[26].mxu0  ;;  %v3594_v11 = vpop.f32.mrb[27].mxu1 }
 0x3b9   : >> { %vm5263_vm15 = vcmp.gt.f32.partialorder %v13923_v52, 0.0  ;;  %v5295_v5 = vmul.f32 0.01, %v13923_v52  ;;  %v13926_v44 = vadd.f32 %v16640_v50, %v3594_v11  ;;  %v5178_v27 = vpop.f32.mrb[27].mxu0 }
 0x3ba   : >> { %v5328_v24 = vsel %vm5264_vm14, %v13921_v10, %v5296_v17  ;;  %v13925_v41 = vadd.f32 %v13924_v43, %v12561_v19 }
 0x3bb   : >> { %5362 = vst.msk [vmem:[%s16649_s26 + $0xc8] sm:$0xff] %vm5336_vm4, %v5328_v24  ;;  %v5327_v20 = vsel %vm5263_vm15, %v13923_v52, %v5295_v5  ;;  %v13927_v58 = vadd.f32 %v13926_v44, %v5178_v27  ;;  %v12308_v22 = vpop.f32.mrb[28].mxu1 }
 0x3bc   : >> { %5361 = vst.msk [vmem:[%s16649_s26 + $0xc0] sm:$0xff] %vm5336_vm4, %v5327_v20  ;;  %vm5266_vm1 = vcmp.gt.f32.partialorder %v13925_v41, 0.0  ;;  %v5298_v51 = vmul.f32 0.01, %v13925_v41  ;;  %v13928_v62 = vadd.f32 %v12308_v22, %v16640_v50  ;;  %v12564_v9 = vpop.f32.mrb[28].mxu0  ;;  %v3604_v47 = vpop.f32.mrb[29].mxu1 }
 0x3bd   : >> { %vm5265_vm2 = vcmp.gt.f32.partialorder %v13927_v58, 0.0  ;;  %v5297_v53 = vmul.f32 0.01, %v13927_v58  ;;  %v13930_v1 = vadd.f32 %v16640_v50, %v3604_v47  ;;  %v5188_v6 = vpop.f32.mrb[29].mxu0 }
 0x3be   : >> { %v5330_v40 = vsel %vm5266_vm1, %v13925_v41, %v5298_v51  ;;  %v13929_v55 = vadd.f32 %v13928_v62, %v12564_v9 }
 0x3bf   : >> { %5364 = vst.msk [vmem:[%s16649_s26 + $0xd8] sm:$0xff] %vm5336_vm4, %v5330_v40  ;;  %v5329_v30 = vsel %vm5265_vm2, %v13927_v58, %v5297_v53  ;;  %v13931_v25 = vadd.f32 %v13930_v1, %v5188_v6  ;;  %v12311_v12 = vpop.f32.mrb[30].mxu1 }
 0x3c0   : >> { %5363 = vst.msk [vmem:[%s16649_s26 + $0xd0] sm:$0xff] %vm5336_vm4, %v5329_v30  ;;  %vm5268_vm3 = vcmp.gt.f32.partialorder %v13929_v55, 0.0  ;;  %v5300_v3 = vmul.f32 0.01, %v13929_v55  ;;  %v13932_v13 = vadd.f32 %v12311_v12, %v16640_v50  ;;  %v12567_v2 = vpop.f32.mrb[30].mxu0  ;;  %v3614_v4 = vpop.f32.mrb[31].mxu1 }
 0x3c1   : >> { %vm5267_vm5 = vcmp.gt.f32.partialorder %v13931_v25, 0.0  ;;  %v5299_v8 = vmul.f32 0.01, %v13931_v25  ;;  %v13934_v63 = vadd.f32 %v16640_v50, %v3614_v4  ;;  %v5198_v38 = vpop.f32.mrb[31].mxu0 }
 0x3c2   : >> { %v5332_v0 = vsel %vm5268_vm3, %v13929_v55, %v5300_v3  ;;  %v13933_v31 = vadd.f32 %v13932_v13, %v12567_v2  ;;  %1664 = sbr.rel (!%p1662_p7) target bundleno = 445 (0x1bd), region = 258 }
 0x3c3   : >> { %5366 = vst.msk [vmem:[%s16649_s26 + $0xe8] sm:$0xff] %vm5336_vm4, %v5332_v0  ;;  %v5331_v15 = vsel %vm5267_vm5, %v13931_v25, %v5299_v8  ;;  %v13935_v34 = vadd.f32 %v13934_v63, %v5198_v38 }
 0x3c4   : >> { %5365 = vst.msk [vmem:[%s16649_s26 + $0xe0] sm:$0xff] %vm5336_vm4, %v5331_v15  ;;  %vm5270_vm6 = vcmp.gt.f32.partialorder %v13933_v31, 0.0  ;;  %v5302_v46 = vmul.f32 0.01, %v13933_v31 }
 0x3c5   : >> { %vm5269_vm7 = vcmp.gt.f32.partialorder %v13935_v34, 0.0  ;;  %v5301_v18 = vmul.f32 0.01, %v13935_v34 }
 0x3c6   : >> { %v5334_v29 = vsel %vm5270_vm6, %v13933_v31, %v5302_v46 }
 0x3c7   : >> { %5368 = vst.msk [vmem:[%s16649_s26 + $0xf8] sm:$0xff] %vm5336_vm4, %v5334_v29  ;;  %v5333_v16 = vsel %vm5269_vm7, %v13935_v34, %v5301_v18 }
 0x3c8   : >> { %5367 = vst.msk [vmem:[%s16649_s26 + $0xf0] sm:$0xff] %vm5336_vm4, %v5333_v16 }
 0x3c9 LB: >> { %s5375_s28 = smul.u32 240, %s14572_s27  ;;  %vm5494_vm8 = vcmask 253952   ;;  %s14572_s27 = sphi %s16752_s27, %s5374_s27  }
 0x3ca   : >> { %s5488_s20 = smul.u32 25, %s14572_s27  ;;  %s5374_s27 = sadd.s32 1, %s14572_s27  }
 0x3cb   : >> { %s16758_s29 = scalar_lea.vmem [#allocation3], %s5375_s28  ;;  %p5371_p8 = scmp.ge.s32.totalorder %s5374_s27, 37  }
 0x3cc   : >> { %s5489_s10 = scalar_lea.vmem [#allocation4], %s5488_s20  ;;  %s16803_s11 = smov (%p5371_p8), 0  }
 0x3cf   : >> { %v5377_v50 = vld [vmem:[%s16758_s29] ss:$3 sm:$0xff]  ;;  %v10558_v23 = vld [vmem:[%s16758_s29 + $0x1] ss:$3 sm:$0xff]  ;;  %v10562_v59 = vld [vmem:[%s16758_s29 + $0x2] ss:$3 sm:$0xff] }
 0x3d0   : >> { %v5393_v61 = vmax.f32 %v5377_v50, %v10558_v23  ;;  %v10566_v21 = vld [vmem:[%s16758_s29 + $0x50] ss:$3 sm:$0xff]  ;;  %v10555_v33 = vld [vmem:[%s16758_s29 + $0x18] ss:$3 sm:$0xff]  ;;  %v10570_v28 = vld [vmem:[%s16758_s29 + $0x51] ss:$3 sm:$0xff] }
 0x3d1   : >> { %v10559_v37 = vld [vmem:[%s16758_s29 + $0x19] ss:$3 sm:$0xff]  ;;  %v10563_v36 = vld [vmem:[%s16758_s29 + $0x1a] ss:$3 sm:$0xff]  ;;  %v10574_v14 = vld [vmem:[%s16758_s29 + $0x52] ss:$3 sm:$0xff] }
 0x3d2   : >> { %v5406_v7 = vmax.f32 %v5393_v61, %v10562_v59  ;;  %v5394_v56 = vmax.f32 %v10555_v33, %v10559_v37  ;;  %v10567_v60 = vld [vmem:[%s16758_s29 + $0x68] ss:$3 sm:$0xff]  ;;  %v10556_v35 = vld [vmem:[%s16758_s29 + $0x30] ss:$3 sm:$0xff]  ;;  %v10578_v39 = vld [vmem:[%s16758_s29 + $0xa0] ss:$3 sm:$0xff] }
 0x3d3   : >> { %v10560_v57 = vld [vmem:[%s16758_s29 + $0x31] ss:$3 sm:$0xff]  ;;  %v10571_v49 = vld [vmem:[%s16758_s29 + $0x69] ss:$3 sm:$0xff]  ;;  %v10582_v26 = vld [vmem:[%s16758_s29 + $0xa1] ss:$3 sm:$0xff] }
 0x3d4   : >> { %v5419_v32 = vmax.f32 %v5406_v7, %v10566_v21  ;;  %v5407_v54 = vmax.f32 %v5394_v56, %v10563_v36  ;;  %v5395_v45 = vmax.f32 %v10556_v35, %v10560_v57  ;;  %v10564_v10 = vld [vmem:[%s16758_s29 + $0x32] ss:$3 sm:$0xff]  ;;  %v10575_v48 = vld [vmem:[%s16758_s29 + $0x6a] ss:$3 sm:$0xff]  ;;  %v10586_v20 = vld [vmem:[%s16758_s29 + $0xa2] ss:$3 sm:$0xff] }
 0x3d5   : >> { %v10568_v17 = vld [vmem:[%s16758_s29 + $0x80] ss:$3 sm:$0xff]  ;;  %v10572_v11 = vld [vmem:[%s16758_s29 + $0x81] ss:$3 sm:$0xff]  ;;  %v10576_v9 = vld [vmem:[%s16758_s29 + $0x82] ss:$3 sm:$0xff] }
 0x3d6   : >> { %v5432_v42 = vmax.f32 %v5419_v32, %v10570_v28  ;;  %v5420_v52 = vmax.f32 %v5407_v54, %v10567_v60  ;;  %v5408_v19 = vmax.f32 %v5395_v45, %v10564_v10  ;;  %v10557_v5 = vld [vmem:[%s16758_s29 + $0x48] ss:$3 sm:$0x1]  ;;  %v10561_v27 = vld [vmem:[%s16758_s29 + $0x49] ss:$3 sm:$0x1] }
 0x3d7   : >> { %v10565_v24 = vld [vmem:[%s16758_s29 + $0x4a] ss:$3 sm:$0x1]  ;;  %v5396_v51 = vmax.f32 %v10557_v5, %v10561_v27  ;;  %v10569_v47 = vld [vmem:[%s16758_s29 + $0x98] ss:$3 sm:$0x1] }
 0x3d8   : >> { %v5445_v43 = vmax.f32 %v5432_v42, %v10574_v14  ;;  %v5433_v44 = vmax.f32 %v5420_v52, %v10571_v49  ;;  %v10579_v58 = vld [vmem:[%s16758_s29 + $0xb8] ss:$3 sm:$0xff]  ;;  %v5421_v22 = vmax.f32 %v5408_v19, %v10568_v17  ;;  %v10583_v1 = vld [vmem:[%s16758_s29 + $0xb9] ss:$3 sm:$0xff]  ;;  %v10587_v3 = vld [vmem:[%s16758_s29 + $0xba] ss:$3 sm:$0xff] }
 0x3d9   : >> { %v5409_v40 = vmax.f32 %v5396_v51, %v10565_v24  ;;  %v10580_v30 = vld [vmem:[%s16758_s29 + $0xd0] ss:$3 sm:$0xff]  ;;  %v10584_v8 = vld [vmem:[%s16758_s29 + $0xd1] ss:$3 sm:$0xff]  ;;  %v10588_v15 = vld [vmem:[%s16758_s29 + $0xd2] ss:$3 sm:$0xff] }
 0x3da   : >> { %v5458_v41 = vmax.f32 %v5445_v43, %v10578_v39  ;;  %v5446_v62 = vmax.f32 %v5433_v44, %v10575_v48  ;;  %v5434_v6 = vmax.f32 %v5421_v22, %v10572_v11  ;;  %v10573_v25 = vld [vmem:[%s16758_s29 + $0x99] ss:$3 sm:$0x1]  ;;  %v10577_v63 = vld [vmem:[%s16758_s29 + $0x9a] ss:$3 sm:$0x1] }
 0x3db   : >> { %v5422_v2 = vmax.f32 %v5409_v40, %v10569_v47  ;;  %v10581_v34 = vld [vmem:[%s16758_s29 + $0xe8] ss:$3 sm:$0x1]  ;;  %v10585_v29 = vld [vmem:[%s16758_s29 + $0xe9] ss:$3 sm:$0x1] }
 0x3dc   : >> { %v5471_v53 = vmax.f32 %v5458_v41, %v10582_v26  ;;  %v5459_v55 = vmax.f32 %v5446_v62, %v10579_v58  ;;  %v5447_v13 = vmax.f32 %v5434_v6, %v10576_v9  ;;  %v10589_v23 = vld [vmem:[%s16758_s29 + $0xea] ss:$3 sm:$0x1] }
 0x3dd   : >> { %v5435_v0 = vmax.f32 %v5422_v2, %v10573_v25 }
 0x3de   : >> { %v5484_v12 = vmax.f32 %v5471_v53, %v10586_v20  ;;  %v5472_v4 = vmax.f32 %v5459_v55, %v10583_v1  ;;  %v5460_v38 = vmax.f32 %v5447_v13, %v10580_v30 }
 0x3df   : >> { %v5448_v18 = vmax.f32 %v5435_v0, %v10577_v63 }
 0x3e0   : >> { %5491 = vst.msk [vmem:[%s5489_s10] sm:$0xff] %vm5336_vm4, %v5484_v12  ;;  %v5485_v31 = vmax.f32 %v5472_v4, %v10587_v3  ;;  %v5473_v46 = vmax.f32 %v5460_v38, %v10584_v8 }
 0x3e1   : >> { %v5461_v50 = vmax.f32 %v5448_v18, %v10581_v34  ;;  %5373 = sbr.rel (!%p5371_p8) target bundleno = 969 (0x3c9), region = 269 }
 0x3e2   : >> { %5492 = vst.msk [vmem:[%s5489_s10 + $0x8] sm:$0xff] %vm5336_vm4, %v5485_v31  ;;  %v5486_v16 = vmax.f32 %v5473_v46, %v10588_v15 }
 0x3e3   : >> { %v5474_v59 = vmax.f32 %v5461_v50, %v10585_v29 }
 0x3e4   : >> { %5493 = vst.msk [vmem:[%s5489_s10 + $0x10] sm:$0xff] %vm5336_vm4, %v5486_v16 }
 0x3e5   : >> { %v5487_v61 = vmax.f32 %v5474_v59, %v10589_v23 }
 0x3e7   : >> { %5495 = vst.msk [vmem:[%s5489_s10 + $0x18] sm:$0x1] %vm5494_vm8, %v5487_v61 }
 0x3e8 LB: >> { %v5530_v21 = vld [vmem:[%s18213_s5] sm:$0xff]  ;;  %v5531_v7 = vld [vmem:[%s18213_s5 + $0x8] sm:$0xff]  ;;  %v5532_v56 = vld [vmem:[%s18213_s5 + $0x10] sm:$0xff]  ;;  %s10590_s20 = sshll.u32 %s14576_s11, 7  ;;  %s5501_s11 = sadd.s32 1, %s14576_s11   ;;  %s14576_s11 = sphi %s16803_s11, %s5501_s11  }
 0x3e9   : >> { %v10732_v33 = vld [vmem:[%s18213_s5 + $0x80] sm:$0xff]  ;;  %v13504_v37 = vpack.c.bf16 %v5531_v7, %v5530_v21  ;;  %v10733_v28 = vld [vmem:[%s18213_s5 + $0x88] sm:$0xff]  ;;  %v5533_v36 = vld [vmem:[%s18213_s5 + $0x18] sm:$0xff]  ;;  %p5503_p9 = scmp.lt.s32.totalorder %s10590_s20, 747  ;;  %p5498_p10 = scmp.ge.s32.totalorder %s5501_s11, 7  }
 0x3ea   : >> { %v16826_v32 = vpack.c.bf16 %v10733_v28, %v10732_v33  ;;  %v13508_v60 = vpack.c.bf16 %v5533_v36, %v5532_v56  ;;  %v10734_v14 = vld [vmem:[%s18213_s5 + $0x90] sm:$0xff]  ;;  %v10735_v54 = vld [vmem:[%s18213_s5 + $0x98] sm:$0xff]  ;;  %v10624_v57 = vld [vmem:[%s18213_s5 + $0x20] sm:$0xff] }
 0x3eb   : >> { %13505 = vmatprep.subr.bf16.mxu1 %v13504_v37  ;;  %v16835_v35 = vpack.c.bf16 %v10735_v54, %v10734_v14  ;;  %v10625_v42 = vld [vmem:[%s18213_s5 + $0x28] sm:$0xff]  ;;  %v10768_v39 = vld [vmem:[%s18213_s5 + $0xa0] sm:$0xff]  ;;  %s18356_s20 = smov (!%p5503_p9, %s10590_s20), 747  ;;  %v10770_v10 = vld [vmem:[%s18213_s5 + $0xb0] sm:$0xff] }
 0x3ec   : >> { %13537 = vmatprep.subr.bf16.mxu0 %v16826_v32  ;;  %13507 = vmatpush3.bf16.msra.mxu1 %v13504_v37  ;;  %v10769_v49 = vld [vmem:[%s18213_s5 + $0xa8] sm:$0xff]  ;;  %v13512_v45 = vpack.c.bf16 %v10625_v42, %v10624_v57  ;;  %v10771_v52 = vld [vmem:[%s18213_s5 + $0xb8] sm:$0xff]  ;;  %v10626_v48 = vld [vmem:[%s18213_s5 + $0x30] sm:$0xff]  ;;  %s16867_s29 = scalar_lea.vmem [#allocation4], %s18356_s20 }
 0x3ed   : >> { %13539 = vmatpush3.bf16.msra.mxu0 %v16826_v32  ;;  %13509 = vmatprep.subr.bf16.mxu1 %v13508_v60  ;;  %v13544_v26 = vpack.c.bf16 %v10769_v49, %v10768_v39  ;;  %v10627_v17 = vld [vmem:[%s18213_s5 + $0x38] sm:$0xff]  ;;  %v13548_v41 = vpack.c.bf16 %v10771_v52, %v10770_v10  ;;  %v10660_v20 = vld [vmem:[%s18213_s5 + $0x40] sm:$0xff]  ;;  %v10661_v58 = vld [vmem:[%s18213_s5 + $0x48] sm:$0xff] }
 0x3ee   : >> { %13541 = vmatprep.subr.bf16.mxu0 %v16835_v35  ;;  %v5514_v43 = vld [vmem:[%s16867_s29] sm:$0xff]  ;;  %v5515_v11 = vld [vmem:[%s16867_s29 + $0x8] sm:$0xff]  ;;  %v5516_v44 = vld [vmem:[%s16867_s29 + $0x10] sm:$0xff]  ;;  %v13516_v24 = vpack.c.bf16 %v10627_v17, %v10626_v48  ;;  %v16911_v1 = vpack.c.bf16 %v10661_v58, %v10660_v20 }
 0x3ef   : >> { %v16871_v19 = vld [vmem:[%s16867_s29 + $0x1a] sm:$0xff]  ;;  %12576 = vmatprep.mubr.msk.f32.mxu1 %vm5336_vm4, %v5514_v43  ;;  %v16877_v5 = vld [vmem:[%s16867_s29 + $0x22] sm:$0xff]  ;;  %v16883_v27 = vld [vmem:[%s16867_s29 + $0x2a] sm:$0xff] }
 0x3f0   : >> { %13511 = vmatpush3.bf16.msra.mxu1 %v13508_v60  ;;  %12704 = vmatprep.mubr.msk.f32.mxu0 %vm5336_vm4, %v16871_v19  ;;  %v5517_v22 = vld [vmem:[%s16867_s29 + $0x18] sm:$0xff]  ;;  %v10804_v51 = vld [vmem:[%s18213_s5 + $0xc0] sm:$0xff]  ;;  %v10805_v62 = vld [vmem:[%s18213_s5 + $0xc8] sm:$0xff] }
 0x3f1   : >> { %13543 = vmatpush3.bf16.msra.mxu0 %v16835_v35  ;;  %13513 = vmatprep.subr.bf16.mxu1 %v13512_v45  ;;  %v16905_v9 = vld [vmem:[%s16867_s29 + $0x32] sm:$0xff]  ;;  %v5518_v47 = vld [vmem:[%s16867_s29 + $0x20] sm:$0xff]  ;;  %v13552_v6 = vpack.c.bf16 %v10805_v62, %v10804_v51  ;;  %v5519_v40 = vld [vmem:[%s16867_s29 + $0x28] sm:$0xff] }
 0x3f2   : >> { %13545 = vmatprep.subr.bf16.mxu0 %v13544_v26  ;;  %v16909_v53 = vld [vmem:[%s16867_s29 + $0x3a] sm:$0xff]  ;;  %v16921_v55 = vld [vmem:[%s16867_s29 + $0x42] sm:$0xff]  ;;  %v5520_v30 = vld [vmem:[%s16867_s29 + $0x30] sm:$0xff] }
 0x3f3   : >> { %12577 = vmatmul.mubr.msk.f32.vlgmr.msra.gmra.mrb[0].mxu1 %vm5336_vm4, %v5515_v11  ;;  %v16925_v25 = vld [vmem:[%s16867_s29 + $0x4a] sm:$0xff]  ;;  %v5521_v12 = vld [vmem:[%s16867_s29 + $0x38] sm:$0xff]  ;;  %v5522_v13 = vld [vmem:[%s16867_s29 + $0x40] sm:$0xff] }
 0x3f4   : >> { %12705 = vmatmul.mubr.msk.f32.vlgmr.msra.gmra.mrb[0].mxu0 %vm5336_vm4, %v16877_v5  ;;  %13515 = vmatpush3.bf16.msra.mxu1 %v13512_v45  ;;  %v16936_v3 = vld [vmem:[%s16867_s29 + $0x52] sm:$0xff]  ;;  %v10752_v2 = vld [vmem:[%s16867_s29 + $0x1b] sm:$0xff]  ;;  %v5523_v63 = vld [vmem:[%s16867_s29 + $0x48] sm:$0xff] }
 0x3f5   : >> { %12579 = vmatprep.mubr.msk.f32.mxu1 %vm5336_vm4, %v5516_v44  ;;  %12707 = vmatprep.mubr.msk.f32.mxu0 %vm5336_vm4, %v16883_v27  ;;  %v10806_v4 = vld [vmem:[%s18213_s5 + $0xd0] sm:$0xff]  ;;  %v10807_v8 = vld [vmem:[%s18213_s5 + $0xd8] sm:$0xff]  ;;  %v10753_v38 = vld [vmem:[%s16867_s29 + $0x23] sm:$0xff] }
 0x3f6   : >> { %13547 = vmatpush3.bf16.msra.mxu0 %v13544_v26  ;;  %13517 = vmatprep.subr.bf16.mxu1 %v13516_v24  ;;  %v5524_v0 = vld [vmem:[%s16867_s29 + $0x50] sm:$0xff]  ;;  %v13556_v15 = vpack.c.bf16 %v10807_v8, %v10806_v4  ;;  %v10840_v34 = vld [vmem:[%s18213_s5 + $0xe0] sm:$0xff]  ;;  %v10841_v46 = vld [vmem:[%s18213_s5 + $0xe8] sm:$0xff] }
 0x3f7   : >> { %12580 = vmatmul.mubr.msk.f32.gmra.mrb[2].mxu1 %vm5336_vm4, %v5517_v22  ;;  %13549 = vmatprep.subr.bf16.mxu0 %v13548_v41  ;;  %v10754_v31 = vld [vmem:[%s16867_s29 + $0x2b] sm:$0xff]  ;;  %v5525_v18 = vld [vmem:[%s16867_s29 + $0x58] sm:$0xff]  ;;  %v5526_v16 = vld [vmem:[%s16867_s29 + $0x60] sm:$0xff]  ;;  %v16973_v23 = vpack.c.bf16 %v10841_v46, %v10840_v34 }
 0x3f8   : >> { %12708 = vmatmul.mubr.msk.f32.gmra.mrb[2].mxu0 %vm5336_vm4, %v16905_v9  ;;  %12582 = vmatprep.mubr.msk.f32.mxu1 %vm5336_vm4, %v5518_v47  ;;  %v16967_v29 = vld [vmem:[%s16867_s29 + $0x33] sm:$0xff]  ;;  %v16971_v50 = vld [vmem:[%s16867_s29 + $0x3b] sm:$0xff]  ;;  %v5527_v59 = vld [vmem:[%s16867_s29 + $0x68] sm:$0xff] }
 0x3f9   : >> { %12710 = vmatprep.mubr.msk.f32.mxu0 %vm5336_vm4, %v16909_v53  ;;  %13519 = vmatpush3.bf16.msra.mxu1 %v13516_v24  ;;  %v16983_v61 = vld [vmem:[%s16867_s29 + $0x43] sm:$0xff]  ;;  %v5528_v21 = vld [vmem:[%s16867_s29 + $0x70] sm:$0xff]  ;;  %v5529_v33 = vld [vmem:[%s16867_s29 + $0x78] sm:$0xff] }
 0x3fa   : >> { %13551 = vmatpush3.bf16.msra.mxu0 %v13548_v41  ;;  %13521 = vmatprep.subr.bf16.mxu1 %v16911_v1  ;;  %v16987_v7 = vld [vmem:[%s16867_s29 + $0x4b] sm:$0xff]  ;;  %v16998_v37 = vld [vmem:[%s16867_s29 + $0x53] sm:$0xff]  ;;  %v10608_v28 = vld [vmem:[%s16867_s29 + $0x1] sm:$0xff] }
 0x3fb   : >> { %12583 = vmatmul.mubr.msk.f32.gmra.mrb[4].mxu1 %vm5336_vm4, %v5519_v40  ;;  %13553 = vmatprep.subr.bf16.mxu0 %v13552_v6  ;;  %v17002_v56 = vld [vmem:[%s16867_s29 + $0x5b] sm:$0xff]  ;;  %v10662_v36 = vld [vmem:[%s18213_s5 + $0x50] sm:$0xff]  ;;  %v17018_v54 = vld [vmem:[%s16867_s29 + $0x63] sm:$0xff] }
 0x3fc   : >> { %12711 = vmatmul.mubr.msk.f32.gmra.mrb[4].mxu0 %vm5336_vm4, %v16921_v55  ;;  %12585 = vmatprep.mubr.msk.f32.mxu1 %vm5336_vm4, %v5520_v30  ;;  %v10663_v60 = vld [vmem:[%s18213_s5 + $0x58] sm:$0xff]  ;;  %v10609_v14 = vld [vmem:[%s16867_s29 + $0x9] sm:$0xff]  ;;  %v10696_v49 = vld [vmem:[%s18213_s5 + $0x60] sm:$0xff] }
 0x3fd   : >> { %12713 = vmatprep.mubr.msk.f32.mxu0 %vm5336_vm4, %v16925_v25  ;;  %v10610_v57 = vld [vmem:[%s16867_s29 + $0x11] sm:$0xff]  ;;  %v13524_v39 = vpack.c.bf16 %v10663_v60, %v10662_v36  ;;  %v10697_v45 = vld [vmem:[%s18213_s5 + $0x68] sm:$0xff]  ;;  %v17035_v10 = vld [vmem:[%s16867_s29 + $0x19] sm:$0xff] }
 0x3fe   : >> { %v17022_v42 = vld [vmem:[%s16867_s29 + $0x6b] sm:$0xff]  ;;  %v17041_v26 = vld [vmem:[%s16867_s29 + $0x73] sm:$0xff]  ;;  %v17044_v52 = vld [vmem:[%s16867_s29 + $0x21] sm:$0xff]  ;;  %v17049_v17 = vpack.c.bf16 %v10697_v45, %v10696_v49 }
 0x3ff   : >> { %12586 = vmatmul.mubr.msk.f32.gmra.mrb[6].mxu1 %vm5336_vm4, %v5521_v12  ;;  %v17047_v48 = vld [vmem:[%s16867_s29 + $0x7b] sm:$0xff]  ;;  %v17058_v43 = vld [vmem:[%s16867_s29 + $0x29] sm:$0xff]  ;;  %v17066_v44 = vld [vmem:[%s16867_s29 + $0x31] sm:$0xff] }
 0x400   : >> { %12714 = vmatmul.mubr.msk.f32.gmra.mrb[6].mxu0 %vm5336_vm4, %v16936_v3  ;;  %12588 = vmatprep.mubr.msk.f32.mxu1 %vm5336_vm4, %v5522_v13  ;;  %v17063_v11 = vld [vmem:[%s16867_s29 + $0x83] sm:$0xff]  ;;  %v17069_v24 = vld [vmem:[%s16867_s29 + $0x8b] sm:$0xff]  ;;  %v17079_v41 = vld [vmem:[%s16867_s29 + $0x39] sm:$0xff] }
 0x401   : >> { %12736 = vmatprep.mubr.msk.f32.mxu0 %vm5336_vm4, %v10752_v2  ;;  %v17084_v20 = vld [vmem:[%s16867_s29 + $0x93] sm:$0xff]  ;;  %v17087_v58 = vld [vmem:[%s16867_s29 + $0x41] sm:$0xff]  ;;  %v17102_v62 = vld [vmem:[%s16867_s29 + $0x49] sm:$0xff] }
 0x402   : >> { %v10842_v22 = vld [vmem:[%s18213_s5 + $0xf0] sm:$0xff]  ;;  %v10843_v51 = vld [vmem:[%s18213_s5 + $0xf8] sm:$0xff]  ;;  %v10877_v40 = vld [vmem:[%s18213_s5 + $0x108] sm:$0xff] }
 0x403   : >> { %12589 = vmatmul.mubr.msk.f32.gmra.mrb[8].mxu1 %vm5336_vm4, %v5523_v63  ;;  %v17107_v47 = vld [vmem:[%s16867_s29 + $0x51] sm:$0xff]  ;;  %v17122_v30 = vld [vmem:[%s16867_s29 + $0x59] sm:$0xff]  ;;  %v17128_v12 = vld [vmem:[%s16867_s29 + $0x61] sm:$0xff] }
 0x404   : >> { %12737 = vmatmul.mubr.msk.f32.vlgmr.msra.gmra.mrb[0].mxu0 %vm5336_vm4, %v10753_v38  ;;  %12591 = vmatprep.mubr.msk.f32.mxu1 %vm5336_vm4, %v5524_v0  ;;  %v17137_v2 = vld [vmem:[%s16867_s29 + $0x69] sm:$0xff]  ;;  %v17142_v4 = vld [vmem:[%s16867_s29 + $0x5a] sm:$0xff]  ;;  %v17145_v8 = vld [vmem:[%s16867_s29 + $0x71] sm:$0xff] }
 0x405   : >> { %12739 = vmatprep.mubr.msk.f32.mxu0 %vm5336_vm4, %v10754_v31  ;;  %13555 = vmatpush3.bf16.msra.mxu0 %v13552_v6  ;;  %v10876_v6 = vld [vmem:[%s18213_s5 + $0x100] sm:$0xff]  ;;  %v17162_v0 = vld [vmem:[%s16867_s29 + $0x6a] sm:$0xff]  ;;  %v10699_v46 = vld [vmem:[%s18213_s5 + $0x78] sm:$0xff] }
 0x406   : >> { %13557 = vmatprep.subr.bf16.mxu0 %v13556_v15  ;;  %v13568_v13 = vpack.c.bf16 %v10877_v40, %v10876_v6  ;;  %v17148_v63 = vld [vmem:[%s16867_s29 + $0x62] sm:$0xff]  ;;  %v17157_v38 = vld [vmem:[%s16867_s29 + $0x79] sm:$0xff]  ;;  %v10698_v34 = vld [vmem:[%s18213_s5 + $0x70] sm:$0xff] }
 0x407   : >> { %12592 = vmatmul.mubr.msk.f32.gmra.mrb[10].mxu1 %vm5336_vm4, %v5525_v18  ;;  %v10644_v31 = vld [vmem:[%s16867_s29 + $0x2] sm:$0xff]  ;;  %v10645_v18 = vld [vmem:[%s16867_s29 + $0xa] sm:$0xff]  ;;  %v10801_v36 = vld [vmem:[%s16867_s29 + $0x9a] sm:$0xff] }
 0x408   : >> { %12740 = vmatmul.mubr.msk.f32.gmra.mrb[2].mxu0 %vm5336_vm4, %v16967_v29  ;;  %12594 = vmatprep.mubr.msk.f32.mxu1 %vm5336_vm4, %v5526_v16  ;;  %v17183_v16 = vld [vmem:[%s16867_s29 + $0x7a] sm:$0xff]  ;;  %v10802_v60 = vld [vmem:[%s16867_s29 + $0xa2] sm:$0xff]  ;;  %v10871_v49 = vld [vmem:[%s16867_s29 + $0x8c] sm:$0xff] }
 0x409   : >> { %12742 = vmatprep.mubr.msk.f32.mxu0 %vm5336_vm4, %v16971_v50  ;;  %13559 = vmatpush3.bf16.msra.mxu0 %v13556_v15  ;;  %v17166_v15 = vld [vmem:[%s16867_s29 + $0x72] sm:$0xff] }
 0x40a   : >> { %13561 = vmatprep.subr.bf16.mxu0 %v16973_v23  ;;  %v10872_v45 = vld [vmem:[%s16867_s29 + $0x94] sm:$0xff] }
 0x40b   : >> { %12595 = vmatmul.mubr.msk.f32.gmra.mrb[12].mxu1 %vm5336_vm4, %v5527_v59  ;;  %v17187_v59 = vld [vmem:[%s16867_s29 + $0x82] sm:$0xff] }
 0x40c   : >> { %12743 = vmatmul.mubr.msk.f32.gmra.mrb[4].mxu0 %vm5336_vm4, %v16983_v61  ;;  %12597 = vmatprep.mubr.msk.f32.mxu1 %vm5336_vm4, %v5528_v21  ;;  %v13532_v21 = vpack.c.bf16 %v10699_v46, %v10698_v34 }
 0x40d   : >> { %12745 = vmatprep.mubr.msk.f32.mxu0 %vm5336_vm4, %v16987_v7 }
 0x40f   : >> { %12598 = vmatmul.mubr.msk.f32.gmra.mrb[14].mxu1 %vm5336_vm4, %v5529_v33  ;;  %v17197_v33 = vld [vmem:[%s16867_s29 + $0x8a] sm:$0xff] }
 0x410   : >> { %12746 = vmatmul.mubr.msk.f32.gmra.mrb[6].mxu0 %vm5336_vm4, %v16998_v37  ;;  %12608 = vmatprep.mubr.msk.f32.mxu1 %vm5336_vm4, %v10608_v28  ;;  %v17200_v28 = vld [vmem:[%s16867_s29 + $0x92] sm:$0xff] }
 0x411   : >> { %12748 = vmatprep.mubr.msk.f32.mxu0 %vm5336_vm4, %v17002_v56 }
 0x413   : >> { %12609 = vmatmul.mubr.msk.f32.vlgmr.msra.gmra.mrb[0].mxu1 %vm5336_vm4, %v10609_v14  ;;  %v10879_v14 = vld [vmem:[%s18213_s5 + $0x118] sm:$0xff] }
 0x414   : >> { %12749 = vmatmul.mubr.msk.f32.gmra.mrb[8].mxu0 %vm5336_vm4, %v17018_v54  ;;  %13523 = vmatpush3.bf16.msra.mxu1 %v16911_v1  ;;  %v13564_v1 = vpack.c.bf16 %v10843_v51, %v10842_v22 }
 0x415   : >> { %12611 = vmatprep.mubr.msk.f32.mxu1 %vm5336_vm4, %v10610_v57  ;;  %12751 = vmatprep.mubr.msk.f32.mxu0 %vm5336_vm4, %v17022_v42  ;;  %v10868_v57 = vld [vmem:[%s16867_s29 + $0x74] sm:$0xff] }
 0x416   : >> { %13525 = vmatprep.subr.bf16.mxu1 %v13524_v39 }
 0x417   : >> { %12612 = vmatmul.mubr.msk.f32.gmra.mrb[2].mxu1 %vm5336_vm4, %v17035_v10 }
 0x418   : >> { %12752 = vmatmul.mubr.msk.f32.gmra.mrb[10].mxu0 %vm5336_vm4, %v17041_v26  ;;  %12614 = vmatprep.mubr.msk.f32.mxu1 %vm5336_vm4, %v17044_v52 }
 0x419   : >> { %12754 = vmatprep.mubr.msk.f32.mxu0 %vm5336_vm4, %v17047_v48  ;;  %13527 = vmatpush3.bf16.msra.mxu1 %v13524_v39  ;;  %v10870_v39 = vld [vmem:[%s16867_s29 + $0x84] sm:$0xff] }
 0x41a   : >> { %13529 = vmatprep.subr.bf16.mxu1 %v17049_v17 }
 0x41b   : >> { %12615 = vmatmul.mubr.msk.f32.gmra.mrb[4].mxu1 %vm5336_vm4, %v17058_v43 }
 0x41c   : >> { %12755 = vmatmul.mubr.msk.f32.gmra.mrb[12].mxu0 %vm5336_vm4, %v17063_v11  ;;  %12617 = vmatprep.mubr.msk.f32.mxu1 %vm5336_vm4, %v17066_v44 }
 0x41d   : >> { %12757 = vmatprep.mubr.msk.f32.mxu0 %vm5336_vm4, %v17069_v24 }
 0x41f   : >> { %12618 = vmatmul.mubr.msk.f32.gmra.mrb[6].mxu1 %vm5336_vm4, %v17079_v41 }
 0x420   : >> { %12758 = vmatmul.mubr.msk.f32.gmra.mrb[14].mxu0 %vm5336_vm4, %v17084_v20  ;;  %12620 = vmatprep.mubr.msk.f32.mxu1 %vm5336_vm4, %v17087_v58 }
 0x421   : >> { %12768 = vmatprep.mubr.msk.f32.mxu0 %vm5336_vm4, %v16905_v9 }
 0x423   : >> { %12621 = vmatmul.mubr.msk.f32.gmra.mrb[8].mxu1 %vm5336_vm4, %v17102_v62 }
 0x424   : >> { %12769 = vmatmul.mubr.msk.f32.vlgmr.msra.gmra.mrb[0].mxu0 %vm5336_vm4, %v16909_v53  ;;  %12623 = vmatprep.mubr.msk.f32.mxu1 %vm5336_vm4, %v17107_v47 }
 0x425   : >> { %12771 = vmatprep.mubr.msk.f32.mxu0 %vm5336_vm4, %v16921_v55  ;;  %13563 = vmatpush3.bf16.msra.mxu0 %v16973_v23  ;;  %v10646_v23 = vld [vmem:[%s16867_s29 + $0x12] sm:$0xff] }
 0x426   : >> { %13565 = vmatprep.subr.bf16.mxu0 %v13564_v1 }
 0x427   : >> { %12624 = vmatmul.mubr.msk.f32.gmra.mrb[10].mxu1 %vm5336_vm4, %v17122_v30 }
 0x428   : >> { %12772 = vmatmul.mubr.msk.f32.gmra.mrb[2].mxu0 %vm5336_vm4, %v16925_v25  ;;  %12626 = vmatprep.mubr.msk.f32.mxu1 %vm5336_vm4, %v17128_v12 }
 0x429   : >> { %12774 = vmatprep.mubr.msk.f32.mxu0 %vm5336_vm4, %v16936_v3  ;;  %13567 = vmatpush3.bf16.msra.mxu0 %v13564_v1 }
 0x42a   : >> { %13569 = vmatprep.subr.bf16.mxu0 %v13568_v13 }
 0x42b   : >> { %12627 = vmatmul.mubr.msk.f32.gmra.mrb[12].mxu1 %vm5336_vm4, %v17137_v2 }
 0x42c   : >> { %12775 = vmatmul.mubr.msk.f32.gmra.mrb[4].mxu0 %vm5336_vm4, %v17142_v4  ;;  %12629 = vmatprep.mubr.msk.f32.mxu1 %vm5336_vm4, %v17145_v8 }
 0x42d   : >> { %12777 = vmatprep.mubr.msk.f32.mxu0 %vm5336_vm4, %v17148_v63 }
 0x42f   : >> { %12630 = vmatmul.mubr.msk.f32.gmra.mrb[14].mxu1 %vm5336_vm4, %v17157_v38 }
 0x430   : >> { %12778 = vmatmul.mubr.msk.f32.gmra.mrb[6].mxu0 %vm5336_vm4, %v17162_v0  ;;  %12640 = vmatprep.mubr.msk.f32.mxu1 %vm5336_vm4, %v10644_v31 }
 0x431   : >> { %12780 = vmatprep.mubr.msk.f32.mxu0 %vm5336_vm4, %v17166_v15 }
 0x433   : >> { %12641 = vmatmul.mubr.msk.f32.vlgmr.msra.gmra.mrb[0].mxu1 %vm5336_vm4, %v10645_v18 }
 0x434   : >> { %12781 = vmatmul.mubr.msk.f32.gmra.mrb[8].mxu0 %vm5336_vm4, %v17183_v16  ;;  %13531 = vmatpush3.bf16.msra.mxu1 %v17049_v17 }
 0x435   : >> { %12643 = vmatprep.mubr.msk.f32.mxu1 %vm5336_vm4, %v10646_v23  ;;  %12783 = vmatprep.mubr.msk.f32.mxu0 %vm5336_vm4, %v17187_v59 }
 0x436   : >> { %13533 = vmatprep.subr.bf16.mxu1 %v13532_v21 }
 0x437   : >> { %12644 = vmatmul.mubr.msk.f32.gmra.mrb[2].mxu1 %vm5336_vm4, %v16871_v19  ;;  %v10803_v19 = vld [vmem:[%s16867_s29 + $0xaa] sm:$0xff] }
 0x438   : >> { %12784 = vmatmul.mubr.msk.f32.gmra.mrb[10].mxu0 %vm5336_vm4, %v17197_v33  ;;  %12646 = vmatprep.mubr.msk.f32.mxu1 %vm5336_vm4, %v16877_v5  ;;  %v10878_v5 = vld [vmem:[%s18213_s5 + $0x110] sm:$0xff] }
 0x439   : >> { %12786 = vmatprep.mubr.msk.f32.mxu0 %vm5336_vm4, %v17200_v28  ;;  %13535 = vmatpush3.bf16.msra.mxu1 %v13532_v21 }
 0x43a   : >> { %14160 = vmatprep.subr.bf16.mxu1 %v16826_v32 }
 0x43b   : >> { %12647 = vmatmul.mubr.msk.f32.gmra.mrb[4].mxu1 %vm5336_vm4, %v16883_v27  ;;  %v13572_v27 = vpack.c.bf16 %v10879_v14, %v10878_v5 }
 0x43c   : >> { %12787 = vmatmul.mubr.msk.f32.gmra.mrb[12].mxu0 %vm5336_vm4, %v10801_v36  ;;  %12649 = vmatprep.mubr.msk.f32.mxu1 %vm5336_vm4, %v16905_v9  ;;  %v10838_v9 = vld [vmem:[%s16867_s29 + $0xa3] sm:$0xff] }
 0x43d   : >> { %12789 = vmatprep.mubr.msk.f32.mxu0 %vm5336_vm4, %v10802_v60 }
 0x43f   : >> { %12650 = vmatmul.mubr.msk.f32.gmra.mrb[6].mxu1 %vm5336_vm4, %v16909_v53  ;;  %v10839_v53 = vld [vmem:[%s16867_s29 + $0xab] sm:$0xff] }
 0x440   : >> { %12790 = vmatmul.mubr.msk.f32.gmra.mrb[14].mxu0 %vm5336_vm4, %v10803_v19  ;;  %12652 = vmatprep.mubr.msk.f32.mxu1 %vm5336_vm4, %v16921_v55  ;;  %v10860_v55 = vld [vmem:[%s16867_s29 + $0x34] sm:$0xff] }
 0x441   : >> { %12800 = vmatprep.mubr.msk.f32.mxu0 %vm5336_vm4, %v16967_v29  ;;  %v10864_v29 = vld [vmem:[%s16867_s29 + $0x54] sm:$0xff] }
 0x443   : >> { %12653 = vmatmul.mubr.msk.f32.gmra.mrb[8].mxu1 %vm5336_vm4, %v16925_v25  ;;  %v10862_v25 = vld [vmem:[%s16867_s29 + $0x44] sm:$0xff] }
 0x444   : >> { %12801 = vmatmul.mubr.msk.f32.vlgmr.msra.gmra.mrb[0].mxu0 %vm5336_vm4, %v16971_v50  ;;  %12655 = vmatprep.mubr.msk.f32.mxu1 %vm5336_vm4, %v16936_v3  ;;  %v10863_v3 = vld [vmem:[%s16867_s29 + $0x4c] sm:$0xff]  ;;  %v10693_v50 = vld [vmem:[%s16867_s29 + $0x81] sm:$0xff] }
 0x445   : >> { %12803 = vmatprep.mubr.msk.f32.mxu0 %vm5336_vm4, %v16983_v61  ;;  %13571 = vmatpush3.bf16.msra.mxu0 %v13568_v13  ;;  %v10865_v61 = vld [vmem:[%s16867_s29 + $0x5c] sm:$0xff] }
 0x446   : >> { %13573 = vmatprep.subr.bf16.mxu0 %v13572_v27 }
 0x447   : >> { %12656 = vmatmul.mubr.msk.f32.gmra.mrb[10].mxu1 %vm5336_vm4, %v17142_v4 }
 0x448   : >> { %12804 = vmatmul.mubr.msk.f32.gmra.mrb[2].mxu0 %vm5336_vm4, %v16987_v7  ;;  %12658 = vmatprep.mubr.msk.f32.mxu1 %vm5336_vm4, %v17148_v63  ;;  %v10694_v7 = vld [vmem:[%s16867_s29 + $0x89] sm:$0xff] }
 0x449   : >> { %12806 = vmatprep.mubr.msk.f32.mxu0 %vm5336_vm4, %v16998_v37  ;;  %13575 = vmatpush3.bf16.msra.mxu0 %v13572_v27  ;;  %v10866_v37 = vld [vmem:[%s16867_s29 + $0x64] sm:$0xff] }
 0x44b   : >> { %12659 = vmatmul.mubr.msk.f32.gmra.mrb[12].mxu1 %vm5336_vm4, %v17162_v0 }
 0x44c   : >> { %12807 = vmatmul.mubr.msk.f32.gmra.mrb[4].mxu0 %vm5336_vm4, %v17002_v56  ;;  %12661 = vmatprep.mubr.msk.f32.mxu1 %vm5336_vm4, %v17166_v15  ;;  %v10695_v56 = vld [vmem:[%s16867_s29 + $0x91] sm:$0xff] }
 0x44d   : >> { %12809 = vmatprep.mubr.msk.f32.mxu0 %vm5336_vm4, %v17018_v54  ;;  %v10867_v54 = vld [vmem:[%s16867_s29 + $0x6c] sm:$0xff] }
 0x44f   : >> { %12662 = vmatmul.mubr.msk.f32.gmra.mrb[14].mxu1 %vm5336_vm4, %v17183_v16 }
 0x450   : >> { %12810 = vmatmul.mubr.msk.f32.gmra.mrb[6].mxu0 %vm5336_vm4, %v17022_v42  ;;  %12672 = vmatprep.mubr.msk.f32.mxu1 %vm5336_vm4, %v17035_v10  ;;  %v10869_v42 = vld [vmem:[%s16867_s29 + $0x7c] sm:$0xff] }
 0x451   : >> { %12812 = vmatprep.mubr.msk.f32.mxu0 %vm5336_vm4, %v17041_v26  ;;  %v10873_v10 = vld [vmem:[%s16867_s29 + $0x9c] sm:$0xff]  ;;  %v10874_v26 = vld [vmem:[%s16867_s29 + $0xa4] sm:$0xff] }
 0x453   : >> { %12673 = vmatmul.mubr.msk.f32.vlgmr.msra.gmra.mrb[0].mxu1 %vm5336_vm4, %v17044_v52  ;;  %v10875_v52 = vld [vmem:[%s16867_s29 + $0xac] sm:$0xff] }
 0x454   : >> { %12813 = vmatmul.mubr.msk.f32.gmra.mrb[8].mxu0 %vm5336_vm4, %v17047_v48  ;;  %14162 = vmatpush3.bf16.msra.mxu1 %v16826_v32  ;;  %v10837_v32 = vld [vmem:[%s16867_s29 + $0x9b] sm:$0xff] }
 0x455   : >> { %12675 = vmatprep.mubr.msk.f32.mxu1 %vm5336_vm4, %v17058_v43  ;;  %12815 = vmatprep.mubr.msk.f32.mxu0 %vm5336_vm4, %v17063_v11 }
 0x456   : >> { %14161 = vmatprep.subr.bf16.mxu1 %v16835_v35 }
 0x457   : >> { %12676 = vmatmul.mubr.msk.f32.gmra.mrb[2].mxu1 %vm5336_vm4, %v17066_v44 }
 0x458   : >> { %12816 = vmatmul.mubr.msk.f32.gmra.mrb[10].mxu0 %vm5336_vm4, %v17069_v24  ;;  %12678 = vmatprep.mubr.msk.f32.mxu1 %vm5336_vm4, %v17079_v41 }
 0x459   : >> { %12818 = vmatprep.mubr.msk.f32.mxu0 %vm5336_vm4, %v17084_v20  ;;  %14163 = vmatpush3.bf16.msra.mxu1 %v16835_v35  ;;  %v10861_v35 = vld [vmem:[%s16867_s29 + $0x3c] sm:$0xff]  ;;  %s17370_s29 = scalar_lea.vmem [#allocation5], %s18356_s20  ;;  %s17403_s20 = smov (%p5498_p10), 0  }
 0x45a   : >> { %v17363_v20 = vld [vmem:[%s18214_s6] ss:$0 sm:$0xff] }
 0x45b   : >> { %12679 = vmatmul.mubr.msk.f32.gmra.mrb[4].mxu1 %vm5336_vm4, %v17087_v58 }
 0x45c   : >> { %12819 = vmatmul.mubr.msk.f32.gmra.mrb[12].mxu0 %vm5336_vm4, %v10837_v32  ;;  %12681 = vmatprep.mubr.msk.f32.mxu1 %vm5336_vm4, %v17102_v62 }
 0x45d   : >> { %12821 = vmatprep.mubr.msk.f32.mxu0 %vm5336_vm4, %v10838_v9 }
 0x45f   : >> { %12682 = vmatmul.mubr.msk.f32.gmra.mrb[6].mxu1 %vm5336_vm4, %v17107_v47 }
 0x460   : >> { %12822 = vmatmul.mubr.msk.f32.gmra.mrb[14].mxu0 %vm5336_vm4, %v10839_v53  ;;  %12684 = vmatprep.mubr.msk.f32.mxu1 %vm5336_vm4, %v17122_v30 }
 0x461   : >> { %12832 = vmatprep.mubr.msk.f32.mxu0 %vm5336_vm4, %v10860_v55 }
 0x463   : >> { %12685 = vmatmul.mubr.msk.f32.gmra.mrb[8].mxu1 %vm5336_vm4, %v17128_v12 }
 0x464   : >> { %12833 = vmatmul.mubr.msk.f32.vlgmr.msra.gmra.mrb[0].mxu0 %vm5336_vm4, %v10861_v35  ;;  %12687 = vmatprep.mubr.msk.f32.mxu1 %vm5336_vm4, %v17137_v2 }
 0x465   : >> { %12835 = vmatprep.mubr.msk.f32.mxu0 %vm5336_vm4, %v10862_v25 }
 0x467   : >> { %12688 = vmatmul.mubr.msk.f32.gmra.mrb[10].mxu1 %vm5336_vm4, %v17145_v8 }
 0x468   : >> { %12836 = vmatmul.mubr.msk.f32.gmra.mrb[2].mxu0 %vm5336_vm4, %v10863_v3  ;;  %12690 = vmatprep.mubr.msk.f32.mxu1 %vm5336_vm4, %v17157_v38 }
 0x469   : >> { %12838 = vmatprep.mubr.msk.f32.mxu0 %vm5336_vm4, %v10864_v29 }
 0x46b   : >> { %12691 = vmatmul.mubr.msk.f32.gmra.mrb[12].mxu1 %vm5336_vm4, %v10693_v50 }
 0x46c   : >> { %12839 = vmatmul.mubr.msk.f32.gmra.mrb[4].mxu0 %vm5336_vm4, %v10865_v61  ;;  %12693 = vmatprep.mubr.msk.f32.mxu1 %vm5336_vm4, %v10694_v7 }
 0x46d   : >> { %12841 = vmatprep.mubr.msk.f32.mxu0 %vm5336_vm4, %v10866_v37 }
 0x46f   : >> { %12694 = vmatmul.mubr.msk.f32.gmra.mrb[14].mxu1 %vm5336_vm4, %v10695_v56 }
 0x470   : >> { %12842 = vmatmul.mubr.msk.f32.gmra.mrb[6].mxu0 %vm5336_vm4, %v10867_v54  ;;  %12716 = vmatprep.mubr.msk.f32.mxu1 %vm5336_vm4, %v17142_v4 }
 0x471   : >> { %12844 = vmatprep.mubr.msk.f32.mxu0 %vm5336_vm4, %v10868_v57 }
 0x473   : >> { %12717 = vmatmul.mubr.msk.f32.vlgmr.msra.gmra.mrb[8].mxu1 %vm5336_vm4, %v17148_v63 }
 0x474   : >> { %12845 = vmatmul.mubr.msk.f32.gmra.mrb[8].mxu0 %vm5336_vm4, %v10869_v42  ;;  %12719 = vmatprep.mubr.msk.f32.mxu1 %vm5336_vm4, %v17162_v0 }
 0x475   : >> { %12847 = vmatprep.mubr.msk.f32.mxu0 %vm5336_vm4, %v10870_v39 }
 0x477   : >> { %12720 = vmatmul.mubr.msk.f32.gmra.mrb[10].mxu1 %vm5336_vm4, %v17166_v15 }
 0x478   : >> { %12848 = vmatmul.mubr.msk.f32.gmra.mrb[10].mxu0 %vm5336_vm4, %v10871_v49  ;;  %12722 = vmatprep.mubr.msk.f32.mxu1 %vm5336_vm4, %v17183_v16 }
 0x479   : >> { %12850 = vmatprep.mubr.msk.f32.mxu0 %vm5336_vm4, %v10872_v45 }
 0x47b   : >> { %12723 = vmatmul.mubr.msk.f32.gmra.mrb[12].mxu1 %vm5336_vm4, %v17187_v59 }
 0x47c   : >> { %12851 = vmatmul.mubr.msk.f32.gmra.mrb[12].mxu0 %vm5336_vm4, %v10873_v10  ;;  %12725 = vmatprep.mubr.msk.f32.mxu1 %vm5336_vm4, %v17197_v33 }
 0x47d   : >> { %12853 = vmatprep.mubr.msk.f32.mxu0 %vm5336_vm4, %v10874_v26 }
 0x47f   : >> { %12726 = vmatmul.mubr.msk.f32.gmra.mrb[14].mxu1 %vm5336_vm4, %v17200_v28 }
 0x480   : >> { %12854 = vmatmul.mubr.msk.f32.gmra.mrb[14].mxu0 %vm5336_vm4, %v10875_v52 }
 0x526   : >> { %v12674_v48 = vpop.f32.mrb[0].mxu1 }
 0x527   : >> { %v6345_v17 = vpop.f32.mrb[1].mxu1  ;;  %v14164_v22 = vadd.f32 %v12674_v48, %v17363_v20 }
 0x528   : >> { %v14166_v51 = vadd.f32 %v17363_v20, %v6345_v17 }
 0x52a   : >> { %v12677_v43 = vpop.f32.mrb[2].mxu1 }
 0x52b   : >> { %v6355_v11 = vpop.f32.mrb[3].mxu1  ;;  %v14168_v40 = vadd.f32 %v12677_v43, %v17363_v20 }
 0x52c   : >> { %v14170_v12 = vadd.f32 %v17363_v20, %v6355_v11 }
 0x52e   : >> { %v12680_v44 = vpop.f32.mrb[4].mxu1 }
 0x52f   : >> { %v6365_v24 = vpop.f32.mrb[5].mxu1  ;;  %v14172_v31 = vadd.f32 %v12680_v44, %v17363_v20 }
 0x530   : >> { %v14174_v34 = vadd.f32 %v17363_v20, %v6365_v24 }
 0x532   : >> { %v12683_v41 = vpop.f32.mrb[6].mxu1 }
 0x533   : >> { %v6375_v58 = vpop.f32.mrb[7].mxu1  ;;  %v14176_v28 = vadd.f32 %v12683_v41, %v17363_v20 }
 0x534   : >> { %v14178_v60 = vadd.f32 %v17363_v20, %v6375_v58 }
 0x537   : >> { %v12834_v62 = vpop.f32.mrb[0].mxu0 }
 0x538   : >> { %v14165_v47 = vadd.f32 %v14164_v22, %v12834_v62  ;;  %v7505_v1 = vpop.f32.mrb[1].mxu0 }
 0x539   : >> { %v14167_v6 = vadd.f32 %v14166_v51, %v7505_v1 }
 0x53a   : >> { %vm7601_vm9 = vcmp.gt.f32.partialorder %v14165_v47, 0.0  ;;  %v7617_v30 = vmul.f32 0.01, %v14165_v47 }
 0x53b   : >> { %vm7600_vm10 = vcmp.gt.f32.partialorder %v14167_v6, 0.0  ;;  %v7616_v13 = vmul.f32 0.01, %v14167_v6  ;;  %v12837_v2 = vpop.f32.mrb[2].mxu0 }
 0x53c   : >> { %v7633_v4 = vsel %vm7601_vm9, %v14165_v47, %v7617_v30  ;;  %v14169_v8 = vadd.f32 %v14168_v40, %v12837_v2  ;;  %v7515_v63 = vpop.f32.mrb[3].mxu0 }
 0x53d   : >> { %7650 = vst [vmem:[%s17370_s29 + $0x8] sm:$0xff] %v7633_v4  ;;  %v7632_v38 = vsel %vm7600_vm10, %v14167_v6, %v7616_v13  ;;  %v14171_v0 = vadd.f32 %v14170_v12, %v7515_v63 }
 0x53e   : >> { %7649 = vst [vmem:[%s17370_s29] sm:$0xff] %v7632_v38  ;;  %vm7603_vm11 = vcmp.gt.f32.partialorder %v14169_v8, 0.0  ;;  %v7619_v15 = vmul.f32 0.01, %v14169_v8 }
 0x53f   : >> { %vm7602_vm12 = vcmp.gt.f32.partialorder %v14171_v0, 0.0  ;;  %v7618_v46 = vmul.f32 0.01, %v14171_v0  ;;  %v12840_v18 = vpop.f32.mrb[4].mxu0 }
 0x540   : >> { %v7635_v16 = vsel %vm7603_vm11, %v14169_v8, %v7619_v15  ;;  %v14173_v23 = vadd.f32 %v14172_v31, %v12840_v18  ;;  %v7525_v59 = vpop.f32.mrb[5].mxu0 }
 0x541   : >> { %7652 = vst [vmem:[%s17370_s29 + $0x18] sm:$0xff] %v7635_v16  ;;  %v7634_v21 = vsel %vm7602_vm12, %v14171_v0, %v7618_v46  ;;  %v14175_v33 = vadd.f32 %v14174_v34, %v7525_v59 }
 0x542   : >> { %7651 = vst [vmem:[%s17370_s29 + $0x10] sm:$0xff] %v7634_v21  ;;  %vm7605_vm13 = vcmp.gt.f32.partialorder %v14173_v23, 0.0  ;;  %v7621_v36 = vmul.f32 0.01, %v14173_v23 }
 0x543   : >> { %vm7604_vm14 = vcmp.gt.f32.partialorder %v14175_v33, 0.0  ;;  %v7620_v19 = vmul.f32 0.01, %v14175_v33  ;;  %v12843_v5 = vpop.f32.mrb[6].mxu0 }
 0x544   : >> { %v7637_v14 = vsel %vm7605_vm13, %v14173_v23, %v7621_v36  ;;  %v14177_v27 = vadd.f32 %v14176_v28, %v12843_v5  ;;  %v7535_v32 = vpop.f32.mrb[7].mxu0 }
 0x545   : >> { %7654 = vst [vmem:[%s17370_s29 + $0x28] sm:$0xff] %v7637_v14  ;;  %v7636_v9 = vsel %vm7604_vm14, %v14175_v33, %v7620_v19  ;;  %v14179_v53 = vadd.f32 %v14178_v60, %v7535_v32 }
 0x546   : >> { %7653 = vst [vmem:[%s17370_s29 + $0x20] sm:$0xff] %v7636_v9  ;;  %vm7607_vm15 = vcmp.gt.f32.partialorder %v14177_v27, 0.0  ;;  %v7623_v55 = vmul.f32 0.01, %v14177_v27  ;;  %v12718_v35 = vpop.f32.mrb[8].mxu1 }
 0x547   : >> { %vm7606_vm1 = vcmp.gt.f32.partialorder %v14179_v53, 0.0  ;;  %v7622_v25 = vmul.f32 0.01, %v14179_v53  ;;  %v14180_v3 = vadd.f32 %v12718_v35, %v17363_v20  ;;  %v12846_v29 = vpop.f32.mrb[8].mxu0  ;;  %v6617_v50 = vpop.f32.mrb[9].mxu1 }
 0x548   : >> { %v7639_v61 = vsel %vm7607_vm15, %v14177_v27, %v7623_v55  ;;  %v14182_v7 = vadd.f32 %v17363_v20, %v6617_v50  ;;  %v7545_v37 = vpop.f32.mrb[9].mxu0 }
 0x549   : >> { %7656 = vst [vmem:[%s17370_s29 + $0x38] sm:$0xff] %v7639_v61  ;;  %v7638_v56 = vsel %vm7606_vm1, %v14179_v53, %v7622_v25  ;;  %v14181_v54 = vadd.f32 %v14180_v3, %v12846_v29 }
 0x54a   : >> { %7655 = vst [vmem:[%s17370_s29 + $0x30] sm:$0xff] %v7638_v56  ;;  %v14183_v57 = vadd.f32 %v14182_v7, %v7545_v37  ;;  %v12721_v42 = vpop.f32.mrb[10].mxu1 }
 0x54b   : >> { %vm7609_vm2 = vcmp.gt.f32.partialorder %v14181_v54, 0.0  ;;  %v7625_v39 = vmul.f32 0.01, %v14181_v54  ;;  %v14184_v49 = vadd.f32 %v12721_v42, %v17363_v20  ;;  %v12849_v45 = vpop.f32.mrb[10].mxu0  ;;  %v6627_v10 = vpop.f32.mrb[11].mxu1 }
 0x54c   : >> { %vm7608_vm3 = vcmp.gt.f32.partialorder %v14183_v57, 0.0  ;;  %v7624_v26 = vmul.f32 0.01, %v14183_v57  ;;  %v14186_v52 = vadd.f32 %v17363_v20, %v6627_v10  ;;  %v7555_v48 = vpop.f32.mrb[11].mxu0 }
 0x54d   : >> { %v7641_v17 = vsel %vm7609_vm2, %v14181_v54, %v7625_v39  ;;  %v14185_v43 = vadd.f32 %v14184_v49, %v12849_v45 }
 0x54e   : >> { %7658 = vst [vmem:[%s17370_s29 + $0x48] sm:$0xff] %v7641_v17  ;;  %v7640_v11 = vsel %vm7608_vm3, %v14183_v57, %v7624_v26  ;;  %v14187_v44 = vadd.f32 %v14186_v52, %v7555_v48  ;;  %v12724_v24 = vpop.f32.mrb[12].mxu1 }
 0x54f   : >> { %7657 = vst [vmem:[%s17370_s29 + $0x40] sm:$0xff] %v7640_v11  ;;  %vm7611_vm5 = vcmp.gt.f32.partialorder %v14185_v43, 0.0  ;;  %v7627_v41 = vmul.f32 0.01, %v14185_v43  ;;  %v14188_v58 = vadd.f32 %v12724_v24, %v17363_v20  ;;  %v12852_v22 = vpop.f32.mrb[12].mxu0  ;;  %v6637_v51 = vpop.f32.mrb[13].mxu1 }
 0x550   : >> { %vm7610_vm6 = vcmp.gt.f32.partialorder %v14187_v44, 0.0  ;;  %v7626_v62 = vmul.f32 0.01, %v14187_v44  ;;  %v14190_v47 = vadd.f32 %v17363_v20, %v6637_v51  ;;  %v7565_v1 = vpop.f32.mrb[13].mxu0 }
 0x551   : >> { %v7643_v6 = vsel %vm7611_vm5, %v14185_v43, %v7627_v41  ;;  %v14189_v40 = vadd.f32 %v14188_v58, %v12852_v22 }
 0x552   : >> { %7660 = vst [vmem:[%s17370_s29 + $0x58] sm:$0xff] %v7643_v6  ;;  %v7642_v30 = vsel %vm7610_vm6, %v14187_v44, %v7626_v62  ;;  %v14191_v12 = vadd.f32 %v14190_v47, %v7565_v1  ;;  %v12727_v13 = vpop.f32.mrb[14].mxu1 }
 0x553   : >> { %7659 = vst [vmem:[%s17370_s29 + $0x50] sm:$0xff] %v7642_v30  ;;  %vm7613_vm7 = vcmp.gt.f32.partialorder %v14189_v40, 0.0  ;;  %v7629_v2 = vmul.f32 0.01, %v14189_v40  ;;  %v14192_v4 = vadd.f32 %v12727_v13, %v17363_v20  ;;  %v12855_v8 = vpop.f32.mrb[14].mxu0  ;;  %v6647_v63 = vpop.f32.mrb[15].mxu1 }
 0x554   : >> { %vm7612_vm8 = vcmp.gt.f32.partialorder %v14191_v12, 0.0  ;;  %v7628_v38 = vmul.f32 0.01, %v14191_v12  ;;  %v14194_v0 = vadd.f32 %v17363_v20, %v6647_v63  ;;  %v7575_v31 = vpop.f32.mrb[15].mxu0 }
 0x555   : >> { %v7645_v15 = vsel %vm7613_vm7, %v14189_v40, %v7629_v2  ;;  %v14193_v34 = vadd.f32 %v14192_v4, %v12855_v8  ;;  %5500 = sbr.rel (!%p5498_p10) target bundleno = 1000 (0x3e8), region = 280 }
 0x556   : >> { %7662 = vst [vmem:[%s17370_s29 + $0x68] sm:$0xff] %v7645_v15  ;;  %v7644_v46 = vsel %vm7612_vm8, %v14191_v12, %v7628_v38  ;;  %v14195_v18 = vadd.f32 %v14194_v0, %v7575_v31 }
 0x557   : >> { %7661 = vst [vmem:[%s17370_s29 + $0x60] sm:$0xff] %v7644_v46  ;;  %vm7615_vm9 = vcmp.gt.f32.partialorder %v14193_v34, 0.0  ;;  %v7631_v16 = vmul.f32 0.01, %v14193_v34 }
 0x558   : >> { %vm7614_vm10 = vcmp.gt.f32.partialorder %v14195_v18, 0.0  ;;  %v7630_v23 = vmul.f32 0.01, %v14195_v18 }
 0x559   : >> { %v7647_v59 = vsel %vm7615_vm9, %v14193_v34, %v7631_v16 }
 0x55a   : >> { %7664 = vst [vmem:[%s17370_s29 + $0x78] sm:$0xff] %v7647_v59  ;;  %v7646_v21 = vsel %vm7614_vm10, %v14195_v18, %v7630_v23 }
 0x55b   : >> { %7663 = vst [vmem:[%s17370_s29 + $0x70] sm:$0xff] %v7646_v21 }
 0x55c LB: >> { %v7699_v20 = vld [vmem:[%s18215_s7] sm:$0xff]  ;;  %v7700_v33 = vld [vmem:[%s18215_s7 + $0x8] sm:$0xff]  ;;  %v7701_v19 = vld [vmem:[%s18215_s7 + $0x10] sm:$0xff]  ;;  %s10896_s23 = sshll.u32 %s14580_s20, 7  ;;  %s7670_s20 = sadd.s32 1, %s14580_s20   ;;  %s14580_s20 = sphi %s17403_s20, %s7670_s20  }
 0x55d   : >> { %v11010_v28 = vld [vmem:[%s18215_s7 + $0x200] sm:$0xff]  ;;  %v13576_v36 = vpack.c.bf16 %v7700_v33, %v7699_v20  ;;  %v11011_v60 = vld [vmem:[%s18215_s7 + $0x208] sm:$0xff]  ;;  %v7702_v5 = vld [vmem:[%s18215_s7 + $0x18] sm:$0xff]  ;;  %p7672_p11 = scmp.lt.s32.totalorder %s10896_s23, 697  ;;  %p7667_p12 = scmp.ge.s32.totalorder %s7670_s20, 7  }
 0x55e   : >> { %v13704_v14 = vpack.c.bf16 %v11011_v60, %v11010_v28  ;;  %v13580_v27 = vpack.c.bf16 %v7702_v5, %v7701_v19  ;;  %v11012_v32 = vld [vmem:[%s18215_s7 + $0x210] sm:$0xff]  ;;  %v11013_v9 = vld [vmem:[%s18215_s7 + $0x218] sm:$0xff]  ;;  %v7703_v53 = vld [vmem:[%s18215_s7 + $0x20] sm:$0xff] }
 0x55f   : >> { %13577 = vmatprep.subr.bf16.mxu1 %v13576_v36  ;;  %v13708_v55 = vpack.c.bf16 %v11013_v9, %v11012_v32  ;;  %v7704_v35 = vld [vmem:[%s18215_s7 + $0x28] sm:$0xff]  ;;  %v11014_v25 = vld [vmem:[%s18215_s7 + $0x220] sm:$0xff]  ;;  %s18358_s23 = smov (!%p7672_p11, %s10896_s23), 697  ;;  %v7705_v61 = vld [vmem:[%s18215_s7 + $0x30] sm:$0xff] }
 0x560   : >> { %v11015_v3 = vld [vmem:[%s18215_s7 + $0x228] sm:$0xff]  ;;  %13705 = vmatprep.subr.bf16.mxu0 %v13704_v14  ;;  %13579 = vmatpush3.bf16.msra.mxu1 %v13576_v36  ;;  %v13584_v29 = vpack.c.bf16 %v7704_v35, %v7703_v53  ;;  %v7706_v7 = vld [vmem:[%s18215_s7 + $0x38] sm:$0xff]  ;;  %v11016_v37 = vld [vmem:[%s18215_s7 + $0x230] sm:$0xff]  ;;  %s17466_s25 = scalar_lea.vmem [#allocation5], %s18358_s23 }
 0x561   : >> { %13707 = vmatpush3.bf16.msra.mxu0 %v13704_v14  ;;  %13581 = vmatprep.subr.bf16.mxu1 %v13580_v27  ;;  %v13712_v50 = vpack.c.bf16 %v11015_v3, %v11014_v25  ;;  %v11017_v56 = vld [vmem:[%s18215_s7 + $0x238] sm:$0xff]  ;;  %v13588_v54 = vpack.c.bf16 %v7706_v7, %v7705_v61  ;;  %v7707_v42 = vld [vmem:[%s18215_s7 + $0x40] sm:$0xff]  ;;  %v7708_v39 = vld [vmem:[%s18215_s7 + $0x48] sm:$0xff] }
 0x562   : >> { %13709 = vmatprep.subr.bf16.mxu0 %v13708_v55  ;;  %v13716_v57 = vpack.c.bf16 %v11017_v56, %v11016_v37  ;;  %v7683_v49 = vld [vmem:[%s17466_s25] sm:$0xff]  ;;  %v11019_v10 = vld [vmem:[%s18215_s7 + $0x248] sm:$0xff]  ;;  %v13592_v52 = vpack.c.bf16 %v7708_v39, %v7707_v42  ;;  %v7709_v17 = vld [vmem:[%s18215_s7 + $0x50] sm:$0xff] }
 0x563   : >> { %v11018_v45 = vld [vmem:[%s18215_s7 + $0x240] sm:$0xff]  ;;  %12888 = vmatprep.mubr.f32.mxu1 %v7683_v49  ;;  %v7710_v43 = vld [vmem:[%s18215_s7 + $0x58] sm:$0xff]  ;;  %v11020_v11 = vld [vmem:[%s18215_s7 + $0x250] sm:$0xff] }
 0x564   : >> { %13583 = vmatpush3.bf16.msra.mxu1 %v13580_v27  ;;  %v17476_v26 = vld [vmem:[%s17466_s25 + $0x1a] sm:$0xff]  ;;  %v13720_v48 = vpack.c.bf16 %v11019_v10, %v11018_v45  ;;  %v13596_v24 = vpack.c.bf16 %v7710_v43, %v7709_v17  ;;  %v7712_v22 = vld [vmem:[%s18215_s7 + $0x68] sm:$0xff]  ;;  %v7713_v6 = vld [vmem:[%s18215_s7 + $0x70] sm:$0xff] }
 0x565   : >> { %13711 = vmatpush3.bf16.msra.mxu0 %v13708_v55  ;;  %13585 = vmatprep.subr.bf16.mxu1 %v13584_v29  ;;  %v11021_v44 = vld [vmem:[%s18215_s7 + $0x258] sm:$0xff]  ;;  %v7711_v58 = vld [vmem:[%s18215_s7 + $0x60] sm:$0xff]  ;;  %v11023_v62 = vld [vmem:[%s18215_s7 + $0x268] sm:$0xff] }
 0x566   : >> { %13713 = vmatprep.subr.bf16.mxu0 %v13712_v50  ;;  %13112 = vmatprep.mubr.f32.mxu0 %v17476_v26  ;;  %v13724_v41 = vpack.c.bf16 %v11021_v44, %v11020_v11  ;;  %v11022_v51 = vld [vmem:[%s18215_s7 + $0x260] sm:$0xff]  ;;  %v13600_v47 = vpack.c.bf16 %v7712_v22, %v7711_v58  ;;  %v7714_v40 = vld [vmem:[%s18215_s7 + $0x78] sm:$0xff]  ;;  %v11024_v30 = vld [vmem:[%s18215_s7 + $0x270] sm:$0xff] }
 0x567   : >> { %v13728_v1 = vpack.c.bf16 %v11023_v62, %v11022_v51  ;;  %v11025_v12 = vld [vmem:[%s18215_s7 + $0x278] sm:$0xff]  ;;  %v13604_v13 = vpack.c.bf16 %v7714_v40, %v7713_v6  ;;  %v10914_v4 = vld [vmem:[%s18215_s7 + $0x80] sm:$0xff]  ;;  %v10915_v8 = vld [vmem:[%s18215_s7 + $0x88] sm:$0xff] }
 0x568   : >> { %13587 = vmatpush3.bf16.msra.mxu1 %v13584_v29  ;;  %v13732_v2 = vpack.c.bf16 %v11025_v12, %v11024_v30  ;;  %v11042_v63 = vld [vmem:[%s18215_s7 + $0x280] sm:$0xff]  ;;  %v11043_v38 = vld [vmem:[%s18215_s7 + $0x288] sm:$0xff]  ;;  %v13608_v0 = vpack.c.bf16 %v10915_v8, %v10914_v4  ;;  %v10916_v15 = vld [vmem:[%s18215_s7 + $0x90] sm:$0xff] }
 0x569   : >> { %13715 = vmatpush3.bf16.msra.mxu0 %v13712_v50  ;;  %13589 = vmatprep.subr.bf16.mxu1 %v13588_v54  ;;  %v13736_v31 = vpack.c.bf16 %v11043_v38, %v11042_v63  ;;  %v10917_v34 = vld [vmem:[%s18215_s7 + $0x98] sm:$0xff]  ;;  %v7684_v46 = vld [vmem:[%s17466_s25 + $0x8] sm:$0xff]  ;;  %v11044_v18 = vld [vmem:[%s18215_s7 + $0x290] sm:$0xff] }
 0x56a   : >> { %13717 = vmatprep.subr.bf16.mxu0 %v13716_v57  ;;  %v11045_v16 = vld [vmem:[%s18215_s7 + $0x298] sm:$0xff]  ;;  %v17541_v23 = vld [vmem:[%s17466_s25 + $0x22] sm:$0xff]  ;;  %v7685_v59 = vld [vmem:[%s17466_s25 + $0x10] sm:$0xff]  ;;  %v13612_v21 = vpack.c.bf16 %v10917_v34, %v10916_v15 }
 0x56b   : >> { %v17545_v20 = vld [vmem:[%s17466_s25 + $0x2a] sm:$0xff]  ;;  %v13740_v33 = vpack.c.bf16 %v11045_v16, %v11044_v18  ;;  %v10918_v28 = vld [vmem:[%s18215_s7 + $0xa0] sm:$0xff]  ;;  %v7686_v60 = vld [vmem:[%s17466_s25 + $0x18] sm:$0xff] }
 0x56c   : >> { %13591 = vmatpush3.bf16.msra.mxu1 %v13588_v54  ;;  %v10919_v36 = vld [vmem:[%s18215_s7 + $0xa8] sm:$0xff]  ;;  %v11046_v19 = vld [vmem:[%s18215_s7 + $0x2a0] sm:$0xff]  ;;  %v17562_v14 = vld [vmem:[%s17466_s25 + $0x32] sm:$0xff] }
 0x56d   : >> { %13719 = vmatpush3.bf16.msra.mxu0 %v13716_v57  ;;  %13593 = vmatprep.subr.bf16.mxu1 %v13592_v52  ;;  %v11047_v5 = vld [vmem:[%s18215_s7 + $0x2a8] sm:$0xff]  ;;  %v7687_v27 = vld [vmem:[%s17466_s25 + $0x20] sm:$0xff]  ;;  %v13616_v32 = vpack.c.bf16 %v10919_v36, %v10918_v28  ;;  %v10920_v55 = vld [vmem:[%s18215_s7 + $0xb0] sm:$0xff] }
 0x56e   : >> { %13721 = vmatprep.subr.bf16.mxu0 %v13720_v48  ;;  %v17567_v9 = vld [vmem:[%s17466_s25 + $0x3a] sm:$0xff]  ;;  %v13744_v53 = vpack.c.bf16 %v11047_v5, %v11046_v19  ;;  %v7688_v25 = vld [vmem:[%s17466_s25 + $0x28] sm:$0xff]  ;;  %v11048_v3 = vld [vmem:[%s18215_s7 + $0x2b0] sm:$0xff] }
 0x56f   : >> { %v10921_v35 = vld [vmem:[%s18215_s7 + $0xb8] sm:$0xff]  ;;  %v17584_v50 = vld [vmem:[%s17466_s25 + $0x42] sm:$0xff]  ;;  %v7689_v61 = vld [vmem:[%s17466_s25 + $0x30] sm:$0xff] }
 0x570   : >> { %13595 = vmatpush3.bf16.msra.mxu1 %v13592_v52  ;;  %v11049_v29 = vld [vmem:[%s18215_s7 + $0x2b8] sm:$0xff]  ;;  %v13620_v7 = vpack.c.bf16 %v10921_v35, %v10920_v55  ;;  %v17589_v37 = vld [vmem:[%s17466_s25 + $0x4a] sm:$0xff]  ;;  %v10922_v54 = vld [vmem:[%s18215_s7 + $0xc0] sm:$0xff] }
 0x571   : >> { %13723 = vmatpush3.bf16.msra.mxu0 %v13720_v48  ;;  %13597 = vmatprep.subr.bf16.mxu1 %v13596_v24  ;;  %v13748_v56 = vpack.c.bf16 %v11049_v29, %v11048_v3  ;;  %v10923_v57 = vld [vmem:[%s18215_s7 + $0xc8] sm:$0xff]  ;;  %v7690_v42 = vld [vmem:[%s17466_s25 + $0x38] sm:$0xff]  ;;  %v11050_v39 = vld [vmem:[%s18215_s7 + $0x2c0] sm:$0xff] }
 0x572   : >> { %13725 = vmatprep.subr.bf16.mxu0 %v13724_v41  ;;  %v11051_v49 = vld [vmem:[%s18215_s7 + $0x2c8] sm:$0xff]  ;;  %v17606_v45 = vld [vmem:[%s17466_s25 + $0x52] sm:$0xff]  ;;  %v7691_v10 = vld [vmem:[%s17466_s25 + $0x40] sm:$0xff]  ;;  %v13624_v52 = vpack.c.bf16 %v10923_v57, %v10922_v54 }
 0x573   : >> { %v17611_v48 = vld [vmem:[%s17466_s25 + $0x5a] sm:$0xff]  ;;  %v13752_v17 = vpack.c.bf16 %v11051_v49, %v11050_v39  ;;  %v10924_v43 = vld [vmem:[%s18215_s7 + $0xd0] sm:$0xff]  ;;  %v7692_v44 = vld [vmem:[%s17466_s25 + $0x48] sm:$0xff] }
 0x574   : >> { %13599 = vmatpush3.bf16.msra.mxu1 %v13596_v24  ;;  %v10925_v11 = vld [vmem:[%s18215_s7 + $0xd8] sm:$0xff]  ;;  %v11052_v24 = vld [vmem:[%s18215_s7 + $0x2d0] sm:$0xff]  ;;  %v17628_v58 = vld [vmem:[%s17466_s25 + $0x62] sm:$0xff] }
 0x575   : >> { %13727 = vmatpush3.bf16.msra.mxu0 %v13724_v41  ;;  %13601 = vmatprep.subr.bf16.mxu1 %v13600_v47  ;;  %v11053_v41 = vld [vmem:[%s18215_s7 + $0x2d8] sm:$0xff]  ;;  %v7693_v22 = vld [vmem:[%s17466_s25 + $0x50] sm:$0xff]  ;;  %v13628_v51 = vpack.c.bf16 %v10925_v11, %v10924_v43  ;;  %v10927_v6 = vld [vmem:[%s18215_s7 + $0xe8] sm:$0xff] }
 0x576   : >> { %13729 = vmatprep.subr.bf16.mxu0 %v13728_v1  ;;  %v17633_v62 = vld [vmem:[%s17466_s25 + $0x6a] sm:$0xff]  ;;  %v7694_v40 = vld [vmem:[%s17466_s25 + $0x58] sm:$0xff]  ;;  %v11054_v30 = vld [vmem:[%s18215_s7 + $0x2e0] sm:$0xff] }
 0x577   : >> { %v11055_v12 = vld [vmem:[%s18215_s7 + $0x2e8] sm:$0xff]  ;;  %v17655_v8 = vld [vmem:[%s17466_s25 + $0x7a] sm:$0xff]  ;;  %v10928_v38 = vld [vmem:[%s18215_s7 + $0xf0] sm:$0xff] }
 0x578   : >> { %13603 = vmatpush3.bf16.msra.mxu1 %v13600_v47  ;;  %v13756_v47 = vpack.c.bf16 %v11053_v41, %v11052_v24  ;;  %v13760_v63 = vpack.c.bf16 %v11055_v12, %v11054_v30  ;;  %v11056_v15 = vld [vmem:[%s18215_s7 + $0x2f0] sm:$0xff]  ;;  %v11057_v34 = vld [vmem:[%s18215_s7 + $0x2f8] sm:$0xff]  ;;  %v10947_v28 = vld [vmem:[%s18215_s7 + $0x108] sm:$0xff] }
 0x579   : >> { %13731 = vmatpush3.bf16.msra.mxu0 %v13728_v1  ;;  %13605 = vmatprep.subr.bf16.mxu1 %v13604_v13  ;;  %v10926_v1 = vld [vmem:[%s18215_s7 + $0xe0] sm:$0xff]  ;;  %v7697_v18 = vld [vmem:[%s17466_s25 + $0x70] sm:$0xff]  ;;  %v7698_v36 = vld [vmem:[%s17466_s25 + $0x78] sm:$0xff] }
 0x57a   : >> { %13733 = vmatprep.subr.bf16.mxu0 %v13732_v2  ;;  %v13632_v4 = vpack.c.bf16 %v10927_v6, %v10926_v1  ;;  %v11075_v19 = vld [vmem:[%s18215_s7 + $0x308] sm:$0xff]  ;;  %v17694_v5 = vld [vmem:[%s17466_s25 + $0x92] sm:$0xff]  ;;  %v10950_v39 = vld [vmem:[%s18215_s7 + $0x120] sm:$0xff] }
 0x57b   : >> { %v10948_v35 = vld [vmem:[%s18215_s7 + $0x110] sm:$0xff]  ;;  %v10951_v49 = vld [vmem:[%s18215_s7 + $0x128] sm:$0xff]  ;;  %v17739_v24 = vld [vmem:[%s17466_s25 + $0x3b] sm:$0xff] }
 0x57c   : >> { %13607 = vmatpush3.bf16.msra.mxu1 %v13604_v13  ;;  %v17650_v13 = vld [vmem:[%s17466_s25 + $0x72] sm:$0xff]  ;;  %v10899_v3 = vld [vmem:[%s17466_s25 + $0x9] sm:$0xff]  ;;  %v17735_v11 = vld [vmem:[%s17466_s25 + $0x21] sm:$0xff] }
 0x57d   : >> { %13735 = vmatpush3.bf16.msra.mxu0 %v13732_v2  ;;  %13609 = vmatprep.subr.bf16.mxu1 %v13608_v0  ;;  %v7695_v2 = vld [vmem:[%s17466_s25 + $0x60] sm:$0xff]  ;;  %v11076_v29 = vld [vmem:[%s18215_s7 + $0x310] sm:$0xff]  ;;  %v11081_v6 = vld [vmem:[%s18215_s7 + $0x338] sm:$0xff] }
 0x57e   : >> { %13737 = vmatprep.subr.bf16.mxu0 %v13736_v31  ;;  %v11028_v57 = vld [vmem:[%s17466_s25 + $0x2b] sm:$0xff]  ;;  %v17732_v43 = vld [vmem:[%s17466_s25 + $0x33] sm:$0xff] }
 0x57f   : >> { %12889 = vmatmul.mubr.f32.vlgmr.msra.gmra.mrb[0].mxu1 %v7684_v46  ;;  %v17672_v46 = vld [vmem:[%s17466_s25 + $0x82] sm:$0xff]  ;;  %v11080_v1 = vld [vmem:[%s18215_s7 + $0x330] sm:$0xff] }
 0x580   : >> { %13113 = vmatmul.mubr.f32.vlgmr.msra.gmra.mrb[0].mxu0 %v17541_v23  ;;  %13611 = vmatpush3.bf16.msra.mxu1 %v13608_v0  ;;  %v10929_v0 = vld [vmem:[%s18215_s7 + $0xf8] sm:$0xff] }
 0x581   : >> { %13739 = vmatpush3.bf16.msra.mxu0 %v13736_v31  ;;  %12891 = vmatprep.mubr.f32.mxu1 %v7685_v59  ;;  %v7696_v31 = vld [vmem:[%s17466_s25 + $0x68] sm:$0xff]  ;;  %v13636_v16 = vpack.c.bf16 %v10929_v0, %v10928_v38  ;;  %v17763_v30 = vld [vmem:[%s17466_s25 + $0x31] sm:$0xff]  ;;  %v17777_v0 = vld [vmem:[%s17466_s25 + $0x39] sm:$0xff] }
 0x582   : >> { %13115 = vmatprep.mubr.f32.mxu0 %v17545_v20  ;;  %13613 = vmatprep.subr.bf16.mxu1 %v13612_v21  ;;  %v17677_v59 = vld [vmem:[%s17466_s25 + $0x8a] sm:$0xff] }
 0x583   : >> { %12892 = vmatmul.mubr.f32.gmra.mrb[2].mxu1 %v7686_v60  ;;  %13741 = vmatprep.subr.bf16.mxu0 %v13740_v33  ;;  %v11074_v60 = vld [vmem:[%s18215_s7 + $0x300] sm:$0xff]  ;;  %v10955_v38 = vld [vmem:[%s18215_s7 + $0x148] sm:$0xff] }
 0x584   : >> { %13116 = vmatmul.mubr.f32.gmra.mrb[2].mxu0 %v17562_v14  ;;  %13615 = vmatpush3.bf16.msra.mxu1 %v13612_v21  ;;  %v13764_v21 = vpack.c.bf16 %v11057_v34, %v11056_v15  ;;  %v13768_v55 = vpack.c.bf16 %v11075_v19, %v11074_v60  ;;  %v11083_v15 = vld [vmem:[%s18215_s7 + $0x348] sm:$0xff]  ;;  %v17787_v34 = vld [vmem:[%s17466_s25 + $0x53] sm:$0xff] }
 0x585   : >> { %13743 = vmatpush3.bf16.msra.mxu0 %v13740_v33  ;;  %12894 = vmatprep.mubr.f32.mxu1 %v7687_v27  ;;  %v10946_v33 = vld [vmem:[%s18215_s7 + $0x100] sm:$0xff]  ;;  %v17805_v60 = vld [vmem:[%s17466_s25 + $0x49] sm:$0xff] }
 0x586   : >> { %13118 = vmatprep.mubr.f32.mxu0 %v17567_v9  ;;  %13617 = vmatprep.subr.bf16.mxu1 %v13616_v32  ;;  %v10898_v27 = vld [vmem:[%s17466_s25 + $0x1] sm:$0xff]  ;;  %v11084_v19 = vld [vmem:[%s18215_s7 + $0x350] sm:$0xff] }
 0x587   : >> { %12895 = vmatmul.mubr.f32.gmra.mrb[4].mxu1 %v7688_v25  ;;  %13745 = vmatprep.subr.bf16.mxu0 %v13744_v53  ;;  %v10949_v25 = vld [vmem:[%s18215_s7 + $0x118] sm:$0xff] }
 0x588   : >> { %13119 = vmatmul.mubr.f32.gmra.mrb[4].mxu0 %v17584_v50  ;;  %13619 = vmatpush3.bf16.msra.mxu1 %v13616_v32  ;;  %v13640_v32 = vpack.c.bf16 %v10947_v28, %v10946_v33  ;;  %v13644_v54 = vpack.c.bf16 %v10949_v25, %v10948_v35  ;;  %v10956_v28 = vld [vmem:[%s18215_s7 + $0x150] sm:$0xff] }
 0x589   : >> { %13747 = vmatpush3.bf16.msra.mxu0 %v13744_v53  ;;  %12897 = vmatprep.mubr.f32.mxu1 %v7689_v61  ;;  %v11026_v53 = vld [vmem:[%s17466_s25 + $0x1b] sm:$0xff]  ;;  %v17823_v35 = vld [vmem:[%s17466_s25 + $0x6b] sm:$0xff] }
 0x58a   : >> { %13121 = vmatprep.mubr.f32.mxu0 %v17589_v37  ;;  %13621 = vmatprep.subr.bf16.mxu1 %v13620_v7  ;;  %v11077_v61 = vld [vmem:[%s18215_s7 + $0x318] sm:$0xff] }
 0x58b   : >> { %12898 = vmatmul.mubr.f32.gmra.mrb[6].mxu1 %v7690_v42  ;;  %13749 = vmatprep.subr.bf16.mxu0 %v13748_v56  ;;  %v13772_v42 = vpack.c.bf16 %v11077_v61, %v11076_v29  ;;  %v10959_v29 = vld [vmem:[%s18215_s7 + $0x168] sm:$0xff]  ;;  %v17833_v61 = vld [vmem:[%s17466_s25 + $0x59] sm:$0xff] }
 0x58c   : >> { %13122 = vmatmul.mubr.f32.gmra.mrb[6].mxu0 %v17606_v45  ;;  %13623 = vmatpush3.bf16.msra.mxu1 %v13620_v7  ;;  %v11027_v7 = vld [vmem:[%s17466_s25 + $0x23] sm:$0xff] }
 0x58d   : >> { %13751 = vmatpush3.bf16.msra.mxu0 %v13748_v56  ;;  %12900 = vmatprep.mubr.f32.mxu1 %v7691_v10  ;;  %v10900_v56 = vld [vmem:[%s17466_s25 + $0x11] sm:$0xff]  ;;  %v17723_v10 = vld [vmem:[%s17466_s25 + $0x19] sm:$0xff] }
 0x58e   : >> { %13124 = vmatprep.mubr.f32.mxu0 %v17611_v48  ;;  %13625 = vmatprep.subr.bf16.mxu1 %v13624_v52 }
 0x58f   : >> { %12901 = vmatmul.mubr.f32.gmra.mrb[8].mxu1 %v7692_v44  ;;  %13753 = vmatprep.subr.bf16.mxu0 %v13752_v17  ;;  %v13648_v44 = vpack.c.bf16 %v10951_v49, %v10950_v39  ;;  %v17851_v39 = vld [vmem:[%s17466_s25 + $0x7b] sm:$0xff] }
 0x590   : >> { %13125 = vmatmul.mubr.f32.gmra.mrb[8].mxu0 %v17628_v58  ;;  %13627 = vmatpush3.bf16.msra.mxu1 %v13624_v52  ;;  %v11078_v52 = vld [vmem:[%s18215_s7 + $0x320] sm:$0xff] }
 0x591   : >> { %13755 = vmatpush3.bf16.msra.mxu0 %v13752_v17  ;;  %12903 = vmatprep.mubr.f32.mxu1 %v7693_v22  ;;  %v11079_v17 = vld [vmem:[%s18215_s7 + $0x328] sm:$0xff]  ;;  %v10952_v22 = vld [vmem:[%s18215_s7 + $0x130] sm:$0xff] }
 0x592   : >> { %13127 = vmatprep.mubr.f32.mxu0 %v17633_v62  ;;  %13629 = vmatprep.subr.bf16.mxu1 %v13628_v51  ;;  %v13776_v41 = vpack.c.bf16 %v11079_v17, %v11078_v52  ;;  %v10960_v52 = vld [vmem:[%s18215_s7 + $0x170] sm:$0xff]  ;;  %v10961_v17 = vld [vmem:[%s18215_s7 + $0x178] sm:$0xff] }
 0x593   : >> { %12904 = vmatmul.mubr.f32.gmra.mrb[10].mxu1 %v7694_v40  ;;  %13757 = vmatprep.subr.bf16.mxu0 %v13756_v47  ;;  %v17759_v40 = vld [vmem:[%s17466_s25 + $0x43] sm:$0xff] }
 0x594   : >> { %13128 = vmatmul.mubr.f32.gmra.mrb[10].mxu0 %v17650_v13  ;;  %13631 = vmatpush3.bf16.msra.mxu1 %v13628_v51  ;;  %v10953_v51 = vld [vmem:[%s18215_s7 + $0x138] sm:$0xff] }
 0x595   : >> { %13759 = vmatpush3.bf16.msra.mxu0 %v13756_v47  ;;  %12906 = vmatprep.mubr.f32.mxu1 %v7695_v2  ;;  %v17749_v47 = vld [vmem:[%s17466_s25 + $0x29] sm:$0xff]  ;;  %v13652_v12 = vpack.c.bf16 %v10953_v51, %v10952_v22  ;;  %v11089_v22 = vld [vmem:[%s18215_s7 + $0x378] sm:$0xff] }
 0x596   : >> { %13130 = vmatprep.mubr.f32.mxu0 %v17655_v8  ;;  %13633 = vmatprep.subr.bf16.mxu1 %v13632_v4  ;;  %v17767_v2 = vld [vmem:[%s17466_s25 + $0x4b] sm:$0xff]  ;;  %v17871_v51 = vld [vmem:[%s17466_s25 + $0x83] sm:$0xff] }
 0x597   : >> { %12907 = vmatmul.mubr.f32.gmra.mrb[12].mxu1 %v7696_v31  ;;  %13761 = vmatprep.subr.bf16.mxu0 %v13760_v63  ;;  %v11082_v31 = vld [vmem:[%s18215_s7 + $0x340] sm:$0xff] }
 0x598   : >> { %13131 = vmatmul.mubr.f32.gmra.mrb[12].mxu0 %v17672_v46  ;;  %13635 = vmatpush3.bf16.msra.mxu1 %v13632_v4  ;;  %v13780_v4 = vpack.c.bf16 %v11081_v6, %v11080_v1  ;;  %v13784_v33 = vpack.c.bf16 %v11083_v15, %v11082_v31  ;;  %v17875_v1 = vld [vmem:[%s17466_s25 + $0x71] sm:$0xff]  ;;  %v13668_v6 = vpack.c.bf16 %v10961_v17, %v10960_v52  ;;  %v17889_v31 = vld [vmem:[%s17466_s25 + $0x79] sm:$0xff]  ;;  %v10983_v52 = vld [vmem:[%s18215_s7 + $0x1a8] sm:$0xff] }
 0x599   : >> { %13763 = vmatpush3.bf16.msra.mxu0 %v13760_v63  ;;  %12909 = vmatprep.mubr.f32.mxu1 %v7697_v18  ;;  %v10954_v63 = vld [vmem:[%s18215_s7 + $0x140] sm:$0xff] }
 0x59a   : >> { %13133 = vmatprep.mubr.f32.mxu0 %v17677_v59  ;;  %13637 = vmatprep.subr.bf16.mxu1 %v13636_v16  ;;  %v17791_v18 = vld [vmem:[%s17466_s25 + $0x41] sm:$0xff] }
 0x59b   : >> { %12910 = vmatmul.mubr.f32.gmra.mrb[14].mxu1 %v7698_v36  ;;  %13765 = vmatprep.subr.bf16.mxu0 %v13764_v21  ;;  %v10957_v36 = vld [vmem:[%s18215_s7 + $0x158] sm:$0xff]  ;;  %v11106_v15 = vld [vmem:[%s18215_s7 + $0x380] sm:$0xff] }
 0x59c   : >> { %13134 = vmatmul.mubr.f32.gmra.mrb[14].mxu0 %v17694_v5  ;;  %13639 = vmatpush3.bf16.msra.mxu1 %v13636_v16  ;;  %v13656_v16 = vpack.c.bf16 %v10955_v38, %v10954_v63  ;;  %v10978_v63 = vld [vmem:[%s18215_s7 + $0x180] sm:$0xff]  ;;  %v10979_v38 = vld [vmem:[%s18215_s7 + $0x188] sm:$0xff] }
 0x59d   : >> { %13767 = vmatpush3.bf16.msra.mxu0 %v13764_v21  ;;  %12944 = vmatprep.mubr.f32.mxu1 %v10898_v27  ;;  %v17795_v21 = vld [vmem:[%s17466_s25 + $0x5b] sm:$0xff] }
 0x59e   : >> { %13168 = vmatprep.mubr.f32.mxu0 %v11026_v53  ;;  %13641 = vmatprep.subr.bf16.mxu1 %v13640_v32  ;;  %v11085_v27 = vld [vmem:[%s18215_s7 + $0x358] sm:$0xff]  ;;  %v11110_v17 = vld [vmem:[%s18215_s7 + $0x3a0] sm:$0xff] }
 0x59f   : >> { %12945 = vmatmul.mubr.f32.vlgmr.msra.gmra.mrb[0].mxu1 %v10899_v3  ;;  %13769 = vmatprep.subr.bf16.mxu0 %v13768_v55  ;;  %v17819_v53 = vld [vmem:[%s17466_s25 + $0x51] sm:$0xff]  ;;  %v13788_v25 = vpack.c.bf16 %v11085_v27, %v11084_v19  ;;  %v10958_v3 = vld [vmem:[%s18215_s7 + $0x160] sm:$0xff] }
 0x5a0   : >> { %13169 = vmatmul.mubr.f32.vlgmr.msra.gmra.mrb[0].mxu0 %v11027_v7  ;;  %13643 = vmatpush3.bf16.msra.mxu1 %v13640_v32  ;;  %v17815_v32 = vld [vmem:[%s17466_s25 + $0x63] sm:$0xff]  ;;  %v10980_v27 = vld [vmem:[%s18215_s7 + $0x190] sm:$0xff] }
 0x5a1   : >> { %13771 = vmatpush3.bf16.msra.mxu0 %v13768_v55  ;;  %12947 = vmatprep.mubr.f32.mxu1 %v10900_v56  ;;  %v13660_v55 = vpack.c.bf16 %v10957_v36, %v10956_v28  ;;  %v11086_v7 = vld [vmem:[%s18215_s7 + $0x360] sm:$0xff]  ;;  %v11087_v56 = vld [vmem:[%s18215_s7 + $0x368] sm:$0xff]  ;;  %v13672_v36 = vpack.c.bf16 %v10979_v38, %v10978_v63  ;;  %v10985_v63 = vld [vmem:[%s18215_s7 + $0x1b8] sm:$0xff] }
 0x5a2   : >> { %13171 = vmatprep.mubr.f32.mxu0 %v11028_v57  ;;  %13645 = vmatprep.subr.bf16.mxu1 %v13644_v54  ;;  %v17847_v57 = vld [vmem:[%s17466_s25 + $0x61] sm:$0xff]  ;;  %v13792_v49 = vpack.c.bf16 %v11087_v56, %v11086_v7  ;;  %v10932_v7 = vld [vmem:[%s17466_s25 + $0x12] sm:$0xff] }
 0x5a3   : >> { %12948 = vmatmul.mubr.f32.gmra.mrb[2].mxu1 %v17723_v10  ;;  %13773 = vmatprep.subr.bf16.mxu0 %v13772_v42  ;;  %v10930_v28 = vld [vmem:[%s17466_s25 + $0x2] sm:$0xff]  ;;  %v11112_v38 = vld [vmem:[%s18215_s7 + $0x3b0] sm:$0xff] }
 0x5a4   : >> { %13172 = vmatmul.mubr.f32.gmra.mrb[2].mxu0 %v17732_v43  ;;  %13647 = vmatpush3.bf16.msra.mxu1 %v13644_v54  ;;  %v17843_v54 = vld [vmem:[%s17466_s25 + $0x73] sm:$0xff] }
 0x5a5   : >> { %13775 = vmatpush3.bf16.msra.mxu0 %v13772_v42  ;;  %12950 = vmatprep.mubr.f32.mxu1 %v17735_v11  ;;  %v13664_v42 = vpack.c.bf16 %v10959_v29, %v10958_v3  ;;  %v11108_v3 = vld [vmem:[%s18215_s7 + $0x390] sm:$0xff]  ;;  %v11109_v29 = vld [vmem:[%s18215_s7 + $0x398] sm:$0xff] }
 0x5a6   : >> { %13174 = vmatprep.mubr.f32.mxu0 %v17739_v24  ;;  %13649 = vmatprep.subr.bf16.mxu1 %v13648_v44 }
 0x5a7   : >> { %12951 = vmatmul.mubr.f32.gmra.mrb[4].mxu1 %v17749_v47  ;;  %13777 = vmatprep.subr.bf16.mxu0 %v13776_v41 }
 0x5a8   : >> { %13175 = vmatmul.mubr.f32.gmra.mrb[4].mxu0 %v17759_v40  ;;  %13651 = vmatpush3.bf16.msra.mxu1 %v13648_v44  ;;  %v17861_v44 = vld [vmem:[%s17466_s25 + $0x69] sm:$0xff] }
 0x5a9   : >> { %13779 = vmatpush3.bf16.msra.mxu0 %v13776_v41  ;;  %12953 = vmatprep.mubr.f32.mxu1 %v17763_v30  ;;  %v11088_v41 = vld [vmem:[%s18215_s7 + $0x370] sm:$0xff] }
 0x5aa   : >> { %13177 = vmatprep.mubr.f32.mxu0 %v17767_v2  ;;  %13653 = vmatprep.subr.bf16.mxu1 %v13652_v12 }
 0x5ab   : >> { %12954 = vmatmul.mubr.f32.gmra.mrb[6].mxu1 %v17777_v0  ;;  %13781 = vmatprep.subr.bf16.mxu0 %v13780_v4 }
 0x5ac   : >> { %13178 = vmatmul.mubr.f32.gmra.mrb[6].mxu0 %v17787_v34  ;;  %13655 = vmatpush3.bf16.msra.mxu1 %v13652_v12  ;;  %v17879_v12 = vld [vmem:[%s17466_s25 + $0x8b] sm:$0xff] }
 0x5ad   : >> { %13783 = vmatpush3.bf16.msra.mxu0 %v13780_v4  ;;  %12956 = vmatprep.mubr.f32.mxu1 %v17791_v18  ;;  %v13796_v4 = vpack.c.bf16 %v11089_v22, %v11088_v41  ;;  %v11111_v41 = vld [vmem:[%s18215_s7 + $0x3a8] sm:$0xff] }
 0x5ae   : >> { %13180 = vmatprep.mubr.f32.mxu0 %v17795_v21  ;;  %13657 = vmatprep.subr.bf16.mxu1 %v13656_v16 }
 0x5af   : >> { %12957 = vmatmul.mubr.f32.gmra.mrb[8].mxu1 %v17805_v60  ;;  %13785 = vmatprep.subr.bf16.mxu0 %v13784_v33 }
 0x5b0   : >> { %13181 = vmatmul.mubr.f32.gmra.mrb[8].mxu0 %v17815_v32  ;;  %13659 = vmatpush3.bf16.msra.mxu1 %v13656_v16  ;;  %v11107_v16 = vld [vmem:[%s18215_s7 + $0x388] sm:$0xff] }
 0x5b1   : >> { %13787 = vmatpush3.bf16.msra.mxu0 %v13784_v33  ;;  %12959 = vmatprep.mubr.f32.mxu1 %v17819_v53  ;;  %v17899_v33 = vld [vmem:[%s17466_s25 + $0x93] sm:$0xff]  ;;  %v13800_v19 = vpack.c.bf16 %v11107_v16, %v11106_v15 }
 0x5b2   : >> { %13183 = vmatprep.mubr.f32.mxu0 %v17823_v35  ;;  %13661 = vmatprep.subr.bf16.mxu1 %v13660_v55 }
 0x5b3   : >> { %12960 = vmatmul.mubr.f32.gmra.mrb[10].mxu1 %v17833_v61  ;;  %13789 = vmatprep.subr.bf16.mxu0 %v13788_v25 }
 0x5b4   : >> { %13184 = vmatmul.mubr.f32.gmra.mrb[10].mxu0 %v17843_v54  ;;  %13663 = vmatpush3.bf16.msra.mxu1 %v13660_v55  ;;  %v10981_v55 = vld [vmem:[%s18215_s7 + $0x198] sm:$0xff] }
 0x5b5   : >> { %13791 = vmatpush3.bf16.msra.mxu0 %v13788_v25  ;;  %12962 = vmatprep.mubr.f32.mxu1 %v17847_v57  ;;  %v10931_v25 = vld [vmem:[%s17466_s25 + $0xa] sm:$0xff]  ;;  %v13676_v56 = vpack.c.bf16 %v10981_v55, %v10980_v27 }
 0x5b6   : >> { %13186 = vmatprep.mubr.f32.mxu0 %v17851_v39  ;;  %13665 = vmatprep.subr.bf16.mxu1 %v13664_v42  ;;  %v10988_v55 = vld [vmem:[%s18215_s7 + $0x1d0] sm:$0xff] }
 0x5b7   : >> { %12963 = vmatmul.mubr.f32.gmra.mrb[12].mxu1 %v17861_v44  ;;  %13793 = vmatprep.subr.bf16.mxu0 %v13792_v49 }
 0x5b8   : >> { %13187 = vmatmul.mubr.f32.gmra.mrb[12].mxu0 %v17871_v51  ;;  %13667 = vmatpush3.bf16.msra.mxu1 %v13664_v42  ;;  %v13804_v42 = vpack.c.bf16 %v11109_v29, %v11108_v3 }
 0x5b9   : >> { %13795 = vmatpush3.bf16.msra.mxu0 %v13792_v49  ;;  %12965 = vmatprep.mubr.f32.mxu1 %v17875_v1  ;;  %v10982_v49 = vld [vmem:[%s18215_s7 + $0x1a0] sm:$0xff] }
 0x5ba   : >> { %13189 = vmatprep.mubr.f32.mxu0 %v17879_v12  ;;  %13669 = vmatprep.subr.bf16.mxu1 %v13668_v6  ;;  %v13680_v22 = vpack.c.bf16 %v10983_v52, %v10982_v49  ;;  %v10992_v52 = vld [vmem:[%s18215_s7 + $0x1f0] sm:$0xff] }
 0x5bb   : >> { %12966 = vmatmul.mubr.f32.gmra.mrb[14].mxu1 %v17889_v31  ;;  %13797 = vmatprep.subr.bf16.mxu0 %v13796_v4 }
 0x5bc   : >> { %13190 = vmatmul.mubr.f32.gmra.mrb[14].mxu0 %v17899_v33  ;;  %13671 = vmatpush3.bf16.msra.mxu1 %v13668_v6  ;;  %v13808_v6 = vpack.c.bf16 %v11111_v41, %v11110_v17  ;;  %v10993_v17 = vld [vmem:[%s18215_s7 + $0x1f8] sm:$0xff] }
 0x5bd   : >> { %13799 = vmatpush3.bf16.msra.mxu0 %v13796_v4  ;;  %13000 = vmatprep.mubr.f32.mxu1 %v10930_v28  ;;  %v10984_v4 = vld [vmem:[%s18215_s7 + $0x1b0] sm:$0xff]  ;;  %v10986_v28 = vld [vmem:[%s18215_s7 + $0x1c0] sm:$0xff]  ;;  %v13700_v41 = vpack.c.bf16 %v10993_v17, %v10992_v52 }
 0x5be   : >> { %13224 = vmatprep.mubr.f32.mxu0 %v17562_v14  ;;  %13673 = vmatprep.subr.bf16.mxu1 %v13672_v36  ;;  %v13684_v15 = vpack.c.bf16 %v10985_v63, %v10984_v4  ;;  %v11139_v4 = vld [vmem:[%s18215_s7 + $0x408] sm:$0xff]  ;;  %v11141_v63 = vld [vmem:[%s18215_s7 + $0x418] sm:$0xff] }
 0x5bf   : >> { %13001 = vmatmul.mubr.f32.vlgmr.msra.gmra.mrb[0].mxu1 %v10931_v25  ;;  %13801 = vmatprep.subr.bf16.mxu0 %v13800_v19  ;;  %v10989_v25 = vld [vmem:[%s18215_s7 + $0x1d8] sm:$0xff] }
 0x5c0   : >> { %13225 = vmatmul.mubr.f32.vlgmr.msra.gmra.mrb[0].mxu0 %v17567_v9  ;;  %13675 = vmatpush3.bf16.msra.mxu1 %v13672_v36  ;;  %v10987_v36 = vld [vmem:[%s18215_s7 + $0x1c8] sm:$0xff]  ;;  %v13692_v3 = vpack.c.bf16 %v10989_v25, %v10988_v55 }
 0x5c1   : >> { %13803 = vmatpush3.bf16.msra.mxu0 %v13800_v19  ;;  %13003 = vmatprep.mubr.f32.mxu1 %v10932_v7  ;;  %v13688_v19 = vpack.c.bf16 %v10987_v36, %v10986_v28  ;;  %v10990_v7 = vld [vmem:[%s18215_s7 + $0x1e0] sm:$0xff]  ;;  %v11125_v28 = vld [vmem:[%s17466_s25 + $0x4c] sm:$0xff]  ;;  %v11134_v36 = vld [vmem:[%s17466_s25 + $0x94] sm:$0xff] }
 0x5c2   : >> { %13227 = vmatprep.mubr.f32.mxu0 %v17584_v50  ;;  %13677 = vmatprep.subr.bf16.mxu1 %v13676_v56  ;;  %v11128_v55 = vld [vmem:[%s17466_s25 + $0x64] sm:$0xff]  ;;  %v11137_v25 = vld [vmem:[%s17466_s25 + $0xac] sm:$0xff] }
 0x5c3   : >> { %13004 = vmatmul.mubr.f32.gmra.mrb[2].mxu1 %v17476_v26  ;;  %13805 = vmatprep.subr.bf16.mxu0 %v13804_v42  ;;  %v11113_v26 = vld [vmem:[%s18215_s7 + $0x3b8] sm:$0xff] }
 0x5c4   : >> { %13228 = vmatmul.mubr.f32.gmra.mrb[2].mxu0 %v17589_v37  ;;  %13679 = vmatpush3.bf16.msra.mxu1 %v13676_v56  ;;  %v13812_v16 = vpack.c.bf16 %v11113_v26, %v11112_v38  ;;  %v10991_v56 = vld [vmem:[%s18215_s7 + $0x1e8] sm:$0xff] }
 0x5c5   : >> { %13807 = vmatpush3.bf16.msra.mxu0 %v13804_v42  ;;  %13006 = vmatprep.mubr.f32.mxu1 %v17541_v23  ;;  %v11114_v23 = vld [vmem:[%s18215_s7 + $0x3c0] sm:$0xff]  ;;  %v13696_v42 = vpack.c.bf16 %v10991_v56, %v10990_v7  ;;  %v11143_v38 = vld [vmem:[%s18215_s7 + $0x428] sm:$0xff] }
 0x5c6   : >> { %13230 = vmatprep.mubr.f32.mxu0 %v17606_v45  ;;  %13681 = vmatprep.subr.bf16.mxu1 %v13680_v22  ;;  %v11132_v26 = vld [vmem:[%s17466_s25 + $0x84] sm:$0xff] }
 0x5c7   : >> { %13007 = vmatmul.mubr.f32.gmra.mrb[4].mxu1 %v17545_v20  ;;  %13809 = vmatprep.subr.bf16.mxu0 %v13808_v6  ;;  %v11115_v20 = vld [vmem:[%s18215_s7 + $0x3c8] sm:$0xff] }
 0x5c8   : >> { %13231 = vmatmul.mubr.f32.gmra.mrb[4].mxu0 %v17611_v48  ;;  %13683 = vmatpush3.bf16.msra.mxu1 %v13680_v22  ;;  %v13816_v27 = vpack.c.bf16 %v11115_v20, %v11114_v23  ;;  %v11126_v23 = vld [vmem:[%s17466_s25 + $0x54] sm:$0xff]  ;;  %v11135_v20 = vld [vmem:[%s17466_s25 + $0x9c] sm:$0xff] }
 0x5c9   : >> { %13811 = vmatpush3.bf16.msra.mxu0 %v13808_v6  ;;  %13009 = vmatprep.mubr.f32.mxu1 %v17562_v14  ;;  %v11116_v14 = vld [vmem:[%s18215_s7 + $0x3d0] sm:$0xff]  ;;  %v11138_v6 = vld [vmem:[%s18215_s7 + $0x400] sm:$0xff] }
 0x5ca   : >> { %13233 = vmatprep.mubr.f32.mxu0 %v17628_v58  ;;  %13685 = vmatprep.subr.bf16.mxu1 %v13684_v15 }
 0x5cb   : >> { %13010 = vmatmul.mubr.f32.gmra.mrb[6].mxu1 %v17567_v9  ;;  %13813 = vmatprep.subr.bf16.mxu0 %v13812_v16  ;;  %v11117_v9 = vld [vmem:[%s18215_s7 + $0x3d8] sm:$0xff] }
 0x5cc   : >> { %13234 = vmatmul.mubr.f32.gmra.mrb[6].mxu0 %v17633_v62  ;;  %13687 = vmatpush3.bf16.msra.mxu1 %v13684_v15  ;;  %v13820_v29 = vpack.c.bf16 %v11117_v9, %v11116_v14  ;;  %v11124_v15 = vld [vmem:[%s17466_s25 + $0x44] sm:$0xff]  ;;  %v11129_v14 = vld [vmem:[%s17466_s25 + $0x6c] sm:$0xff] }
 0x5cd   : >> { %13815 = vmatpush3.bf16.msra.mxu0 %v13812_v16  ;;  %13012 = vmatprep.mubr.f32.mxu1 %v17584_v50  ;;  %v11118_v50 = vld [vmem:[%s18215_s7 + $0x3e0] sm:$0xff]  ;;  %v11133_v16 = vld [vmem:[%s17466_s25 + $0x8c] sm:$0xff] }
 0x5ce   : >> { %13236 = vmatprep.mubr.f32.mxu0 %v17650_v13  ;;  %13689 = vmatprep.subr.bf16.mxu1 %v13688_v19 }
 0x5cf   : >> { %13013 = vmatmul.mubr.f32.gmra.mrb[8].mxu1 %v17589_v37  ;;  %13817 = vmatprep.subr.bf16.mxu0 %v13816_v27  ;;  %v11119_v37 = vld [vmem:[%s18215_s7 + $0x3e8] sm:$0xff] }
 0x5d0   : >> { %13237 = vmatmul.mubr.f32.gmra.mrb[8].mxu0 %v17655_v8  ;;  %13691 = vmatpush3.bf16.msra.mxu1 %v13688_v19  ;;  %v13824_v49 = vpack.c.bf16 %v11119_v37, %v11118_v50  ;;  %v11127_v19 = vld [vmem:[%s17466_s25 + $0x5c] sm:$0xff] }
 0x5d1   : >> { %13819 = vmatpush3.bf16.msra.mxu0 %v13816_v27  ;;  %13015 = vmatprep.mubr.f32.mxu1 %v17606_v45  ;;  %v11120_v45 = vld [vmem:[%s18215_s7 + $0x3f0] sm:$0xff]  ;;  %v11136_v27 = vld [vmem:[%s17466_s25 + $0xa4] sm:$0xff] }
 0x5d2   : >> { %13239 = vmatprep.mubr.f32.mxu0 %v17672_v46  ;;  %13693 = vmatprep.subr.bf16.mxu1 %v13692_v3  ;;  %v11071_v46 = vld [vmem:[%s17466_s25 + $0x9a] sm:$0xff] }
 0x5d3   : >> { %13016 = vmatmul.mubr.f32.gmra.mrb[10].mxu1 %v17611_v48  ;;  %13821 = vmatprep.subr.bf16.mxu0 %v13820_v29  ;;  %v11121_v48 = vld [vmem:[%s18215_s7 + $0x3f8] sm:$0xff] }
 0x5d4   : >> { %13240 = vmatmul.mubr.f32.gmra.mrb[10].mxu0 %v17677_v59  ;;  %13695 = vmatpush3.bf16.msra.mxu1 %v13692_v3  ;;  %v11072_v59 = vld [vmem:[%s17466_s25 + $0xa2] sm:$0xff]  ;;  %v13828_v22 = vpack.c.bf16 %v11121_v48, %v11120_v45 }
 0x5d5   : >> { %13823 = vmatpush3.bf16.msra.mxu0 %v13820_v29  ;;  %13018 = vmatprep.mubr.f32.mxu1 %v17628_v58  ;;  %v11073_v58 = vld [vmem:[%s17466_s25 + $0xaa] sm:$0xff] }
 0x5d6   : >> { %13242 = vmatprep.mubr.f32.mxu0 %v17694_v5  ;;  %13697 = vmatprep.subr.bf16.mxu1 %v13696_v42  ;;  %v11140_v5 = vld [vmem:[%s18215_s7 + $0x410] sm:$0xff] }
 0x5d7   : >> { %13019 = vmatmul.mubr.f32.gmra.mrb[12].mxu1 %v17633_v62  ;;  %13825 = vmatprep.subr.bf16.mxu0 %v13824_v49  ;;  %v13832_v62 = vpack.c.bf16 %v11139_v4, %v11138_v6 }
 0x5d8   : >> { %13243 = vmatmul.mubr.f32.gmra.mrb[12].mxu0 %v11071_v46  ;;  %13699 = vmatpush3.bf16.msra.mxu1 %v13696_v42 }
 0x5d9   : >> { %13827 = vmatpush3.bf16.msra.mxu0 %v13824_v49  ;;  %13021 = vmatprep.mubr.f32.mxu1 %v17650_v13  ;;  %v13836_v13 = vpack.c.bf16 %v11141_v63, %v11140_v5  ;;  %v18127_v49 = vld [vmem:[%s18216_s8] ss:$0 sm:$0xff] }
 0x5da   : >> { %13245 = vmatprep.mubr.f32.mxu0 %v11072_v59  ;;  %13701 = vmatprep.subr.bf16.mxu1 %v13700_v41 }
 0x5db   : >> { %13022 = vmatmul.mubr.f32.gmra.mrb[14].mxu1 %v17655_v8  ;;  %13829 = vmatprep.subr.bf16.mxu0 %v13828_v22  ;;  %v11142_v8 = vld [vmem:[%s18215_s7 + $0x420] sm:$0xff] }
 0x5dc   : >> { %13246 = vmatmul.mubr.f32.gmra.mrb[14].mxu0 %v11073_v58  ;;  %13703 = vmatpush3.bf16.msra.mxu1 %v13700_v41 }
 0x5dd   : >> { %13831 = vmatpush3.bf16.msra.mxu0 %v13828_v22  ;;  %13056 = vmatprep.mubr.f32.mxu1 %v17723_v10  ;;  %v13840_v10 = vpack.c.bf16 %v11143_v38, %v11142_v8 }
 0x5de   : >> { %13280 = vmatprep.mubr.f32.mxu0 %v17732_v43  ;;  %13833 = vmatprep.subr.bf16.mxu0 %v13832_v62  ;;  %v11144_v43 = vld [vmem:[%s18215_s7 + $0x430] sm:$0xff] }
 0x5df   : >> { %13057 = vmatmul.mubr.f32.vlgmr.msra.gmra.mrb[0].mxu1 %v17735_v11  ;;  %14308 = vmatprep.subr.bf16.mxu1 %v13832_v62  ;;  %v11145_v11 = vld [vmem:[%s18215_s7 + $0x438] sm:$0xff] }
 0x5e0   : >> { %13281 = vmatmul.mubr.f32.vlgmr.msra.gmra.mrb[0].mxu0 %v17739_v24  ;;  %14316 = vmatpush3.bf16.msra.mxu1 %v13832_v62  ;;  %v13844_v24 = vpack.c.bf16 %v11145_v11, %v11144_v43 }
 0x5e1   : >> { %13835 = vmatpush3.bf16.msra.mxu0 %v13832_v62  ;;  %13059 = vmatprep.mubr.f32.mxu1 %v17749_v47  ;;  %v11146_v47 = vld [vmem:[%s18215_s7 + $0x440] sm:$0xff] }
 0x5e2   : >> { %13283 = vmatprep.mubr.f32.mxu0 %v17759_v40  ;;  %13837 = vmatprep.subr.bf16.mxu0 %v13836_v13  ;;  %v11147_v40 = vld [vmem:[%s18215_s7 + $0x448] sm:$0xff] }
 0x5e3   : >> { %13060 = vmatmul.mubr.f32.gmra.mrb[2].mxu1 %v17763_v30  ;;  %14309 = vmatprep.subr.bf16.mxu1 %v13836_v13  ;;  %v13848_v30 = vpack.c.bf16 %v11147_v40, %v11146_v47 }
 0x5e4   : >> { %13284 = vmatmul.mubr.f32.gmra.mrb[2].mxu0 %v17767_v2  ;;  %14317 = vmatpush3.bf16.msra.mxu1 %v13836_v13  ;;  %v11148_v2 = vld [vmem:[%s18215_s7 + $0x450] sm:$0xff] }
 0x5e5   : >> { %13839 = vmatpush3.bf16.msra.mxu0 %v13836_v13  ;;  %13062 = vmatprep.mubr.f32.mxu1 %v17777_v0  ;;  %v11149_v0 = vld [vmem:[%s18215_s7 + $0x458] sm:$0xff] }
 0x5e6   : >> { %13286 = vmatprep.mubr.f32.mxu0 %v17787_v34  ;;  %13841 = vmatprep.subr.bf16.mxu0 %v13840_v10  ;;  %v13852_v34 = vpack.c.bf16 %v11149_v0, %v11148_v2 }
 0x5e7   : >> { %13063 = vmatmul.mubr.f32.gmra.mrb[4].mxu1 %v17791_v18  ;;  %14310 = vmatprep.subr.bf16.mxu1 %v13840_v10  ;;  %v11150_v18 = vld [vmem:[%s18215_s7 + $0x460] sm:$0xff] }
 0x5e8   : >> { %13287 = vmatmul.mubr.f32.gmra.mrb[4].mxu0 %v17795_v21  ;;  %14318 = vmatpush3.bf16.msra.mxu1 %v13840_v10  ;;  %v11151_v21 = vld [vmem:[%s18215_s7 + $0x468] sm:$0xff] }
 0x5e9   : >> { %13843 = vmatpush3.bf16.msra.mxu0 %v13840_v10  ;;  %13065 = vmatprep.mubr.f32.mxu1 %v17805_v60  ;;  %v13856_v60 = vpack.c.bf16 %v11151_v21, %v11150_v18 }
 0x5ea   : >> { %13289 = vmatprep.mubr.f32.mxu0 %v17815_v32  ;;  %13845 = vmatprep.subr.bf16.mxu0 %v13844_v24  ;;  %v11152_v32 = vld [vmem:[%s18215_s7 + $0x470] sm:$0xff] }
 0x5eb   : >> { %13066 = vmatmul.mubr.f32.gmra.mrb[6].mxu1 %v17819_v53  ;;  %14311 = vmatprep.subr.bf16.mxu1 %v13844_v24  ;;  %v11153_v53 = vld [vmem:[%s18215_s7 + $0x478] sm:$0xff] }
 0x5ec   : >> { %13290 = vmatmul.mubr.f32.gmra.mrb[6].mxu0 %v17823_v35  ;;  %14319 = vmatpush3.bf16.msra.mxu1 %v13844_v24  ;;  %v10975_v35 = vld [vmem:[%s17466_s25 + $0x81] sm:$0xff] }
 0x5ed   : >> { %13847 = vmatpush3.bf16.msra.mxu0 %v13844_v24  ;;  %13068 = vmatprep.mubr.f32.mxu1 %v17833_v61  ;;  %v11103_v61 = vld [vmem:[%s17466_s25 + $0x9b] sm:$0xff] }
 0x5ee   : >> { %13292 = vmatprep.mubr.f32.mxu0 %v17843_v54  ;;  %13849 = vmatprep.subr.bf16.mxu0 %v13848_v30  ;;  %v10976_v54 = vld [vmem:[%s17466_s25 + $0x89] sm:$0xff] }
 0x5ef   : >> { %13069 = vmatmul.mubr.f32.gmra.mrb[8].mxu1 %v17847_v57  ;;  %14312 = vmatprep.subr.bf16.mxu1 %v13848_v30  ;;  %v13860_v57 = vpack.c.bf16 %v11153_v53, %v11152_v32 }
 0x5f0   : >> { %13293 = vmatmul.mubr.f32.gmra.mrb[8].mxu0 %v17851_v39  ;;  %14320 = vmatpush3.bf16.msra.mxu1 %v13848_v30  ;;  %v11104_v39 = vld [vmem:[%s17466_s25 + $0xa3] sm:$0xff] }
 0x5f1   : >> { %13851 = vmatpush3.bf16.msra.mxu0 %v13848_v30  ;;  %13071 = vmatprep.mubr.f32.mxu1 %v17861_v44  ;;  %v10977_v44 = vld [vmem:[%s17466_s25 + $0x91] sm:$0xff] }
 0x5f2   : >> { %13295 = vmatprep.mubr.f32.mxu0 %v17871_v51  ;;  %13853 = vmatprep.subr.bf16.mxu0 %v13852_v34  ;;  %v11105_v51 = vld [vmem:[%s17466_s25 + $0xab] sm:$0xff] }
 0x5f3   : >> { %13072 = vmatmul.mubr.f32.gmra.mrb[10].mxu1 %v17875_v1  ;;  %14313 = vmatprep.subr.bf16.mxu1 %v13852_v34  ;;  %v11122_v1 = vld [vmem:[%s17466_s25 + $0x34] sm:$0xff] }
 0x5f4   : >> { %13296 = vmatmul.mubr.f32.gmra.mrb[10].mxu0 %v17879_v12  ;;  %14321 = vmatpush3.bf16.msra.mxu1 %v13852_v34  ;;  %v11130_v12 = vld [vmem:[%s17466_s25 + $0x74] sm:$0xff] }
 0x5f5   : >> { %13855 = vmatpush3.bf16.msra.mxu0 %v13852_v34  ;;  %13074 = vmatprep.mubr.f32.mxu1 %v17889_v31  ;;  %v11131_v31 = vld [vmem:[%s17466_s25 + $0x7c] sm:$0xff] }
 0x5f6   : >> { %13298 = vmatprep.mubr.f32.mxu0 %v17899_v33  ;;  %13857 = vmatprep.subr.bf16.mxu0 %v13856_v60  ;;  %v11123_v33 = vld [vmem:[%s17466_s25 + $0x3c] sm:$0xff]  ;;  %s18150_s25 = scalar_lea.vmem [#allocation6], %s18358_s23  ;;  %s18199_s23 = smov (%p7667_p12), 0  }
 0x5f7   : >> { %13075 = vmatmul.mubr.f32.gmra.mrb[12].mxu1 %v10975_v35  ;;  %14314 = vmatprep.subr.bf16.mxu1 %v13856_v60 }
 0x5f8   : >> { %13299 = vmatmul.mubr.f32.gmra.mrb[12].mxu0 %v11103_v61  ;;  %14322 = vmatpush3.bf16.msra.mxu1 %v13856_v60 }
 0x5f9   : >> { %13859 = vmatpush3.bf16.msra.mxu0 %v13856_v60  ;;  %13077 = vmatprep.mubr.f32.mxu1 %v10976_v54 }
 0x5fa   : >> { %13301 = vmatprep.mubr.f32.mxu0 %v11104_v39  ;;  %13861 = vmatprep.subr.bf16.mxu0 %v13860_v57 }
 0x5fb   : >> { %13078 = vmatmul.mubr.f32.gmra.mrb[14].mxu1 %v10977_v44  ;;  %14315 = vmatprep.subr.bf16.mxu1 %v13860_v57 }
 0x5fc   : >> { %13302 = vmatmul.mubr.f32.gmra.mrb[14].mxu0 %v11105_v51  ;;  %14323 = vmatpush3.bf16.msra.mxu1 %v13860_v57 }
 0x5fd   : >> { %13863 = vmatpush3.bf16.msra.mxu0 %v13860_v57  ;;  %13336 = vmatprep.mubr.f32.mxu0 %v11122_v1 }
 0x5fe   : >> { %13348 = vmatprep.mubr.f32.mxu1 %v11130_v12 }
 0x5ff   : >> { %13349 = vmatmul.mubr.f32.vlgmr.msra.gmra.mrb[16].mxu1 %v11131_v31 }
 0x600   : >> { %13337 = vmatmul.mubr.f32.vlgmr.msra.gmra.mrb[0].mxu0 %v11123_v33  ;;  %13351 = vmatprep.mubr.f32.mxu1 %v11132_v26 }
 0x601   : >> { %13339 = vmatprep.mubr.f32.mxu0 %v11124_v15 }
 0x603   : >> { %13352 = vmatmul.mubr.f32.gmra.mrb[18].mxu1 %v11133_v16 }
 0x604   : >> { %13340 = vmatmul.mubr.f32.gmra.mrb[2].mxu0 %v11125_v28  ;;  %13354 = vmatprep.mubr.f32.mxu1 %v11134_v36 }
 0x605   : >> { %13342 = vmatprep.mubr.f32.mxu0 %v11126_v23 }
 0x607   : >> { %13355 = vmatmul.mubr.f32.gmra.mrb[20].mxu1 %v11135_v20 }
 0x608   : >> { %13343 = vmatmul.mubr.f32.gmra.mrb[4].mxu0 %v11127_v19  ;;  %13357 = vmatprep.mubr.f32.mxu1 %v11136_v27 }
 0x609   : >> { %13345 = vmatprep.mubr.f32.mxu0 %v11128_v55 }
 0x60b   : >> { %13358 = vmatmul.mubr.f32.gmra.mrb[22].mxu1 %v11137_v25 }
 0x60c   : >> { %13346 = vmatmul.mubr.f32.gmra.mrb[6].mxu0 %v11129_v14 }
 0x6b2   : >> { %v13058_v9 = vpop.f32.mrb[0].mxu1 }
 0x6b3   : >> { %v8369_v3 = vpop.f32.mrb[1].mxu1  ;;  %v14324_v53 = vadd.f32 %v13058_v9, %v18127_v49 }
 0x6b4   : >> { %v14326_v54 = vadd.f32 %v18127_v49, %v8369_v3 }
 0x6b6   : >> { %v13061_v29 = vpop.f32.mrb[2].mxu1 }
 0x6b7   : >> { %v8379_v7 = vpop.f32.mrb[3].mxu1  ;;  %v14328_v31 = vadd.f32 %v13061_v29, %v18127_v49 }
 0x6b8   : >> { %v14330_v28 = vadd.f32 %v18127_v49, %v8379_v7 }
 0x6ba   : >> { %v18116_v56 = vpop.f32.mrb[4].mxu1 }
 0x6bb   : >> { %v18118_v50 = vpop.f32.mrb[5].mxu1  ;;  %v14332_v29 = vadd.f32 %v18116_v56, %v18127_v49 }
 0x6be   : >> { %v18120_v37 = vpop.f32.mrb[6].mxu1 }
 0x6bf   : >> { %v18122_v42 = vpop.f32.mrb[7].mxu1 }
 0x6c2   : >> { %v13070_v52 = vpop.f32.mrb[8].mxu1 }
 0x6c3   : >> { %v14340_v17 = vadd.f32 %v13070_v52, %v18127_v49  ;;  %v13294_v45 = vpop.f32.mrb[8].mxu0  ;;  %v8409_v48 = vpop.f32.mrb[9].mxu1 }
 0x6c4   : >> { %v14343_v46 = vadd.f32 %v18127_v49, %v8409_v48  ;;  %v9193_v41 = vpop.f32.mrb[9].mxu0 }
 0x6c5   : >> { %v14341_v59 = vadd.f32 %v14340_v17, %v13294_v45 }
 0x6c6   : >> { %v14344_v22 = vadd.f32 %v14343_v46, %v9193_v41  ;;  %v13073_v6 = vpop.f32.mrb[10].mxu1  ;;  %v14334_v41 = vadd.f32 %v18127_v49, %v18118_v50 }
 0x6c7   : >> { %v14346_v4 = vadd.f32 %v13073_v6, %v18127_v49  ;;  %v13297_v58 = vpop.f32.mrb[10].mxu0  ;;  %v8419_v62 = vpop.f32.mrb[11].mxu1 }
 0x6c8   : >> { %v14349_v5 = vadd.f32 %v18127_v49, %v8419_v62  ;;  %v9203_v63 = vpop.f32.mrb[11].mxu0 }
 0x6c9   : >> { %v14347_v13 = vadd.f32 %v14346_v4, %v13297_v58 }
 0x6ca   : >> { %v14350_v8 = vadd.f32 %v14349_v5, %v9203_v63  ;;  %v13076_v38 = vpop.f32.mrb[12].mxu1 }
 0x6cb   : >> { %v14352_v10 = vadd.f32 %v13076_v38, %v18127_v49  ;;  %v13300_v43 = vpop.f32.mrb[12].mxu0  ;;  %v8429_v11 = vpop.f32.mrb[13].mxu1  ;;  %v14336_v38 = vadd.f32 %v18120_v37, %v18127_v49 }
 0x6cc   : >> { %v14355_v24 = vadd.f32 %v18127_v49, %v8429_v11  ;;  %v9213_v47 = vpop.f32.mrb[13].mxu0 }
 0x6cd   : >> { %v18135_v40 = vadd.f32 %v14352_v10, %v13300_v43 }
 0x6ce   : >> { %v18137_v30 = vadd.f32 %v14355_v24, %v9213_v47  ;;  %v13079_v2 = vpop.f32.mrb[14].mxu1 }
 0x6cf   : >> { %v14358_v0 = vadd.f32 %v13079_v2, %v18127_v49  ;;  %v13303_v34 = vpop.f32.mrb[14].mxu0  ;;  %v8439_v18 = vpop.f32.mrb[15].mxu1 }
 0x6d0   : >> { %v14361_v21 = vadd.f32 %v18127_v49, %v8439_v18  ;;  %v9223_v60 = vpop.f32.mrb[15].mxu0 }
 0x6d1   : >> { %v18141_v32 = vadd.f32 %v14358_v0, %v13303_v34 }
 0x6d2   : >> { %v18144_v35 = vadd.f32 %v14361_v21, %v9223_v60  ;;  %v13350_v61 = vpop.f32.mrb[16].mxu1 }
 0x6d3   : >> { %v13338_v57 = vpop.f32.mrb[0].mxu0  ;;  %v14342_v39 = vadd.f32 %v14341_v59, %v13350_v61  ;;  %v9389_v44 = vpop.f32.mrb[17].mxu1 }
 0x6d4   : >> { %v14325_v51 = vadd.f32 %v14324_v53, %v13338_v57  ;;  %v9349_v1 = vpop.f32.mrb[1].mxu0  ;;  %v14345_v12 = vadd.f32 %v14344_v22, %v9389_v44 }
 0x6d5   : >> { %vm9453_vm4 = vcmp.gt.f32.partialorder %v14342_v39, 0.0  ;;  %v9469_v33 = vmul.f32 0.01, %v14342_v39  ;;  %v14327_v26 = vadd.f32 %v14326_v54, %v9349_v1 }
 0x6d6   : >> { %vm9445_vm11 = vcmp.gt.f32.partialorder %v14325_v51, 0.0  ;;  %v9461_v15 = vmul.f32 0.01, %v14325_v51  ;;  %vm9452_vm12 = vcmp.gt.f32.partialorder %v14345_v12, 0.0  ;;  %v9468_v16 = vmul.f32 0.01, %v14345_v12 }
 0x6d7   : >> { %v9485_v36 = vsel %vm9453_vm4, %v14342_v39, %v9469_v33  ;;  %vm9444_vm13 = vcmp.gt.f32.partialorder %v14327_v26, 0.0  ;;  %v9460_v23 = vmul.f32 0.01, %v14327_v26  ;;  %v13341_v20 = vpop.f32.mrb[2].mxu0  ;;  %v13353_v19 = vpop.f32.mrb[18].mxu1 }
 0x6d8   : >> { %v9477_v27 = vsel %vm9445_vm11, %v14325_v51, %v9461_v15  ;;  %9502 = vst.msk [vmem:[%s18150_s25 + $0x48] sm:$0xff] %vm333_vm0, %v9485_v36  ;;  %v9484_v55 = vsel %vm9452_vm12, %v14345_v12, %v9468_v16  ;;  %v14329_v25 = vadd.f32 %v14328_v31, %v13341_v20  ;;  %v14348_v14 = vadd.f32 %v14347_v13, %v13353_v19  ;;  %v9359_v9 = vpop.f32.mrb[3].mxu0  ;;  %v9399_v3 = vpop.f32.mrb[19].mxu1 }
 0x6d9   : >> { %9494 = vst.msk [vmem:[%s18150_s25 + $0x8] sm:$0xff] %vm333_vm0, %v9477_v27  ;;  %v9476_v7 = vsel %vm9444_vm13, %v14327_v26, %v9460_v23  ;;  %9501 = vst.msk [vmem:[%s18150_s25 + $0x40] sm:$0xff] %vm333_vm0, %v9484_v55  ;;  %v14331_v52 = vadd.f32 %v14330_v28, %v9359_v9  ;;  %v14351_v17 = vadd.f32 %v14350_v8, %v9399_v3 }
 0x6da   : >> { %9493 = vst.msk [vmem:[%s18150_s25] sm:$0xff] %vm333_vm0, %v9476_v7  ;;  %vm9447_vm14 = vcmp.gt.f32.partialorder %v14329_v25, 0.0  ;;  %v9463_v45 = vmul.f32 0.01, %v14329_v25  ;;  %vm9455_vm15 = vcmp.gt.f32.partialorder %v14348_v14, 0.0  ;;  %v13356_v4 = vpop.f32.mrb[20].mxu1 }
 0x6db   : >> { %v9471_v48 = vmul.f32 0.01, %v14348_v14  ;;  %vm9446_vm1 = vcmp.gt.f32.partialorder %v14331_v52, 0.0  ;;  %v9462_v46 = vmul.f32 0.01, %v14331_v52  ;;  %vm9454_vm2 = vcmp.gt.f32.partialorder %v14351_v17, 0.0 }
 0x6dc   : >> { %v9470_v56 = vmul.f32 0.01, %v14351_v17  ;;  %v9479_v59 = vsel %vm9447_vm14, %v14329_v25, %v9463_v45  ;;  %v13344_v6 = vpop.f32.mrb[4].mxu0  ;;  %v14354_v63 = vadd.f32 %v18135_v40, %v13356_v4  ;;  %v9409_v8 = vpop.f32.mrb[21].mxu1  ;;  %v14338_v40 = vadd.f32 %v18127_v49, %v18122_v42 }
 0x6dd   : >> { %v9487_v22 = vsel %vm9455_vm15, %v14348_v14, %v9471_v48  ;;  %9496 = vst.msk [vmem:[%s18150_s25 + $0x18] sm:$0xff] %vm333_vm0, %v9479_v59  ;;  %v9478_v58 = vsel %vm9446_vm1, %v14331_v52, %v9462_v46  ;;  %v14333_v5 = vadd.f32 %v14332_v29, %v13344_v6  ;;  %v9369_v13 = vpop.f32.mrb[5].mxu0  ;;  %v14357_v10 = vadd.f32 %v18137_v30, %v9409_v8 }
 0x6de   : >> { %9504 = vst.msk [vmem:[%s18150_s25 + $0x58] sm:$0xff] %vm333_vm0, %v9487_v22  ;;  %v9486_v62 = vsel %vm9454_vm2, %v14351_v17, %v9470_v56  ;;  %9495 = vst.msk [vmem:[%s18150_s25 + $0x10] sm:$0xff] %vm333_vm0, %v9478_v58  ;;  %v14335_v50 = vadd.f32 %v14334_v41, %v9369_v13  ;;  %v13359_v43 = vpop.f32.mrb[22].mxu1  ;;  %vm9457_vm5 = vcmp.gt.f32.partialorder %v14354_v63, 0.0  ;;  %v9473_v24 = vmul.f32 0.01, %v14354_v63 }
 0x6df   : >> { %9503 = vst.msk [vmem:[%s18150_s25 + $0x50] sm:$0xff] %vm333_vm0, %v9486_v62  ;;  %vm9449_vm3 = vcmp.gt.f32.partialorder %v14333_v5, 0.0  ;;  %v9465_v11 = vmul.f32 0.01, %v14333_v5  ;;  %vm9456_vm7 = vcmp.gt.f32.partialorder %v14357_v10, 0.0  ;;  %v13347_v34 = vpop.f32.mrb[6].mxu0  ;;  %v14360_v30 = vadd.f32 %v18141_v32, %v13359_v43 }
 0x6e0   : >> { %vm9448_vm6 = vcmp.gt.f32.partialorder %v14335_v50, 0.0  ;;  %v9464_v47 = vmul.f32 0.01, %v14335_v50  ;;  %v9472_v37 = vmul.f32 0.01, %v14357_v10  ;;  %v9489_v0 = vsel %vm9457_vm5, %v14354_v63, %v9473_v24  ;;  %v9419_v18 = vpop.f32.mrb[23].mxu1 }
 0x6e1   : >> { %v9481_v2 = vsel %vm9449_vm3, %v14333_v5, %v9465_v11  ;;  %9506 = vst.msk [vmem:[%s18150_s25 + $0x68] sm:$0xff] %vm333_vm0, %v9489_v0  ;;  %v14337_v53 = vadd.f32 %v14336_v38, %v13347_v34  ;;  %v9379_v61 = vpop.f32.mrb[7].mxu0  ;;  %v14363_v54 = vadd.f32 %v18144_v35, %v9419_v18  ;;  %vm9459_vm8 = vcmp.gt.f32.partialorder %v14360_v30, 0.0  ;;  %7669 = sbr.rel (!%p7667_p12) target bundleno = 1372 (0x55c), region = 291 }
 0x6e2   : >> { %9498 = vst.msk [vmem:[%s18150_s25 + $0x28] sm:$0xff] %vm333_vm0, %v9481_v2  ;;  %v9480_v21 = vsel %vm9448_vm6, %v14335_v50, %v9464_v47  ;;  %v9488_v60 = vsel %vm9456_vm7, %v14357_v10, %v9472_v37  ;;  %v9475_v42 = vmul.f32 0.01, %v14360_v30  ;;  %v14339_v49 = vadd.f32 %v14338_v40, %v9379_v61 }
 0x6e3   : >> { %9497 = vst.msk [vmem:[%s18150_s25 + $0x20] sm:$0xff] %vm333_vm0, %v9480_v21  ;;  %9505 = vst.msk [vmem:[%s18150_s25 + $0x60] sm:$0xff] %vm333_vm0, %v9488_v60  ;;  %vm9451_vm9 = vcmp.gt.f32.partialorder %v14337_v53, 0.0  ;;  %v9467_v32 = vmul.f32 0.01, %v14337_v53  ;;  %vm9458_vm10 = vcmp.gt.f32.partialorder %v14363_v54, 0.0 }
 0x6e4   : >> { %v9474_v57 = vmul.f32 0.01, %v14363_v54  ;;  %v9491_v39 = vsel %vm9459_vm8, %v14360_v30, %v9475_v42  ;;  %vm9450_vm4 = vcmp.gt.f32.partialorder %v14339_v49, 0.0  ;;  %v9466_v44 = vmul.f32 0.01, %v14339_v49 }
 0x6e5   : >> { %v9483_v51 = vsel %vm9451_vm9, %v14337_v53, %v9467_v32  ;;  %9508 = vst.msk [vmem:[%s18150_s25 + $0x78] sm:$0xff] %vm333_vm0, %v9491_v39 }
 0x6e6   : >> { %v9490_v35 = vsel %vm9458_vm10, %v14363_v54, %v9474_v57  ;;  %9500 = vst.msk [vmem:[%s18150_s25 + $0x38] sm:$0xff] %vm333_vm0, %v9483_v51  ;;  %v9482_v1 = vsel %vm9450_vm4, %v14339_v49, %v9466_v44 }
 0x6e7   : >> { %9507 = vst.msk [vmem:[%s18150_s25 + $0x70] sm:$0xff] %vm333_vm0, %v9490_v35  ;;  %9499 = vst.msk [vmem:[%s18150_s25 + $0x30] sm:$0xff] %vm333_vm0, %v9482_v1 }
 0x6e8 LB: >> { %s9515_s29 = smul.u32 75, %s14584_s23  ;;  %vm9552_vm0 = vcmask 522240   ;;  %s14584_s23 = sphi %s18199_s23, %s9514_s23  }
 0x6e9   : >> { %s9550_s20 = smul.u32 7, %s14584_s23  ;;  %s9514_s23 = sadd.s32 1, %s14584_s23  }
 0x6ea   : >> { %s9516_s24 = scalar_lea.vmem [#allocation6], %s9515_s29  ;;  %p9511_p13 = scmp.ge.s32.totalorder %s9514_s23, 11  }
 0x6eb   : >> { %s9551_s26 = scalar_lea.vmem %s14655_s18, %s9550_s20 }
 0x6ee   : >> { %v9517_v12 = vld [vmem:[%s9516_s24] ss:$3 sm:$0x7f]  ;;  %v11154_v31 = vld [vmem:[%s9516_s24 + $0x1] ss:$3 sm:$0x7f] }
 0x6ef   : >> { %v9521_v33 = vmax.f32 %v9517_v12, %v11154_v31  ;;  %v11155_v26 = vld [vmem:[%s9516_s24 + $0x2] ss:$3 sm:$0x7f]  ;;  %v11157_v28 = vld [vmem:[%s9516_s24 + $0x1a] ss:$3 sm:$0x7f] }
 0x6f0   : >> { %v11156_v15 = vld [vmem:[%s9516_s24 + $0x19] ss:$3 sm:$0x7f]  ;;  %v11158_v23 = vld [vmem:[%s9516_s24 + $0x1b] ss:$3 sm:$0x7f] }
 0x6f1   : >> { %v9525_v16 = vmax.f32 %v9521_v33, %v11155_v26  ;;  %v11159_v19 = vld [vmem:[%s9516_s24 + $0x32] ss:$3 sm:$0x7f]  ;;  %v11160_v55 = vld [vmem:[%s9516_s24 + $0x33] ss:$3 sm:$0x7f] }
 0x6f2   : >> { %v11161_v14 = vld [vmem:[%s9516_s24 + $0x34] ss:$3 sm:$0x7f] }
 0x6f3   : >> { %v9529_v36 = vmax.f32 %v9525_v16, %v11156_v15 }
 0x6f5   : >> { %v9533_v20 = vmax.f32 %v9529_v36, %v11157_v28 }
 0x6f7   : >> { %v9537_v27 = vmax.f32 %v9533_v20, %v11158_v23 }
 0x6f9   : >> { %v9541_v25 = vmax.f32 %v9537_v27, %v11159_v19  ;;  %9513 = sbr.rel (!%p9511_p13) target bundleno = 1768 (0x6e8), region = 302 }
 0x6fb   : >> { %v9545_v9 = vmax.f32 %v9541_v25, %v11160_v55 }
 0x6fd   : >> { %v9549_v3 = vmax.f32 %v9545_v9, %v11161_v14 }
 0x6ff   : >> { %9553 = vst.msk [vmem:[%s9551_s26] sm:$0x7f] %vm9552_vm0, %v9549_v3 }
 0x700 PF: > { %s19_s30 = sadd.s32 1, %s14560_s30  }
 0x701   : > { %p16_p0 = scmp.ge.s32.totalorder %s19_s30, 4  }
 0x703   :  { %18 = sbr.rel (!%p16_p0) target bundleno = 1 (0x1), region = 313 }

</bundles_post_ra>
